<compile_context>
chip_gen: v7x
topology: tpu7x:2x2x1
jax: 0.10.0
libtpu: 0.0.40
codegen_flags: <defaults>
</compile_context>

<pallas_src>
import functools

import jax
import jax.numpy as jnp
from jax.experimental import pallas as pl
from jax.experimental.pallas import tpu as pltpu


DEFAULT_TILE = 256

_COMPILER_PARAMS = pltpu.CompilerParams(
    dimension_semantics=("parallel",),
    vmem_limit_bytes=32 * 1024 * 1024,
)


# ----------------------------------------------------------------------------
# helpers: row tiling / padding
# ----------------------------------------------------------------------------
def _pick_tile(n, target):
    if n <= 8:
        return n
    tile = min(target, n)
    # Prefer at least two grid steps (when cheap) so the "parallel" grid axis
    # can actually split across the two TensorCores on megacore parts.
    if tile == n and n % 16 == 0:
        tile = n // 2
    return tile


def _pad_rows(a, tile):
    n = a.shape[0]
    pad = (-n) % tile
    if pad == 0:
        return a
    return jnp.pad(a, [(0, pad)] + [(0, 0)] * (a.ndim - 1))


# ----------------------------------------------------------------------------
# Kernel 1: single fused linear   y = act(x @ Wfolded + shift [+ res])
#   (BN scale is folded into W host-side; covers linear3+bn3+res+relu, mlp1+bn)
# ----------------------------------------------------------------------------
def _linear_kernel(x_ref, w_ref, b_ref, o_ref, *, relu):
    y = jnp.dot(x_ref[...], w_ref[...], preferred_element_type=jnp.float32)
    y = y + b_ref[...]
    if relu:
        y = jnp.maximum(y, 0.0)
    o_ref[...] = y.astype(o_ref.dtype)


def _linear_res_kernel(x_ref, w_ref, b_ref, res_ref, o_ref, *, relu):
    y = jnp.dot(x_ref[...], w_ref[...], preferred_element_type=jnp.float32)
    y = y + b_ref[...] + res_ref[...]
    if relu:
        y = jnp.maximum(y, 0.0)
    o_ref[...] = y.astype(o_ref.dtype)


def linear_act(x, w, shift, res=None, *, relu, tile_n=DEFAULT_TILE):
    n, cin = x.shape
    cout = w.shape[1]
    shift = jnp.asarray(shift, jnp.float32).reshape(1, cout)
    tile = _pick_tile(n, tile_n)
    xp = _pad_rows(x, tile)
    npad = xp.shape[0]

    x_spec = pl.BlockSpec((tile, cin), lambda i: (i, 0))
    w_spec = pl.BlockSpec((cin, cout), lambda i: (0, 0))
    b_spec = pl.BlockSpec((1, cout), lambda i: (0, 0))
    out_spec = pl.BlockSpec((tile, cout), lambda i: (i, 0))

    if res is None:
        kernel = functools.partial(_linear_kernel, relu=relu)
        in_specs = [x_spec, w_spec, b_spec]
        args = (xp, w, shift)
    else:
        kernel = functools.partial(_linear_res_kernel, relu=relu)
        in_specs = [x_spec, w_spec, b_spec,
                    pl.BlockSpec((tile, cout), lambda i: (i, 0))]
        args = (xp, w, shift, _pad_rows(res, tile))

    y = pl.pallas_call(
        kernel,
        out_shape=jax.ShapeDtypeStruct((npad, cout), jnp.float32),
        grid=(npad // tile,),
        in_specs=in_specs,
        out_specs=out_spec,
        compiler_params=_COMPILER_PARAMS,
    )(*args)
    return y[:n] if npad != n else y


# ----------------------------------------------------------------------------
# Kernel 2: fused two-stage MLP   y = act2(relu(x @ W1 + b1) @ W2 + b2)
#   Covers: in_mlp (Linear+BN+ReLU x2) and block's linear1+bn1+relu -> q/k/v.
# ----------------------------------------------------------------------------
def _mlp2_kernel(x_ref, w1_ref, b1_ref, w2_ref, b2_ref, o_ref, *, relu_out):
    h = jnp.dot(x_ref[...], w1_ref[...], preferred_element_type=jnp.float32)
    h = jnp.maximum(h + b1_ref[...], 0.0)
    y = jnp.dot(h, w2_ref[...], preferred_element_type=jnp.float32) + b2_ref[...]
    if relu_out:
        y = jnp.maximum(y, 0.0)
    o_ref[...] = y.astype(o_ref.dtype)


def mlp2(x, w1, b1, w2, b2, *, relu_out, tile_n=DEFAULT_TILE):
    n, cin = x.shape
    ch = w1.shape[1]
    cout = w2.shape[1]
    b1 = jnp.asarray(b1, jnp.float32).reshape(1, ch)
    b2 = jnp.asarray(b2, jnp.float32).reshape(1, cout)
    tile = _pick_tile(n, tile_n)
    xp = _pad_rows(x, tile)
    npad = xp.shape[0]

    y = pl.pallas_call(
        functools.partial(_mlp2_kernel, relu_out=relu_out),
        out_shape=jax.ShapeDtypeStruct((npad, cout), jnp.float32),
        grid=(npad // tile,),
        in_specs=[
            pl.BlockSpec((tile, cin), lambda i: (i, 0)),
            pl.BlockSpec((cin, ch), lambda i: (0, 0)),
            pl.BlockSpec((1, ch), lambda i: (0, 0)),
            pl.BlockSpec((ch, cout), lambda i: (0, 0)),
            pl.BlockSpec((1, cout), lambda i: (0, 0)),
        ],
        out_specs=pl.BlockSpec((tile, cout), lambda i: (i, 0)),
        compiler_params=_COMPILER_PARAMS,
    )(xp, w1, b1, w2, b2)
    return y[:n] if npad != n else y


# ----------------------------------------------------------------------------
# Kernel 3: PointTransformerLayer attention core + fused bn2/ReLU epilogue.
#   p_r = linear_p(p_rel); w = linear_w(x_k - x_q + p_r); softmax over nsample;
#   out = relu(bn2( sum_s (x_v + p_r) * w ))
#   The final Linear(cs, cs) of linear_w is column-tiled host-side to width c,
#   so everything after it stays lane-dense and no concatenate is needed.
# ----------------------------------------------------------------------------
def _pt_attention_kernel(xq_ref, xk_ref, xv_ref, pr_ref,
                         wp1_ref, bp1_ref, wp2_ref, bp2_ref,
                         bnw_s_ref, bnw_t_ref, ww1_ref, bw1_ref,
                         ww2_ref, bw2_ref, bn2_s_ref, bn2_t_ref, o_ref):
    tn, s, c = xk_ref.shape

    xq = xq_ref[...]                      # (tn, c)
    xk = xk_ref[...]                      # (tn, s, c)
    xv = xv_ref[...]                      # (tn, s, c)
    pr = pr_ref[...]                      # (tn, s, 3)

    def small_linear(x, w_ref, b_ref):
        # x: (..., k) with tiny k; unrolled broadcast-MACs on the VPU.
        out = b_ref[...]
        for i in range(w_ref.shape[0]):
            out = out + x[..., i:i + 1] * w_ref[i:i + 1, :]
        return out

    # linear_p: Linear(3,3)+BN(3) (folded) -> ReLU -> Linear(3, c)
    h = jnp.maximum(small_linear(pr, wp1_ref, bp1_ref), 0.0)      # (tn, s, 3)
    p_r = small_linear(h, wp2_ref, bp2_ref)                       # (tn, s, c)

    # w = x_k - x_q + p_r   (out_planes // mid_planes == 1 so .sum(2) is identity)
    w = xk - xq[:, None, :] + p_r                                 # (tn, s, c)
    # linear_w: BN(c) -> ReLU -> Linear(c, cs)+BN(cs) (folded) -> ReLU
    #           -> Linear(cs, cs) column-tiled to width c.  Matmuls on the MXU.
    w = jnp.maximum(w * bnw_s_ref[...] + bnw_t_ref[...], 0.0)
    wf = w.reshape(tn * s, c)
    wf = jnp.dot(wf, ww1_ref[...], preferred_element_type=jnp.float32)
    wf = jnp.maximum(wf + bw1_ref[...], 0.0)                      # (tn*s, cs)
    wf = jnp.dot(wf, ww2_ref[...], preferred_element_type=jnp.float32)
    w = wf.reshape(tn, s, c) + bw2_ref[...]                       # (tn, s, c)

    # softmax over the nsample axis (PyTorch dim=1); columns within one share
    # group are identical copies, so the full-width softmax is redundant but
    # runs in otherwise-idle lanes.
    w = w - jnp.max(w, axis=1, keepdims=True)
    w = jnp.exp(w)
    w = w / jnp.sum(w, axis=1, keepdims=True)

    out = jnp.sum((xv + p_r) * w, axis=1)                         # (tn, c)
    # fused bn2 + ReLU epilogue
    out = jnp.maximum(out * bn2_s_ref[...] + bn2_t_ref[...], 0.0)
    o_ref[...] = out.astype(o_ref.dtype)


def pt_attention(xq, xk_g, xv_g, p_rel, prm, bn2_s, bn2_t, *,
                 tile_n=DEFAULT_TILE):
    n, s, c = xk_g.shape
    tile = _pick_tile(n, tile_n)
    xq_p = _pad_rows(xq, tile)
    xk_p = _pad_rows(xk_g, tile)
    xv_p = _pad_rows(xv_g, tile)
    pr_p = _pad_rows(p_rel, tile)
    npad = xq_p.shape[0]

    weights = [prm['wp1'], prm['bp1'], prm['wp2'], prm['bp2'],
               prm['bnw_s'], prm['bnw_t'], prm['ww1'], prm['bw1'],
               prm['ww2_t'], prm['bw2_t'],
               jnp.asarray(bn2_s, jnp.float32).reshape(1, c),
               jnp.asarray(bn2_t, jnp.float32).reshape(1, c)]
    in_specs = ([pl.BlockSpec((tile, c), lambda i: (i, 0)),
                 pl.BlockSpec((tile, s, c), lambda i: (i, 0, 0)),
                 pl.BlockSpec((tile, s, c), lambda i: (i, 0, 0)),
                 pl.BlockSpec((tile, s, 3), lambda i: (i, 0, 0))]
                + [pl.BlockSpec(w.shape, lambda i: (0, 0)) for w in weights])

    y = pl.pallas_call(
        _pt_attention_kernel,
        out_shape=jax.ShapeDtypeStruct((npad, c), jnp.float32),
        grid=(npad // tile,),
        in_specs=in_specs,
        out_specs=pl.BlockSpec((tile, c), lambda i: (i, 0)),
        compiler_params=_COMPILER_PARAMS,
    )(xq_p, xk_p, xv_p, pr_p, *weights)
    return y[:n] if npad != n else y


# ----------------------------------------------------------------------------
# JAX glue: kNN grouping (pointops.queryandgroup equivalent)
# ----------------------------------------------------------------------------
def knn_indices(p, o, nsample):
    # TODO(synk): data-dependent top-k / gather; kept in plain JAX.
    n = p.shape[0]
    pt = jnp.arange(n)
    seg = jnp.sum(pt[:, None] >= o[None, :], axis=1)              # segment id
    sq = jnp.sum(p * p, axis=1)
    d2 = sq[:, None] + sq[None, :] - 2.0 * (p @ p.T)              # (n, n) via MXU
    d2 = jnp.where(seg[:, None] == seg[None, :], d2, jnp.inf)
    neg_d, idx = jax.lax.top_k(-d2, nsample)                      # incl. self
    # If a segment has fewer than nsample points, fall back to the query itself.
    idx = jnp.where(jnp.isfinite(neg_d), idx, pt[:, None])
    return idx.astype(jnp.int32)                                  # (n, nsample)


# ----------------------------------------------------------------------------
# Module forward passes
# ----------------------------------------------------------------------------
def pt_block_forward(p, x, idx, prm):
    c = x.shape[1]
    identity = x
    # Fused: y = relu(bn1(linear1(x))); qkv = [linear_q|k|v](y)  -> one kernel.
    qkv = mlp2(x, prm['w1f'], prm['bn1_t'], prm['tr']['wqkv'], prm['tr']['bqkv'],
               relu_out=False)                                    # (n, 3c)
    xq, xk, xv = qkv[:, :c], qkv[:, c:2 * c], qkv[:, 2 * c:]
    # TODO(synk): neighbor gather stays in plain JAX (jnp.take); in-kernel
    # gather via scalar-prefetched idx would remove this HBM round trip.
    xk_g = jnp.take(xk, idx, axis=0)                              # (n, s, c)
    xv_g = jnp.take(xv, idx, axis=0)                              # (n, s, c)
    p_rel = jnp.take(p, idx, axis=0) - p[:, None, :]              # (n, s, 3)
    # attention + bn2 + ReLU fused in one kernel
    y = pt_attention(xq, xk_g, xv_g, p_rel, prm['tr'],
                     prm['bn2_s'], prm['bn2_t'])
    # bn3(linear3(y)) + identity, ReLU — residual fused in the linear kernel
    y = linear_act(y, prm['w3f'], prm['bn3_t'], res=identity, relu=True)
    return y


def encoder_forward(p0, feat0, o0, params):
    x = jnp.concatenate([p0, feat0], axis=1)                      # (n, 6)
    # in_mlp: two Linear+BN+ReLU stages fused in one kernel
    x0 = mlp2(x, params['in_w1f'], params['in_b1'],
              params['in_w2f'], params['in_b2'], relu_out=True)   # (n, 64)
    idx = knn_indices(p0, o0, nsample=8)
    x1 = pt_block_forward(p0, x0, idx, params['block1'])
    x2 = pt_block_forward(p0, x1, idx, params['block2'])
    x3 = pt_block_forward(p0, x2, idx, params['block3'])
    x_features = jnp.concatenate([x0, x1, x2, x3], axis=1)        # (n, 256)
    x_out = linear_act(x_features, params['mlp1_wf'], params['mlp1_b'],
                       relu=True)                                 # (n, 1024)
    return x_out, x_features


# ----------------------------------------------------------------------------
# Deterministic parameter initialization (BN running-stat affine, folded)
# ----------------------------------------------------------------------------
def _dense(key, cin, cout, bias=True):
    k1, k2 = jax.random.split(key)
    lim = 1.0 / (cin ** 0.5)
    w = jax.random.uniform(k1, (cin, cout), jnp.float32, -lim, lim)
    b = jax.random.uniform(k2, (cout,), jnp.float32, -lim, lim) if bias else None
    return w, b


def _bn(key, c, eps=1e-5):
    k1, k2, k3 = jax.random.split(key, 3)
    gamma = 1.0 + 0.1 * jax.random.normal(k1, (c,), jnp.float32)
    beta = 0.1 * jax.random.normal(k2, (c,), jnp.float32)
    mean = 0.1 * jax.random.normal(k3, (c,), jnp.float32)
    var = jnp.ones((c,), jnp.float32)
    scale = gamma / jnp.sqrt(var + eps)
    shift = beta - mean * scale
    return scale, shift


def init_transformer_params(key, c, share_planes):
    cs = c // share_planes
    ks = jax.random.split(key, 10)
    wq, bq = _dense(ks[0], c, c)
    wk, bk = _dense(ks[1], c, c)
    wv, bv = _dense(ks[2], c, c)
    wp1, bp1 = _dense(ks[3], 3, 3)
    bnp_s, bnp_t = _bn(ks[4], 3)
    wp2, bp2 = _dense(ks[5], 3, c)
    bnw1_s, bnw1_t = _bn(ks[6], c)
    ww1, bw1 = _dense(ks[7], c, cs)
    bnw2_s, bnw2_t = _bn(ks[8], cs)
    ww2, bw2 = _dense(ks[9], cs, cs)
    # Fold each BN that directly follows a Linear into that Linear.
    wp1f = wp1 * bnp_s[None, :]
    bp1f = bp1 * bnp_s + bnp_t
    ww1f = ww1 * bnw2_s[None, :]
    bw1f = bw1 * bnw2_s + bnw2_t
    # Column-tile the final Linear(cs, cs) to full width c: column ch uses
    # ww2[:, ch % cs], matching the PyTorch (N, S, share, c//share) view.
    ww2_t = jnp.tile(ww2, (1, share_planes))                      # (cs, c)
    bw2_t = jnp.tile(bw2, share_planes)                           # (c,)
    return dict(
        wqkv=jnp.concatenate([wq, wk, wv], axis=1),               # (c, 3c)
        bqkv=jnp.concatenate([bq, bk, bv]),                       # (3c,)
        wp1=wp1f, bp1=bp1f.reshape(1, 3),
        wp2=wp2, bp2=bp2.reshape(1, c),
        bnw_s=bnw1_s.reshape(1, c), bnw_t=bnw1_t.reshape(1, c),
        ww1=ww1f, bw1=bw1f.reshape(1, cs),
        ww2_t=ww2_t, bw2_t=bw2_t.reshape(1, c),
    )


def init_block_params(key, c, share_planes):
    ks = jax.random.split(key, 6)
    w1, _ = _dense(ks[0], c, c, bias=False)
    bn1_s, bn1_t = _bn(ks[1], c)
    tr = init_transformer_params(ks[2], c, share_planes)
    bn2_s, bn2_t = _bn(ks[3], c)
    w3, _ = _dense(ks[4], c, c, bias=False)
    bn3_s, bn3_t = _bn(ks[5], c)
    return dict(w1f=w1 * bn1_s[None, :], bn1_t=bn1_t, tr=tr,
                bn2_s=bn2_s, bn2_t=bn2_t,
                w3f=w3 * bn3_s[None, :], bn3_t=bn3_t)


def init_encoder_params(key, input_channels=6, planes0=64, share_planes=8):
    ks = jax.random.split(key, 9)
    in_w1, _ = _dense(ks[0], input_channels, planes0, bias=False)
    in_bn1_s, in_bn1_t = _bn(ks[1], planes0)
    in_w2, _ = _dense(ks[2], planes0, planes0, bias=False)
    in_bn2_s, in_bn2_t = _bn(ks[3], planes0)
    b1 = init_block_params(ks[4], planes0, share_planes)
    b2 = init_block_params(ks[5], planes0, share_planes)
    b3 = init_block_params(ks[6], planes0, share_planes)
    mlp_w, mlp_b = _dense(ks[7], 4 * planes0, 1024)
    bnm_s, bnm_t = _bn(ks[8], 1024)
    return dict(
        in_w1f=in_w1 * in_bn1_s[None, :], in_b1=in_bn1_t,
        in_w2f=in_w2 * in_bn2_s[None, :], in_b2=in_bn2_t,
        block1=b1, block2=b2, block3=b3,
        mlp1_wf=mlp_w * bnm_s[None, :],
        mlp1_b=mlp_b * bnm_s + bnm_t)


# ----------------------------------------------------------------------------
if __name__ == "__main__":
    key = jax.random.PRNGKey(0)
    kp, kf, kparam = jax.random.split(key, 3)

    N = 128                                   # total points (2 segments of 64)
    p0 = jax.random.normal(kp, (N, 3), jnp.float32)        # coordinates
    feat0 = jax.random.normal(kf, (N, 3), jnp.float32)     # extra features (c=6)
    o0 = jnp.array([N // 2, N], dtype=jnp.int32)            # batch offsets

    params = init_encoder_params(kparam)

    fwd = jax.jit(encoder_forward)
    x, x_features = fwd(p0, feat0, o0, params)
    jax.block_until_ready((x, x_features))
    assert x.shape == (N, 1024) and x_features.shape == (N, 256)
    assert bool(jnp.all(jnp.isfinite(x)))
    print("KERNEL_OK")
</pallas_src>

<mosaic_0001>
module attributes {stable_mosaic.version = 11 : i64} {
  func.func @_mlp2_kernel(%arg0: i32, %arg1: memref<64x6xf32, #tpu.memory_space<vmem>>, %arg2: memref<6x64xf32, #tpu.memory_space<vmem>>, %arg3: memref<1x64xf32, #tpu.memory_space<vmem>>, %arg4: memref<64x64xf32, #tpu.memory_space<vmem>>, %arg5: memref<1x64xf32, #tpu.memory_space<vmem>>, %arg6: memref<64x64xf32, #tpu.memory_space<vmem>>) attributes {dimension_semantics = [#tpu.dimension_semantics<parallel>], iteration_bounds = array<i64: 2>, scalar_prefetch = 0 : i64, scratch_operands = 0 : i64, tpu.core_type = #tpu.core_type<tc>, window_params = [{transform_indices = @transform_0, window_bounds = array<i64: 64, 6>}, {pipeline_mode = #tpu.pipeline_mode<synchronous>, transform_indices = @transform_1, window_bounds = array<i64: 6, 64>}, {pipeline_mode = #tpu.pipeline_mode<synchronous>, transform_indices = @transform_2, window_bounds = array<i64: 1, 64>}, {pipeline_mode = #tpu.pipeline_mode<synchronous>, transform_indices = @transform_3, window_bounds = array<i64: 64, 64>}, {pipeline_mode = #tpu.pipeline_mode<synchronous>, transform_indices = @transform_4, window_bounds = array<i64: 1, 64>}, {transform_indices = @transform_5, window_bounds = array<i64: 64, 64>}]} {
    %c0 = arith.constant 0 : index
    %c0_0 = arith.constant 0 : index
    %0 = vector.load %arg1[%c0, %c0_0] : memref<64x6xf32, #tpu.memory_space<vmem>>, vector<64x6xf32>
    %c0_1 = arith.constant 0 : index
    %c0_2 = arith.constant 0 : index
    %1 = vector.load %arg2[%c0_1, %c0_2] : memref<6x64xf32, #tpu.memory_space<vmem>>, vector<6x64xf32>
    %cst = arith.constant dense<0.000000e+00> : vector<64x64xf32>
    %2 = tpu.matmul %0, %1, %cst {dimension_numbers = #tpu.dot_dimension_numbers<[1], [0], [0], [1], [0, 0, 1, 1], [], []>} : vector<64x6xf32>, vector<6x64xf32>, vector<64x64xf32> -> vector<64x64xf32>
    %c0_3 = arith.constant 0 : index
    %c0_4 = arith.constant 0 : index
    %3 = vector.load %arg3[%c0_3, %c0_4] : memref<1x64xf32, #tpu.memory_space<vmem>>, vector<1x64xf32>
    %4 = vector.broadcast %3 : vector<1x64xf32> to vector<64x64xf32>
    %5 = arith.addf %2, %4 : vector<64x64xf32>
    %cst_5 = arith.constant 0.000000e+00 : f32
    %6 = vector.broadcast %cst_5 : f32 to vector<64x64xf32>
    %7 = arith.maximumf %5, %6 : vector<64x64xf32>
    %c0_6 = arith.constant 0 : index
    %c0_7 = arith.constant 0 : index
    %8 = vector.load %arg4[%c0_6, %c0_7] : memref<64x64xf32, #tpu.memory_space<vmem>>, vector<64x64xf32>
    %cst_8 = arith.constant dense<0.000000e+00> : vector<64x64xf32>
    %9 = tpu.matmul %7, %8, %cst_8 {dimension_numbers = #tpu.dot_dimension_numbers<[1], [0], [0], [1], [0, 0, 1, 1], [], []>} : vector<64x64xf32>, vector<64x64xf32>, vector<64x64xf32> -> vector<64x64xf32>
    %c0_9 = arith.constant 0 : index
    %c0_10 = arith.constant 0 : index
    %10 = vector.load %arg5[%c0_9, %c0_10] : memref<1x64xf32, #tpu.memory_space<vmem>>, vector<1x64xf32>
    %11 = vector.broadcast %10 : vector<1x64xf32> to vector<64x64xf32>
    %12 = arith.addf %9, %11 : vector<64x64xf32>
    %cst_11 = arith.constant 0.000000e+00 : f32
    %13 = vector.broadcast %cst_11 : f32 to vector<64x64xf32>
    %14 = arith.maximumf %12, %13 : vector<64x64xf32>
    %c0_12 = arith.constant 0 : index
    %c0_13 = arith.constant 0 : index
    %15 = vector.load %arg6[%c0_12, %c0_13] : memref<64x64xf32, #tpu.memory_space<vmem>>, vector<64x64xf32>
    tpu.vector_store %arg6[%c0_12, %c0_13], %14 {strides = array<i32>} : memref<64x64xf32, #tpu.memory_space<vmem>>, vector<64x64xf32>,
    return
  }
  func.func @transform_0(%arg0: i32) -> (i32, i32) {
    %c0_i32 = arith.constant 0 : i32
    %c0_i32_0 = arith.constant 0 : i32
    return %arg0, %c0_i32 : i32, i32
  }
  func.func @transform_1(%arg0: i32) -> (i32, i32) {
    %c0_i32 = arith.constant 0 : i32
    %c0_i32_0 = arith.constant 0 : i32
    %c0_i32_1 = arith.constant 0 : i32
    return %c0_i32, %c0_i32_0 : i32, i32
  }
  func.func @transform_2(%arg0: i32) -> (i32, i32) {
    %c0_i32 = arith.constant 0 : i32
    %c0_i32_0 = arith.constant 0 : i32
    %c0_i32_1 = arith.constant 0 : i32
    return %c0_i32, %c0_i32_0 : i32, i32
  }
  func.func @transform_3(%arg0: i32) -> (i32, i32) {
    %c0_i32 = arith.constant 0 : i32
    %c0_i32_0 = arith.constant 0 : i32
    %c0_i32_1 = arith.constant 0 : i32
    return %c0_i32, %c0_i32_0 : i32, i32
  }
  func.func @transform_4(%arg0: i32) -> (i32, i32) {
    %c0_i32 = arith.constant 0 : i32
    %c0_i32_0 = arith.constant 0 : i32
    %c0_i32_1 = arith.constant 0 : i32
    return %c0_i32, %c0_i32_0 : i32, i32
  }
  func.func @transform_5(%arg0: i32) -> (i32, i32) {
    %c0_i32 = arith.constant 0 : i32
    %c0_i32_0 = arith.constant 0 : i32
    return %arg0, %c0_i32 : i32, i32
  }
}

module attributes {stable_mosaic.version = 11 : i64} {
  func.func @_mlp2_kernel(%arg0: i32, %arg1: memref<64x64xf32, #tpu.memory_space<vmem>>, %arg2: memref<64x64xf32, #tpu.memory_space<vmem>>, %arg3: memref<1x64xf32, #tpu.memory_space<vmem>>, %arg4: memref<64x192xf32, #tpu.memory_space<vmem>>, %arg5: memref<1x192xf32, #tpu.memory_space<vmem>>, %arg6: memref<64x192xf32, #tpu.memory_space<vmem>>) attributes {dimension_semantics = [#tpu.dimension_semantics<parallel>], iteration_bounds = array<i64: 2>, scalar_prefetch = 0 : i64, scratch_operands = 0 : i64, tpu.core_type = #tpu.core_type<tc>, window_params = [{transform_indices = @transform_0, window_bounds = array<i64: 64, 64>}, {pipeline_mode = #tpu.pipeline_mode<synchronous>, transform_indices = @transform_1, window_bounds = array<i64: 64, 64>}, {pipeline_mode = #tpu.pipeline_mode<synchronous>, transform_indices = @transform_2, window_bounds = array<i64: 1, 64>}, {pipeline_mode = #tpu.pipeline_mode<synchronous>, transform_indices = @transform_3, window_bounds = array<i64: 64, 192>}, {pipeline_mode = #tpu.pipeline_mode<synchronous>, transform_indices = @transform_4, window_bounds = array<i64: 1, 192>}, {transform_indices = @transform_5, window_bounds = array<i64: 64, 192>}]} {
    %c0 = arith.constant 0 : index
    %c0_0 = arith.constant 0 : index
    %0 = vector.load %arg1[%c0, %c0_0] : memref<64x64xf32, #tpu.memory_space<vmem>>, vector<64x64xf32>
    %c0_1 = arith.constant 0 : index
    %c0_2 = arith.constant 0 : index
    %1 = vector.load %arg2[%c0_1, %c0_2] : memref<64x64xf32, #tpu.memory_space<vmem>>, vector<64x64xf32>
    %cst = arith.constant dense<0.000000e+00> : vector<64x64xf32>
    %2 = tpu.matmul %0, %1, %cst {dimension_numbers = #tpu.dot_dimension_numbers<[1], [0], [0], [1], [0, 0, 1, 1], [], []>} : vector<64x64xf32>, vector<64x64xf32>, vector<64x64xf32> -> vector<64x64xf32>
    %c0_3 = arith.constant 0 : index
    %c0_4 = arith.constant 0 : index
    %3 = vector.load %arg3[%c0_3, %c0_4] : memref<1x64xf32, #tpu.memory_space<vmem>>, vector<1x64xf32>
    %4 = vector.broadcast %3 : vector<1x64xf32> to vector<64x64xf32>
    %5 = arith.addf %2, %4 : vector<64x64xf32>
    %cst_5 = arith.constant 0.000000e+00 : f32
    %6 = vector.broadcast %cst_5 : f32 to vector<64x64xf32>
    %7 = arith.maximumf %5, %6 : vector<64x64xf32>
    %c0_6 = arith.constant 0 : index
    %c0_7 = arith.constant 0 : index
    %8 = vector.load %arg4[%c0_6, %c0_7] : memref<64x192xf32, #tpu.memory_space<vmem>>, vector<64x192xf32>
    %cst_8 = arith.constant dense<0.000000e+00> : vector<64x192xf32>
    %9 = tpu.matmul %7, %8, %cst_8 {dimension_numbers = #tpu.dot_dimension_numbers<[1], [0], [0], [1], [0, 0, 1, 1], [], []>} : vector<64x64xf32>, vector<64x192xf32>, vector<64x192xf32> -> vector<64x192xf32>
    %c0_9 = arith.constant 0 : index
    %c0_10 = arith.constant 0 : index
    %10 = vector.load %arg5[%c0_9, %c0_10] : memref<1x192xf32, #tpu.memory_space<vmem>>, vector<1x192xf32>
    %11 = vector.broadcast %10 : vector<1x192xf32> to vector<64x192xf32>
    %12 = arith.addf %9, %11 : vector<64x192xf32>
    %c0_11 = arith.constant 0 : index
    %c0_12 = arith.constant 0 : index
    %13 = vector.load %arg6[%c0_11, %c0_12] : memref<64x192xf32, #tpu.memory_space<vmem>>, vector<64x192xf32>
    tpu.vector_store %arg6[%c0_11, %c0_12], %12 {strides = array<i32>} : memref<64x192xf32, #tpu.memory_space<vmem>>, vector<64x192xf32>,
    return
  }
  func.func @transform_0(%arg0: i32) -> (i32, i32) {
    %c0_i32 = arith.constant 0 : i32
    %c0_i32_0 = arith.constant 0 : i32
    return %arg0, %c0_i32 : i32, i32
  }
  func.func @transform_1(%arg0: i32) -> (i32, i32) {
    %c0_i32 = arith.constant 0 : i32
    %c0_i32_0 = arith.constant 0 : i32
    %c0_i32_1 = arith.constant 0 : i32
    return %c0_i32, %c0_i32_0 : i32, i32
  }
  func.func @transform_2(%arg0: i32) -> (i32, i32) {
    %c0_i32 = arith.constant 0 : i32
    %c0_i32_0 = arith.constant 0 : i32
    %c0_i32_1 = arith.constant 0 : i32
    return %c0_i32, %c0_i32_0 : i32, i32
  }
  func.func @transform_3(%arg0: i32) -> (i32, i32) {
    %c0_i32 = arith.constant 0 : i32
    %c0_i32_0 = arith.constant 0 : i32
    %c0_i32_1 = arith.constant 0 : i32
    return %c0_i32, %c0_i32_0 : i32, i32
  }
  func.func @transform_4(%arg0: i32) -> (i32, i32) {
    %c0_i32 = arith.constant 0 : i32
    %c0_i32_0 = arith.constant 0 : i32
    %c0_i32_1 = arith.constant 0 : i32
    return %c0_i32, %c0_i32_0 : i32, i32
  }
  func.func @transform_5(%arg0: i32) -> (i32, i32) {
    %c0_i32 = arith.constant 0 : i32
    %c0_i32_0 = arith.constant 0 : i32
    return %arg0, %c0_i32 : i32, i32
  }
}

module attributes {stable_mosaic.version = 11 : i64} {
  func.func @_pt_attention_kernel(%arg0: i32, %arg1: memref<64x64xf32, #tpu.memory_space<vmem>>, %arg2: memref<64x8x64xf32, #tpu.memory_space<vmem>>, %arg3: memref<64x8x64xf32, #tpu.memory_space<vmem>>, %arg4: memref<64x8x3xf32, #tpu.memory_space<vmem>>, %arg5: memref<3x3xf32, #tpu.memory_space<vmem>>, %arg6: memref<1x3xf32, #tpu.memory_space<vmem>>, %arg7: memref<3x64xf32, #tpu.memory_space<vmem>>, %arg8: memref<1x64xf32, #tpu.memory_space<vmem>>, %arg9: memref<1x64xf32, #tpu.memory_space<vmem>>, %arg10: memref<1x64xf32, #tpu.memory_space<vmem>>, %arg11: memref<64x8xf32, #tpu.memory_space<vmem>>, %arg12: memref<1x8xf32, #tpu.memory_space<vmem>>, %arg13: memref<8x64xf32, #tpu.memory_space<vmem>>, %arg14: memref<1x64xf32, #tpu.memory_space<vmem>>, %arg15: memref<1x64xf32, #tpu.memory_space<vmem>>, %arg16: memref<1x64xf32, #tpu.memory_space<vmem>>, %arg17: memref<64x64xf32, #tpu.memory_space<vmem>>) attributes {dimension_semantics = [#tpu.dimension_semantics<parallel>], iteration_bounds = array<i64: 2>, scalar_prefetch = 0 : i64, scratch_operands = 0 : i64, tpu.core_type = #tpu.core_type<tc>, window_params = [{transform_indices = @transform_0, window_bounds = array<i64: 64, 64>}, {transform_indices = @transform_1, window_bounds = array<i64: 64, 8, 64>}, {transform_indices = @transform_2, window_bounds = array<i64: 64, 8, 64>}, {transform_indices = @transform_3, window_bounds = array<i64: 64, 8, 3>}, {pipeline_mode = #tpu.pipeline_mode<synchronous>, transform_indices = @transform_4, window_bounds = array<i64: 3, 3>}, {pipeline_mode = #tpu.pipeline_mode<synchronous>, transform_indices = @transform_5, window_bounds = array<i64: 1, 3>}, {pipeline_mode = #tpu.pipeline_mode<synchronous>, transform_indices = @transform_6, window_bounds = array<i64: 3, 64>}, {pipeline_mode = #tpu.pipeline_mode<synchronous>, transform_indices = @transform_7, window_bounds = array<i64: 1, 64>}, {pipeline_mode = #tpu.pipeline_mode<synchronous>, transform_indices = @transform_8, window_bounds = array<i64: 1, 64>}, {pipeline_mode = #tpu.pipeline_mode<synchronous>, transform_indices = @transform_9, window_bounds = array<i64: 1, 64>}, {pipeline_mode = #tpu.pipeline_mode<synchronous>, transform_indices = @transform_10, window_bounds = array<i64: 64, 8>}, {pipeline_mode = #tpu.pipeline_mode<synchronous>, transform_indices = @transform_11, window_bounds = array<i64: 1, 8>}, {pipeline_mode = #tpu.pipeline_mode<synchronous>, transform_indices = @transform_12, window_bounds = array<i64: 8, 64>}, {pipeline_mode = #tpu.pipeline_mode<synchronous>, transform_indices = @transform_13, window_bounds = array<i64: 1, 64>}, {pipeline_mode = #tpu.pipeline_mode<synchronous>, transform_indices = @transform_14, window_bounds = array<i64: 1, 64>}, {pipeline_mode = #tpu.pipeline_mode<synchronous>, transform_indices = @transform_15, window_bounds = array<i64: 1, 64>}, {transform_indices = @transform_16, window_bounds = array<i64: 64, 64>}]} {
    %c0 = arith.constant 0 : index
    %c0_0 = arith.constant 0 : index
    %0 = vector.load %arg1[%c0, %c0_0] : memref<64x64xf32, #tpu.memory_space<vmem>>, vector<64x64xf32>
    %c0_1 = arith.constant 0 : index
    %c0_2 = arith.constant 0 : index
    %c0_3 = arith.constant 0 : index
    %1 = vector.load %arg2[%c0_1, %c0_2, %c0_3] : memref<64x8x64xf32, #tpu.memory_space<vmem>>, vector<64x8x64xf32>
    %c0_4 = arith.constant 0 : index
    %c0_5 = arith.constant 0 : index
    %c0_6 = arith.constant 0 : index
    %2 = vector.load %arg3[%c0_4, %c0_5, %c0_6] : memref<64x8x64xf32, #tpu.memory_space<vmem>>, vector<64x8x64xf32>
    %c0_7 = arith.constant 0 : index
    %c0_8 = arith.constant 0 : index
    %c0_9 = arith.constant 0 : index
    %3 = vector.load %arg4[%c0_7, %c0_8, %c0_9] : memref<64x8x3xf32, #tpu.memory_space<vmem>>, vector<64x8x3xf32>
    %c0_10 = arith.constant 0 : index
    %c0_11 = arith.constant 0 : index
    %4 = vector.load %arg6[%c0_10, %c0_11] : memref<1x3xf32, #tpu.memory_space<vmem>>, vector<1x3xf32>
    %5 = vector.extract_strided_slice %3 {offsets = [0, 0, 0], sizes = [64, 8, 1], strides = [1, 1, 1]} : vector<64x8x3xf32> to vector<64x8x1xf32>
    %c0_12 = arith.constant 0 : index
    %c0_13 = arith.constant 0 : index
    %6 = vector.load %arg5[%c0_12, %c0_13] : memref<3x3xf32, #tpu.memory_space<vmem>>, vector<1x3xf32>
    %7 = vector.shape_cast %6 : vector<1x3xf32> to vector<1x1x3xf32>
    %8 = vector.broadcast %5 : vector<64x8x1xf32> to vector<64x8x3xf32>
    %9 = vector.broadcast %7 : vector<1x1x3xf32> to vector<64x8x3xf32>
    %10 = arith.mulf %8, %9 : vector<64x8x3xf32>
    %11 = vector.shape_cast %4 : vector<1x3xf32> to vector<1x1x3xf32>
    %12 = vector.broadcast %11 : vector<1x1x3xf32> to vector<64x8x3xf32>
    %13 = arith.addf %12, %10 : vector<64x8x3xf32>
    %14 = vector.extract_strided_slice %3 {offsets = [0, 0, 1], sizes = [64, 8, 1], strides = [1, 1, 1]} : vector<64x8x3xf32> to vector<64x8x1xf32>
    %c1 = arith.constant 1 : index
    %c0_14 = arith.constant 0 : index
    %15 = vector.load %arg5[%c1, %c0_14] : memref<3x3xf32, #tpu.memory_space<vmem>>, vector<1x3xf32>
    %16 = vector.shape_cast %15 : vector<1x3xf32> to vector<1x1x3xf32>
    %17 = vector.broadcast %14 : vector<64x8x1xf32> to vector<64x8x3xf32>
    %18 = vector.broadcast %16 : vector<1x1x3xf32> to vector<64x8x3xf32>
    %19 = arith.mulf %17, %18 : vector<64x8x3xf32>
    %20 = arith.addf %13, %19 : vector<64x8x3xf32>
    %21 = vector.extract_strided_slice %3 {offsets = [0, 0, 2], sizes = [64, 8, 1], strides = [1, 1, 1]} : vector<64x8x3xf32> to vector<64x8x1xf32>
    %c2 = arith.constant 2 : index
    %c0_15 = arith.constant 0 : index
    %22 = vector.load %arg5[%c2, %c0_15] : memref<3x3xf32, #tpu.memory_space<vmem>>, vector<1x3xf32>
    %23 = vector.shape_cast %22 : vector<1x3xf32> to vector<1x1x3xf32>
    %24 = vector.broadcast %21 : vector<64x8x1xf32> to vector<64x8x3xf32>
    %25 = vector.broadcast %23 : vector<1x1x3xf32> to vector<64x8x3xf32>
    %26 = arith.mulf %24, %25 : vector<64x8x3xf32>
    %27 = arith.addf %20, %26 : vector<64x8x3xf32>
    %cst = arith.constant 0.000000e+00 : f32
    %28 = vector.broadcast %cst : f32 to vector<64x8x3xf32>
    %29 = arith.maximumf %27, %28 : vector<64x8x3xf32>
    %c0_16 = arith.constant 0 : index
    %c0_17 = arith.constant 0 : index
    %30 = vector.load %arg8[%c0_16, %c0_17] : memref<1x64xf32, #tpu.memory_space<vmem>>, vector<1x64xf32>
    %31 = vector.extract_strided_slice %29 {offsets = [0, 0, 0], sizes = [64, 8, 1], strides = [1, 1, 1]} : vector<64x8x3xf32> to vector<64x8x1xf32>
    %c0_18 = arith.constant 0 : index
    %c0_19 = arith.constant 0 : index
    %32 = vector.load %arg7[%c0_18, %c0_19] : memref<3x64xf32, #tpu.memory_space<vmem>>, vector<1x64xf32>
    %33 = vector.shape_cast %32 : vector<1x64xf32> to vector<1x1x64xf32>
    %34 = vector.broadcast %31 : vector<64x8x1xf32> to vector<64x8x64xf32>
    %35 = vector.broadcast %33 : vector<1x1x64xf32> to vector<64x8x64xf32>
    %36 = arith.mulf %34, %35 : vector<64x8x64xf32>
    %37 = vector.shape_cast %30 : vector<1x64xf32> to vector<1x1x64xf32>
    %38 = vector.broadcast %37 : vector<1x1x64xf32> to vector<64x8x64xf32>
    %39 = arith.addf %38, %36 : vector<64x8x64xf32>
    %40 = vector.extract_strided_slice %29 {offsets = [0, 0, 1], sizes = [64, 8, 1], strides = [1, 1, 1]} : vector<64x8x3xf32> to vector<64x8x1xf32>
    %c1_20 = arith.constant 1 : index
    %c0_21 = arith.constant 0 : index
    %41 = vector.load %arg7[%c1_20, %c0_21] : memref<3x64xf32, #tpu.memory_space<vmem>>, vector<1x64xf32>
    %42 = vector.shape_cast %41 : vector<1x64xf32> to vector<1x1x64xf32>
    %43 = vector.broadcast %40 : vector<64x8x1xf32> to vector<64x8x64xf32>
    %44 = vector.broadcast %42 : vector<1x1x64xf32> to vector<64x8x64xf32>
    %45 = arith.mulf %43, %44 : vector<64x8x64xf32>
    %46 = arith.addf %39, %45 : vector<64x8x64xf32>
    %47 = vector.extract_strided_slice %29 {offsets = [0, 0, 2], sizes = [64, 8, 1], strides = [1, 1, 1]} : vector<64x8x3xf32> to vector<64x8x1xf32>
    %c2_22 = arith.constant 2 : index
    %c0_23 = arith.constant 0 : index
    %48 = vector.load %arg7[%c2_22, %c0_23] : memref<3x64xf32, #tpu.memory_space<vmem>>, vector<1x64xf32>
    %49 = vector.shape_cast %48 : vector<1x64xf32> to vector<1x1x64xf32>
    %50 = vector.broadcast %47 : vector<64x8x1xf32> to vector<64x8x64xf32>
    %51 = vector.broadcast %49 : vector<1x1x64xf32> to vector<64x8x64xf32>
    %52 = arith.mulf %50, %51 : vector<64x8x64xf32>
    %53 = arith.addf %46, %52 : vector<64x8x64xf32>
    %54 = vector.shape_cast %0 : vector<64x64xf32> to vector<64x1x64xf32>
    %55 = vector.broadcast %54 : vector<64x1x64xf32> to vector<64x8x64xf32>
    %56 = arith.subf %1, %55 : vector<64x8x64xf32>
    %57 = arith.addf %56, %53 : vector<64x8x64xf32>
    %c0_24 = arith.constant 0 : index
    %c0_25 = arith.constant 0 : index
    %58 = vector.load %arg9[%c0_24, %c0_25] : memref<1x64xf32, #tpu.memory_space<vmem>>, vector<1x64xf32>
    %59 = vector.shape_cast %58 : vector<1x64xf32> to vector<1x1x64xf32>
    %60 = vector.broadcast %59 : vector<1x1x64xf32> to vector<64x8x64xf32>
    %61 = arith.mulf %57, %60 : vector<64x8x64xf32>
    %c0_26 = arith.constant 0 : index
    %c0_27 = arith.constant 0 : index
    %62 = vector.load %arg10[%c0_26, %c0_27] : memref<1x64xf32, #tpu.memory_space<vmem>>, vector<1x64xf32>
    %63 = vector.shape_cast %62 : vector<1x64xf32> to vector<1x1x64xf32>
    %64 = vector.broadcast %63 : vector<1x1x64xf32> to vector<64x8x64xf32>
    %65 = arith.addf %61, %64 : vector<64x8x64xf32>
    %cst_28 = arith.constant 0.000000e+00 : f32
    %66 = vector.broadcast %cst_28 : f32 to vector<64x8x64xf32>
    %67 = arith.maximumf %65, %66 : vector<64x8x64xf32>
    %68 = vector.shape_cast %67 : vector<64x8x64xf32> to vector<512x64xf32>
    %c0_29 = arith.constant 0 : index
    %c0_30 = arith.constant 0 : index
    %69 = vector.load %arg11[%c0_29, %c0_30] : memref<64x8xf32, #tpu.memory_space<vmem>>, vector<64x8xf32>
    %cst_31 = arith.constant dense<0.000000e+00> : vector<512x8xf32>
    %70 = tpu.matmul %68, %69, %cst_31 {dimension_numbers = #tpu.dot_dimension_numbers<[1], [0], [0], [1], [0, 0, 1, 1], [], []>} : vector<512x64xf32>, vector<64x8xf32>, vector<512x8xf32> -> vector<512x8xf32>
    %c0_32 = arith.constant 0 : index
    %c0_33 = arith.constant 0 : index
    %71 = vector.load %arg12[%c0_32, %c0_33] : memref<1x8xf32, #tpu.memory_space<vmem>>, vector<1x8xf32>
    %72 = vector.broadcast %71 : vector<1x8xf32> to vector<512x8xf32>
    %73 = arith.addf %70, %72 : vector<512x8xf32>
    %cst_34 = arith.constant 0.000000e+00 : f32
    %74 = vector.broadcast %cst_34 : f32 to vector<512x8xf32>
    %75 = arith.maximumf %73, %74 : vector<512x8xf32>
    %c0_35 = arith.constant 0 : index
    %c0_36 = arith.constant 0 : index
    %76 = vector.load %arg13[%c0_35, %c0_36] : memref<8x64xf32, #tpu.memory_space<vmem>>, vector<8x64xf32>
    %cst_37 = arith.constant dense<0.000000e+00> : vector<512x64xf32>
    %77 = tpu.matmul %75, %76, %cst_37 {dimension_numbers = #tpu.dot_dimension_numbers<[1], [0], [0], [1], [0, 0, 1, 1], [], []>} : vector<512x8xf32>, vector<8x64xf32>, vector<512x64xf32> -> vector<512x64xf32>
    %78 = vector.shape_cast %77 : vector<512x64xf32> to vector<64x8x64xf32>
    %c0_38 = arith.constant 0 : index
    %c0_39 = arith.constant 0 : index
    %79 = vector.load %arg14[%c0_38, %c0_39] : memref<1x64xf32, #tpu.memory_space<vmem>>, vector<1x64xf32>
    %80 = vector.shape_cast %79 : vector<1x64xf32> to vector<1x1x64xf32>
    %81 = vector.broadcast %80 : vector<1x1x64xf32> to vector<64x8x64xf32>
    %82 = arith.addf %78, %81 : vector<64x8x64xf32>
    %cst_40 = arith.constant dense<0xFF800000> : vector<64x64xf32>
    %83 = vector.multi_reduction <maximumf>, %82, %cst_40 [1] : vector<64x8x64xf32> to vector<64x64xf32>
    %84 = vector.shape_cast %83 : vector<64x64xf32> to vector<64x1x64xf32>
    %85 = vector.broadcast %84 : vector<64x1x64xf32> to vector<64x8x64xf32>
    %86 = arith.subf %82, %85 : vector<64x8x64xf32>
    %87 = math.exp %86 : vector<64x8x64xf32>
    %cst_41 = arith.constant dense<0.000000e+00> : vector<64x64xf32>
    %88 = vector.multi_reduction <add>, %87, %cst_41 [1] : vector<64x8x64xf32> to vector<64x64xf32>
    %89 = vector.shape_cast %88 : vector<64x64xf32> to vector<64x1x64xf32>
    %90 = vector.broadcast %89 : vector<64x1x64xf32> to vector<64x8x64xf32>
    %91 = arith.divf %87, %90 : vector<64x8x64xf32>
    %92 = arith.addf %2, %53 : vector<64x8x64xf32>
    %93 = arith.mulf %92, %91 : vector<64x8x64xf32>
    %cst_42 = arith.constant dense<0.000000e+00> : vector<64x64xf32>
    %94 = vector.multi_reduction <add>, %93, %cst_42 [1] : vector<64x8x64xf32> to vector<64x64xf32>
    %c0_43 = arith.constant 0 : index
    %c0_44 = arith.constant 0 : index
    %95 = vector.load %arg15[%c0_43, %c0_44] : memref<1x64xf32, #tpu.memory_space<vmem>>, vector<1x64xf32>
    %96 = vector.broadcast %95 : vector<1x64xf32> to vector<64x64xf32>
    %97 = arith.mulf %94, %96 : vector<64x64xf32>
    %c0_45 = arith.constant 0 : index
    %c0_46 = arith.constant 0 : index
    %98 = vector.load %arg16[%c0_45, %c0_46] : memref<1x64xf32, #tpu.memory_space<vmem>>, vector<1x64xf32>
    %99 = vector.broadcast %98 : vector<1x64xf32> to vector<64x64xf32>
    %100 = arith.addf %97, %99 : vector<64x64xf32>
    %cst_47 = arith.constant 0.000000e+00 : f32
    %101 = vector.broadcast %cst_47 : f32 to vector<64x64xf32>
    %102 = arith.maximumf %100, %101 : vector<64x64xf32>
    %c0_48 = arith.constant 0 : index
    %c0_49 = arith.constant 0 : index
    %103 = vector.load %arg17[%c0_48, %c0_49] : memref<64x64xf32, #tpu.memory_space<vmem>>, vector<64x64xf32>
    tpu.vector_store %arg17[%c0_48, %c0_49], %102 {strides = array<i32>} : memref<64x64xf32, #tpu.memory_space<vmem>>, vector<64x64xf32>,
    return
  }
  func.func @transform_0(%arg0: i32) -> (i32, i32) {
    %c0_i32 = arith.constant 0 : i32
    %c0_i32_0 = arith.constant 0 : i32
    return %arg0, %c0_i32 : i32, i32
  }
  func.func @transform_1(%arg0: i32) -> (i32, i32, i32) {
    %c0_i32 = arith.constant 0 : i32
    %c0_i32_0 = arith.constant 0 : i32
    %c0_i32_1 = arith.constant 0 : i32
    return %arg0, %c0_i32, %c0_i32_0 : i32, i32, i32
  }
  func.func @transform_2(%arg0: i32) -> (i32, i32, i32) {
    %c0_i32 = arith.constant 0 : i32
    %c0_i32_0 = arith.constant 0 : i32
    %c0_i32_1 = arith.constant 0 : i32
    return %arg0, %c0_i32, %c0_i32_0 : i32, i32, i32
  }
  func.func @transform_3(%arg0: i32) -> (i32, i32, i32) {
    %c0_i32 = arith.constant 0 : i32
    %c0_i32_0 = arith.constant 0 : i32
    %c0_i32_1 = arith.constant 0 : i32
    return %arg0, %c0_i32, %c0_i32_0 : i32, i32, i32
  }
  func.func @transform_4(%arg0: i32) -> (i32, i32) {
    %c0_i32 = arith.constant 0 : i32
    %c0_i32_0 = arith.constant 0 : i32
    %c0_i32_1 = arith.constant 0 : i32
    return %c0_i32, %c0_i32_0 : i32, i32
  }
  func.func @transform_5(%arg0: i32) -> (i32, i32) {
    %c0_i32 = arith.constant 0 : i32
    %c0_i32_0 = arith.constant 0 : i32
    %c0_i32_1 = arith.constant 0 : i32
    return %c0_i32, %c0_i32_0 : i32, i32
  }
  func.func @transform_6(%arg0: i32) -> (i32, i32) {
    %c0_i32 = arith.constant 0 : i32
    %c0_i32_0 = arith.constant 0 : i32
    %c0_i32_1 = arith.constant 0 : i32
    return %c0_i32, %c0_i32_0 : i32, i32
  }
  func.func @transform_7(%arg0: i32) -> (i32, i32) {
    %c0_i32 = arith.constant 0 : i32
    %c0_i32_0 = arith.constant 0 : i32
    %c0_i32_1 = arith.constant 0 : i32
    return %c0_i32, %c0_i32_0 : i32, i32
  }
  func.func @transform_8(%arg0: i32) -> (i32, i32) {
    %c0_i32 = arith.constant 0 : i32
    %c0_i32_0 = arith.constant 0 : i32
    %c0_i32_1 = arith.constant 0 : i32
    return %c0_i32, %c0_i32_0 : i32, i32
  }
  func.func @transform_9(%arg0: i32) -> (i32, i32) {
    %c0_i32 = arith.constant 0 : i32
    %c0_i32_0 = arith.constant 0 : i32
    %c0_i32_1 = arith.constant 0 : i32
    return %c0_i32, %c0_i32_0 : i32, i32
  }
  func.func @transform_10(%arg0: i32) -> (i32, i32) {
    %c0_i32 = arith.constant 0 : i32
    %c0_i32_0 = arith.constant 0 : i32
    %c0_i32_1 = arith.constant 0 : i32
    return %c0_i32, %c0_i32_0 : i32, i32
  }
  func.func @transform_11(%arg0: i32) -> (i32, i32) {
    %c0_i32 = arith.constant 0 : i32
    %c0_i32_0 = arith.constant 0 : i32
    %c0_i32_1 = arith.constant 0 : i32
    return %c0_i32, %c0_i32_0 : i32, i32
  }
  func.func @transform_12(%arg0: i32) -> (i32, i32) {
    %c0_i32 = arith.constant 0 : i32
    %c0_i32_0 = arith.constant 0 : i32
    %c0_i32_1 = arith.constant 0 : i32
    return %c0_i32, %c0_i32_0 : i32, i32
  }
  func.func @transform_13(%arg0: i32) -> (i32, i32) {
    %c0_i32 = arith.constant 0 : i32
    %c0_i32_0 = arith.constant 0 : i32
    %c0_i32_1 = arith.constant 0 : i32
    return %c0_i32, %c0_i32_0 : i32, i32
  }
  func.func @transform_14(%arg0: i32) -> (i32, i32) {
    %c0_i32 = arith.constant 0 : i32
    %c0_i32_0 = arith.constant 0 : i32
    %c0_i32_1 = arith.constant 0 : i32
    return %c0_i32, %c0_i32_0 : i32, i32
  }
  func.func @transform_15(%arg0: i32) -> (i32, i32) {
    %c0_i32 = arith.constant 0 : i32
    %c0_i32_0 = arith.constant 0 : i32
    %c0_i32_1 = arith.constant 0 : i32
    return %c0_i32, %c0_i32_0 : i32, i32
  }
  func.func @transform_16(%arg0: i32) -> (i32, i32) {
    %c0_i32 = arith.constant 0 : i32
    %c0_i32_0 = arith.constant 0 : i32
    return %arg0, %c0_i32 : i32, i32
  }
}

module attributes {stable_mosaic.version = 11 : i64} {
  func.func @_linear_res_kernel(%arg0: i32, %arg1: memref<64x64xf32, #tpu.memory_space<vmem>>, %arg2: memref<64x64xf32, #tpu.memory_space<vmem>>, %arg3: memref<1x64xf32, #tpu.memory_space<vmem>>, %arg4: memref<64x64xf32, #tpu.memory_space<vmem>>, %arg5: memref<64x64xf32, #tpu.memory_space<vmem>>) attributes {dimension_semantics = [#tpu.dimension_semantics<parallel>], iteration_bounds = array<i64: 2>, scalar_prefetch = 0 : i64, scratch_operands = 0 : i64, tpu.core_type = #tpu.core_type<tc>, window_params = [{transform_indices = @transform_0, window_bounds = array<i64: 64, 64>}, {pipeline_mode = #tpu.pipeline_mode<synchronous>, transform_indices = @transform_1, window_bounds = array<i64: 64, 64>}, {pipeline_mode = #tpu.pipeline_mode<synchronous>, transform_indices = @transform_2, window_bounds = array<i64: 1, 64>}, {transform_indices = @transform_3, window_bounds = array<i64: 64, 64>}, {transform_indices = @transform_4, window_bounds = array<i64: 64, 64>}]} {
    %c0 = arith.constant 0 : index
    %c0_0 = arith.constant 0 : index
    %0 = vector.load %arg1[%c0, %c0_0] : memref<64x64xf32, #tpu.memory_space<vmem>>, vector<64x64xf32>
    %c0_1 = arith.constant 0 : index
    %c0_2 = arith.constant 0 : index
    %1 = vector.load %arg2[%c0_1, %c0_2] : memref<64x64xf32, #tpu.memory_space<vmem>>, vector<64x64xf32>
    %cst = arith.constant dense<0.000000e+00> : vector<64x64xf32>
    %2 = tpu.matmul %0, %1, %cst {dimension_numbers = #tpu.dot_dimension_numbers<[1], [0], [0], [1], [0, 0, 1, 1], [], []>} : vector<64x64xf32>, vector<64x64xf32>, vector<64x64xf32> -> vector<64x64xf32>
    %c0_3 = arith.constant 0 : index
    %c0_4 = arith.constant 0 : index
    %3 = vector.load %arg3[%c0_3, %c0_4] : memref<1x64xf32, #tpu.memory_space<vmem>>, vector<1x64xf32>
    %4 = vector.broadcast %3 : vector<1x64xf32> to vector<64x64xf32>
    %5 = arith.addf %2, %4 : vector<64x64xf32>
    %c0_5 = arith.constant 0 : index
    %c0_6 = arith.constant 0 : index
    %6 = vector.load %arg4[%c0_5, %c0_6] : memref<64x64xf32, #tpu.memory_space<vmem>>, vector<64x64xf32>
    %7 = arith.addf %5, %6 : vector<64x64xf32>
    %cst_7 = arith.constant 0.000000e+00 : f32
    %8 = vector.broadcast %cst_7 : f32 to vector<64x64xf32>
    %9 = arith.maximumf %7, %8 : vector<64x64xf32>
    %c0_8 = arith.constant 0 : index
    %c0_9 = arith.constant 0 : index
    %10 = vector.load %arg5[%c0_8, %c0_9] : memref<64x64xf32, #tpu.memory_space<vmem>>, vector<64x64xf32>
    tpu.vector_store %arg5[%c0_8, %c0_9], %9 {strides = array<i32>} : memref<64x64xf32, #tpu.memory_space<vmem>>, vector<64x64xf32>,
    return
  }
  func.func @transform_0(%arg0: i32) -> (i32, i32) {
    %c0_i32 = arith.constant 0 : i32
    %c0_i32_0 = arith.constant 0 : i32
    return %arg0, %c0_i32 : i32, i32
  }
  func.func @transform_1(%arg0: i32) -> (i32, i32) {
    %c0_i32 = arith.constant 0 : i32
    %c0_i32_0 = arith.constant 0 : i32
    %c0_i32_1 = arith.constant 0 : i32
    return %c0_i32, %c0_i32_0 : i32, i32
  }
  func.func @transform_2(%arg0: i32) -> (i32, i32) {
    %c0_i32 = arith.constant 0 : i32
    %c0_i32_0 = arith.constant 0 : i32
    %c0_i32_1 = arith.constant 0 : i32
    return %c0_i32, %c0_i32_0 : i32, i32
  }
  func.func @transform_3(%arg0: i32) -> (i32, i32) {
    %c0_i32 = arith.constant 0 : i32
    %c0_i32_0 = arith.constant 0 : i32
    return %arg0, %c0_i32 : i32, i32
  }
  func.func @transform_4(%arg0: i32) -> (i32, i32) {
    %c0_i32 = arith.constant 0 : i32
    %c0_i32_0 = arith.constant 0 : i32
    return %arg0, %c0_i32 : i32, i32
  }
}

module attributes {stable_mosaic.version = 11 : i64} {
  func.func @_linear_kernel(%arg0: i32, %arg1: memref<64x256xf32, #tpu.memory_space<vmem>>, %arg2: memref<256x1024xf32, #tpu.memory_space<vmem>>, %arg3: memref<1x1024xf32, #tpu.memory_space<vmem>>, %arg4: memref<64x1024xf32, #tpu.memory_space<vmem>>) attributes {dimension_semantics = [#tpu.dimension_semantics<parallel>], iteration_bounds = array<i64: 2>, scalar_prefetch = 0 : i64, scratch_operands = 0 : i64, tpu.core_type = #tpu.core_type<tc>, window_params = [{transform_indices = @transform_0, window_bounds = array<i64: 64, 256>}, {pipeline_mode = #tpu.pipeline_mode<synchronous>, transform_indices = @transform_1, window_bounds = array<i64: 256, 1024>}, {pipeline_mode = #tpu.pipeline_mode<synchronous>, transform_indices = @transform_2, window_bounds = array<i64: 1, 1024>}, {transform_indices = @transform_3, window_bounds = array<i64: 64, 1024>}]} {
    %c0 = arith.constant 0 : index
    %c0_0 = arith.constant 0 : index
    %0 = vector.load %arg1[%c0, %c0_0] : memref<64x256xf32, #tpu.memory_space<vmem>>, vector<64x256xf32>
    %c0_1 = arith.constant 0 : index
    %c0_2 = arith.constant 0 : index
    %1 = vector.load %arg2[%c0_1, %c0_2] : memref<256x1024xf32, #tpu.memory_space<vmem>>, vector<256x1024xf32>
    %cst = arith.constant dense<0.000000e+00> : vector<64x1024xf32>
    %2 = tpu.matmul %0, %1, %cst {dimension_numbers = #tpu.dot_dimension_numbers<[1], [0], [0], [1], [0, 0, 1, 1], [], []>} : vector<64x256xf32>, vector<256x1024xf32>, vector<64x1024xf32> -> vector<64x1024xf32>
    %c0_3 = arith.constant 0 : index
    %c0_4 = arith.constant 0 : index
    %3 = vector.load %arg3[%c0_3, %c0_4] : memref<1x1024xf32, #tpu.memory_space<vmem>>, vector<1x1024xf32>
    %4 = vector.broadcast %3 : vector<1x1024xf32> to vector<64x1024xf32>
    %5 = arith.addf %2, %4 : vector<64x1024xf32>
    %cst_5 = arith.constant 0.000000e+00 : f32
    %6 = vector.broadcast %cst_5 : f32 to vector<64x1024xf32>
    %7 = arith.maximumf %5, %6 : vector<64x1024xf32>
    %c0_6 = arith.constant 0 : index
    %c0_7 = arith.constant 0 : index
    %8 = vector.load %arg4[%c0_6, %c0_7] : memref<64x1024xf32, #tpu.memory_space<vmem>>, vector<64x1024xf32>
    tpu.vector_store %arg4[%c0_6, %c0_7], %7 {strides = array<i32>} : memref<64x1024xf32, #tpu.memory_space<vmem>>, vector<64x1024xf32>,
    return
  }
  func.func @transform_0(%arg0: i32) -> (i32, i32) {
    %c0_i32 = arith.constant 0 : i32
    %c0_i32_0 = arith.constant 0 : i32
    return %arg0, %c0_i32 : i32, i32
  }
  func.func @transform_1(%arg0: i32) -> (i32, i32) {
    %c0_i32 = arith.constant 0 : i32
    %c0_i32_0 = arith.constant 0 : i32
    %c0_i32_1 = arith.constant 0 : i32
    return %c0_i32, %c0_i32_0 : i32, i32
  }
  func.func @transform_2(%arg0: i32) -> (i32, i32) {
    %c0_i32 = arith.constant 0 : i32
    %c0_i32_0 = arith.constant 0 : i32
    %c0_i32_1 = arith.constant 0 : i32
    return %c0_i32, %c0_i32_0 : i32, i32
  }
  func.func @transform_3(%arg0: i32) -> (i32, i32) {
    %c0_i32 = arith.constant 0 : i32
    %c0_i32_0 = arith.constant 0 : i32
    return %arg0, %c0_i32 : i32, i32
  }
}

</mosaic_0001>

<bundles_post_ra>
// kernel: encoder_forward.11
= control target key start
LH: loop header
LB: loop body
LE: loop exit
PB: predicated region body
PF: predicated region fallthrough
CT: control target
= control target key end

     0   :  { %s770_s18 = smov 0   ;;  %s851_s0 = inlined_call_operand.vmem [shape: f32[128,6], index: 0, kind: input, shape index: {}]   ;;  %s852_s1 = inlined_call_operand.vmem [shape: f32[6,64], index: 1, kind: input, shape index: {}]   ;;  %s853_s2 = inlined_call_operand.vmem [shape: f32[1,64], index: 2, kind: input, shape index: {}]   ;;  %s854_s3 = inlined_call_operand.vmem [shape: f32[64,64], index: 3, kind: input, shape index: {}]   ;;  %s855_s4 = inlined_call_operand.vmem [shape: f32[1,64], index: 4, kind: input, shape index: {}]   ;;  %s856_s5 = inlined_call_operand.vmem [shape: f32[128,64], index: 5, kind: output, shape index: {}]  }
   0x1 LB: > { %s603_s19 = sadd.s32 4294967295, %s738_s18   ;;  %p607_p0 = scmp.ge.s32.totalorder %s738_s18, 1  ;;  %s738_s18 = sphi %s770_s18, %s15_s18  }
   0x2   : > { %p188_p1 = scmp.lt.s32.totalorder %s738_s18, 3 }
   0x4   : > { %p189_p2 = pnand %p607_p0, %p188_p1 }
   0x5   : > { %v236_v0 = vld [vmem:[%s852_s1] sm:$0x3f] (!%p189_p2)  ;;  %vm269_vm0 = vcmask (!%p189_p2), 1045504   ;;  %s608_s22 = sshll.u32 (!%p189_p2), %s603_s19, 3  ;;  %v387_v2 = vld [vmem:[%s854_s3 + $0x8] sm:$0xff] (!%p189_p2)  ;;  %v388_v3 = vld [vmem:[%s854_s3 + $0x10] sm:$0xff] (!%p189_p2) }
   0x6   : > { %192 = sbr.rel (%p189_p2) target bundleno = 466 (0x1d2), region = 40  ;;  %v386_v1 = vld [vmem:[%s854_s3] sm:$0xff] (!%p189_p2)  ;;  %658 = vmatprep.subr.msk.mxu0 (!%p189_p2), %vm269_vm0, %v236_v0  ;;  %p217_p3 = scmp.lt.s32.totalorder (!%p189_p2), %s608_s22, 15  ;;  %v389_v4 = vld [vmem:[%s854_s3 + $0x18] sm:$0xff] (!%p189_p2)  ;;  %vm244_vm1 = vcmask (!%p189_p2), 48128   ;;  %v391_v8 = vld [vmem:[%s854_s3 + $0x28] sm:$0xff] (!%p189_p2) }
   0x7   : > { %659 = vmatpush3.msk.msra.mxu0 (!%p189_p2), %vm269_vm0, %v236_v0  ;;  %v700_v5 = vpack.c.bf16 (!%p189_p2), %v387_v2, %v386_v1  ;;  %v704_v6 = vpack.c.bf16 (!%p189_p2), %v389_v4, %v388_v3  ;;  %v390_v7 = vld [vmem:[%s854_s3 + $0x20] sm:$0xff] (!%p189_p2)  ;;  %v392_v18 = vld [vmem:[%s854_s3 + $0x30] sm:$0xff] (!%p189_p2)  ;;  %v393_v19 = vld [vmem:[%s854_s3 + $0x38] sm:$0xff] (!%p189_p2)  ;;  %vm401_vm2 = vcmask (!%p189_p2), 523264  }
   0x8   : > { %v708_v12 = vpack.c.bf16 (!%p189_p2), %v391_v8, %v390_v7  ;;  %v712_v20 = vpack.c.bf16 (!%p189_p2), %v393_v19, %v392_v18  ;;  %v612_v21 = vld [vmem:[%s853_s2] ss:$0 sm:$0xff] (!%p189_p2) }
   0x9   : > { %701 = vmatprep.subr.bf16.mxu0 (!%p189_p2), %v700_v5  ;;  %716 = vmatprep.subr.bf16.mxu1 (!%p189_p2), %v700_v5  ;;  %v622_v46 = vld [vmem:[%s855_s4] ss:$0 sm:$0xff] (!%p189_p2) }
   0xa   : > { %720 = vmatpush3.bf16.msra.mxu1 (!%p189_p2), %v700_v5 }
   0xb   : > { %717 = vmatprep.subr.bf16.mxu1 (!%p189_p2), %v704_v6 }
   0xd   : > { %s858_s22 = smov (!%p217_p3, %s608_s22), 15 }
   0xe   : > { %s609_s6 = sshll.u32 %s858_s22, 3  ;;  %721 = vmatpush3.bf16.msra.mxu1 %v704_v6 }
   0xf   : > { %s220_s9 = scalar_lea.vmem %s851_s0, %s609_s6  ;;  %718 = vmatprep.subr.bf16.mxu1 %v708_v12  ;;  %s226_s26 = scalar_lea.vmem %s856_s5, %s609_s6 }
  0x10   : > { %v228_v9 = vld [vmem:[%s220_s9] sm:$0xff]  ;;  %v229_v10 = vld [vmem:[%s220_s9 + $0x8] sm:$0xff]  ;;  %v230_v11 = vld [vmem:[%s220_s9 + $0x10] sm:$0xff] }
  0x11   : > { %660 = vmatprep.mubr.msk.f32.mxu0 %vm244_vm1, %v228_v9  ;;  %v231_v13 = vld [vmem:[%s220_s9 + $0x18] sm:$0xff]  ;;  %v232_v14 = vld [vmem:[%s220_s9 + $0x20] sm:$0xff]  ;;  %v233_v15 = vld [vmem:[%s220_s9 + $0x28] sm:$0xff] }
  0x12   : > { %661 = vmatmul.mubr.msk.f32.vlgmr.msra.gmra.mrb[0].mxu0 %vm244_vm1, %v229_v10  ;;  %722 = vmatpush3.bf16.msra.mxu1 %v708_v12  ;;  %v234_v16 = vld [vmem:[%s220_s9 + $0x30] sm:$0xff]  ;;  %v235_v17 = vld [vmem:[%s220_s9 + $0x38] sm:$0xff] }
  0x13   : > { %663 = vmatprep.mubr.msk.f32.mxu0 %vm244_vm1, %v230_v11  ;;  %703 = vmatpush3.bf16.msra.mxu0 %v700_v5 }
  0x14   : > { %705 = vmatprep.subr.bf16.mxu0 %v704_v6  ;;  %719 = vmatprep.subr.bf16.mxu1 %v712_v20 }
  0x16   : > { %664 = vmatmul.mubr.msk.f32.gmra.mrb[2].mxu0 %vm244_vm1, %v231_v13  ;;  %723 = vmatpush3.bf16.msra.mxu1 %v712_v20 }
  0x17   : > { %666 = vmatprep.mubr.msk.f32.mxu0 %vm244_vm1, %v232_v14  ;;  %707 = vmatpush3.bf16.msra.mxu0 %v704_v6 }
  0x18   : > { %709 = vmatprep.subr.bf16.mxu0 %v708_v12 }
  0x1a   : > { %667 = vmatmul.mubr.msk.f32.gmra.mrb[4].mxu0 %vm244_vm1, %v233_v15 }
  0x1b   : > { %669 = vmatprep.mubr.msk.f32.mxu0 %vm244_vm1, %v234_v16  ;;  %711 = vmatpush3.bf16.msra.mxu0 %v708_v12 }
  0x1c   : > { %713 = vmatprep.subr.bf16.mxu0 %v712_v20 }
  0x1e   : > { %670 = vmatmul.mubr.msk.f32.gmra.mrb[6].mxu0 %vm244_vm1, %v235_v17 }
  0x1f   : > { %715 = vmatpush3.bf16.msra.mxu0 %v712_v20 }
  0xe5   : > { %v662_v22 = vpop.f32.mrb[0].mxu0 }
  0xe6   : > { %v345_v23 = vadd.f32 %v662_v22, %v612_v21  ;;  %v339_v24 = vpop.f32.mrb[1].mxu0 }
  0xe7   : > { %v340_v25 = vadd.f32 %v612_v21, %v339_v24 }
  0xe8   : > { %v379_v28 = vmax.f32 %v345_v23, 0.0 }
  0xe9   : > { %v378_v26 = vmax.f32 %v340_v25, 0.0  ;;  %v665_v27 = vpop.f32.mrb[2].mxu0 }
  0xea   : > { %v355_v29 = vadd.f32 %v665_v27, %v612_v21  ;;  %v349_v30 = vpop.f32.mrb[3].mxu0 }
  0xeb   : > { %v350_v31 = vadd.f32 %v612_v21, %v349_v30  ;;  %688 = vmatprep.mubr.msk.f32.mxu0 %vm401_vm2, %v378_v26 }
  0xec   : > { %689 = vmatmul.mubr.msk.f32.vlgmr.msra.gmra.mrb[8].mxu0 %vm401_vm2, %v379_v28  ;;  %v381_v34 = vmax.f32 %v355_v29, 0.0 }
  0xed   : > { %v380_v32 = vmax.f32 %v350_v31, 0.0  ;;  %v668_v33 = vpop.f32.mrb[4].mxu0 }
  0xee   : > { %v365_v35 = vadd.f32 %v668_v33, %v612_v21  ;;  %v359_v36 = vpop.f32.mrb[5].mxu0 }
  0xef   : > { %v360_v37 = vadd.f32 %v612_v21, %v359_v36  ;;  %691 = vmatprep.mubr.msk.f32.mxu1 %vm401_vm2, %v380_v32 }
  0xf0   : > { %692 = vmatmul.mubr.msk.f32.vlgmr.msra.gmra.mrb[0].mxu1 %vm401_vm2, %v381_v34  ;;  %v383_v40 = vmax.f32 %v365_v35, 0.0 }
  0xf1   : > { %v382_v38 = vmax.f32 %v360_v37, 0.0  ;;  %v671_v39 = vpop.f32.mrb[6].mxu0 }
  0xf2   : > { %v375_v41 = vadd.f32 %v671_v39, %v612_v21  ;;  %v369_v42 = vpop.f32.mrb[7].mxu0 }
  0xf3   : > { %v370_v43 = vadd.f32 %v612_v21, %v369_v42  ;;  %694 = vmatprep.mubr.msk.f32.mxu1 %vm401_vm2, %v382_v38 }
  0xf4   : > { %695 = vmatmul.mubr.msk.f32.gmra.mrb[2].mxu1 %vm401_vm2, %v383_v40  ;;  %v385_v45 = vmax.f32 %v375_v41, 0.0 }
  0xf5   : > { %v384_v44 = vmax.f32 %v370_v43, 0.0 }
  0xf7   : > { %697 = vmatprep.mubr.msk.f32.mxu1 %vm401_vm2, %v384_v44 }
  0xf8   : > { %698 = vmatmul.mubr.msk.f32.gmra.mrb[4].mxu1 %vm401_vm2, %v385_v45 }
 0x1bf   : > { %v690_v47 = vpop.f32.mrb[8].mxu0 }
 0x1c0   : > { %v498_v48 = vadd.f32 %v690_v47, %v622_v46  ;;  %v492_v49 = vpop.f32.mrb[9].mxu0 }
 0x1c1   : > { %v493_v50 = vadd.f32 %v622_v46, %v492_v49 }
 0x1c2   : > { %v532_v51 = vmax.f32 %v498_v48, 0.0 }
 0x1c3   : > { %v531_v52 = vmax.f32 %v493_v50, 0.0  ;;  %v693_v53 = vpop.f32.mrb[0].mxu1 }
 0x1c4   : > { %540 = vst.msk [vmem:[%s226_s26 + $0x8] sm:$0xff] %vm401_vm2, %v532_v51  ;;  %v508_v54 = vadd.f32 %v693_v53, %v622_v46  ;;  %v502_v55 = vpop.f32.mrb[1].mxu1 }
 0x1c5   : > { %539 = vst.msk [vmem:[%s226_s26] sm:$0xff] %vm401_vm2, %v531_v52  ;;  %v503_v56 = vadd.f32 %v622_v46, %v502_v55 }
 0x1c6   : > { %v534_v57 = vmax.f32 %v508_v54, 0.0 }
 0x1c7   : > { %v533_v58 = vmax.f32 %v503_v56, 0.0  ;;  %v696_v59 = vpop.f32.mrb[2].mxu1 }
 0x1c8   : > { %542 = vst.msk [vmem:[%s226_s26 + $0x18] sm:$0xff] %vm401_vm2, %v534_v57  ;;  %v518_v60 = vadd.f32 %v696_v59, %v622_v46  ;;  %v512_v61 = vpop.f32.mrb[3].mxu1 }
 0x1c9   : > { %541 = vst.msk [vmem:[%s226_s26 + $0x10] sm:$0xff] %vm401_vm2, %v533_v58  ;;  %v513_v62 = vadd.f32 %v622_v46, %v512_v61 }
 0x1ca   : > { %v536_v63 = vmax.f32 %v518_v60, 0.0 }
 0x1cb   : > { %v535_v0 = vmax.f32 %v513_v62, 0.0  ;;  %v699_v1 = vpop.f32.mrb[4].mxu1 }
 0x1cc   : > { %544 = vst.msk [vmem:[%s226_s26 + $0x28] sm:$0xff] %vm401_vm2, %v536_v63  ;;  %v528_v2 = vadd.f32 %v699_v1, %v622_v46  ;;  %v522_v3 = vpop.f32.mrb[5].mxu1 }
 0x1cd   : > { %543 = vst.msk [vmem:[%s226_s26 + $0x20] sm:$0xff] %vm401_vm2, %v535_v0  ;;  %v523_v4 = vadd.f32 %v622_v46, %v522_v3 }
 0x1ce   : > { %v538_v5 = vmax.f32 %v528_v2, 0.0 }
 0x1cf   : > { %v537_v6 = vmax.f32 %v523_v4, 0.0 }
 0x1d0   : > { %546 = vst.msk [vmem:[%s226_s26 + $0x38] sm:$0xff] %vm401_vm2, %v538_v5 }
 0x1d1   : > { %545 = vst.msk [vmem:[%s226_s26 + $0x30] sm:$0xff] %vm401_vm2, %v537_v6 }
 0x1d2 PF: > { %s15_s18 = sadd.s32 1, %s738_s18  }
 0x1d3   : > { %p12_p4 = scmp.ge.s32.totalorder %s15_s18, 4  }
 0x1d5   :  { %14 = sbr.rel (!%p12_p4) target bundleno = 1 (0x1), region = 70 }

// kernel: encoder_forward.12
= control target key start
LH: loop header
LB: loop body
LE: loop exit
PB: predicated region body
PF: predicated region fallthrough
CT: control target
= control target key end

     0   :  { %s792_s18 = smov 0   ;;  %s943_s0 = inlined_call_operand.vmem [shape: f32[128,64], index: 0, kind: input, shape index: {}]   ;;  %s944_s1 = inlined_call_operand.vmem [shape: f32[64,64], index: 1, kind: input, shape index: {}]   ;;  %s945_s2 = inlined_call_operand.vmem [shape: f32[1,64], index: 2, kind: input, shape index: {}]   ;;  %s946_s3 = inlined_call_operand.vmem [shape: f32[64,192], index: 3, kind: input, shape index: {}]   ;;  %s947_s4 = inlined_call_operand.vmem [shape: f32[1,192], index: 4, kind: input, shape index: {}]   ;;  %s948_s5 = inlined_call_operand.vmem [shape: f32[128,192], index: 5, kind: output, shape index: {}]  }
   0x1 LB: > { %s630_s19 = sadd.s32 4294967295, %s759_s18   ;;  %p634_p0 = scmp.ge.s32.totalorder %s759_s18, 1  ;;  %s759_s18 = sphi %s792_s18, %s15_s18  }
   0x2   : > { %p188_p1 = scmp.lt.s32.totalorder %s759_s18, 3 }
   0x4   : > { %p189_p2 = pnand %p634_p0, %p188_p1 }
   0x5   : > { %v238_v0 = vld [vmem:[%s944_s1] sm:$0xff] (!%p189_p2)  ;;  %v239_v1 = vld [vmem:[%s944_s1 + $0x8] sm:$0xff] (!%p189_p2)  ;;  %v240_v2 = vld [vmem:[%s944_s1 + $0x10] sm:$0xff] (!%p189_p2)  ;;  %s635_s26 = sshll.u32 (!%p189_p2), %s630_s19, 3  ;;  %vm253_vm0 = vcmask (!%p189_p2), 523264   ;;  %v761_v44 = vmov (!%p189_p2), 0.0  }
   0x6   : > { %192 = sbr.rel (%p189_p2) target bundleno = 481 (0x1e1), region = 40  ;;  %v704_v3 = vpack.c.bf16 (!%p189_p2), %v239_v1, %v238_v0  ;;  %v241_v4 = vld [vmem:[%s944_s1 + $0x18] sm:$0xff] (!%p189_p2)  ;;  %p218_p3 = scmp.lt.s32.totalorder (!%p189_p2), %s635_s26, 15  ;;  %v242_v6 = vld [vmem:[%s944_s1 + $0x20] sm:$0xff] (!%p189_p2)  ;;  %v243_v7 = vld [vmem:[%s944_s1 + $0x28] sm:$0xff] (!%p189_p2)  ;;  %519 = vmatprep.mubr.f32.mxu1 (!%p189_p2), %v761_v44 }
   0x7   : > { %v708_v5 = vpack.c.bf16 (!%p189_p2), %v241_v4, %v240_v2  ;;  %v392_v8 = vld [vmem:[%s946_s3 + $0x8] sm:$0xff] (!%p189_p2)  ;;  %v394_v9 = vld [vmem:[%s946_s3 + $0x18] sm:$0xff] (!%p189_p2)  ;;  %v391_v10 = vld [vmem:[%s946_s3] sm:$0xff] (!%p189_p2)  ;;  %v712_v15 = vpack.c.bf16 (!%p189_p2), %v243_v7, %v242_v6  ;;  %v409_v6 = vlaneseq (!%p189_p2) }
   0x8   : > { %705 = vmatprep.subr.bf16.mxu0 (!%p189_p2), %v704_v3  ;;  %v393_v11 = vld [vmem:[%s946_s3 + $0x10] sm:$0xff] (!%p189_p2)  ;;  %v720_v12 = vpack.c.bf16 (!%p189_p2), %v394_v9, %v392_v8  ;;  %v396_v13 = vld [vmem:[%s946_s3 + $0x28] sm:$0xff] (!%p189_p2)  ;;  %v398_v14 = vld [vmem:[%s946_s3 + $0x38] sm:$0xff] (!%p189_p2) }
   0x9   : > { %707 = vmatpush3.bf16.msra.mxu0 (!%p189_p2), %v704_v3  ;;  %v244_v16 = vld [vmem:[%s944_s1 + $0x30] sm:$0xff] (!%p189_p2)  ;;  %v722_v17 = vpack.c.bf16 (!%p189_p2), %v393_v11, %v391_v10  ;;  %v245_v18 = vld [vmem:[%s944_s1 + $0x38] sm:$0xff] (!%p189_p2)  ;;  %v395_v19 = vld [vmem:[%s946_s3 + $0x20] sm:$0xff] (!%p189_p2)  ;;  %v724_v22 = vpack.c.bf16 (!%p189_p2), %v398_v14, %v396_v13  ;;  %v410_v7 = vshrl.u32 (!%p189_p2), %v409_v6, 7 }
   0xa   : > { %709 = vmatprep.subr.bf16.mxu0 (!%p189_p2), %v708_v5  ;;  %736 = vmatprep.subr.bf16.mxu1 (!%p189_p2), %v720_v12  ;;  %v397_v20 = vld [vmem:[%s946_s3 + $0x30] sm:$0xff] (!%p189_p2)  ;;  %v400_v23 = vld [vmem:[%s946_s3 + $0x48] sm:$0xff] (!%p189_p2)  ;;  %v402_v24 = vld [vmem:[%s946_s3 + $0x58] sm:$0xff] (!%p189_p2)  ;;  %v716_v25 = vpack.c.bf16 (!%p189_p2), %v245_v18, %v244_v16 }
   0xb   : > { %740 = vmatpush1.bf16.msra.mxu1 (!%p189_p2), %v722_v17  ;;  %v726_v26 = vpack.c.bf16 (!%p189_p2), %v397_v20, %v395_v19  ;;  %v728_v27 = vpack.c.bf16 (!%p189_p2), %v402_v24, %v400_v23  ;;  %v399_v28 = vld [vmem:[%s946_s3 + $0x40] sm:$0xff] (!%p189_p2)  ;;  %v401_v29 = vld [vmem:[%s946_s3 + $0x50] sm:$0xff] (!%p189_p2)  ;;  %v404_v38 = vld [vmem:[%s946_s3 + $0x68] sm:$0xff] (!%p189_p2)  ;;  %v411_v8 = vsub.s32 (!%p189_p2), 0, %v410_v7  ;;  %v415_v10 = vsub.s32 (!%p189_p2), 1, %v410_v7 }
   0xc   : > { %737 = vmatprep.subr.bf16.mxu1 (!%p189_p2), %v724_v22  ;;  %v730_v30 = vpack.c.bf16 (!%p189_p2), %v401_v29, %v399_v28  ;;  %v406_v39 = vld [vmem:[%s946_s3 + $0x78] sm:$0xff] (!%p189_p2)  ;;  %v403_v41 = vld [vmem:[%s946_s3 + $0x60] sm:$0xff] (!%p189_p2)  ;;  %v405_v42 = vld [vmem:[%s946_s3 + $0x70] sm:$0xff] (!%p189_p2) }
   0xd   : > { %s950_s26 = smov (!%p218_p3, %s635_s26), 15  ;;  %711 = vmatpush3.bf16.msra.mxu0 %v708_v5  ;;  %v732_v40 = vpack.c.bf16 %v406_v39, %v404_v38  ;;  %v734_v43 = vpack.c.bf16 %v405_v42, %v403_v41  ;;  %v640_v45 = vld [vmem:[%s945_s2] ss:$0 sm:$0xff] }
   0xe   : > { %s636_s23 = sshll.u32 %s950_s26, 3  ;;  %713 = vmatprep.subr.bf16.mxu0 %v712_v15  ;;  %v407_v9 = vld [vmem:[%s947_s4] sm:$0x3]  ;;  %s659_s6 = sshll.u32 %s950_s26, 4 }
   0xf   : > { %s848_s29 = scalar_lea.vmem %s943_s0, %s636_s23  ;;  %741 = vmatpush1.bf16.msra.mxu1 %v726_v26  ;;  %v412_v11 = vrot.slane %v407_v9, %v411_v8  ;;  %s914_s9 = scalar_lea.vmem %s948_s5, %s659_s6 }
  0x10   : > { %v230_v21 = vld [vmem:[%s848_s29] sm:$0xff]  ;;  %738 = vmatprep.subr.bf16.mxu1 %v728_v27  ;;  %v231_v31 = vld [vmem:[%s848_s29 + $0x8] sm:$0xff]  ;;  %v232_v32 = vld [vmem:[%s848_s29 + $0x10] sm:$0xff] }
  0x11   : > { %692 = vmatprep.mubr.msk.f32.mxu0 %vm253_vm0, %v230_v21  ;;  %715 = vmatpush3.bf16.msra.mxu0 %v712_v15  ;;  %v233_v33 = vld [vmem:[%s848_s29 + $0x18] sm:$0xff]  ;;  %v234_v34 = vld [vmem:[%s848_s29 + $0x20] sm:$0xff]  ;;  %v235_v35 = vld [vmem:[%s848_s29 + $0x28] sm:$0xff] }
  0x12   : > { %717 = vmatprep.subr.bf16.mxu0 %v716_v25  ;;  %v236_v36 = vld [vmem:[%s848_s29 + $0x30] sm:$0xff]  ;;  %v237_v37 = vld [vmem:[%s848_s29 + $0x38] sm:$0xff] }
  0x13   : > { %742 = vmatpush1.bf16.msra.mxu1 %v730_v30 }
  0x14   : > { %739 = vmatprep.subr.bf16.mxu1 %v732_v40 }
  0x15   : > { %719 = vmatpush3.bf16.msra.mxu0 %v716_v25 }
  0x16   : > { %721 = vmatprep.subr.bf16.mxu0 %v720_v12  ;;  %v416_v12 = vrot.slane %v407_v9, %v415_v10 }
  0x17   : > { %743 = vmatpush1.bf16.msra.mxu1 %v734_v43 }
  0x18   : > { %693 = vmatmul.mubr.msk.f32.vlgmr.msra.gmra.mrb[0].mxu0 %vm253_vm0, %v231_v31 }
  0x19   : > { %695 = vmatprep.mubr.msk.f32.mxu0 %vm253_vm0, %v232_v32  ;;  %723 = vmatpush1.bf16.msra.mxu0 %v722_v17 }
  0x1a   : > { %725 = vmatprep.subr.bf16.mxu0 %v724_v22 }
  0x1c   : > { %696 = vmatmul.mubr.msk.f32.gmra.mrb[2].mxu0 %vm253_vm0, %v233_v33 }
  0x1d   : > { %698 = vmatprep.mubr.msk.f32.mxu0 %vm253_vm0, %v234_v34  ;;  %727 = vmatpush1.bf16.msra.mxu0 %v726_v26 }
  0x1e   : > { %729 = vmatprep.subr.bf16.mxu0 %v728_v27 }
  0x20   : > { %699 = vmatmul.mubr.msk.f32.gmra.mrb[4].mxu0 %vm253_vm0, %v235_v35 }
  0x21   : > { %701 = vmatprep.mubr.msk.f32.mxu0 %vm253_vm0, %v236_v36  ;;  %731 = vmatpush1.bf16.msra.mxu0 %v730_v30 }
  0x22   : > { %733 = vmatprep.subr.bf16.mxu0 %v732_v40 }
  0x24   : > { %702 = vmatmul.mubr.msk.f32.gmra.mrb[6].mxu0 %vm253_vm0, %v237_v37 }
  0x25   : > { %735 = vmatpush1.bf16.msra.mxu0 %v734_v43  ;;  %507 = vmatprep.mubr.f32.mxu0 %v761_v44 }
  0xeb   : > { %v694_v46 = vpop.f32.mrb[0].mxu0 }
  0xec   : > { %v344_v47 = vpop.f32.mrb[1].mxu0  ;;  %v350_v49 = vadd.f32 %v694_v46, %v640_v45 }
  0xed   : > { %v345_v48 = vadd.f32 %v640_v45, %v344_v47 }
  0xee   : > { %v384_v54 = vmax.f32 %v350_v49, 0.0 }
  0xef   : > { %v383_v50 = vmax.f32 %v345_v48, 0.0  ;;  %v697_v51 = vpop.f32.mrb[2].mxu0 }
  0xf0   : > { %v354_v52 = vpop.f32.mrb[3].mxu0  ;;  %v360_v55 = vadd.f32 %v697_v51, %v640_v45 }
  0xf1   : > { %v355_v53 = vadd.f32 %v640_v45, %v354_v52  ;;  %649 = vmatmul.mubr.msk.f32.vlgmr.msra.gmra.mrb[8].mxu0 %vm253_vm0, %v383_v50 }
  0xf2   : > { %513 = vmatprep.mubr.f32.mxu0 %v761_v44  ;;  %v386_v60 = vmax.f32 %v360_v55, 0.0 }
  0xf3   : > { %v385_v56 = vmax.f32 %v355_v53, 0.0  ;;  %v700_v57 = vpop.f32.mrb[4].mxu0 }
  0xf4   : > { %v364_v58 = vpop.f32.mrb[5].mxu0  ;;  %v370_v0 = vadd.f32 %v700_v57, %v640_v45 }
  0xf5   : > { %650 = vmatmul.mubr.msk.f32.gmra.mrb[10].mxu0 %vm253_vm0, %v384_v54  ;;  %651 = vmatmul.mubr.msk.f32.vlgmr.msra.gmra.mrb[0].mxu1 %vm253_vm0, %v385_v56  ;;  %v365_v59 = vadd.f32 %v640_v45, %v364_v58 }
  0xf6   : > { %525 = vmatprep.mubr.f32.mxu1 %v761_v44  ;;  %v388_v2 = vmax.f32 %v370_v0, 0.0 }
  0xf7   : > { %v703_v61 = vpop.f32.mrb[6].mxu0  ;;  %v387_v63 = vmax.f32 %v365_v59, 0.0 }
  0xf8   : > { %v374_v62 = vpop.f32.mrb[7].mxu0  ;;  %v380_v4 = vadd.f32 %v703_v61, %v640_v45 }
  0xf9   : > { %652 = vmatmul.mubr.msk.f32.gmra.mrb[2].mxu1 %vm253_vm0, %v386_v60  ;;  %v375_v1 = vadd.f32 %v640_v45, %v374_v62 }
  0xfa   : > { %531 = vmatprep.mubr.f32.mxu1 %v761_v44  ;;  %v390_v5 = vmax.f32 %v380_v4, 0.0 }
  0xfb   : > { %v389_v3 = vmax.f32 %v375_v1, 0.0 }
  0xfd   : > { %653 = vmatmul.mubr.msk.f32.gmra.mrb[4].mxu1 %vm253_vm0, %v387_v63 }
  0xfe   : > { %537 = vmatprep.mubr.f32.mxu1 %v761_v44 }
 0x101   : > { %654 = vmatmul.mubr.msk.f32.gmra.mrb[6].mxu1 %vm253_vm0, %v388_v2 }
 0x102   : > { %543 = vmatprep.mubr.f32.mxu1 %v761_v44 }
 0x105   : > { %655 = vmatmul.mubr.msk.f32.gmra.mrb[8].mxu1 %vm253_vm0, %v389_v3 }
 0x106   : > { %549 = vmatprep.mubr.f32.mxu1 %v761_v44 }
 0x109   : > { %656 = vmatmul.mubr.msk.f32.gmra.mrb[10].mxu1 %vm253_vm0, %v390_v5 }
 0x1c4   : > { %v509_v13 = vpop.f32.mrb[8].mxu0 }
 0x1c5   : > { %v510_v14 = vadd.f32 %v509_v13, %v412_v11  ;;  %v511_v15 = vpop.f32.mrb[9].mxu0 }
 0x1c6   : > { %v512_v16 = vadd.f32 %v511_v15, %v416_v12 }
 0x1c7   : > { %556 = vst [vmem:[%s914_s9] sm:$0xff] %v510_v14 }
 0x1c8   : > { %557 = vst.msk [vmem:[%s914_s9 + $0x8] sm:$0xff] %vm253_vm0, %v512_v16  ;;  %v515_v17 = vpop.f32.mrb[10].mxu0  ;;  %v521_v18 = vpop.f32.mrb[0].mxu1 }
 0x1c9   : > { %v516_v19 = vadd.f32 %v515_v17, %v412_v11  ;;  %v522_v20 = vadd.f32 %v521_v18, %v412_v11  ;;  %v517_v21 = vpop.f32.mrb[11].mxu0  ;;  %v523_v22 = vpop.f32.mrb[1].mxu1 }
 0x1ca   : > { %v518_v23 = vadd.f32 %v517_v21, %v416_v12  ;;  %v524_v24 = vadd.f32 %v523_v22, %v416_v12 }
 0x1cb   : > { %558 = vst [vmem:[%s914_s9 + $0x10] sm:$0xff] %v516_v19  ;;  %560 = vst [vmem:[%s914_s9 + $0x20] sm:$0xff] %v522_v20 }
 0x1cc   : > { %559 = vst.msk [vmem:[%s914_s9 + $0x18] sm:$0xff] %vm253_vm0, %v518_v23  ;;  %561 = vst.msk [vmem:[%s914_s9 + $0x28] sm:$0xff] %vm253_vm0, %v524_v24  ;;  %v527_v25 = vpop.f32.mrb[2].mxu1 }
 0x1cd   : > { %v528_v26 = vadd.f32 %v527_v25, %v412_v11  ;;  %v529_v27 = vpop.f32.mrb[3].mxu1 }
 0x1ce   : > { %v530_v28 = vadd.f32 %v529_v27, %v416_v12 }
 0x1cf   : > { %562 = vst [vmem:[%s914_s9 + $0x30] sm:$0xff] %v528_v26 }
 0x1d0   : > { %563 = vst.msk [vmem:[%s914_s9 + $0x38] sm:$0xff] %vm253_vm0, %v530_v28  ;;  %v533_v29 = vpop.f32.mrb[4].mxu1 }
 0x1d1   : > { %v534_v30 = vadd.f32 %v533_v29, %v412_v11  ;;  %v535_v31 = vpop.f32.mrb[5].mxu1 }
 0x1d2   : > { %v536_v32 = vadd.f32 %v535_v31, %v416_v12 }
 0x1d3   : > { %564 = vst [vmem:[%s914_s9 + $0x40] sm:$0xff] %v534_v30 }
 0x1d4   : > { %565 = vst.msk [vmem:[%s914_s9 + $0x48] sm:$0xff] %vm253_vm0, %v536_v32  ;;  %v539_v33 = vpop.f32.mrb[6].mxu1 }
 0x1d5   : > { %v540_v34 = vadd.f32 %v539_v33, %v412_v11  ;;  %v541_v35 = vpop.f32.mrb[7].mxu1 }
 0x1d6   : > { %v542_v36 = vadd.f32 %v541_v35, %v416_v12 }
 0x1d7   : > { %566 = vst [vmem:[%s914_s9 + $0x50] sm:$0xff] %v540_v34 }
 0x1d8   : > { %567 = vst.msk [vmem:[%s914_s9 + $0x58] sm:$0xff] %vm253_vm0, %v542_v36  ;;  %v545_v37 = vpop.f32.mrb[8].mxu1 }
 0x1d9   : > { %v546_v38 = vadd.f32 %v545_v37, %v412_v11  ;;  %v547_v39 = vpop.f32.mrb[9].mxu1 }
 0x1da   : > { %v548_v40 = vadd.f32 %v547_v39, %v416_v12 }
 0x1db   : > { %568 = vst [vmem:[%s914_s9 + $0x60] sm:$0xff] %v546_v38 }
 0x1dc   : > { %569 = vst.msk [vmem:[%s914_s9 + $0x68] sm:$0xff] %vm253_vm0, %v548_v40  ;;  %v551_v41 = vpop.f32.mrb[10].mxu1 }
 0x1dd   : > { %v552_v42 = vadd.f32 %v551_v41, %v412_v11  ;;  %v553_v43 = vpop.f32.mrb[11].mxu1 }
 0x1de   : > { %v554_v44 = vadd.f32 %v553_v43, %v416_v12 }
 0x1df   : > { %570 = vst [vmem:[%s914_s9 + $0x70] sm:$0xff] %v552_v42 }
 0x1e0   : > { %571 = vst.msk [vmem:[%s914_s9 + $0x78] sm:$0xff] %vm253_vm0, %v554_v44 }
 0x1e1 PF: > { %s15_s18 = sadd.s32 1, %s759_s18  }
 0x1e2   : > { %p12_p4 = scmp.ge.s32.totalorder %s15_s18, 4  }
 0x1e4   :  { %14 = sbr.rel (!%p12_p4) target bundleno = 1 (0x1), region = 70 }

// kernel: encoder_forward.14
= control target key start
LH: loop header
LB: loop body
LE: loop exit
PB: predicated region body
PF: predicated region fallthrough
CT: control target
= control target key end

     0   :  { %s607_s15 = smov 0   ;;  %s685_s0 = inlined_call_operand.vmem [shape: f32[128,64], index: 0, kind: input, shape index: {}]   ;;  %s686_s1 = inlined_call_operand.vmem [shape: f32[64,64], index: 1, kind: input, shape index: {}]   ;;  %s687_s2 = inlined_call_operand.vmem [shape: f32[1,64], index: 2, kind: input, shape index: {}]   ;;  %s688_s3 = inlined_call_operand.vmem [shape: f32[128,64], index: 3, kind: input, shape index: {}]   ;;  %s689_s4 = inlined_call_operand.vmem [shape: f32[128,64], index: 4, kind: output, shape index: {}]  }
   0x1 LB: > { %s476_s16 = sadd.s32 4294967295, %s580_s15   ;;  %p480_p0 = scmp.ge.s32.totalorder %s580_s15, 1  ;;  %s580_s15 = sphi %s607_s15, %s14_s15  }
   0x2   : > { %p174_p1 = scmp.lt.s32.totalorder %s580_s15, 3 }
   0x4   : > { %p175_p2 = pnand %p480_p0, %p174_p1 }
   0x5   : > { %v231_v0 = vld [vmem:[%s686_s1] sm:$0xff] (!%p175_p2)  ;;  %v232_v1 = vld [vmem:[%s686_s1 + $0x8] sm:$0xff] (!%p175_p2)  ;;  %v233_v2 = vld [vmem:[%s686_s1 + $0x10] sm:$0xff] (!%p175_p2)  ;;  %s481_s23 = sshll.u32 (!%p175_p2), %s476_s16, 3  ;;  %vm246_vm0 = vcmask (!%p175_p2), 523264  }
   0x6   : > { %178 = sbr.rel (%p175_p2) target bundleno = 249 (0xf9), region = 36  ;;  %v542_v3 = vpack.c.bf16 (!%p175_p2), %v232_v1, %v231_v0  ;;  %v234_v4 = vld [vmem:[%s686_s1 + $0x18] sm:$0xff] (!%p175_p2)  ;;  %p206_p3 = scmp.lt.s32.totalorder (!%p175_p2), %s481_s23, 15  ;;  %v235_v6 = vld [vmem:[%s686_s1 + $0x20] sm:$0xff] (!%p175_p2)  ;;  %v236_v7 = vld [vmem:[%s686_s1 + $0x28] sm:$0xff] (!%p175_p2) }
   0x7   : > { %v546_v5 = vpack.c.bf16 (!%p175_p2), %v234_v4, %v233_v2  ;;  %v550_v8 = vpack.c.bf16 (!%p175_p2), %v236_v7, %v235_v6  ;;  %v237_v9 = vld [vmem:[%s686_s1 + $0x30] sm:$0xff] (!%p175_p2)  ;;  %v238_v10 = vld [vmem:[%s686_s1 + $0x38] sm:$0xff] (!%p175_p2)  ;;  %v487_v20 = vld [vmem:[%s687_s2] ss:$0 sm:$0xff] (!%p175_p2) }
   0x8   : > { %543 = vmatprep.subr.bf16.mxu0 (!%p175_p2), %v542_v3  ;;  %558 = vmatprep.subr.bf16.mxu1 (!%p175_p2), %v542_v3  ;;  %v554_v13 = vpack.c.bf16 (!%p175_p2), %v238_v10, %v237_v9 }
   0x9   : > { %545 = vmatpush3.bf16.msra.mxu0 (!%p175_p2), %v542_v3  ;;  %562 = vmatpush3.bf16.msra.mxu1 (!%p175_p2), %v542_v3 }
   0xa   : > { %547 = vmatprep.subr.bf16.mxu0 (!%p175_p2), %v546_v5  ;;  %559 = vmatprep.subr.bf16.mxu1 (!%p175_p2), %v546_v5 }
   0xd   : > { %s691_s23 = smov (!%p206_p3, %s481_s23), 15  ;;  %549 = vmatpush3.bf16.msra.mxu0 %v546_v5  ;;  %563 = vmatpush3.bf16.msra.mxu1 %v546_v5 }
   0xe   : > { %s633_s30 = sshll.u32 %s691_s23, 3  ;;  %551 = vmatprep.subr.bf16.mxu0 %v550_v8  ;;  %560 = vmatprep.subr.bf16.mxu1 %v550_v8 }
   0xf   : > { %s209_s11 = scalar_lea.vmem %s685_s0, %s633_s30  ;;  %s215_s14 = scalar_lea.vmem %s688_s3, %s633_s30 }
  0x10   : > { %v223_v11 = vld [vmem:[%s209_s11] sm:$0xff]  ;;  %v224_v14 = vld [vmem:[%s209_s11 + $0x8] sm:$0xff]  ;;  %v225_v16 = vld [vmem:[%s209_s11 + $0x10] sm:$0xff]  ;;  %s664_s20 = scalar_lea.vmem %s689_s4, %s633_s30 }
  0x11   : > { %v227_v12 = vld [vmem:[%s209_s11 + $0x20] sm:$0xff]  ;;  %530 = vmatprep.mubr.msk.f32.mxu0 %vm246_vm0, %v223_v11  ;;  %553 = vmatpush3.bf16.msra.mxu0 %v550_v8  ;;  %v228_v15 = vld [vmem:[%s209_s11 + $0x28] sm:$0xff]  ;;  %v229_v17 = vld [vmem:[%s209_s11 + $0x30] sm:$0xff] }
  0x12   : > { %536 = vmatprep.mubr.msk.f32.mxu1 %vm246_vm0, %v227_v12  ;;  %564 = vmatpush3.bf16.msra.mxu1 %v550_v8  ;;  %v226_v18 = vld [vmem:[%s209_s11 + $0x18] sm:$0xff]  ;;  %v377_v22 = vld [vmem:[%s215_s14 + $0x8] sm:$0xff]  ;;  %v376_v28 = vld [vmem:[%s215_s14] sm:$0xff] }
  0x13   : > { %555 = vmatprep.subr.bf16.mxu0 %v554_v13  ;;  %561 = vmatprep.subr.bf16.mxu1 %v554_v13  ;;  %v230_v19 = vld [vmem:[%s209_s11 + $0x38] sm:$0xff]  ;;  %v381_v24 = vld [vmem:[%s215_s14 + $0x28] sm:$0xff]  ;;  %v380_v30 = vld [vmem:[%s215_s14 + $0x20] sm:$0xff] }
  0x14   : > { %v379_v38 = vld [vmem:[%s215_s14 + $0x18] sm:$0xff]  ;;  %v378_v46 = vld [vmem:[%s215_s14 + $0x10] sm:$0xff] }
  0x15   : > { %557 = vmatpush3.bf16.msra.mxu0 %v554_v13  ;;  %v383_v40 = vld [vmem:[%s215_s14 + $0x38] sm:$0xff]  ;;  %v382_v48 = vld [vmem:[%s215_s14 + $0x30] sm:$0xff] }
  0x16   : > { %565 = vmatpush3.bf16.msra.mxu1 %v554_v13 }
  0x18   : > { %531 = vmatmul.mubr.msk.f32.vlgmr.msra.gmra.mrb[0].mxu0 %vm246_vm0, %v224_v14 }
  0x19   : > { %537 = vmatmul.mubr.msk.f32.vlgmr.msra.gmra.mrb[0].mxu1 %vm246_vm0, %v228_v15  ;;  %533 = vmatprep.mubr.msk.f32.mxu0 %vm246_vm0, %v225_v16 }
  0x1a   : > { %539 = vmatprep.mubr.msk.f32.mxu1 %vm246_vm0, %v229_v17 }
  0x1c   : > { %534 = vmatmul.mubr.msk.f32.gmra.mrb[2].mxu0 %vm246_vm0, %v226_v18 }
  0x1d   : > { %540 = vmatmul.mubr.msk.f32.gmra.mrb[2].mxu1 %vm246_vm0, %v230_v19 }
  0xeb   : > { %v532_v21 = vpop.f32.mrb[0].mxu0 }
  0xec   : > { %v538_v23 = vpop.f32.mrb[0].mxu1  ;;  %v343_v25 = vadd.f32 %v532_v21, %v487_v20  ;;  %v337_v27 = vpop.f32.mrb[1].mxu0 }
  0xed   : > { %v363_v26 = vadd.f32 %v538_v23, %v487_v20  ;;  %v357_v29 = vpop.f32.mrb[1].mxu1  ;;  %v338_v31 = vadd.f32 %v487_v20, %v337_v27 }
  0xee   : > { %v358_v32 = vadd.f32 %v487_v20, %v357_v29  ;;  %v385_v33 = vadd.f32 %v377_v22, %v343_v25 }
  0xef   : > { %v389_v34 = vadd.f32 %v381_v24, %v363_v26  ;;  %v384_v35 = vadd.f32 %v376_v28, %v338_v31  ;;  %v535_v37 = vpop.f32.mrb[2].mxu0 }
  0xf0   : > { %v388_v36 = vadd.f32 %v380_v30, %v358_v32  ;;  %v541_v39 = vpop.f32.mrb[2].mxu1  ;;  %v393_v41 = vmax.f32 %v385_v33, 0.0  ;;  %v353_v43 = vadd.f32 %v535_v37, %v487_v20  ;;  %v347_v45 = vpop.f32.mrb[3].mxu0 }
  0xf1   : > { %v397_v42 = vmax.f32 %v389_v34, 0.0  ;;  %v373_v44 = vadd.f32 %v541_v39, %v487_v20  ;;  %v367_v47 = vpop.f32.mrb[3].mxu1  ;;  %v392_v49 = vmax.f32 %v384_v35, 0.0  ;;  %v348_v51 = vadd.f32 %v487_v20, %v347_v45 }
  0xf2   : > { %v396_v50 = vmax.f32 %v388_v36, 0.0  ;;  %v368_v52 = vadd.f32 %v487_v20, %v367_v47  ;;  %401 = vst.msk [vmem:[%s664_s20 + $0x8] sm:$0xff] %vm246_vm0, %v393_v41  ;;  %v387_v53 = vadd.f32 %v379_v38, %v353_v43 }
  0xf3   : > { %405 = vst.msk [vmem:[%s664_s20 + $0x28] sm:$0xff] %vm246_vm0, %v397_v42  ;;  %v391_v54 = vadd.f32 %v383_v40, %v373_v44  ;;  %400 = vst.msk [vmem:[%s664_s20] sm:$0xff] %vm246_vm0, %v392_v49  ;;  %v386_v55 = vadd.f32 %v378_v46, %v348_v51 }
  0xf4   : > { %404 = vst.msk [vmem:[%s664_s20 + $0x20] sm:$0xff] %vm246_vm0, %v396_v50  ;;  %v390_v56 = vadd.f32 %v382_v48, %v368_v52  ;;  %v395_v57 = vmax.f32 %v387_v53, 0.0 }
  0xf5   : > { %v399_v58 = vmax.f32 %v391_v54, 0.0  ;;  %v394_v59 = vmax.f32 %v386_v55, 0.0 }
  0xf6   : > { %v398_v60 = vmax.f32 %v390_v56, 0.0  ;;  %403 = vst.msk [vmem:[%s664_s20 + $0x18] sm:$0xff] %vm246_vm0, %v395_v57 }
  0xf7   : > { %407 = vst.msk [vmem:[%s664_s20 + $0x38] sm:$0xff] %vm246_vm0, %v399_v58  ;;  %402 = vst.msk [vmem:[%s664_s20 + $0x10] sm:$0xff] %vm246_vm0, %v394_v59 }
  0xf8   : > { %406 = vst.msk [vmem:[%s664_s20 + $0x30] sm:$0xff] %vm246_vm0, %v398_v60 }
  0xf9 PF: > { %s14_s15 = sadd.s32 1, %s580_s15  }
  0xfa   : > { %p11_p4 = scmp.ge.s32.totalorder %s14_s15, 4  }
  0xfc   :  { %13 = sbr.rel (!%p11_p4) target bundleno = 1 (0x1), region = 69 }

// kernel: encoder_forward.21
= control target key start
LH: loop header
LB: loop body
LE: loop exit
PB: predicated region body
PF: predicated region fallthrough
CT: control target
= control target key end

     0   :  { %8 = vsyncpa [#allocation3], 0  ;;  %s2714_s0 = inlined_call_operand.vmem [shape: f32[128,256], index: 0, kind: input, shape index: {}]   ;;  %s2715_s1 = inlined_call_operand.vmem [shape: f32[256,1024], index: 1, kind: input, shape index: {}]   ;;  %s2716_s2 = inlined_call_operand.vmem [shape: f32[1,1024], index: 2, kind: input, shape index: {}]   ;;  %s2717_s3 = inlined_call_operand.hbm [shape: f32[128,1024], index: 3, kind: output, shape index: {}]  }
   0x1   :  { %10 = vsyncpa [#allocation3 + $0x1], 0  ;;  %s1547_s12 = smov 0   ;;  %s1549_s13 = smov 0  }
   0x2   :  { %s1551_s14 = smov 0   ;;  %s1553_s15 = smov 0  }
   0x3 LB: > { %s1568_s16 = sadd.s32 4294967295, %s1522_s15   ;;  %s1146_s17 = sadd.s32 4294967294, %s1522_s15   ;;  %s1522_s15 = sphi %s1553_s15, %s2724_s15   ;;  %s1518_s14 = sphi %s1551_s14, %s2723_s14   ;;  %s1514_s13 = sphi %s1549_s13, %s2722_s13   ;;  %s1510_s12 = sphi %s1547_s12, %s2721_s12  }
   0x4   : > { %s1572_s18 = sadd.s32 1, %s1522_s15   ;;  %s91_s19 = sadd.s32 1, %s1518_s14 }
   0x5   : > { %s88_s20 = ssub.s32 %s1522_s15, %s1572_s18  ;;  %p101_p0 = scmp.ne.s32.totalorder %s1518_s14, %s1514_s13 }
   0x6   : > { %p89_p1 = scmp.eq.s32.totalorder %s88_s20, 0  ;;  %p102_p2 = scmp.eq.s32.totalorder %s1568_s16, 1 }
   0x7   : > { %p107_p3 = scmp.ne.s32.totalorder %s1514_s13, %s1510_s12  ;;  %p108_p4 = scmp.eq.s32.totalorder %s1146_s17, 1 }
   0x8   : > { %s1583_s21 = scalar_select %p89_p1, %s1518_s14, %s91_s19  }
   0x9   : > { %p1585_p5 = por %p102_p2, %p101_p0  ;;  %p1589_p6 = por %p108_p4, %p107_p3 }
   0xa   : > { %p1149_p7 = scmp.ge.s32.totalorder %s1522_s15, 1  ;;  %p142_p8 = scmp.lt.s32.totalorder %s1522_s15, 3 }
   0xc   : > { %p143_p9 = pnand %p1149_p7, %p142_p8 }
   0xd   : > { %v192_v0 = vld [vmem:[%s2715_s1 + $0x8] sm:$0xff] (!%p143_p9)  ;;  %v194_v2 = vld [vmem:[%s2715_s1 + $0x18] sm:$0xff] (!%p143_p9)  ;;  %v191_v5 = vld [vmem:[%s2715_s1] sm:$0xff] (!%p143_p9)  ;;  %s1151_s24 = sshll.u32 (!%p143_p9), %s1568_s16, 3  ;;  %s164_s11 = sand.u32 (!%p143_p9), 1, %s1514_s13  }
   0xe   : > { %146 = sbr.rel (%p143_p9) target bundleno = 406 (0x196), region = 32  ;;  %v200_v1 = vld [vmem:[%s2715_s1 + $0x48] sm:$0xff] (!%p143_p9)  ;;  %v202_v4 = vld [vmem:[%s2715_s1 + $0x58] sm:$0xff] (!%p143_p9)  ;;  %v199_v6 = vld [vmem:[%s2715_s1 + $0x40] sm:$0xff] (!%p143_p9)  ;;  %p1800_p10 = scmp.lt.s32.totalorder (!%p143_p9), %s1151_s24, 15 }
   0xf   : > { %v1163_v3 = vpack.c.bf16 (!%p143_p9), %v200_v1, %v192_v0  ;;  %v1227_v7 = vpack.c.bf16 (!%p143_p9), %v202_v4, %v194_v2  ;;  %v1165_v8 = vpack.c.bf16 (!%p143_p9), %v199_v6, %v191_v5  ;;  %v193_v9 = vld [vmem:[%s2715_s1 + $0x10] sm:$0xff] (!%p143_p9)  ;;  %v208_v11 = vld [vmem:[%s2715_s1 + $0x88] sm:$0xff] (!%p143_p9)  ;;  %v210_v14 = vld [vmem:[%s2715_s1 + $0x98] sm:$0xff] (!%p143_p9)  ;;  %s1150_s17 = sshll.u32 (!%p143_p9), %s164_s11, 9  ;;  %s1162_s20 = sshll.u32 (!%p143_p9), %s1568_s16, 13 }
  0x10   : > { %v201_v10 = vld [vmem:[%s2715_s1 + $0x50] sm:$0xff] (!%p143_p9)  ;;  %v216_v13 = vld [vmem:[%s2715_s1 + $0xc8] sm:$0xff] (!%p143_p9)  ;;  %v218_v15 = vld [vmem:[%s2715_s1 + $0xd8] sm:$0xff] (!%p143_p9)  ;;  %s2520_s19 = scalar_lea.vmem (!%p143_p9), [#allocation2], %s1150_s17  ;;  %s2673_s25 = scalar_lea.sflag (!%p143_p9), [#allocation3], %s164_s11 }
  0x11   : > { %1164 = vmatprep.subr.bf16.mxu0 (!%p143_p9), %v1163_v3  ;;  %v1229_v12 = vpack.c.bf16 (!%p143_p9), %v201_v10, %v193_v9  ;;  %1228 = vmatprep.subr.bf16.mxu1 (!%p143_p9), %v1227_v7  ;;  %v1167_v16 = vpack.c.bf16 (!%p143_p9), %v216_v13, %v208_v11  ;;  %v1231_v17 = vpack.c.bf16 (!%p143_p9), %v218_v15, %v210_v14  ;;  %v207_v18 = vld [vmem:[%s2715_s1 + $0x80] sm:$0xff] (!%p143_p9)  ;;  %v209_v20 = vld [vmem:[%s2715_s1 + $0x90] sm:$0xff] (!%p143_p9)  ;;  %v224_v23 = vld [vmem:[%s2715_s1 + $0x108] sm:$0xff] (!%p143_p9)  ;;  %s1084_s8 = sshll.u32 (!%p143_p9), %s2520_s19, 4  ;;  %s1524_s27 = smov (!%p143_p9), [#allocation2]   ;;  %s2665_s8 = int_to_ptr.vmem [resolvable:$true] %s1084_s8 }
  0x12   : > { %1166 = vmatpush1.bf16.msra.mxu0 (!%p143_p9), %v1165_v8  ;;  %v215_v19 = vld [vmem:[%s2715_s1 + $0xc0] sm:$0xff] (!%p143_p9)  ;;  %v217_v22 = vld [vmem:[%s2715_s1 + $0xd0] sm:$0xff] (!%p143_p9)  ;;  %v232_v24 = vld [vmem:[%s2715_s1 + $0x148] sm:$0xff] (!%p143_p9)  ;;  %s1460_s26 = scalar_lea.vmem (!%p143_p9), %s2665_s8, 8192 }
  0x13   : > { %1230 = vmatpush1.bf16.msra.mxu1 (!%p143_p9), %v1229_v12  ;;  %v1169_v21 = vpack.c.bf16 (!%p143_p9), %v215_v19, %v207_v18  ;;  %1168 = vmatprep.subr.bf16.mxu0 (!%p143_p9), %v1167_v16  ;;  %v1233_v25 = vpack.c.bf16 (!%p143_p9), %v217_v22, %v209_v20  ;;  %v1171_v26 = vpack.c.bf16 (!%p143_p9), %v232_v24, %v224_v23  ;;  %v226_v27 = vld [vmem:[%s2715_s1 + $0x118] sm:$0xff] (!%p143_p9)  ;;  %v223_v29 = vld [vmem:[%s2715_s1 + $0x100] sm:$0xff] (!%p143_p9)  ;;  %v225_v32 = vld [vmem:[%s2715_s1 + $0x110] sm:$0xff] (!%p143_p9)  ;;  %p1461_p11 = scmp.ne.s32.totalorder (!%p143_p9), %s2665_s8, %s1460_s26 }
  0x14   : > { %1232 = vmatprep.subr.bf16.mxu1 (!%p143_p9), %v1231_v17  ;;  %v234_v28 = vld [vmem:[%s2715_s1 + $0x158] sm:$0xff] (!%p143_p9)  ;;  %v231_v31 = vld [vmem:[%s2715_s1 + $0x140] sm:$0xff] (!%p143_p9)  ;;  %v233_v33 = vld [vmem:[%s2715_s1 + $0x150] sm:$0xff] (!%p143_p9) }
  0x15   : > { %v1235_v30 = vpack.c.bf16 %v234_v28, %v226_v27  ;;  %v1173_v34 = vpack.c.bf16 %v231_v31, %v223_v29  ;;  %v240_v35 = vld [vmem:[%s2715_s1 + $0x188] sm:$0xff]  ;;  %v242_v37 = vld [vmem:[%s2715_s1 + $0x198] sm:$0xff]  ;;  %v1237_v38 = vpack.c.bf16 %v233_v33, %v225_v32  ;;  %v239_v41 = vld [vmem:[%s2715_s1 + $0x180] sm:$0xff]  ;;  %s2726_s24 = smov (!%p1800_p10, %s1151_s24), 15  ;;  %p1462_p12 = pnand %p1461_p11, %p1585_p5 }
  0x16   : > { %1170 = vmatpush1.bf16.msra.mxu0 %v1169_v21  ;;  %v248_v36 = vld [vmem:[%s2715_s1 + $0x1c8] sm:$0xff]  ;;  %v250_v40 = vld [vmem:[%s2715_s1 + $0x1d8] sm:$0xff]  ;;  %v247_v42 = vld [vmem:[%s2715_s1 + $0x1c0] sm:$0xff]  ;;  %s1160_s7 = sshll.u32 %s2726_s24, 4 }
  0x17   : > { %1234 = vmatpush1.bf16.msra.mxu1 %v1233_v25  ;;  %1172 = vmatprep.subr.bf16.mxu0 %v1171_v26  ;;  %v1175_v39 = vpack.c.bf16 %v248_v36, %v240_v35  ;;  %v1239_v43 = vpack.c.bf16 %v250_v40, %v242_v37  ;;  %v241_v44 = vld [vmem:[%s2715_s1 + $0x190] sm:$0xff]  ;;  %v256_v46 = vld [vmem:[%s2715_s1 + $0x208] sm:$0xff]  ;;  %v258_v48 = vld [vmem:[%s2715_s1 + $0x218] sm:$0xff]  ;;  %v1177_v50 = vpack.c.bf16 %v247_v42, %v239_v41  ;;  %s1884_s10 = scalar_lea.vmem %s2714_s0, %s1160_s7  ;;  %s2663_s7 = scalar_lea.hbm %s2717_s3, %s1162_s20 }
  0x18   : > { %1236 = vmatprep.subr.bf16.mxu1 %v1235_v30  ;;  %v249_v45 = vld [vmem:[%s2715_s1 + $0x1d0] sm:$0xff]  ;;  %v264_v47 = vld [vmem:[%s2715_s1 + $0x248] sm:$0xff]  ;;  %v266_v49 = vld [vmem:[%s2715_s1 + $0x258] sm:$0xff]  ;;  %p1463_p13 = pneg %p1462_p12 }
  0x19   : > { %v1241_v51 = vpack.c.bf16 %v249_v45, %v241_v44  ;;  %v1179_v52 = vpack.c.bf16 %v264_v47, %v256_v46  ;;  %v255_v53 = vld [vmem:[%s2715_s1 + $0x200] sm:$0xff]  ;;  %v257_v55 = vld [vmem:[%s2715_s1 + $0x210] sm:$0xff]  ;;  %v1243_v56 = vpack.c.bf16 %v266_v49, %v258_v48  ;;  %v272_v58 = vld [vmem:[%s2715_s1 + $0x288] sm:$0xff] }
  0x1a   : > { %1174 = vmatpush1.bf16.msra.mxu0 %v1173_v34  ;;  %v263_v54 = vld [vmem:[%s2715_s1 + $0x240] sm:$0xff]  ;;  %v265_v57 = vld [vmem:[%s2715_s1 + $0x250] sm:$0xff]  ;;  %v280_v59 = vld [vmem:[%s2715_s1 + $0x2c8] sm:$0xff] }
  0x1b   : > { %1238 = vmatpush1.bf16.msra.mxu1 %v1237_v38  ;;  %1176 = vmatprep.subr.bf16.mxu0 %v1175_v39  ;;  %v274_v60 = vld [vmem:[%s2715_s1 + $0x298] sm:$0xff]  ;;  %v1181_v62 = vpack.c.bf16 %v263_v54, %v255_v53  ;;  %v1245_v63 = vpack.c.bf16 %v265_v57, %v257_v55  ;;  %v1183_v0 = vpack.c.bf16 %v280_v59, %v272_v58  ;;  %v271_v1 = vld [vmem:[%s2715_s1 + $0x280] sm:$0xff]  ;;  %v273_v3 = vld [vmem:[%s2715_s1 + $0x290] sm:$0xff] }
  0x1c   : > { %1240 = vmatprep.subr.bf16.mxu1 %v1239_v43  ;;  %v282_v61 = vld [vmem:[%s2715_s1 + $0x2d8] sm:$0xff]  ;;  %v279_v2 = vld [vmem:[%s2715_s1 + $0x2c0] sm:$0xff]  ;;  %v281_v5 = vld [vmem:[%s2715_s1 + $0x2d0] sm:$0xff] }
  0x1d   : > { %v1247_v4 = vpack.c.bf16 %v282_v61, %v274_v60  ;;  %v288_v6 = vld [vmem:[%s2715_s1 + $0x308] sm:$0xff]  ;;  %v290_v8 = vld [vmem:[%s2715_s1 + $0x318] sm:$0xff]  ;;  %v1185_v10 = vpack.c.bf16 %v279_v2, %v271_v1  ;;  %v1249_v11 = vpack.c.bf16 %v281_v5, %v273_v3  ;;  %v287_v13 = vld [vmem:[%s2715_s1 + $0x300] sm:$0xff] }
  0x1e   : > { %1178 = vmatpush1.bf16.msra.mxu0 %v1177_v50  ;;  %v296_v7 = vld [vmem:[%s2715_s1 + $0x348] sm:$0xff]  ;;  %v298_v9 = vld [vmem:[%s2715_s1 + $0x358] sm:$0xff]  ;;  %v295_v14 = vld [vmem:[%s2715_s1 + $0x340] sm:$0xff] }
  0x1f   : > { %1242 = vmatpush1.bf16.msra.mxu1 %v1241_v51  ;;  %1180 = vmatprep.subr.bf16.mxu0 %v1179_v52  ;;  %v1187_v12 = vpack.c.bf16 %v296_v7, %v288_v6  ;;  %v289_v15 = vld [vmem:[%s2715_s1 + $0x310] sm:$0xff]  ;;  %v1251_v16 = vpack.c.bf16 %v298_v9, %v290_v8  ;;  %v304_v18 = vld [vmem:[%s2715_s1 + $0x388] sm:$0xff]  ;;  %v306_v20 = vld [vmem:[%s2715_s1 + $0x398] sm:$0xff]  ;;  %v1189_v22 = vpack.c.bf16 %v295_v14, %v287_v13 }
  0x20   : > { %1244 = vmatprep.subr.bf16.mxu1 %v1243_v56  ;;  %v297_v17 = vld [vmem:[%s2715_s1 + $0x350] sm:$0xff]  ;;  %v312_v19 = vld [vmem:[%s2715_s1 + $0x3c8] sm:$0xff]  ;;  %v314_v21 = vld [vmem:[%s2715_s1 + $0x3d8] sm:$0xff] }
  0x21   : > { %v1253_v23 = vpack.c.bf16 %v297_v17, %v289_v15  ;;  %v1191_v24 = vpack.c.bf16 %v312_v19, %v304_v18  ;;  %v303_v25 = vld [vmem:[%s2715_s1 + $0x380] sm:$0xff]  ;;  %v305_v27 = vld [vmem:[%s2715_s1 + $0x390] sm:$0xff]  ;;  %v1255_v28 = vpack.c.bf16 %v314_v21, %v306_v20  ;;  %v320_v30 = vld [vmem:[%s2715_s1 + $0x408] sm:$0xff] }
  0x22   : > { %1182 = vmatpush1.bf16.msra.mxu0 %v1181_v62  ;;  %v311_v26 = vld [vmem:[%s2715_s1 + $0x3c0] sm:$0xff]  ;;  %v313_v29 = vld [vmem:[%s2715_s1 + $0x3d0] sm:$0xff]  ;;  %v328_v31 = vld [vmem:[%s2715_s1 + $0x448] sm:$0xff] }
  0x23   : > { %1246 = vmatpush1.bf16.msra.mxu1 %v1245_v63  ;;  %1184 = vmatprep.subr.bf16.mxu0 %v1183_v0  ;;  %v322_v32 = vld [vmem:[%s2715_s1 + $0x418] sm:$0xff]  ;;  %v1193_v34 = vpack.c.bf16 %v311_v26, %v303_v25  ;;  %v1257_v35 = vpack.c.bf16 %v313_v29, %v305_v27  ;;  %v1195_v36 = vpack.c.bf16 %v328_v31, %v320_v30  ;;  %v319_v37 = vld [vmem:[%s2715_s1 + $0x400] sm:$0xff]  ;;  %v321_v39 = vld [vmem:[%s2715_s1 + $0x410] sm:$0xff] }
  0x24   : > { %1248 = vmatprep.subr.bf16.mxu1 %v1247_v4  ;;  %v330_v33 = vld [vmem:[%s2715_s1 + $0x458] sm:$0xff]  ;;  %v327_v38 = vld [vmem:[%s2715_s1 + $0x440] sm:$0xff]  ;;  %v329_v41 = vld [vmem:[%s2715_s1 + $0x450] sm:$0xff] }
  0x25   : > { %v1259_v40 = vpack.c.bf16 %v330_v33, %v322_v32  ;;  %v336_v42 = vld [vmem:[%s2715_s1 + $0x488] sm:$0xff]  ;;  %v338_v44 = vld [vmem:[%s2715_s1 + $0x498] sm:$0xff]  ;;  %v1197_v46 = vpack.c.bf16 %v327_v38, %v319_v37  ;;  %v1261_v47 = vpack.c.bf16 %v329_v41, %v321_v39  ;;  %v335_v49 = vld [vmem:[%s2715_s1 + $0x480] sm:$0xff] }
  0x26   : > { %1186 = vmatpush1.bf16.msra.mxu0 %v1185_v10  ;;  %v344_v43 = vld [vmem:[%s2715_s1 + $0x4c8] sm:$0xff]  ;;  %v346_v45 = vld [vmem:[%s2715_s1 + $0x4d8] sm:$0xff]  ;;  %v343_v50 = vld [vmem:[%s2715_s1 + $0x4c0] sm:$0xff] }
  0x27   : > { %1250 = vmatpush1.bf16.msra.mxu1 %v1249_v11  ;;  %1188 = vmatprep.subr.bf16.mxu0 %v1187_v12  ;;  %v1199_v48 = vpack.c.bf16 %v344_v43, %v336_v42  ;;  %v337_v51 = vld [vmem:[%s2715_s1 + $0x490] sm:$0xff]  ;;  %v1263_v52 = vpack.c.bf16 %v346_v45, %v338_v44  ;;  %v352_v54 = vld [vmem:[%s2715_s1 + $0x508] sm:$0xff]  ;;  %v354_v56 = vld [vmem:[%s2715_s1 + $0x518] sm:$0xff]  ;;  %v1201_v58 = vpack.c.bf16 %v343_v50, %v335_v49 }
  0x28   : > { %1252 = vmatprep.subr.bf16.mxu1 %v1251_v16  ;;  %v345_v53 = vld [vmem:[%s2715_s1 + $0x4d0] sm:$0xff]  ;;  %v360_v55 = vld [vmem:[%s2715_s1 + $0x548] sm:$0xff]  ;;  %v362_v57 = vld [vmem:[%s2715_s1 + $0x558] sm:$0xff] }
  0x29   : > { %v1265_v59 = vpack.c.bf16 %v345_v53, %v337_v51  ;;  %v1203_v60 = vpack.c.bf16 %v360_v55, %v352_v54  ;;  %v351_v61 = vld [vmem:[%s2715_s1 + $0x500] sm:$0xff]  ;;  %v353_v63 = vld [vmem:[%s2715_s1 + $0x510] sm:$0xff]  ;;  %v1267_v0 = vpack.c.bf16 %v362_v57, %v354_v56  ;;  %v368_v2 = vld [vmem:[%s2715_s1 + $0x588] sm:$0xff] }
  0x2a   : > { %1190 = vmatpush1.bf16.msra.mxu0 %v1189_v22  ;;  %v359_v62 = vld [vmem:[%s2715_s1 + $0x540] sm:$0xff]  ;;  %v361_v1 = vld [vmem:[%s2715_s1 + $0x550] sm:$0xff]  ;;  %v376_v3 = vld [vmem:[%s2715_s1 + $0x5c8] sm:$0xff] }
  0x2b   : > { %1254 = vmatpush1.bf16.msra.mxu1 %v1253_v23  ;;  %1192 = vmatprep.subr.bf16.mxu0 %v1191_v24  ;;  %v370_v4 = vld [vmem:[%s2715_s1 + $0x598] sm:$0xff]  ;;  %v1205_v6 = vpack.c.bf16 %v359_v62, %v351_v61  ;;  %v367_v7 = vld [vmem:[%s2715_s1 + $0x580] sm:$0xff]  ;;  %v1269_v8 = vpack.c.bf16 %v361_v1, %v353_v63  ;;  %v1207_v9 = vpack.c.bf16 %v376_v3, %v368_v2  ;;  %v369_v11 = vld [vmem:[%s2715_s1 + $0x590] sm:$0xff] }
  0x2c   : > { %1256 = vmatprep.subr.bf16.mxu1 %v1255_v28  ;;  %v378_v5 = vld [vmem:[%s2715_s1 + $0x5d8] sm:$0xff]  ;;  %v375_v10 = vld [vmem:[%s2715_s1 + $0x5c0] sm:$0xff]  ;;  %v377_v12 = vld [vmem:[%s2715_s1 + $0x5d0] sm:$0xff] }
  0x2d   : > { %v1271_v13 = vpack.c.bf16 %v378_v5, %v370_v4  ;;  %v384_v14 = vld [vmem:[%s2715_s1 + $0x608] sm:$0xff]  ;;  %v386_v17 = vld [vmem:[%s2715_s1 + $0x618] sm:$0xff]  ;;  %v1209_v19 = vpack.c.bf16 %v375_v10, %v367_v7  ;;  %v1273_v20 = vpack.c.bf16 %v377_v12, %v369_v11  ;;  %v383_v22 = vld [vmem:[%s2715_s1 + $0x600] sm:$0xff] }
  0x2e   : > { %1194 = vmatpush1.bf16.msra.mxu0 %v1193_v34  ;;  %v392_v15 = vld [vmem:[%s2715_s1 + $0x648] sm:$0xff]  ;;  %v394_v18 = vld [vmem:[%s2715_s1 + $0x658] sm:$0xff]  ;;  %v391_v23 = vld [vmem:[%s2715_s1 + $0x640] sm:$0xff] }
  0x2f   : > { %1258 = vmatpush1.bf16.msra.mxu1 %v1257_v35  ;;  %1196 = vmatprep.subr.bf16.mxu0 %v1195_v36  ;;  %v1905_v16 = vld [vmem:[%s1884_s10 + $0x8] sm:$0xff]  ;;  %v1211_v21 = vpack.c.bf16 %v392_v15, %v384_v14  ;;  %v385_v24 = vld [vmem:[%s2715_s1 + $0x610] sm:$0xff]  ;;  %v1275_v25 = vpack.c.bf16 %v394_v18, %v386_v17  ;;  %v402_v29 = vld [vmem:[%s2715_s1 + $0x698] sm:$0xff]  ;;  %v1213_v31 = vpack.c.bf16 %v391_v23, %v383_v22 }
  0x30   : > { %1260 = vmatprep.subr.bf16.mxu1 %v1259_v40  ;;  %553 = vmatprep.mubr.f32.mxu0 %v1905_v16  ;;  %v393_v26 = vld [vmem:[%s2715_s1 + $0x650] sm:$0xff]  ;;  %v400_v27 = vld [vmem:[%s2715_s1 + $0x688] sm:$0xff]  ;;  %v410_v30 = vld [vmem:[%s2715_s1 + $0x6d8] sm:$0xff] }
  0x31   : > { %666 = vmatprep.mubr.f32.mxu1 %v1905_v16  ;;  %v408_v28 = vld [vmem:[%s2715_s1 + $0x6c8] sm:$0xff]  ;;  %v1277_v32 = vpack.c.bf16 %v393_v26, %v385_v24  ;;  %v399_v34 = vld [vmem:[%s2715_s1 + $0x680] sm:$0xff]  ;;  %v401_v36 = vld [vmem:[%s2715_s1 + $0x690] sm:$0xff]  ;;  %v1279_v37 = vpack.c.bf16 %v410_v30, %v402_v29 }
  0x32   : > { %1198 = vmatpush1.bf16.msra.mxu0 %v1197_v46  ;;  %v1215_v33 = vpack.c.bf16 %v408_v28, %v400_v27  ;;  %v407_v35 = vld [vmem:[%s2715_s1 + $0x6c0] sm:$0xff]  ;;  %v409_v38 = vld [vmem:[%s2715_s1 + $0x6d0] sm:$0xff]  ;;  %v416_v39 = vld [vmem:[%s2715_s1 + $0x708] sm:$0xff] }
  0x33   : > { %1262 = vmatpush1.bf16.msra.mxu1 %v1261_v47  ;;  %1200 = vmatprep.subr.bf16.mxu0 %v1199_v48  ;;  %v424_v40 = vld [vmem:[%s2715_s1 + $0x748] sm:$0xff]  ;;  %v418_v41 = vld [vmem:[%s2715_s1 + $0x718] sm:$0xff]  ;;  %v1217_v43 = vpack.c.bf16 %v407_v35, %v399_v34  ;;  %v1281_v44 = vpack.c.bf16 %v409_v38, %v401_v36  ;;  %v415_v46 = vld [vmem:[%s2715_s1 + $0x700] sm:$0xff] }
  0x34   : > { %1264 = vmatprep.subr.bf16.mxu1 %v1263_v52  ;;  %v426_v42 = vld [vmem:[%s2715_s1 + $0x758] sm:$0xff]  ;;  %v1219_v45 = vpack.c.bf16 %v424_v40, %v416_v39  ;;  %v423_v47 = vld [vmem:[%s2715_s1 + $0x740] sm:$0xff]  ;;  %v417_v48 = vld [vmem:[%s2715_s1 + $0x710] sm:$0xff] }
  0x35   : > { %v1283_v49 = vpack.c.bf16 %v426_v42, %v418_v41  ;;  %v425_v50 = vld [vmem:[%s2715_s1 + $0x750] sm:$0xff]  ;;  %v432_v51 = vld [vmem:[%s2715_s1 + $0x788] sm:$0xff]  ;;  %v434_v53 = vld [vmem:[%s2715_s1 + $0x798] sm:$0xff]  ;;  %v1221_v55 = vpack.c.bf16 %v423_v47, %v415_v46 }
  0x36   : > { %1202 = vmatpush1.bf16.msra.mxu0 %v1201_v58  ;;  %v440_v52 = vld [vmem:[%s2715_s1 + $0x7c8] sm:$0xff]  ;;  %v442_v54 = vld [vmem:[%s2715_s1 + $0x7d8] sm:$0xff]  ;;  %v1285_v56 = vpack.c.bf16 %v425_v50, %v417_v48  ;;  %v431_v58 = vld [vmem:[%s2715_s1 + $0x780] sm:$0xff] }
  0x37   : > { %1266 = vmatpush1.bf16.msra.mxu1 %v1265_v59  ;;  %1204 = vmatprep.subr.bf16.mxu0 %v1203_v60  ;;  %v1223_v57 = vpack.c.bf16 %v440_v52, %v432_v51  ;;  %v439_v59 = vld [vmem:[%s2715_s1 + $0x7c0] sm:$0xff]  ;;  %v433_v60 = vld [vmem:[%s2715_s1 + $0x790] sm:$0xff]  ;;  %v1287_v61 = vpack.c.bf16 %v442_v54, %v434_v53  ;;  %v196_v63 = vld [vmem:[%s2715_s1 + $0x28] sm:$0xff] }
  0x38   : > { %1268 = vmatprep.subr.bf16.mxu1 %v1267_v0  ;;  %v441_v62 = vld [vmem:[%s2715_s1 + $0x7d0] sm:$0xff]  ;;  %v204_v0 = vld [vmem:[%s2715_s1 + $0x68] sm:$0xff]  ;;  %v198_v1 = vld [vmem:[%s2715_s1 + $0x38] sm:$0xff]  ;;  %v1225_v3 = vpack.c.bf16 %v439_v59, %v431_v58 }
  0x39   : > { %v206_v2 = vld [vmem:[%s2715_s1 + $0x78] sm:$0xff]  ;;  %v1289_v4 = vpack.c.bf16 %v441_v62, %v433_v60  ;;  %v1291_v5 = vpack.c.bf16 %v204_v0, %v196_v63  ;;  %v203_v7 = vld [vmem:[%s2715_s1 + $0x60] sm:$0xff]  ;;  %v205_v10 = vld [vmem:[%s2715_s1 + $0x70] sm:$0xff] }
  0x3a   : > { %1206 = vmatpush1.bf16.msra.mxu0 %v1205_v6  ;;  %v195_v6 = vld [vmem:[%s2715_s1 + $0x20] sm:$0xff]  ;;  %v212_v11 = vld [vmem:[%s2715_s1 + $0xa8] sm:$0xff]  ;;  %v222_v14 = vld [vmem:[%s2715_s1 + $0xf8] sm:$0xff] }
  0x3b   : > { %1270 = vmatpush1.bf16.msra.mxu1 %v1269_v8  ;;  %1208 = vmatprep.subr.bf16.mxu0 %v1207_v9  ;;  %v197_v8 = vld [vmem:[%s2715_s1 + $0x30] sm:$0xff]  ;;  %v1355_v9 = vpack.c.bf16 %v206_v2, %v198_v1  ;;  %v220_v12 = vld [vmem:[%s2715_s1 + $0xe8] sm:$0xff]  ;;  %v2036_v15 = vld [vmem:[%s1884_s10] sm:$0xff]  ;;  %v1293_v17 = vpack.c.bf16 %v203_v7, %v195_v6 }
  0x3c   : > { %1272 = vmatprep.subr.bf16.mxu1 %v1271_v13  ;;  %v214_v13 = vld [vmem:[%s2715_s1 + $0xb8] sm:$0xff]  ;;  %v1357_v18 = vpack.c.bf16 %v205_v10, %v197_v8  ;;  %v213_v22 = vld [vmem:[%s2715_s1 + $0xb0] sm:$0xff]  ;;  %v236_v26 = vld [vmem:[%s2715_s1 + $0x168] sm:$0xff] }
  0x3d   : > { %v1359_v23 = vpack.c.bf16 %v222_v14, %v214_v13  ;;  %v221_v24 = vld [vmem:[%s2715_s1 + $0xf0] sm:$0xff]  ;;  %v230_v27 = vld [vmem:[%s2715_s1 + $0x138] sm:$0xff]  ;;  %v227_v34 = vld [vmem:[%s2715_s1 + $0x120] sm:$0xff] }
  0x3e   : > { %1210 = vmatpush1.bf16.msra.mxu0 %v1209_v19  ;;  %v1295_v19 = vpack.c.bf16 %v220_v12, %v212_v11  ;;  %v238_v28 = vld [vmem:[%s2715_s1 + $0x178] sm:$0xff]  ;;  %v235_v35 = vld [vmem:[%s2715_s1 + $0x160] sm:$0xff]  ;;  %v229_v36 = vld [vmem:[%s2715_s1 + $0x130] sm:$0xff] }
  0x3f   : > { %1274 = vmatpush1.bf16.msra.mxu1 %v1273_v20  ;;  %1212 = vmatprep.subr.bf16.mxu0 %v1211_v21  ;;  %v211_v20 = vld [vmem:[%s2715_s1 + $0xa0] sm:$0xff]  ;;  %v2064_v29 = vld [vmem:[%s1884_s10 + $0x18] sm:$0xff]  ;;  %v237_v38 = vld [vmem:[%s2715_s1 + $0x170] sm:$0xff] }
  0x40   : > { %1276 = vmatprep.subr.bf16.mxu1 %v1275_v25  ;;  %v219_v21 = vld [vmem:[%s2715_s1 + $0xe0] sm:$0xff]  ;;  %v228_v25 = vld [vmem:[%s2715_s1 + $0x128] sm:$0xff]  ;;  %v246_v41 = vld [vmem:[%s2715_s1 + $0x1b8] sm:$0xff]  ;;  %v1365_v46 = vpack.c.bf16 %v237_v38, %v229_v36 }
  0x41   : > { %v1297_v30 = vpack.c.bf16 %v219_v21, %v211_v20  ;;  %v244_v39 = vld [vmem:[%s2715_s1 + $0x1a8] sm:$0xff]  ;;  %v254_v42 = vld [vmem:[%s2715_s1 + $0x1f8] sm:$0xff]  ;;  %v243_v48 = vld [vmem:[%s2715_s1 + $0x1a0] sm:$0xff] }
  0x42   : > { %1214 = vmatpush1.bf16.msra.mxu0 %v1213_v31  ;;  %v2068_v31 = vld [vmem:[%s1884_s10 + $0x10] sm:$0xff]  ;;  %v252_v40 = vld [vmem:[%s2715_s1 + $0x1e8] sm:$0xff]  ;;  %v1367_v51 = vpack.c.bf16 %v254_v42, %v246_v41  ;;  %v259_v62 = vld [vmem:[%s2715_s1 + $0x220] sm:$0xff] }
  0x43   : > { %1278 = vmatpush1.bf16.msra.mxu1 %v1277_v32  ;;  %1216 = vmatprep.subr.bf16.mxu0 %v1215_v33  ;;  %v1361_v32 = vpack.c.bf16 %v221_v24, %v213_v22  ;;  %v1299_v33 = vpack.c.bf16 %v236_v26, %v228_v25  ;;  %v1303_v47 = vpack.c.bf16 %v252_v40, %v244_v39  ;;  %v245_v50 = vld [vmem:[%s2715_s1 + $0x1b0] sm:$0xff]  ;;  %v260_v53 = vld [vmem:[%s2715_s1 + $0x228] sm:$0xff]  ;;  %v267_v63 = vld [vmem:[%s2715_s1 + $0x260] sm:$0xff] }
  0x44   : > { %1280 = vmatprep.subr.bf16.mxu1 %v1279_v37  ;;  %v1363_v37 = vpack.c.bf16 %v238_v28, %v230_v27  ;;  %v253_v52 = vld [vmem:[%s2715_s1 + $0x1f0] sm:$0xff]  ;;  %v268_v54 = vld [vmem:[%s2715_s1 + $0x268] sm:$0xff]  ;;  %v286_v6 = vld [vmem:[%s2715_s1 + $0x2f8] sm:$0xff]  ;;  %v1309_v8 = vpack.c.bf16 %v267_v63, %v259_v62 }
  0x45   : > { %v2136_v59 = vld [vmem:[%s1884_s10 + $0x30] sm:$0xff]  ;;  %v1369_v60 = vpack.c.bf16 %v253_v52, %v245_v50  ;;  %v2166_v7 = vld [vmem:[%s1884_s10 + $0x48] sm:$0xff]  ;;  %v275_v12 = vld [vmem:[%s2715_s1 + $0x2a0] sm:$0xff] }
  0x46   : > { %1218 = vmatpush1.bf16.msra.mxu0 %v1217_v43  ;;  %v2098_v43 = vld [vmem:[%s1884_s10 + $0x28] sm:$0xff]  ;;  %v261_v0 = vld [vmem:[%s2715_s1 + $0x230] sm:$0xff]  ;;  %v283_v13 = vld [vmem:[%s2715_s1 + $0x2e0] sm:$0xff] }
  0x47   : > { %1282 = vmatpush1.bf16.msra.mxu1 %v1281_v44  ;;  %1220 = vmatprep.subr.bf16.mxu0 %v1219_v45  ;;  %v1301_v44 = vpack.c.bf16 %v235_v35, %v227_v34  ;;  %v2102_v45 = vld [vmem:[%s1884_s10 + $0x20] sm:$0xff]  ;;  %v269_v2 = vld [vmem:[%s2715_s1 + $0x270] sm:$0xff]  ;;  %v300_v20 = vld [vmem:[%s2715_s1 + $0x368] sm:$0xff]  ;;  %v1313_v24 = vpack.c.bf16 %v283_v13, %v275_v12 }
  0x48   : > { %1284 = vmatprep.subr.bf16.mxu1 %v1283_v49  ;;  %v251_v49 = vld [vmem:[%s2715_s1 + $0x1e0] sm:$0xff]  ;;  %v1373_v10 = vpack.c.bf16 %v269_v2, %v261_v0  ;;  %v277_v14 = vld [vmem:[%s2715_s1 + $0x2b0] sm:$0xff]  ;;  %v294_v21 = vld [vmem:[%s2715_s1 + $0x338] sm:$0xff] }
  0x49   : > { %v1305_v58 = vpack.c.bf16 %v251_v49, %v243_v48  ;;  %v302_v22 = vld [vmem:[%s2715_s1 + $0x378] sm:$0xff]  ;;  %v2204_v25 = vld [vmem:[%s1884_s10 + $0x50] sm:$0xff]  ;;  %v291_v28 = vld [vmem:[%s2715_s1 + $0x320] sm:$0xff] }
  0x4a   : > { %1222 = vmatpush1.bf16.msra.mxu0 %v1221_v55  ;;  %v262_v55 = vld [vmem:[%s2715_s1 + $0x238] sm:$0xff]  ;;  %v301_v34 = vld [vmem:[%s2715_s1 + $0x370] sm:$0xff]  ;;  %v308_v35 = vld [vmem:[%s2715_s1 + $0x3a8] sm:$0xff] }
  0x4b   : > { %1286 = vmatpush1.bf16.msra.mxu1 %v1285_v56  ;;  %1224 = vmatprep.subr.bf16.mxu0 %v1223_v57  ;;  %v270_v56 = vld [vmem:[%s2715_s1 + $0x278] sm:$0xff]  ;;  %v316_v36 = vld [vmem:[%s2715_s1 + $0x3e8] sm:$0xff]  ;;  %v2238_v41 = vld [vmem:[%s1884_s10 + $0x60] sm:$0xff] }
  0x4c   : > { %1288 = vmatprep.subr.bf16.mxu1 %v1287_v61  ;;  %v2132_v57 = vld [vmem:[%s1884_s10 + $0x38] sm:$0xff]  ;;  %v1307_v61 = vpack.c.bf16 %v268_v54, %v260_v53  ;;  %v1371_v1 = vpack.c.bf16 %v270_v56, %v262_v55  ;;  %v2234_v39 = vld [vmem:[%s1884_s10 + $0x68] sm:$0xff]  ;;  %v309_v48 = vld [vmem:[%s2715_s1 + $0x3b0] sm:$0xff] }
  0x4d   : > { %v318_v38 = vld [vmem:[%s2715_s1 + $0x3f8] sm:$0xff]  ;;  %v317_v50 = vld [vmem:[%s2715_s1 + $0x3f0] sm:$0xff]  ;;  %v332_v52 = vld [vmem:[%s2715_s1 + $0x468] sm:$0xff] }
  0x4e   : > { %1226 = vmatpush1.bf16.msra.mxu0 %v1225_v3  ;;  %v276_v3 = vld [vmem:[%s2715_s1 + $0x2a8] sm:$0xff]  ;;  %v326_v53 = vld [vmem:[%s2715_s1 + $0x438] sm:$0xff]  ;;  %v323_v62 = vld [vmem:[%s2715_s1 + $0x420] sm:$0xff] }
  0x4f   : > { %1290 = vmatpush1.bf16.msra.mxu1 %v1289_v4  ;;  %1292 = vmatprep.subr.bf16.mxu0 %v1291_v5  ;;  %v284_v4 = vld [vmem:[%s2715_s1 + $0x2e8] sm:$0xff]  ;;  %v278_v5 = vld [vmem:[%s2715_s1 + $0x2b8] sm:$0xff]  ;;  %v331_v63 = vld [vmem:[%s2715_s1 + $0x460] sm:$0xff] }
  0x50   : > { %1356 = vmatprep.subr.bf16.mxu1 %v1355_v9  ;;  %v2170_v9 = vld [vmem:[%s1884_s10 + $0x40] sm:$0xff]  ;;  %v1311_v11 = vpack.c.bf16 %v284_v4, %v276_v3  ;;  %v334_v54 = vld [vmem:[%s2715_s1 + $0x478] sm:$0xff]  ;;  %v325_v0 = vld [vmem:[%s2715_s1 + $0x430] sm:$0xff] }
  0x51   : > { %554 = vmatmul.mubr.f32.vlgmr.msra.gmra.mrb[0].mxu0 %v2036_v15  ;;  %v2268_v55 = vld [vmem:[%s1884_s10 + $0x78] sm:$0xff]  ;;  %v333_v2 = vld [vmem:[%s2715_s1 + $0x470] sm:$0xff]  ;;  %v340_v3 = vld [vmem:[%s2715_s1 + $0x4a8] sm:$0xff] }
  0x52   : > { %667 = vmatmul.mubr.f32.vlgmr.msra.gmra.mrb[0].mxu1 %v2036_v15  ;;  %1294 = vmatpush1.bf16.msra.mxu0 %v1293_v17  ;;  %v1375_v17 = vpack.c.bf16 %v286_v6, %v278_v5  ;;  %v348_v4 = vld [vmem:[%s2715_s1 + $0x4e8] sm:$0xff]  ;;  %v342_v5 = vld [vmem:[%s2715_s1 + $0x4b8] sm:$0xff]  ;;  %v339_v12 = vld [vmem:[%s2715_s1 + $0x4a0] sm:$0xff] }
  0x53   : > { %1358 = vmatpush1.bf16.msra.mxu1 %v1357_v18  ;;  %1296 = vmatprep.subr.bf16.mxu0 %v1295_v19  ;;  %v285_v18 = vld [vmem:[%s2715_s1 + $0x2f0] sm:$0xff]  ;;  %v292_v19 = vld [vmem:[%s2715_s1 + $0x328] sm:$0xff]  ;;  %v350_v6 = vld [vmem:[%s2715_s1 + $0x4f8] sm:$0xff] }
  0x54   : > { %1360 = vmatprep.subr.bf16.mxu1 %v1359_v23  ;;  %559 = vmatprep.mubr.f32.mxu0 %v2064_v29  ;;  %v2200_v23 = vld [vmem:[%s1884_s10 + $0x58] sm:$0xff]  ;;  %v1377_v26 = vpack.c.bf16 %v285_v18, %v277_v14  ;;  %v1315_v27 = vpack.c.bf16 %v300_v20, %v292_v19  ;;  %v347_v13 = vld [vmem:[%s2715_s1 + $0x4e0] sm:$0xff]  ;;  %v341_v14 = vld [vmem:[%s2715_s1 + $0x4b0] sm:$0xff] }
  0x55   : > { %672 = vmatprep.mubr.f32.mxu1 %v2064_v29  ;;  %560 = vmatmul.mubr.f32.gmra.mrb[2].mxu0 %v2068_v31  ;;  %v349_v18 = vld [vmem:[%s2715_s1 + $0x4f0] sm:$0xff]  ;;  %v356_v19 = vld [vmem:[%s2715_s1 + $0x528] sm:$0xff] }
  0x56   : > { %1298 = vmatpush1.bf16.msra.mxu0 %v1297_v30  ;;  %673 = vmatmul.mubr.f32.gmra.mrb[2].mxu1 %v2068_v31  ;;  %v299_v30 = vld [vmem:[%s2715_s1 + $0x360] sm:$0xff]  ;;  %v364_v20 = vld [vmem:[%s2715_s1 + $0x568] sm:$0xff] }
  0x57   : > { %1362 = vmatpush1.bf16.msra.mxu1 %v1361_v32  ;;  %1300 = vmatprep.subr.bf16.mxu0 %v1299_v33  ;;  %v293_v32 = vld [vmem:[%s2715_s1 + $0x330] sm:$0xff]  ;;  %v1379_v33 = vpack.c.bf16 %v302_v22, %v294_v21  ;;  %v1317_v40 = vpack.c.bf16 %v299_v30, %v291_v28  ;;  %v358_v21 = vld [vmem:[%s2715_s1 + $0x538] sm:$0xff]  ;;  %v355_v28 = vld [vmem:[%s2715_s1 + $0x520] sm:$0xff] }
  0x58   : > { %1364 = vmatprep.subr.bf16.mxu1 %v1363_v37  ;;  %565 = vmatprep.mubr.f32.mxu0 %v2098_v43  ;;  %v310_v37 = vld [vmem:[%s2715_s1 + $0x3b8] sm:$0xff]  ;;  %v1381_v42 = vpack.c.bf16 %v301_v34, %v293_v32  ;;  %v363_v30 = vld [vmem:[%s2715_s1 + $0x560] sm:$0xff]  ;;  %v357_v32 = vld [vmem:[%s2715_s1 + $0x530] sm:$0xff] }
  0x59   : > { %678 = vmatprep.mubr.f32.mxu1 %v2098_v43  ;;  %566 = vmatmul.mubr.f32.gmra.mrb[4].mxu0 %v2102_v45  ;;  %v1383_v49 = vpack.c.bf16 %v318_v38, %v310_v37  ;;  %v366_v22 = vld [vmem:[%s2715_s1 + $0x578] sm:$0xff]  ;;  %v372_v34 = vld [vmem:[%s2715_s1 + $0x5a8] sm:$0xff]  ;;  %v1333_v38 = vpack.c.bf16 %v363_v30, %v355_v28  ;;  %v427_v28 = vld [vmem:[%s2715_s1 + $0x760] sm:$0xff] }
  0x5a   : > { %1302 = vmatpush1.bf16.msra.mxu0 %v1301_v44  ;;  %679 = vmatmul.mubr.f32.gmra.mrb[4].mxu1 %v2102_v45  ;;  %v1319_v44 = vpack.c.bf16 %v316_v36, %v308_v35  ;;  %v380_v35 = vld [vmem:[%s2715_s1 + $0x5e8] sm:$0xff]  ;;  %v374_v36 = vld [vmem:[%s2715_s1 + $0x5b8] sm:$0xff]  ;;  %v421_v30 = vld [vmem:[%s2715_s1 + $0x730] sm:$0xff] }
  0x5b   : > { %1366 = vmatpush1.bf16.msra.mxu1 %v1365_v46  ;;  %1304 = vmatprep.subr.bf16.mxu0 %v1303_v47  ;;  %v307_v46 = vld [vmem:[%s2715_s1 + $0x3a0] sm:$0xff]  ;;  %v382_v37 = vld [vmem:[%s2715_s1 + $0x5f8] sm:$0xff] }
  0x5c   : > { %1368 = vmatprep.subr.bf16.mxu1 %v1367_v51  ;;  %571 = vmatprep.mubr.f32.mxu0 %v2132_v57  ;;  %v315_v47 = vld [vmem:[%s2715_s1 + $0x3e0] sm:$0xff]  ;;  %v324_v51 = vld [vmem:[%s2715_s1 + $0x428] sm:$0xff] }
  0x5d   : > { %684 = vmatprep.mubr.f32.mxu1 %v2132_v57  ;;  %572 = vmatmul.mubr.f32.gmra.mrb[6].mxu0 %v2136_v59  ;;  %v1321_v56 = vpack.c.bf16 %v315_v47, %v307_v46  ;;  %v379_v46 = vld [vmem:[%s2715_s1 + $0x5e0] sm:$0xff]  ;;  %v373_v47 = vld [vmem:[%s2715_s1 + $0x5b0] sm:$0xff] }
  0x5e   : > { %1306 = vmatpush1.bf16.msra.mxu0 %v1305_v58  ;;  %685 = vmatmul.mubr.f32.gmra.mrb[6].mxu1 %v2136_v59  ;;  %v2272_v58 = vld [vmem:[%s1884_s10 + $0x70] sm:$0xff]  ;;  %s1464_s10 = sshll.u32 %s1524_s27, 4  ;;  %s1465_s10 = int_to_ptr.vmem [resolvable:$false] %s1464_s10 }
  0x5f   : > { %1370 = vmatpush1.bf16.msra.mxu1 %v1369_v60  ;;  %1308 = vmatprep.subr.bf16.mxu0 %v1307_v61  ;;  %v1385_v60 = vpack.c.bf16 %v317_v50, %v309_v48  ;;  %v1323_v61 = vpack.c.bf16 %v332_v52, %v324_v51  ;;  %v1399_v48 = vpack.c.bf16 %v382_v37, %v374_v36  ;;  %v388_v50 = vld [vmem:[%s2715_s1 + $0x628] sm:$0xff]  ;;  %v390_v52 = vld [vmem:[%s2715_s1 + $0x638] sm:$0xff]  ;;  %s1466_s28 = scalar_lea.vmem %s1465_s10, 16384  ;;  %p1467_p0 = scmp.lt.s32.totalorder %s2665_s8, %s1465_s10 }
  0x60   : > { %1372 = vmatprep.subr.bf16.mxu1 %v1371_v1  ;;  %577 = vmatprep.mubr.f32.mxu0 %v2166_v7  ;;  %v1387_v1 = vpack.c.bf16 %v334_v54, %v326_v53  ;;  %v396_v51 = vld [vmem:[%s2715_s1 + $0x668] sm:$0xff]  ;;  %v398_v53 = vld [vmem:[%s2715_s1 + $0x678] sm:$0xff]  ;;  %p1468_p1 = scmp.lt.s32.totalorder %s1466_s28, %s1460_s26 }
  0x61   : > { %690 = vmatprep.mubr.f32.mxu1 %v2166_v7  ;;  %578 = vmatmul.mubr.f32.gmra.mrb[8].mxu0 %v2170_v9  ;;  %v446_v36 = vld [vmem:[%s2715_s1 + $0x7f8] sm:$0xff] }
  0x62   : > { %1310 = vmatpush1.bf16.msra.mxu0 %v1309_v8  ;;  %691 = vmatmul.mubr.f32.gmra.mrb[8].mxu1 %v2170_v9  ;;  %v1325_v8 = vpack.c.bf16 %v331_v63, %v323_v62  ;;  %v395_v62 = vld [vmem:[%s2715_s1 + $0x660] sm:$0xff]  ;;  %v389_v63 = vld [vmem:[%s2715_s1 + $0x630] sm:$0xff]  ;;  %p1469_p2 = por %p1468_p1, %p1467_p0 }
  0x63   : > { %1374 = vmatpush1.bf16.msra.mxu1 %v1373_v10  ;;  %1312 = vmatprep.subr.bf16.mxu0 %v1311_v11  ;;  %v1389_v10 = vpack.c.bf16 %v333_v2, %v325_v0  ;;  %v1327_v11 = vpack.c.bf16 %v348_v4, %v340_v3  ;;  %v1403_v0 = vpack.c.bf16 %v398_v53, %v390_v52  ;;  %v404_v2 = vld [vmem:[%s2715_s1 + $0x6a8] sm:$0xff]  ;;  %v406_v4 = vld [vmem:[%s2715_s1 + $0x6b8] sm:$0xff] }
  0x64   : > { %1376 = vmatprep.subr.bf16.mxu1 %v1375_v17  ;;  %583 = vmatprep.mubr.f32.mxu0 %v2200_v23  ;;  %v1391_v17 = vpack.c.bf16 %v350_v6, %v342_v5  ;;  %v412_v3 = vld [vmem:[%s2715_s1 + $0x6e8] sm:$0xff]  ;;  %v414_v5 = vld [vmem:[%s2715_s1 + $0x6f8] sm:$0xff]  ;;  %p1470_p3 = pnand %p1469_p2, %p1463_p13 }
  0x65   : > { %696 = vmatprep.mubr.f32.mxu1 %v2200_v23  ;;  %584 = vmatmul.mubr.f32.gmra.mrb[10].mxu0 %v2204_v25 }
  0x66   : > { %1314 = vmatpush1.bf16.msra.mxu0 %v1313_v24  ;;  %697 = vmatmul.mubr.f32.gmra.mrb[10].mxu1 %v2204_v25  ;;  %v1329_v24 = vpack.c.bf16 %v347_v13, %v339_v12  ;;  %v411_v12 = vld [vmem:[%s2715_s1 + $0x6e0] sm:$0xff]  ;;  %v405_v13 = vld [vmem:[%s2715_s1 + $0x6b0] sm:$0xff] }
  0x67   : > { %1378 = vmatpush1.bf16.msra.mxu1 %v1377_v26  ;;  %1316 = vmatprep.subr.bf16.mxu0 %v1315_v27  ;;  %v1393_v26 = vpack.c.bf16 %v349_v18, %v341_v14  ;;  %v1331_v27 = vpack.c.bf16 %v364_v20, %v356_v19  ;;  %v1407_v14 = vpack.c.bf16 %v414_v5, %v406_v4  ;;  %v420_v18 = vld [vmem:[%s2715_s1 + $0x728] sm:$0xff]  ;;  %v422_v20 = vld [vmem:[%s2715_s1 + $0x738] sm:$0xff] }
  0x68   : > { %1380 = vmatprep.subr.bf16.mxu1 %v1379_v33  ;;  %589 = vmatprep.mubr.f32.mxu0 %v2234_v39  ;;  %v365_v33 = vld [vmem:[%s2715_s1 + $0x570] sm:$0xff]  ;;  %v428_v19 = vld [vmem:[%s2715_s1 + $0x768] sm:$0xff] }
  0x69   : > { %702 = vmatprep.mubr.f32.mxu1 %v2234_v39  ;;  %590 = vmatmul.mubr.f32.gmra.mrb[12].mxu0 %v2238_v41 }
  0x6a   : > { %1318 = vmatpush1.bf16.msra.mxu0 %v1317_v40  ;;  %703 = vmatmul.mubr.f32.gmra.mrb[12].mxu1 %v2238_v41  ;;  %v1397_v40 = vpack.c.bf16 %v365_v33, %v357_v32  ;;  %v436_v33 = vld [vmem:[%s2715_s1 + $0x7a8] sm:$0xff] }
  0x6b   : > { %1382 = vmatpush1.bf16.msra.mxu1 %v1381_v42  ;;  %1320 = vmatprep.subr.bf16.mxu0 %v1319_v44  ;;  %v1335_v42 = vpack.c.bf16 %v380_v35, %v372_v34  ;;  %v371_v44 = vld [vmem:[%s2715_s1 + $0x5a0] sm:$0xff]  ;;  %v444_v34 = vld [vmem:[%s2715_s1 + $0x7e8] sm:$0xff]  ;;  %v438_v35 = vld [vmem:[%s2715_s1 + $0x7b8] sm:$0xff] }
  0x6c   : > { %1384 = vmatprep.subr.bf16.mxu1 %v1383_v49  ;;  %595 = vmatprep.mubr.f32.mxu0 %v2268_v55  ;;  %v381_v49 = vld [vmem:[%s2715_s1 + $0x5f0] sm:$0xff]  ;;  %v1337_v54 = vpack.c.bf16 %v379_v46, %v371_v44  ;;  %v443_v44 = vld [vmem:[%s2715_s1 + $0x7e0] sm:$0xff]  ;;  %v1415_v46 = vpack.c.bf16 %v446_v36, %v438_v35 }
  0x6d   : > { %708 = vmatprep.mubr.f32.mxu1 %v2268_v55  ;;  %596 = vmatmul.mubr.f32.gmra.mrb[14].mxu0 %v2272_v58 }
  0x6e   : > { %1322 = vmatpush1.bf16.msra.mxu0 %v1321_v56  ;;  %709 = vmatmul.mubr.f32.gmra.mrb[14].mxu1 %v2272_v58  ;;  %v1401_v56 = vpack.c.bf16 %v381_v49, %v373_v47  ;;  %v437_v47 = vld [vmem:[%s2715_s1 + $0x7b0] sm:$0xff] }
  0x6f   : > { %1386 = vmatpush1.bf16.msra.mxu1 %v1385_v60  ;;  %1324 = vmatprep.subr.bf16.mxu0 %v1323_v61  ;;  %v1339_v60 = vpack.c.bf16 %v396_v51, %v388_v50  ;;  %v387_v61 = vld [vmem:[%s2715_s1 + $0x620] sm:$0xff] }
  0x70   : > { %1388 = vmatprep.subr.bf16.mxu1 %v1387_v1  ;;  %779 = vmatprep.mubr.f32.mxu0 %v1905_v16  ;;  %v397_v1 = vld [vmem:[%s2715_s1 + $0x670] sm:$0xff]  ;;  %v1341_v6 = vpack.c.bf16 %v395_v62, %v387_v61 }
  0x71   : > { %892 = vmatprep.mubr.f32.mxu1 %v1905_v16  ;;  %v1395_v16 = vpack.c.bf16 %v366_v22, %v358_v21  ;;  %v430_v21 = vld [vmem:[%s2715_s1 + $0x778] sm:$0xff] }
  0x72   : > { %1326 = vmatpush1.bf16.msra.mxu0 %v1325_v8  ;;  %v1405_v8 = vpack.c.bf16 %v397_v1, %v389_v63  ;;  %v1411_v32 = vpack.c.bf16 %v430_v21, %v422_v20 }
  0x73   : > { %1390 = vmatpush1.bf16.msra.mxu1 %v1389_v10  ;;  %1328 = vmatprep.subr.bf16.mxu0 %v1327_v11  ;;  %v1343_v10 = vpack.c.bf16 %v412_v3, %v404_v2  ;;  %v403_v11 = vld [vmem:[%s2715_s1 + $0x6a0] sm:$0xff] }
  0x74   : > { %1392 = vmatprep.subr.bf16.mxu1 %v1391_v17  ;;  %v413_v17 = vld [vmem:[%s2715_s1 + $0x6f0] sm:$0xff]  ;;  %v1345_v22 = vpack.c.bf16 %v411_v12, %v403_v11 }
  0x76   : > { %1330 = vmatpush1.bf16.msra.mxu0 %v1329_v24  ;;  %v1409_v24 = vpack.c.bf16 %v413_v17, %v405_v13 }
  0x77   : > { %1394 = vmatpush1.bf16.msra.mxu1 %v1393_v26  ;;  %1332 = vmatprep.subr.bf16.mxu0 %v1331_v27  ;;  %v1347_v26 = vpack.c.bf16 %v428_v19, %v420_v18  ;;  %v419_v27 = vld [vmem:[%s2715_s1 + $0x720] sm:$0xff] }
  0x78   : > { %1396 = vmatprep.subr.bf16.mxu1 %v1395_v16  ;;  %v429_v16 = vld [vmem:[%s2715_s1 + $0x770] sm:$0xff]  ;;  %v1349_v37 = vpack.c.bf16 %v427_v28, %v419_v27 }
  0x7a   : > { %1334 = vmatpush1.bf16.msra.mxu0 %v1333_v38  ;;  %v1413_v38 = vpack.c.bf16 %v429_v16, %v421_v30 }
  0x7b   : > { %1398 = vmatpush1.bf16.msra.mxu1 %v1397_v40  ;;  %1336 = vmatprep.subr.bf16.mxu0 %v1335_v42  ;;  %v1351_v40 = vpack.c.bf16 %v444_v34, %v436_v33  ;;  %v435_v42 = vld [vmem:[%s2715_s1 + $0x7a0] sm:$0xff] }
  0x7c   : > { %1400 = vmatprep.subr.bf16.mxu1 %v1399_v48  ;;  %v445_v48 = vld [vmem:[%s2715_s1 + $0x7f0] sm:$0xff]  ;;  %v1353_v49 = vpack.c.bf16 %v443_v44, %v435_v42 }
  0x7d   : > { %v1417_v50 = vpack.c.bf16 %v445_v48, %v437_v47 }
  0x7e   : > { %1338 = vmatpush1.bf16.msra.mxu0 %v1337_v54 }
  0x7f   : > { %1402 = vmatpush1.bf16.msra.mxu1 %v1401_v56  ;;  %1340 = vmatprep.subr.bf16.mxu0 %v1339_v60 }
  0x80   : > { %1404 = vmatprep.subr.bf16.mxu1 %v1403_v0 }
  0x82   : > { %1342 = vmatpush1.bf16.msra.mxu0 %v1341_v6 }
  0x83   : > { %1406 = vmatpush1.bf16.msra.mxu1 %v1405_v8  ;;  %1344 = vmatprep.subr.bf16.mxu0 %v1343_v10 }
  0x84   : > { %1408 = vmatprep.subr.bf16.mxu1 %v1407_v14 }
  0x86   : > { %1346 = vmatpush1.bf16.msra.mxu0 %v1345_v22 }
  0x87   : > { %1410 = vmatpush1.bf16.msra.mxu1 %v1409_v24  ;;  %1348 = vmatprep.subr.bf16.mxu0 %v1347_v26 }
  0x88   : > { %1412 = vmatprep.subr.bf16.mxu1 %v1411_v32 }
  0x8a   : > { %1350 = vmatpush1.bf16.msra.mxu0 %v1349_v37 }
  0x8b   : > { %1414 = vmatpush1.bf16.msra.mxu1 %v1413_v38  ;;  %1352 = vmatprep.subr.bf16.mxu0 %v1351_v40 }
  0x8c   : > { %1416 = vmatprep.subr.bf16.mxu1 %v1415_v46 }
  0x8e   : > { %1354 = vmatpush1.bf16.msra.mxu0 %v1353_v49 }
  0x8f   : > { %1418 = vmatpush1.bf16.msra.mxu1 %v1417_v50 }
  0x91   : > { %780 = vmatmul.mubr.f32.vlgmr.msra.gmra.mrb[16].mxu0 %v2036_v15 }
  0x92   : > { %893 = vmatmul.mubr.f32.vlgmr.msra.gmra.mrb[16].mxu1 %v2036_v15  ;;  %785 = vmatprep.mubr.f32.mxu0 %v2064_v29  ;;  %v449_v15 = vlaneseq }
  0x93   : > { %898 = vmatprep.mubr.f32.mxu1 %v2064_v29 }
  0x94   : > { %v2490_v29 = vshrl.u32 %v449_v15, 7 }
  0x95   : > { %786 = vmatmul.mubr.f32.gmra.mrb[18].mxu0 %v2068_v31 }
  0x96   : > { %899 = vmatmul.mubr.f32.gmra.mrb[18].mxu1 %v2068_v31  ;;  %791 = vmatprep.mubr.f32.mxu0 %v2098_v43  ;;  %v451_v31 = vsub.s32 0, %v2490_v29 }
  0x97   : > { %904 = vmatprep.mubr.f32.mxu1 %v2098_v43  ;;  %v2496_v43 = vld [vmem:[%s2716_s2] sm:$0xff] }
  0x99   : > { %792 = vmatmul.mubr.f32.gmra.mrb[20].mxu0 %v2102_v45 }
  0x9a   : > { %905 = vmatmul.mubr.f32.gmra.mrb[20].mxu1 %v2102_v45  ;;  %797 = vmatprep.mubr.f32.mxu0 %v2132_v57  ;;  %v459_v45 = vsub.s32 2, %v2490_v29 }
  0x9b   : > { %910 = vmatprep.mubr.f32.mxu1 %v2132_v57  ;;  %v455_v57 = vsub.s32 1, %v2490_v29 }
  0x9d   : > { %798 = vmatmul.mubr.f32.gmra.mrb[22].mxu0 %v2136_v59 }
  0x9e   : > { %911 = vmatmul.mubr.f32.gmra.mrb[22].mxu1 %v2136_v59  ;;  %803 = vmatprep.mubr.f32.mxu0 %v2166_v7  ;;  %v463_v59 = vsub.s32 3, %v2490_v29 }
  0x9f   : > { %916 = vmatprep.mubr.f32.mxu1 %v2166_v7  ;;  %v2503_v7 = vrot.slane %v2496_v43, %v451_v31 }
  0xa1   : > { %804 = vmatmul.mubr.f32.gmra.mrb[24].mxu0 %v2170_v9 }
  0xa2   : > { %917 = vmatmul.mubr.f32.gmra.mrb[24].mxu1 %v2170_v9  ;;  %809 = vmatprep.mubr.f32.mxu0 %v2200_v23  ;;  %v2506_v9 = vrot.slane %v2496_v43, %v459_v45 }
  0xa3   : > { %922 = vmatprep.mubr.f32.mxu1 %v2200_v23  ;;  %v2509_v23 = vrot.slane %v2496_v43, %v455_v57 }
  0xa5   : > { %810 = vmatmul.mubr.f32.gmra.mrb[26].mxu0 %v2204_v25 }
  0xa6   : > { %923 = vmatmul.mubr.f32.gmra.mrb[26].mxu1 %v2204_v25  ;;  %815 = vmatprep.mubr.f32.mxu0 %v2234_v39  ;;  %v2514_v25 = vrot.slane %v2496_v43, %v463_v59 }
  0xa7   : > { %928 = vmatprep.mubr.f32.mxu1 %v2234_v39 }
  0xa9   : > { %816 = vmatmul.mubr.f32.gmra.mrb[28].mxu0 %v2238_v41 }
  0xaa   : > { %929 = vmatmul.mubr.f32.gmra.mrb[28].mxu1 %v2238_v41  ;;  %821 = vmatprep.mubr.f32.mxu0 %v2268_v55 }
  0xab   : > { %934 = vmatprep.mubr.f32.mxu1 %v2268_v55 }
  0xad   : > { %822 = vmatmul.mubr.f32.gmra.mrb[30].mxu0 %v2272_v58 }
  0xae   : > { %935 = vmatmul.mubr.f32.gmra.mrb[30].mxu1 %v2272_v58 }
 0x124   : > { %v555_v39 = vpop.f32.mrb[0].mxu0 }
 0x125   : > { %v556_v41 = vadd.f32 %v555_v39, %v2503_v7  ;;  %v668_v55 = vpop.f32.mrb[0].mxu1  ;;  %v557_v58 = vpop.f32.mrb[1].mxu0 }
 0x126   : > { %v669_v51 = vadd.f32 %v668_v55, %v2506_v9  ;;  %v558_v52 = vadd.f32 %v557_v58, %v2509_v23  ;;  %v670_v53 = vpop.f32.mrb[1].mxu1 }
 0x127   : > { %v941_v54 = vmax.f32 %v556_v41, 0.0  ;;  %v671_v56 = vadd.f32 %v670_v53, %v2514_v25 }
 0x128   : > { %v943_v60 = vmax.f32 %v669_v51, 0.0  ;;  %v942_v61 = vmax.f32 %v558_v52, 0.0  ;;  %v561_v62 = vpop.f32.mrb[2].mxu0 }
 0x129   : > { %1005 = vst [vmem:[%s2520_s19] sm:$0xff] %v941_v54  ;;  %v944_v63 = vmax.f32 %v671_v56, 0.0  ;;  %v562_v0 = vadd.f32 %v561_v62, %v2503_v7  ;;  %v674_v1 = vpop.f32.mrb[2].mxu1  ;;  %v563_v2 = vpop.f32.mrb[3].mxu0 }
 0x12a   : > { %1007 = vst [vmem:[%s2520_s19 + $0x10] sm:$0xff] %v943_v60  ;;  %1006 = vst [vmem:[%s2520_s19 + $0x8] sm:$0xff] %v942_v61  ;;  %v675_v3 = vadd.f32 %v674_v1, %v2506_v9  ;;  %v564_v4 = vadd.f32 %v563_v2, %v2509_v23  ;;  %v676_v5 = vpop.f32.mrb[3].mxu1 }
 0x12b   : > { %1008 = vst [vmem:[%s2520_s19 + $0x18] sm:$0xff] %v944_v63  ;;  %v949_v6 = vmax.f32 %v562_v0, 0.0  ;;  %v677_v8 = vadd.f32 %v676_v5, %v2514_v25 }
 0x12c   : > { %v951_v10 = vmax.f32 %v675_v3, 0.0  ;;  %v950_v11 = vmax.f32 %v564_v4, 0.0  ;;  %v567_v12 = vpop.f32.mrb[4].mxu0 }
 0x12d   : > { %1013 = vst [vmem:[%s2520_s19 + $0x40] sm:$0xff] %v949_v6  ;;  %v952_v13 = vmax.f32 %v677_v8, 0.0  ;;  %v568_v14 = vadd.f32 %v567_v12, %v2503_v7  ;;  %v680_v17 = vpop.f32.mrb[4].mxu1  ;;  %v569_v18 = vpop.f32.mrb[5].mxu0 }
 0x12e   : > { %1015 = vst [vmem:[%s2520_s19 + $0x50] sm:$0xff] %v951_v10  ;;  %1014 = vst [vmem:[%s2520_s19 + $0x48] sm:$0xff] %v950_v11  ;;  %v681_v19 = vadd.f32 %v680_v17, %v2506_v9  ;;  %v570_v20 = vadd.f32 %v569_v18, %v2509_v23  ;;  %v682_v21 = vpop.f32.mrb[5].mxu1 }
 0x12f   : > { %1016 = vst [vmem:[%s2520_s19 + $0x58] sm:$0xff] %v952_v13  ;;  %v957_v22 = vmax.f32 %v568_v14, 0.0  ;;  %v683_v24 = vadd.f32 %v682_v21, %v2514_v25 }
 0x130   : > { %v959_v26 = vmax.f32 %v681_v19, 0.0  ;;  %v958_v27 = vmax.f32 %v570_v20, 0.0  ;;  %v573_v28 = vpop.f32.mrb[6].mxu0 }
 0x131   : > { %1021 = vst [vmem:[%s2520_s19 + $0x80] sm:$0xff] %v957_v22  ;;  %v960_v30 = vmax.f32 %v683_v24, 0.0  ;;  %v574_v32 = vadd.f32 %v573_v28, %v2503_v7  ;;  %v686_v16 = vpop.f32.mrb[6].mxu1  ;;  %v575_v33 = vpop.f32.mrb[7].mxu0 }
 0x132   : > { %1023 = vst [vmem:[%s2520_s19 + $0x90] sm:$0xff] %v959_v26  ;;  %1022 = vst [vmem:[%s2520_s19 + $0x88] sm:$0xff] %v958_v27  ;;  %v687_v34 = vadd.f32 %v686_v16, %v2506_v9  ;;  %v576_v35 = vadd.f32 %v575_v33, %v2509_v23  ;;  %v688_v36 = vpop.f32.mrb[7].mxu1  ;;  %v475_v16 = vsub.s32 6, %v2490_v29 }
 0x133   : > { %1024 = vst [vmem:[%s2520_s19 + $0x98] sm:$0xff] %v960_v30  ;;  %v965_v37 = vmax.f32 %v574_v32, 0.0  ;;  %v689_v38 = vadd.f32 %v688_v36, %v2514_v25 }
 0x134   : > { %v967_v40 = vmax.f32 %v687_v34, 0.0  ;;  %v966_v42 = vmax.f32 %v576_v35, 0.0  ;;  %v579_v44 = vpop.f32.mrb[8].mxu0 }
 0x135   : > { %1029 = vst [vmem:[%s2520_s19 + $0xc0] sm:$0xff] %v965_v37  ;;  %v968_v46 = vmax.f32 %v689_v38, 0.0  ;;  %v580_v47 = vadd.f32 %v579_v44, %v2503_v7  ;;  %v692_v48 = vpop.f32.mrb[8].mxu1  ;;  %v581_v49 = vpop.f32.mrb[9].mxu0 }
 0x136   : > { %1031 = vst [vmem:[%s2520_s19 + $0xd0] sm:$0xff] %v967_v40  ;;  %1030 = vst [vmem:[%s2520_s19 + $0xc8] sm:$0xff] %v966_v42  ;;  %v693_v50 = vadd.f32 %v692_v48, %v2506_v9  ;;  %v582_v15 = vadd.f32 %v581_v49, %v2509_v23  ;;  %v694_v31 = vpop.f32.mrb[9].mxu1 }
 0x137   : > { %1032 = vst [vmem:[%s2520_s19 + $0xd8] sm:$0xff] %v968_v46  ;;  %v973_v45 = vmax.f32 %v580_v47, 0.0  ;;  %v695_v57 = vadd.f32 %v694_v31, %v2514_v25 }
 0x138   : > { %v975_v59 = vmax.f32 %v693_v50, 0.0  ;;  %v974_v39 = vmax.f32 %v582_v15, 0.0  ;;  %v585_v41 = vpop.f32.mrb[10].mxu0 }
 0x139   : > { %1037 = vst [vmem:[%s2520_s19 + $0x100] sm:$0xff] %v973_v45  ;;  %v976_v55 = vmax.f32 %v695_v57, 0.0  ;;  %v586_v58 = vadd.f32 %v585_v41, %v2503_v7  ;;  %v698_v51 = vpop.f32.mrb[10].mxu1  ;;  %v587_v52 = vpop.f32.mrb[11].mxu0 }
 0x13a   : > { %1039 = vst [vmem:[%s2520_s19 + $0x110] sm:$0xff] %v975_v59  ;;  %1038 = vst [vmem:[%s2520_s19 + $0x108] sm:$0xff] %v974_v39  ;;  %v699_v53 = vadd.f32 %v698_v51, %v2506_v9  ;;  %v588_v54 = vadd.f32 %v587_v52, %v2509_v23  ;;  %v700_v56 = vpop.f32.mrb[11].mxu1 }
 0x13b   : > { %1040 = vst [vmem:[%s2520_s19 + $0x118] sm:$0xff] %v976_v55  ;;  %v981_v60 = vmax.f32 %v586_v58, 0.0  ;;  %v701_v61 = vadd.f32 %v700_v56, %v2514_v25 }
 0x13c   : > { %v983_v62 = vmax.f32 %v699_v53, 0.0  ;;  %v982_v63 = vmax.f32 %v588_v54, 0.0  ;;  %v591_v0 = vpop.f32.mrb[12].mxu0 }
 0x13d   : > { %1045 = vst [vmem:[%s2520_s19 + $0x140] sm:$0xff] %v981_v60  ;;  %v984_v1 = vmax.f32 %v701_v61, 0.0  ;;  %v592_v2 = vadd.f32 %v591_v0, %v2503_v7  ;;  %v704_v3 = vpop.f32.mrb[12].mxu1  ;;  %v593_v4 = vpop.f32.mrb[13].mxu0 }
 0x13e   : > { %1047 = vst [vmem:[%s2520_s19 + $0x150] sm:$0xff] %v983_v62  ;;  %1046 = vst [vmem:[%s2520_s19 + $0x148] sm:$0xff] %v982_v63  ;;  %v705_v5 = vadd.f32 %v704_v3, %v2506_v9  ;;  %v594_v6 = vadd.f32 %v593_v4, %v2509_v23  ;;  %v706_v8 = vpop.f32.mrb[13].mxu1 }
 0x13f   : > { %1048 = vst [vmem:[%s2520_s19 + $0x158] sm:$0xff] %v984_v1  ;;  %v989_v10 = vmax.f32 %v592_v2, 0.0  ;;  %v707_v11 = vadd.f32 %v706_v8, %v2514_v25 }
 0x140   : > { %v991_v12 = vmax.f32 %v705_v5, 0.0  ;;  %v990_v13 = vmax.f32 %v594_v6, 0.0  ;;  %v597_v14 = vpop.f32.mrb[14].mxu0 }
 0x141   : > { %1053 = vst [vmem:[%s2520_s19 + $0x180] sm:$0xff] %v989_v10  ;;  %v992_v17 = vmax.f32 %v707_v11, 0.0  ;;  %v598_v18 = vadd.f32 %v597_v14, %v2503_v7  ;;  %v710_v19 = vpop.f32.mrb[14].mxu1  ;;  %v599_v20 = vpop.f32.mrb[15].mxu0  ;;  %v467_v7 = vsub.s32 4, %v2490_v29 }
 0x142   : > { %1055 = vst [vmem:[%s2520_s19 + $0x190] sm:$0xff] %v991_v12  ;;  %1054 = vst [vmem:[%s2520_s19 + $0x188] sm:$0xff] %v990_v13  ;;  %v711_v21 = vadd.f32 %v710_v19, %v2506_v9  ;;  %v600_v22 = vadd.f32 %v599_v20, %v2509_v23  ;;  %v712_v24 = vpop.f32.mrb[15].mxu1  ;;  %v471_v9 = vsub.s32 5, %v2490_v29  ;;  %v479_v23 = vsub.s32 7, %v2490_v29 }
 0x143   : > { %1056 = vst [vmem:[%s2520_s19 + $0x198] sm:$0xff] %v992_v17  ;;  %v997_v26 = vmax.f32 %v598_v18, 0.0  ;;  %v713_v27 = vadd.f32 %v712_v24, %v2514_v25  ;;  %v2587_v33 = vrot.slane %v2496_v43, %v467_v7  ;;  %v2590_v25 = vrot.slane %v2496_v43, %v475_v16 }
 0x144   : > { %v999_v28 = vmax.f32 %v711_v21, 0.0  ;;  %v998_v30 = vmax.f32 %v600_v22, 0.0  ;;  %v2593_v34 = vrot.slane %v2496_v43, %v471_v9  ;;  %v2596_v35 = vrot.slane %v2496_v43, %v479_v23 }
 0x145   : > { %1061 = vst [vmem:[%s2520_s19 + $0x1c0] sm:$0xff] %v997_v26  ;;  %v1000_v32 = vmax.f32 %v713_v27, 0.0 }
 0x146   : > { %1063 = vst [vmem:[%s2520_s19 + $0x1d0] sm:$0xff] %v999_v28  ;;  %1062 = vst [vmem:[%s2520_s19 + $0x1c8] sm:$0xff] %v998_v30 }
 0x147   : > { %1064 = vst [vmem:[%s2520_s19 + $0x1d8] sm:$0xff] %v1000_v32 }
 0x164   : > { %v781_v36 = vpop.f32.mrb[16].mxu0 }
 0x165   : > { %v782_v37 = vadd.f32 %v781_v36, %v2587_v33  ;;  %v894_v38 = vpop.f32.mrb[16].mxu1  ;;  %v783_v29 = vpop.f32.mrb[17].mxu0 }
 0x166   : > { %v895_v40 = vadd.f32 %v894_v38, %v2590_v25  ;;  %v784_v42 = vadd.f32 %v783_v29, %v2593_v34  ;;  %v896_v44 = vpop.f32.mrb[17].mxu1 }
 0x167   : > { %v945_v46 = vmax.f32 %v782_v37, 0.0  ;;  %v897_v47 = vadd.f32 %v896_v44, %v2596_v35 }
 0x168   : > { %v947_v48 = vmax.f32 %v895_v40, 0.0  ;;  %v946_v49 = vmax.f32 %v784_v42, 0.0  ;;  %v787_v43 = vpop.f32.mrb[18].mxu0 }
 0x169   : > { %1009 = vst [vmem:[%s2520_s19 + $0x20] sm:$0xff] %v945_v46  ;;  %v948_v50 = vmax.f32 %v897_v47, 0.0  ;;  %v788_v15 = vadd.f32 %v787_v43, %v2587_v33  ;;  %v900_v31 = vpop.f32.mrb[18].mxu1  ;;  %v789_v45 = vpop.f32.mrb[19].mxu0 }
 0x16a   : > { %1011 = vst [vmem:[%s2520_s19 + $0x30] sm:$0xff] %v947_v48  ;;  %1010 = vst [vmem:[%s2520_s19 + $0x28] sm:$0xff] %v946_v49  ;;  %v901_v57 = vadd.f32 %v900_v31, %v2590_v25  ;;  %v790_v59 = vadd.f32 %v789_v45, %v2593_v34  ;;  %v902_v39 = vpop.f32.mrb[19].mxu1 }
 0x16b   : > { %1012 = vst [vmem:[%s2520_s19 + $0x38] sm:$0xff] %v948_v50  ;;  %v953_v41 = vmax.f32 %v788_v15, 0.0  ;;  %v903_v55 = vadd.f32 %v902_v39, %v2596_v35 }
 0x16c   : > { %v955_v58 = vmax.f32 %v901_v57, 0.0  ;;  %v954_v51 = vmax.f32 %v790_v59, 0.0  ;;  %v793_v52 = vpop.f32.mrb[20].mxu0 }
 0x16d   : > { %1017 = vst [vmem:[%s2520_s19 + $0x60] sm:$0xff] %v953_v41  ;;  %v956_v53 = vmax.f32 %v903_v55, 0.0  ;;  %v794_v54 = vadd.f32 %v793_v52, %v2587_v33  ;;  %v906_v56 = vpop.f32.mrb[20].mxu1  ;;  %v795_v60 = vpop.f32.mrb[21].mxu0 }
 0x16e   : > { %1019 = vst [vmem:[%s2520_s19 + $0x70] sm:$0xff] %v955_v58  ;;  %1018 = vst [vmem:[%s2520_s19 + $0x68] sm:$0xff] %v954_v51  ;;  %v907_v61 = vadd.f32 %v906_v56, %v2590_v25  ;;  %v796_v62 = vadd.f32 %v795_v60, %v2593_v34  ;;  %v908_v63 = vpop.f32.mrb[21].mxu1 }
 0x16f   : > { %1020 = vst [vmem:[%s2520_s19 + $0x78] sm:$0xff] %v956_v53  ;;  %v961_v0 = vmax.f32 %v794_v54, 0.0  ;;  %v909_v1 = vadd.f32 %v908_v63, %v2596_v35 }
 0x170   : > { %v963_v2 = vmax.f32 %v907_v61, 0.0  ;;  %v962_v3 = vmax.f32 %v796_v62, 0.0  ;;  %v799_v4 = vpop.f32.mrb[22].mxu0 }
 0x171   : > { %1025 = vst [vmem:[%s2520_s19 + $0xa0] sm:$0xff] %v961_v0  ;;  %v964_v5 = vmax.f32 %v909_v1, 0.0  ;;  %v800_v6 = vadd.f32 %v799_v4, %v2587_v33  ;;  %v912_v8 = vpop.f32.mrb[22].mxu1  ;;  %v801_v10 = vpop.f32.mrb[23].mxu0 }
 0x172   : > { %1027 = vst [vmem:[%s2520_s19 + $0xb0] sm:$0xff] %v963_v2  ;;  %1026 = vst [vmem:[%s2520_s19 + $0xa8] sm:$0xff] %v962_v3  ;;  %v913_v11 = vadd.f32 %v912_v8, %v2590_v25  ;;  %v802_v12 = vadd.f32 %v801_v10, %v2593_v34  ;;  %v914_v13 = vpop.f32.mrb[23].mxu1 }
 0x173   : > { %1028 = vst [vmem:[%s2520_s19 + $0xb8] sm:$0xff] %v964_v5  ;;  %v969_v14 = vmax.f32 %v800_v6, 0.0  ;;  %v915_v17 = vadd.f32 %v914_v13, %v2596_v35 }
 0x174   : > { %v971_v18 = vmax.f32 %v913_v11, 0.0  ;;  %v970_v19 = vmax.f32 %v802_v12, 0.0  ;;  %v805_v20 = vpop.f32.mrb[24].mxu0 }
 0x175   : > { %1033 = vst [vmem:[%s2520_s19 + $0xe0] sm:$0xff] %v969_v14  ;;  %v972_v21 = vmax.f32 %v915_v17, 0.0  ;;  %v806_v22 = vadd.f32 %v805_v20, %v2587_v33  ;;  %v918_v24 = vpop.f32.mrb[24].mxu1  ;;  %v807_v26 = vpop.f32.mrb[25].mxu0 }
 0x176   : > { %1035 = vst [vmem:[%s2520_s19 + $0xf0] sm:$0xff] %v971_v18  ;;  %1034 = vst [vmem:[%s2520_s19 + $0xe8] sm:$0xff] %v970_v19  ;;  %v919_v27 = vadd.f32 %v918_v24, %v2590_v25  ;;  %v808_v28 = vadd.f32 %v807_v26, %v2593_v34  ;;  %v920_v30 = vpop.f32.mrb[25].mxu1 }
 0x177   : > { %1036 = vst [vmem:[%s2520_s19 + $0xf8] sm:$0xff] %v972_v21  ;;  %v977_v32 = vmax.f32 %v806_v22, 0.0  ;;  %v921_v7 = vadd.f32 %v920_v30, %v2596_v35 }
 0x178   : > { %v979_v16 = vmax.f32 %v919_v27, 0.0  ;;  %v978_v9 = vmax.f32 %v808_v28, 0.0  ;;  %v811_v23 = vpop.f32.mrb[26].mxu0 }
 0x179   : > { %1041 = vst [vmem:[%s2520_s19 + $0x120] sm:$0xff] %v977_v32  ;;  %v980_v36 = vmax.f32 %v921_v7, 0.0  ;;  %v812_v37 = vadd.f32 %v811_v23, %v2587_v33  ;;  %v924_v38 = vpop.f32.mrb[26].mxu1  ;;  %v813_v29 = vpop.f32.mrb[27].mxu0 }
 0x17a   : > { %1043 = vst [vmem:[%s2520_s19 + $0x130] sm:$0xff] %v979_v16  ;;  %1042 = vst [vmem:[%s2520_s19 + $0x128] sm:$0xff] %v978_v9  ;;  %v925_v40 = vadd.f32 %v924_v38, %v2590_v25  ;;  %v814_v42 = vadd.f32 %v813_v29, %v2593_v34  ;;  %v926_v44 = vpop.f32.mrb[27].mxu1 }
 0x17b   : > { %1044 = vst [vmem:[%s2520_s19 + $0x138] sm:$0xff] %v980_v36  ;;  %v985_v46 = vmax.f32 %v812_v37, 0.0  ;;  %v927_v47 = vadd.f32 %v926_v44, %v2596_v35 }
 0x17c   : > { %v987_v48 = vmax.f32 %v925_v40, 0.0  ;;  %v986_v49 = vmax.f32 %v814_v42, 0.0  ;;  %v817_v43 = vpop.f32.mrb[28].mxu0 }
 0x17d   : > { %1049 = vst [vmem:[%s2520_s19 + $0x160] sm:$0xff] %v985_v46  ;;  %v988_v50 = vmax.f32 %v927_v47, 0.0  ;;  %v818_v15 = vadd.f32 %v817_v43, %v2587_v33  ;;  %v930_v31 = vpop.f32.mrb[28].mxu1  ;;  %v819_v45 = vpop.f32.mrb[29].mxu0 }
 0x17e   : > { %1051 = vst [vmem:[%s2520_s19 + $0x170] sm:$0xff] %v987_v48  ;;  %1050 = vst [vmem:[%s2520_s19 + $0x168] sm:$0xff] %v986_v49  ;;  %v931_v57 = vadd.f32 %v930_v31, %v2590_v25  ;;  %v820_v59 = vadd.f32 %v819_v45, %v2593_v34  ;;  %v932_v39 = vpop.f32.mrb[29].mxu1 }
 0x17f   : > { %1052 = vst [vmem:[%s2520_s19 + $0x178] sm:$0xff] %v988_v50  ;;  %v993_v41 = vmax.f32 %v818_v15, 0.0  ;;  %v933_v55 = vadd.f32 %v932_v39, %v2596_v35 }
 0x180   : > { %v995_v58 = vmax.f32 %v931_v57, 0.0  ;;  %v994_v51 = vmax.f32 %v820_v59, 0.0  ;;  %v823_v52 = vpop.f32.mrb[30].mxu0 }
 0x181   : > { %1057 = vst [vmem:[%s2520_s19 + $0x1a0] sm:$0xff] %v993_v41  ;;  %v996_v53 = vmax.f32 %v933_v55, 0.0  ;;  %v824_v54 = vadd.f32 %v823_v52, %v2587_v33  ;;  %v936_v56 = vpop.f32.mrb[30].mxu1  ;;  %v825_v60 = vpop.f32.mrb[31].mxu0 }
 0x182   : > { %1059 = vst [vmem:[%s2520_s19 + $0x1b0] sm:$0xff] %v995_v58  ;;  %1058 = vst [vmem:[%s2520_s19 + $0x1a8] sm:$0xff] %v994_v51  ;;  %v937_v61 = vadd.f32 %v936_v56, %v2590_v25  ;;  %v826_v62 = vadd.f32 %v825_v60, %v2593_v34  ;;  %v938_v63 = vpop.f32.mrb[31].mxu1 }
 0x183   : > { %1060 = vst [vmem:[%s2520_s19 + $0x1b8] sm:$0xff] %v996_v53  ;;  %v1001_v0 = vmax.f32 %v824_v54, 0.0  ;;  %v939_v33 = vadd.f32 %v938_v63, %v2596_v35 }
 0x184   : > { %v1003_v1 = vmax.f32 %v937_v61, 0.0  ;;  %v1002_v2 = vmax.f32 %v826_v62, 0.0 }
 0x185   : > { %1065 = vst [vmem:[%s2520_s19 + $0x1e0] sm:$0xff] %v1001_v0  ;;  %v1004_v25 = vmax.f32 %v939_v33, 0.0 }
 0x186   : > { %1067 = vst [vmem:[%s2520_s19 + $0x1f0] sm:$0xff] %v1003_v1  ;;  %1066 = vst [vmem:[%s2520_s19 + $0x1e8] sm:$0xff] %v1002_v2 }
 0x187   : > { %1068 = vst [vmem:[%s2520_s19 + $0x1f8] sm:$0xff] %v1004_v25 }
 0x188   : > { %1473 = shalt.err (!%p1470_p3)
}
 0x189   : > { %s1474_s29 = scalar_lea.hbm %s2663_s7, 8192  ;;  %s1478_s5 = scalar_lea.hbm %s2717_s3, 16384 }
 0x18a   : > { %p1475_p4 = scmp.ne.s32.totalorder %s2663_s7, %s1474_s29  ;;  %p1479_p9 = scmp.lt.u32.totalorder %s2663_s7, %s2717_s3 }
 0x18b   : > { %p1480_p10 = scmp.lt.u32.totalorder %s1478_s5, %s1474_s29  ;;  %p1482_p12 = scmp.lt.u32.totalorder %s1474_s29, %s2663_s7 }
 0x18c   : > { %p1476_p7 = pnand %p1475_p4, %p1585_p5 }
 0x18d   : > { %p1481_p11 = por %p1480_p10, %p1479_p9 }
 0x18e   : > { %p1477_p8 = pneg %p1476_p7 }
 0x18f   : > { %p1483_p13 = por %p1482_p12, %p1481_p11 }
 0x191   : > { %p1484_p0 = pnand %p1483_p13, %p1477_p8 }
 0x193   : > { %1487 = shalt.err (!%p1484_p0)
}
 0x194   : > { %s1525_s11 = smov 1024   ;;  %s1526_s17 = smov 64  }
 0x195   : > { %1419 = dma.vmem_to_hbm [thread:$0]  (%p1585_p5), %s2665_s8, 8192, %s2663_s7, %s2673_s25, %s1525_s11, %s1525_s11, %s1526_s17  }
 0x196 PF: > { %p1425_p1 = scmp.ge.s32.totalorder %s1522_s15, 2  ;;  %s1099_s19 = sand.u32 1, %s1510_s12  }
 0x197   : > { %s1100_s20 = scalar_lea.sflag [#allocation3], %s1099_s19 }
 0x198   : > { %p1422_p2 = pnand %p1425_p1, %p1589_p6 }
 0x19a   : > { %1505 = dma.done.wait (!%p1422_p2), %s1100_s20, 8192  }
 0x19b   : > { %1507 = vsyncadd (!%p1422_p2), %s1100_s20, 4294959104  ;;  %p13_p3 = scmp.ge.s32.totalorder %s1572_s18, 4   ;;  %s2721_s12 = smov %s1514_s13 }
 0x19c   : > { %s2722_s13 = smov %s1518_s14  ;;  %s2723_s14 = smov %s1583_s21 }
 0x19d   : > { %s2724_s15 = smov %s1572_s18  ;;  %15 = sbr.rel (!%p13_p3) target bundleno = 3 (0x3), region = 67 }
 0x1a4   :  { %1105 = vsyncpa [#allocation3], 1 }
 0x1a5   :  { %1107 = vsyncpa [#allocation3 + $0x1], 1 }

// kernel: encoder_forward.13
= control target key start
LH: loop header
LB: loop body
LE: loop exit
PB: predicated region body
PF: predicated region fallthrough
CT: control target
= control target key end

     0   :  { %s9022_s21 = smov 0   ;;  %s13864_s0 = inlined_call_operand.vmem [shape: f32[128,64], index: 0, kind: input, shape index: {}]   ;;  %s13865_s1 = inlined_call_operand.vmem [shape: f32[128,8,64], index: 1, kind: input, shape index: {}]   ;;  %s13866_s2 = inlined_call_operand.vmem [shape: f32[128,8,64], index: 2, kind: input, shape index: {}]   ;;  %s13867_s3 = inlined_call_operand.vmem [shape: f32[128,8,3], index: 3, kind: input, shape index: {}]   ;;  %s13868_s4 = inlined_call_operand.vmem [shape: f32[3,3], index: 4, kind: input, shape index: {}]   ;;  %s13869_s5 = inlined_call_operand.vmem [shape: f32[1,3], index: 5, kind: input, shape index: {}]   ;;  %s13870_s6 = inlined_call_operand.vmem [shape: f32[3,64], index: 6, kind: input, shape index: {}]   ;;  %s13871_s7 = inlined_call_operand.vmem [shape: f32[1,64], index: 7, kind: input, shape index: {}]   ;;  %s13872_s8 = inlined_call_operand.vmem [shape: f32[1,64], index: 8, kind: input, shape index: {}]   ;;  %s13873_s9 = inlined_call_operand.vmem [shape: f32[1,64], index: 9, kind: input, shape index: {}]   ;;  %s13874_s10 = inlined_call_operand.vmem [shape: f32[64,8], index: 10, kind: input, shape index: {}]   ;;  %s13875_s11 = inlined_call_operand.vmem [shape: f32[1,8], index: 11, kind: input, shape index: {}]   ;;  %s13876_s12 = inlined_call_operand.vmem [shape: f32[8,64], index: 12, kind: input, shape index: {}]   ;;  %s13877_s13 = inlined_call_operand.vmem [shape: f32[1,64], index: 13, kind: input, shape index: {}]   ;;  %s13878_s14 = inlined_call_operand.vmem [shape: f32[1,64], index: 14, kind: input, shape index: {}]   ;;  %s13879_s15 = inlined_call_operand.vmem [shape: f32[1,64], index: 15, kind: input, shape index: {}]   ;;  %s13880_s16 = inlined_call_operand.vmem [shape: f32[128,64], index: 16, kind: output, shape index: {}]  }
   0x1   :  { %14023 = sst [smem:[#allocation94_spill]] %s13864_s0 }
   0x2 LB: > { %s7981_s22 = sadd.s32 4294967295, %s8931_s21   ;;  %p7985_p0 = scmp.ge.s32.totalorder %s8931_s21, 1  ;;  %s8931_s21 = sphi %s9022_s21, %s26_s21  }
   0x3   : > { %p496_p1 = scmp.lt.s32.totalorder %s8931_s21, 3 }
   0x5   : > { %p497_p2 = pnand %p7985_p0, %p496_p1 }
   0x7   : > { %500 = sbr.rel (%p497_p2) target bundleno = 1868 (0x74c), region = 84 }
   0xe   : > { %s7988_s23 = sshll.u32 %s7981_s22, 6  ;;  %v13883_v0 = vmov 0   ;;  %v13885_v16 = vmov 2   ;;  %v13881_v23 = vmov 1   ;;  %s7986_s19 = sshll.u32 %s7981_s22, 3  ;;  %vm4400_vm0 = vcmask 523264  }
   0xf   : > { %8516 = vset.pattern.permute.xlu1 %v13883_v0  ;;  %8515 = vset.pattern.permute.xlu0 %v13883_v0  ;;  %p568_p3 = scmp.lt.s32.totalorder %s7988_s23, 127  ;;  %p562_p4 = scmp.lt.s32.totalorder %s7986_s19, 15  ;;  %vm5043_vm1 = vcmask 64512   ;;  %vm7755_vm2 = vcmask 1041409   ;;  %vm7758_vm3 = vcmask 1042434   ;;  %vm7761_vm4 = vcmask 1043459  }
  0x10   : > { %vm7764_vm5 = vcmask 1044484   ;;  %vm7767_vm6 = vcmask 1045509   ;;  %vm7770_vm7 = vcmask 1046534   ;;  %vm7773_vm8 = vcmask 1047559  }
  0x11   : > { %s14543_s23 = smov (!%p568_p3, %s7988_s23), 127  ;;  %s14545_s19 = smov (!%p562_p4, %s7986_s19), 15 }
  0x12   : > { %s9034_s24 = sshll.u32 %s14543_s23, 3  ;;  %s7987_s22 = sshll.u32 %s14545_s19, 3 }
  0x13   : > { %s9040_s27 = scalar_lea.vmem %s13867_s3, %s9034_s24  ;;  %s10435_s23 = scalar_lea.vmem %s13865_s1, %s9034_s24 }
  0x14   : > { %v9043_v1 = vld [vmem:[%s9040_s27 + $0x10] sm:$0xff]  ;;  %v9046_v2 = vld [vmem:[%s9040_s27] sm:$0xff]  ;;  %v9051_v3 = vld [vmem:[%s9040_s27 + $0x18] sm:$0xff]  ;;  %s12578_s29 = scalar_lea.vmem %s13880_s16, %s7987_s22 }
  0x15   : > { %805 = vperm.xlu1 %8516, %v9043_v1   ;;  %795 = vperm.xlu0 %8515, %v9046_v2   ;;  %v9054_v4 = vld [vmem:[%s9040_s27 + $0x8] sm:$0xff]  ;;  %v9062_v6 = vld [vmem:[%s9040_s27 + $0x20] sm:$0xff]  ;;  %v9067_v7 = vld [vmem:[%s9040_s27 + $0x38] sm:$0xff] }
  0x16   : > { %v9059_v5 = vld [vmem:[%s9040_s27 + $0x28] sm:$0xff]  ;;  %v9070_v8 = vld [vmem:[%s9040_s27 + $0x30] sm:$0xff]  ;;  %v9078_v10 = vld [vmem:[%s9040_s27 + $0x40] sm:$0xff] }
  0x17   : > { %v9075_v9 = vld [vmem:[%s9040_s27 + $0x48] sm:$0xff]  ;;  %v9083_v11 = vld [vmem:[%s9040_s27 + $0x58] sm:$0xff]  ;;  %v9086_v12 = vld [vmem:[%s9040_s27 + $0x50] sm:$0xff] }
  0x18   : > { %v9091_v13 = vld [vmem:[%s9040_s27 + $0x68] sm:$0xff]  ;;  %v9094_v14 = vld [vmem:[%s9040_s27 + $0x60] sm:$0xff]  ;;  %v9099_v15 = vld [vmem:[%s9040_s27 + $0x78] sm:$0xff] }
  0x19   : > { %810 = vperm.xlu1 %8516, %v9051_v3   ;;  %800 = vperm.xlu0 %8515, %v9054_v4   ;;  %v9105_v17 = vld [vmem:[%s9040_s27 + $0x88] sm:$0xff]  ;;  %v9110_v18 = vld [vmem:[%s9040_s27 + $0x98] sm:$0xff]  ;;  %v9255_v49 = vld [vmem:[%s9040_s27 + $0x70] sm:$0xff] }
  0x1a   : > { %v9115_v19 = vld [vmem:[%s9040_s27 + $0xa8] sm:$0xff]  ;;  %v9120_v20 = vld [vmem:[%s9040_s27 + $0xb8] sm:$0xff]  ;;  %v9262_v51 = vld [vmem:[%s9040_s27 + $0x80] sm:$0xff] }
  0x1b   : > { %v9125_v21 = vld [vmem:[%s9040_s27 + $0xc8] sm:$0xff]  ;;  %v9130_v22 = vld [vmem:[%s9040_s27 + $0xd8] sm:$0xff]  ;;  %v9269_v53 = vld [vmem:[%s9040_s27 + $0x90] sm:$0xff] }
  0x1c   : > { %v9135_v24 = vld [vmem:[%s9040_s27 + $0xe8] sm:$0xff]  ;;  %v9140_v25 = vld [vmem:[%s9040_s27 + $0xf8] sm:$0xff]  ;;  %v9276_v55 = vld [vmem:[%s9040_s27 + $0xa0] sm:$0xff] }
  0x1d   : > { %820 = vperm.xlu1 %8516, %v9059_v5   ;;  %815 = vperm.xlu0 %8515, %v9062_v6   ;;  %v9145_v26 = vld [vmem:[%s9040_s27 + $0x108] sm:$0xff]  ;;  %v9150_v27 = vld [vmem:[%s9040_s27 + $0x118] sm:$0xff]  ;;  %v9283_v57 = vld [vmem:[%s9040_s27 + $0xb0] sm:$0xff] }
  0x1e   : > { %v9155_v28 = vld [vmem:[%s9040_s27 + $0x128] sm:$0xff]  ;;  %v9160_v29 = vld [vmem:[%s9040_s27 + $0x138] sm:$0xff]  ;;  %v9290_v59 = vld [vmem:[%s9040_s27 + $0xc0] sm:$0xff] }
  0x1f   : > { %v9165_v30 = vld [vmem:[%s9040_s27 + $0x148] sm:$0xff]  ;;  %v9170_v31 = vld [vmem:[%s9040_s27 + $0x158] sm:$0xff]  ;;  %v9297_v61 = vld [vmem:[%s9040_s27 + $0xd0] sm:$0xff] }
  0x20   : > { %v9175_v32 = vld [vmem:[%s9040_s27 + $0x168] sm:$0xff]  ;;  %v9180_v33 = vld [vmem:[%s9040_s27 + $0x178] sm:$0xff]  ;;  %v9303_v63 = vld [vmem:[%s9040_s27 + $0xe0] sm:$0xff] }
  0x21   : > { %830 = vperm.xlu1 %8516, %v9067_v7   ;;  %825 = vperm.xlu0 %8515, %v9070_v8   ;;  %v9185_v34 = vld [vmem:[%s9040_s27 + $0x188] sm:$0xff]  ;;  %v9190_v35 = vld [vmem:[%s9040_s27 + $0x198] sm:$0xff]  ;;  %v9327_v0 = vld [vmem:[%s9040_s27 + $0x120] sm:$0xff] }
  0x22   : > { %v9195_v36 = vld [vmem:[%s9040_s27 + $0x1a8] sm:$0xff]  ;;  %v9200_v37 = vld [vmem:[%s9040_s27 + $0x1b8] sm:$0xff] }
  0x23   : > { %v9205_v38 = vld [vmem:[%s9040_s27 + $0x1c8] sm:$0xff]  ;;  %v9210_v39 = vld [vmem:[%s9040_s27 + $0x1d8] sm:$0xff] }
  0x24   : > { %v9215_v40 = vld [vmem:[%s9040_s27 + $0x1e8] sm:$0xff]  ;;  %v9220_v41 = vld [vmem:[%s9040_s27 + $0x1f8] sm:$0xff] }
  0x25   : > { %840 = vperm.xlu1 %8516, %v9075_v9   ;;  %835 = vperm.xlu0 %8515, %v9078_v10  }
  0x29   : > { %850 = vperm.xlu1 %8516, %v9083_v11   ;;  %845 = vperm.xlu0 %8515, %v9086_v12  }
  0x2d   : > { %860 = vperm.xlu1 %8516, %v9091_v13   ;;  %855 = vperm.xlu0 %8515, %v9094_v14  }
  0x31   : > { %870 = vperm.xlu1 %8516, %v9099_v15   ;;  %8519 = vset.pattern.permute.xlu0 %v13885_v16 }
  0x32   : > { %1646 = vperm.xlu0 %8519, %v9054_v4  }
  0x35   : > { %880 = vperm.xlu1 %8516, %v9105_v17  }
  0x36   : > { %1658 = vperm.xlu0 %8519, %v9062_v6  }
  0x39   : > { %890 = vperm.xlu1 %8516, %v9110_v18  }
  0x3a   : > { %1666 = vperm.xlu0 %8519, %v9070_v8  }
  0x3d   : > { %900 = vperm.xlu1 %8516, %v9115_v19  }
  0x3e   : > { %1674 = vperm.xlu0 %8519, %v9078_v10  }
  0x41   : > { %910 = vperm.xlu1 %8516, %v9120_v20  }
  0x42   : > { %1682 = vperm.xlu0 %8519, %v9086_v12  }
  0x45   : > { %920 = vperm.xlu1 %8516, %v9125_v21  }
  0x46   : > { %1690 = vperm.xlu0 %8519, %v9094_v14  }
  0x49   : > { %930 = vperm.xlu1 %8516, %v9130_v22  }
  0x4a   : > { %8520 = vset.pattern.permute.xlu0 %v13881_v23 }
  0x4b   : > { %1253 = vperm.xlu0 %8520, %v9046_v2  }
  0x4d   : > { %940 = vperm.xlu1 %8516, %v9135_v24  }
  0x4f   : > { %1265 = vperm.xlu0 %8520, %v9051_v3  }
  0x51   : > { %950 = vperm.xlu1 %8516, %v9140_v25  }
  0x53   : > { %1273 = vperm.xlu0 %8520, %v9059_v5  }
  0x55   : > { %960 = vperm.xlu1 %8516, %v9145_v26  }
  0x57   : > { %1281 = vperm.xlu0 %8520, %v9067_v7  }
  0x59   : > { %970 = vperm.xlu1 %8516, %v9150_v27  }
  0x5b   : > { %1289 = vperm.xlu0 %8520, %v9075_v9  }
  0x5d   : > { %980 = vperm.xlu1 %8516, %v9155_v28  }
  0x5f   : > { %1297 = vperm.xlu0 %8520, %v9083_v11  }
  0x61   : > { %990 = vperm.xlu1 %8516, %v9160_v29  }
  0x63   : > { %1305 = vperm.xlu0 %8520, %v9091_v13  }
  0x65   : > { %1000 = vperm.xlu1 %8516, %v9165_v30  }
  0x67   : > { %1313 = vperm.xlu0 %8520, %v9099_v15  }
  0x69   : > { %1010 = vperm.xlu1 %8516, %v9170_v31  }
  0x6b   : > { %1321 = vperm.xlu0 %8520, %v9105_v17  }
  0x6d   : > { %1020 = vperm.xlu1 %8516, %v9175_v32  }
  0x6f   : > { %1329 = vperm.xlu0 %8520, %v9110_v18  }
  0x71   : > { %1030 = vperm.xlu1 %8516, %v9180_v33  }
  0x73   : > { %1337 = vperm.xlu0 %8520, %v9115_v19  }
  0x75   : > { %1040 = vperm.xlu1 %8516, %v9185_v34  }
  0x77   : > { %1345 = vperm.xlu0 %8520, %v9120_v20  }
  0x79   : > { %1050 = vperm.xlu1 %8516, %v9190_v35  }
  0x7b   : > { %1353 = vperm.xlu0 %8520, %v9125_v21  }
  0x7d   : > { %1060 = vperm.xlu1 %8516, %v9195_v36  }
  0x7f   : > { %1361 = vperm.xlu0 %8520, %v9130_v22  }
  0x81   : > { %1070 = vperm.xlu1 %8516, %v9200_v37  }
  0x83   : > { %1369 = vperm.xlu0 %8520, %v9135_v24  }
  0x85   : > { %1080 = vperm.xlu1 %8516, %v9205_v38  }
  0x87   : > { %1377 = vperm.xlu0 %8520, %v9140_v25  }
  0x89   : > { %1090 = vperm.xlu1 %8516, %v9210_v39  }
  0x8b   : > { %1385 = vperm.xlu0 %8520, %v9145_v26  }
  0x8d   : > { %1100 = vperm.xlu1 %8516, %v9215_v40  }
  0x8f   : > { %1393 = vperm.xlu0 %8520, %v9150_v27  }
  0x91   : > { %1110 = vperm.xlu1 %8516, %v9220_v41  }
  0x93   : > { %1401 = vperm.xlu0 %8520, %v9155_v28  }
  0x94   : > { %v9225_v42 = vpop.permute.xlu1 %805 }
  0x95   : > { %8517 = vset.pattern.permute.xlu1 %v13881_v23 }
  0x96   : > { %1257 = vperm.xlu1 %8517, %v9054_v4  }
  0x97   : > { %1409 = vperm.xlu0 %8520, %v9160_v29  }
  0x98   : > { %v9230_v43 = vpop.permute.xlu1 %810 }
  0x9a   : > { %1261 = vperm.xlu1 %8517, %v9043_v1  }
  0x9b   : > { %1417 = vperm.xlu0 %8520, %v9165_v30  }
  0x9c   : > { %v9234_v44 = vpop.permute.xlu1 %820 }
  0x9e   : > { %1269 = vperm.xlu1 %8517, %v9062_v6   ;;  %v9309_v6 = vld [vmem:[%s9040_s27 + $0xf0] sm:$0xff] }
  0x9f   : > { %1425 = vperm.xlu0 %8520, %v9170_v31  }
  0xa0   : > { %v9238_v45 = vpop.permute.xlu1 %830 }
  0xa2   : > { %1277 = vperm.xlu1 %8517, %v9070_v8  }
  0xa3   : > { %1433 = vperm.xlu0 %8520, %v9175_v32  }
  0xa4   : > { %v9242_v46 = vpop.permute.xlu1 %840 }
  0xa5   : > { %14024 = vst [vmem:[#allocation2_spill] sm:$0xff] %v9242_v46 }
  0xa6   : > { %1285 = vperm.xlu1 %8517, %v9078_v10   ;;  %v9315_v10 = vld [vmem:[%s9040_s27 + $0x100] sm:$0xff] }
  0xa7   : > { %1441 = vperm.xlu0 %8520, %v9180_v33  }
  0xa8   : > { %v9246_v47 = vpop.permute.xlu1 %850 }
  0xa9   : > { %14025 = vst [vmem:[#allocation3_spill] sm:$0xff] %v9246_v47 }
  0xaa   : > { %1293 = vperm.xlu1 %8517, %v9086_v12  }
  0xab   : > { %1449 = vperm.xlu0 %8520, %v9185_v34  }
  0xac   : > { %v9250_v48 = vpop.permute.xlu1 %860 }
  0xad   : > { %14026 = vst [vmem:[#allocation4_spill] sm:$0xff] %v9250_v48 }
  0xae   : > { %1301 = vperm.xlu1 %8517, %v9094_v14   ;;  %v9321_v14 = vld [vmem:[%s9040_s27 + $0x110] sm:$0xff] }
  0xaf   : > { %1457 = vperm.xlu0 %8520, %v9190_v35  }
  0xb0   : > { %v9257_v50 = vpop.permute.xlu1 %870 }
  0xb1   : > { %14027 = vst [vmem:[#allocation5_spill] sm:$0xff] %v9257_v50  ;;  %v9381_v50 = vld [vmem:[%s9040_s27 + $0x1b0] sm:$0xff] }
  0xb2   : > { %1309 = vperm.xlu1 %8517, %v9255_v49   ;;  %14054 = vst [vmem:[#allocation32_spill] sm:$0xff] %v9381_v50 }
  0xb3   : > { %1465 = vperm.xlu0 %8520, %v9195_v36  }
  0xb4   : > { %v9264_v52 = vpop.permute.xlu1 %880 }
  0xb5   : > { %14028 = vst [vmem:[#allocation6_spill] sm:$0xff] %v9264_v52  ;;  %v9375_v52 = vld [vmem:[%s9040_s27 + $0x1a0] sm:$0xff] }
  0xb6   : > { %1317 = vperm.xlu1 %8517, %v9262_v51   ;;  %14052 = vst [vmem:[#allocation30_spill] sm:$0xff] %v9375_v52 }
  0xb7   : > { %1473 = vperm.xlu0 %8520, %v9200_v37  }
  0xb8   : > { %v9271_v54 = vpop.permute.xlu1 %890 }
  0xb9   : > { %14029 = vst [vmem:[#allocation7_spill] sm:$0xff] %v9271_v54  ;;  %v9369_v54 = vld [vmem:[%s9040_s27 + $0x190] sm:$0xff] }
  0xba   : > { %1325 = vperm.xlu1 %8517, %v9269_v53   ;;  %14050 = vst [vmem:[#allocation28_spill] sm:$0xff] %v9369_v54 }
  0xbb   : > { %1481 = vperm.xlu0 %8520, %v9205_v38  }
  0xbc   : > { %v9278_v56 = vpop.permute.xlu1 %900 }
  0xbd   : > { %14030 = vst [vmem:[#allocation8_spill] sm:$0xff] %v9278_v56  ;;  %v9363_v56 = vld [vmem:[%s9040_s27 + $0x180] sm:$0xff] }
  0xbe   : > { %1333 = vperm.xlu1 %8517, %v9276_v55   ;;  %14048 = vst [vmem:[#allocation26_spill] sm:$0xff] %v9363_v56 }
  0xbf   : > { %1489 = vperm.xlu0 %8520, %v9210_v39  }
  0xc0   : > { %v9285_v58 = vpop.permute.xlu1 %910 }
  0xc1   : > { %14031 = vst [vmem:[#allocation9_spill] sm:$0xff] %v9285_v58  ;;  %v9357_v58 = vld [vmem:[%s9040_s27 + $0x170] sm:$0xff] }
  0xc2   : > { %1341 = vperm.xlu1 %8517, %v9283_v57   ;;  %14046 = vst [vmem:[#allocation24_spill] sm:$0xff] %v9357_v58 }
  0xc3   : > { %1497 = vperm.xlu0 %8520, %v9215_v40  }
  0xc4   : > { %v9292_v60 = vpop.permute.xlu1 %920 }
  0xc5   : > { %14032 = vst [vmem:[#allocation10_spill] sm:$0xff] %v9292_v60  ;;  %v9351_v60 = vld [vmem:[%s9040_s27 + $0x160] sm:$0xff] }
  0xc6   : > { %1349 = vperm.xlu1 %8517, %v9290_v59   ;;  %14044 = vst [vmem:[#allocation22_spill] sm:$0xff] %v9351_v60 }
  0xc7   : > { %1505 = vperm.xlu0 %8520, %v9220_v41  }
  0xc8   : > { %v9299_v62 = vpop.permute.xlu1 %930 }
  0xc9   : > { %14033 = vst [vmem:[#allocation11_spill] sm:$0xff] %v9299_v62  ;;  %v9345_v62 = vld [vmem:[%s9040_s27 + $0x150] sm:$0xff] }
  0xca   : > { %1357 = vperm.xlu1 %8517, %v9297_v61   ;;  %14042 = vst [vmem:[#allocation20_spill] sm:$0xff] %v9345_v62 }
  0xcc   : > { %v9305_v4 = vpop.permute.xlu1 %940 }
  0xcd   : > { %14034 = vst [vmem:[#allocation12_spill] sm:$0xff] %v9305_v4  ;;  %v9339_v4 = vld [vmem:[%s9040_s27 + $0x140] sm:$0xff] }
  0xce   : > { %1365 = vperm.xlu1 %8517, %v9303_v63   ;;  %14040 = vst [vmem:[#allocation18_spill] sm:$0xff] %v9339_v4 }
  0xd0   : > { %v9311_v8 = vpop.permute.xlu1 %950 }
  0xd1   : > { %14035 = vst [vmem:[#allocation13_spill] sm:$0xff] %v9311_v8  ;;  %v9333_v8 = vld [vmem:[%s9040_s27 + $0x130] sm:$0xff] }
  0xd2   : > { %1373 = vperm.xlu1 %8517, %v9309_v6  }
  0xd4   : > { %v9317_v12 = vpop.permute.xlu1 %960 }
  0xd5   : > { %14036 = vst [vmem:[#allocation14_spill] sm:$0xff] %v9317_v12 }
  0xd6   : > { %1381 = vperm.xlu1 %8517, %v9315_v10  }
  0xd8   : > { %v9323_v23 = vpop.permute.xlu1 %970 }
  0xd9   : > { %14037 = vst [vmem:[#allocation15_spill] sm:$0xff] %v9323_v23 }
  0xda   : > { %1389 = vperm.xlu1 %8517, %v9321_v14  }
  0xdc   : > { %v9329_v16 = vpop.permute.xlu1 %980 }
  0xdd   : > { %14038 = vst [vmem:[#allocation16_spill] sm:$0xff] %v9329_v16 }
  0xde   : > { %1397 = vperm.xlu1 %8517, %v9327_v0  }
  0xe0   : > { %v9335_v12 = vpop.permute.xlu1 %990 }
  0xe1   : > { %14039 = vst [vmem:[#allocation17_spill] sm:$0xff] %v9335_v12 }
  0xe2   : > { %1405 = vperm.xlu1 %8517, %v9333_v8  }
  0xe4   : > { %v9341_v23 = vpop.permute.xlu1 %1000 }
  0xe5   : > { %14041 = vst [vmem:[#allocation19_spill] sm:$0xff] %v9341_v23 }
  0xe6   : > { %1413 = vperm.xlu1 %8517, %v9339_v4  }
  0xe8   : > { %v9347_v16 = vpop.permute.xlu1 %1010 }
  0xe9   : > { %14043 = vst [vmem:[#allocation21_spill] sm:$0xff] %v9347_v16 }
  0xea   : > { %1421 = vperm.xlu1 %8517, %v9345_v62  }
  0xec   : > { %v9353_v12 = vpop.permute.xlu1 %1020 }
  0xed   : > { %14045 = vst [vmem:[#allocation23_spill] sm:$0xff] %v9353_v12 }
  0xee   : > { %1429 = vperm.xlu1 %8517, %v9351_v60  }
  0xf0   : > { %v9359_v23 = vpop.permute.xlu1 %1030 }
  0xf1   : > { %14047 = vst [vmem:[#allocation25_spill] sm:$0xff] %v9359_v23 }
  0xf2   : > { %1437 = vperm.xlu1 %8517, %v9357_v58  }
  0xf4   : > { %v9365_v16 = vpop.permute.xlu1 %1040 }
  0xf5   : > { %14049 = vst [vmem:[#allocation27_spill] sm:$0xff] %v9365_v16  ;;  %v9387_v16 = vld [vmem:[%s9040_s27 + $0x1c0] sm:$0xff] }
  0xf6   : > { %1445 = vperm.xlu1 %8517, %v9363_v56   ;;  %14056 = vst [vmem:[#allocation34_spill] sm:$0xff] %v9387_v16 }
  0xf8   : > { %v9371_v12 = vpop.permute.xlu1 %1050 }
  0xf9   : > { %14051 = vst [vmem:[#allocation29_spill] sm:$0xff] %v9371_v12  ;;  %v9393_v12 = vld [vmem:[%s9040_s27 + $0x1d0] sm:$0xff] }
  0xfa   : > { %1453 = vperm.xlu1 %8517, %v9369_v54   ;;  %14058 = vst [vmem:[#allocation36_spill] sm:$0xff] %v9393_v12 }
  0xfc   : > { %v9377_v23 = vpop.permute.xlu1 %1060 }
  0xfd   : > { %14053 = vst [vmem:[#allocation31_spill] sm:$0xff] %v9377_v23  ;;  %v9399_v23 = vld [vmem:[%s9040_s27 + $0x1e0] sm:$0xff] }
  0xfe   : > { %1461 = vperm.xlu1 %8517, %v9375_v52   ;;  %14060 = vst [vmem:[#allocation38_spill] sm:$0xff] %v9399_v23 }
 0x100   : > { %v9383_v48 = vpop.permute.xlu1 %1070 }
 0x101   : > { %14055 = vst [vmem:[#allocation33_spill] sm:$0xff] %v9383_v48  ;;  %v9405_v48 = vld [vmem:[%s9040_s27 + $0x1f0] sm:$0xff]  ;;  %s14217_s27 = sld [smem:[#allocation94_spill]] }
 0x102   : > { %1469 = vperm.xlu1 %8517, %v9381_v50   ;;  %14062 = vst [vmem:[#allocation40_spill] sm:$0xff] %v9405_v48  ;;  %v9407_v50 = vpop.permute.xlu0 %795 }
 0x104   : > { %v9389_v56 = vpop.permute.xlu1 %1080 }
 0x105   : > { %14057 = vst [vmem:[#allocation35_spill] sm:$0xff] %v9389_v56 }
 0x106   : > { %1477 = vperm.xlu1 %8517, %v9387_v16   ;;  %v9414_v16 = vpop.permute.xlu0 %800 }
 0x107   : > { %s10332_s28 = scalar_lea.vmem %s14217_s27, %s7987_s22  ;;  %s12056_s27 = scalar_lea.vmem %s13866_s2, %s9034_s24 }
 0x108   : > { %v9395_v54 = vpop.permute.xlu1 %1090 }
 0x109   : > { %14059 = vst [vmem:[#allocation37_spill] sm:$0xff] %v9395_v54  ;;  %v14064_v54 = vmov 2  }
 0x10a   : > { %1485 = vperm.xlu1 %8517, %v9393_v12  }
 0x10c   : > { %v9401_v52 = vpop.permute.xlu1 %1100 }
 0x10d   : > { %14061 = vst [vmem:[#allocation39_spill] sm:$0xff] %v9401_v52  ;;  %v9421_v52 = vpop.permute.xlu0 %815 }
 0x10e   : > { %1493 = vperm.xlu1 %8517, %v9399_v23  }
 0x110   : > { %v9409_v58 = vpop.permute.xlu1 %1110 }
 0x111   : > { %14063 = vst [vmem:[#allocation41_spill] sm:$0xff] %v9409_v58 }
 0x112   : > { %1501 = vperm.xlu1 %8517, %v9405_v48   ;;  %v9428_v48 = vpop.permute.xlu0 %825 }
 0x115   : > { %v9412_v56 = vpop.permute.xlu1 %1257 }
 0x116   : > { %8518 = vset.pattern.permute.xlu1 %v14064_v54 }
 0x117   : > { %1642 = vperm.xlu1 %8518, %v9046_v2   ;;  %v9434_v2 = vpop.permute.xlu0 %835 }
 0x119   : > { %v9418_v12 = vpop.permute.xlu1 %1261 }
 0x11b   : > { %1650 = vperm.xlu1 %8518, %v9043_v1   ;;  %v9441_v62 = vpop.permute.xlu0 %845 }
 0x11d   : > { %v9423_v23 = vpop.permute.xlu1 %1269 }
 0x11f   : > { %1654 = vperm.xlu1 %8518, %v9051_v3  }
 0x121   : > { %v9426_v58 = vpop.permute.xlu1 %1277 }
 0x123   : > { %1662 = vperm.xlu1 %8518, %v9059_v5   ;;  %v9447_v5 = vpop.permute.xlu0 %855 }
 0x125   : > { %v9431_v47 = vpop.permute.xlu1 %1285 }
 0x127   : > { %1670 = vperm.xlu1 %8518, %v9067_v7   ;;  %v9454_v46 = vpop.permute.xlu0 %1646 }
 0x129   : > { %v9436_v60 = vpop.permute.xlu1 %1293 }
 0x12b   : > { %1678 = vperm.xlu1 %8518, %v9075_v9  }
 0x12d   : > { %v9439_v1 = vpop.permute.xlu1 %1301 }
 0x12f   : > { %1686 = vperm.xlu1 %8518, %v9083_v11   ;;  %v9460_v11 = vpop.permute.xlu0 %1658 }
 0x131   : > { %v9444_v3 = vpop.permute.xlu1 %1309 }
 0x132   : > { %14065 = vst [vmem:[#allocation42_spill] sm:$0xff] %v9444_v3 }
 0x133   : > { %1694 = vperm.xlu1 %8518, %v9091_v13  }
 0x135   : > { %v9449_v4 = vpop.permute.xlu1 %1317 }
 0x136   : > { %14066 = vst [vmem:[#allocation43_spill] sm:$0xff] %v9449_v4  ;;  %v9467_v4 = vpop.permute.xlu0 %1666 }
 0x137   : > { %1702 = vperm.xlu1 %8518, %v9099_v15  }
 0x139   : > { %v9452_v7 = vpop.permute.xlu1 %1325 }
 0x13a   : > { %14067 = vst [vmem:[#allocation44_spill] sm:$0xff] %v9452_v7 }
 0x13b   : > { %1710 = vperm.xlu1 %8518, %v9105_v17   ;;  %v9473_v17 = vpop.permute.xlu0 %1674 }
 0x13d   : > { %v9457_v9 = vpop.permute.xlu1 %1333 }
 0x13e   : > { %14068 = vst [vmem:[#allocation45_spill] sm:$0xff] %v9457_v9 }
 0x13f   : > { %1718 = vperm.xlu1 %8518, %v9110_v18  }
 0x141   : > { %v9462_v3 = vpop.permute.xlu1 %1341 }
 0x142   : > { %14069 = vst [vmem:[#allocation46_spill] sm:$0xff] %v9462_v3  ;;  %v9480_v3 = vpop.permute.xlu0 %1682 }
 0x143   : > { %1726 = vperm.xlu1 %8518, %v9115_v19  }
 0x145   : > { %v9465_v13 = vpop.permute.xlu1 %1349 }
 0x146   : > { %14070 = vst [vmem:[#allocation47_spill] sm:$0xff] %v9465_v13 }
 0x147   : > { %1734 = vperm.xlu1 %8518, %v9120_v20   ;;  %v9486_v20 = vpop.permute.xlu0 %1690 }
 0x149   : > { %v9470_v15 = vpop.permute.xlu1 %1357 }
 0x14a   : > { %14071 = vst [vmem:[#allocation48_spill] sm:$0xff] %v9470_v15 }
 0x14b   : > { %1742 = vperm.xlu1 %8518, %v9125_v21  }
 0x14d   : > { %v9475_v9 = vpop.permute.xlu1 %1365 }
 0x14e   : > { %14072 = vst [vmem:[#allocation49_spill] sm:$0xff] %v9475_v9  ;;  %v1254_v9 = vpop.permute.xlu0 %1253 }
 0x14f   : > { %1750 = vperm.xlu1 %8518, %v9130_v22  }
 0x151   : > { %v9478_v18 = vpop.permute.xlu1 %1373 }
 0x152   : > { %14073 = vst [vmem:[#allocation50_spill] sm:$0xff] %v9478_v18 }
 0x153   : > { %1758 = vperm.xlu1 %8518, %v9135_v24   ;;  %v9497_v24 = vpop.permute.xlu0 %1265 }
 0x155   : > { %v9483_v19 = vpop.permute.xlu1 %1381 }
 0x156   : > { %14074 = vst [vmem:[#allocation51_spill] sm:$0xff] %v9483_v19 }
 0x157   : > { %1766 = vperm.xlu1 %8518, %v9140_v25  }
 0x159   : > { %v9488_v15 = vpop.permute.xlu1 %1389 }
 0x15a   : > { %14075 = vst [vmem:[#allocation52_spill] sm:$0xff] %v9488_v15  ;;  %v9504_v15 = vpop.permute.xlu0 %1273 }
 0x15b   : > { %1774 = vperm.xlu1 %8518, %v9145_v26  }
 0x15d   : > { %v9491_v21 = vpop.permute.xlu1 %1397 }
 0x15e   : > { %14076 = vst [vmem:[#allocation53_spill] sm:$0xff] %v9491_v21 }
 0x15f   : > { %1782 = vperm.xlu1 %8518, %v9150_v27   ;;  %v9510_v27 = vpop.permute.xlu0 %1281 }
 0x161   : > { %v9494_v22 = vpop.permute.xlu1 %1405 }
 0x162   : > { %14077 = vst [vmem:[#allocation54_spill] sm:$0xff] %v9494_v22 }
 0x163   : > { %1790 = vperm.xlu1 %8518, %v9155_v28  }
 0x165   : > { %v9499_v19 = vpop.permute.xlu1 %1413 }
 0x166   : > { %14078 = vst [vmem:[#allocation55_spill] sm:$0xff] %v9499_v19  ;;  %v9517_v19 = vpop.permute.xlu0 %1289 }
 0x167   : > { %1798 = vperm.xlu1 %8518, %v9160_v29  }
 0x169   : > { %v9502_v25 = vpop.permute.xlu1 %1421 }
 0x16a   : > { %14079 = vst [vmem:[#allocation56_spill] sm:$0xff] %v9502_v25 }
 0x16b   : > { %1806 = vperm.xlu1 %8518, %v9165_v30   ;;  %v9523_v30 = vpop.permute.xlu0 %1297 }
 0x16d   : > { %v9507_v26 = vpop.permute.xlu1 %1429 }
 0x16e   : > { %14080 = vst [vmem:[#allocation57_spill] sm:$0xff] %v9507_v26 }
 0x16f   : > { %1814 = vperm.xlu1 %8518, %v9170_v31  }
 0x171   : > { %v9512_v22 = vpop.permute.xlu1 %1437 }
 0x172   : > { %14081 = vst [vmem:[#allocation58_spill] sm:$0xff] %v9512_v22  ;;  %v9530_v22 = vpop.permute.xlu0 %1305 }
 0x173   : > { %1822 = vperm.xlu1 %8518, %v9175_v32  }
 0x175   : > { %v9515_v28 = vpop.permute.xlu1 %1445 }
 0x176   : > { %14082 = vst [vmem:[#allocation59_spill] sm:$0xff] %v9515_v28  ;;  %v9572_v28 = vld [vmem:[%s13868_s4 + $0x2] ss:$0 sm:$0xff] }
 0x177   : > { %1830 = vperm.xlu1 %8518, %v9180_v33   ;;  %v9536_v33 = vpop.permute.xlu0 %1313 }
 0x179   : > { %v9520_v29 = vpop.permute.xlu1 %1453 }
 0x17a   : > { %14083 = vst [vmem:[#allocation60_spill] sm:$0xff] %v9520_v29 }
 0x17b   : > { %1838 = vperm.xlu1 %8518, %v9185_v34   ;;  %v9541_v34 = vld [vmem:[%s13868_s4] ss:$0 sm:$0xff] }
 0x17c   : > { %v1121_v29 = vmul.f32 %v9541_v34, %v9421_v52 }
 0x17d   : > { %v9525_v26 = vpop.permute.xlu1 %1461 }
 0x17e   : > { %14084 = vst [vmem:[#allocation61_spill] sm:$0xff] %v9525_v26 }
 0x17f   : > { %1846 = vperm.xlu1 %8518, %v9190_v35   ;;  %v1118_v35 = vmul.f32 %v9541_v34, %v9414_v16 }
 0x181   : > { %v9528_v31 = vpop.permute.xlu1 %1469 }
 0x182   : > { %14085 = vst [vmem:[#allocation62_spill] sm:$0xff] %v9528_v31 }
 0x183   : > { %1854 = vperm.xlu1 %8518, %v9195_v36   ;;  %v9551_v36 = vld [vmem:[%s13869_s5] ss:$0 sm:$0xff] }
 0x184   : > { %v1188_v31 = vadd.f32 %v9551_v36, %v1118_v35  ;;  %v1125_v35 = vmul.f32 %v9541_v34, %v9434_v2  ;;  %v1191_v52 = vadd.f32 %v9551_v36, %v1121_v29  ;;  %v1905_v29 = vmul.f32 %v9572_v28, %v9460_v11 }
 0x185   : > { %v9533_v32 = vpop.permute.xlu1 %1477  ;;  %v1909_v11 = vmul.f32 %v9572_v28, %v9473_v17 }
 0x186   : > { %14086 = vst [vmem:[#allocation63_spill] sm:$0xff] %v9533_v32  ;;  %v1195_v2 = vadd.f32 %v9551_v36, %v1125_v35 }
 0x187   : > { %1862 = vperm.xlu1 %8518, %v9200_v37   ;;  %v9556_v37 = vld [vmem:[%s13868_s4 + $0x1] ss:$0 sm:$0xff] }
 0x188   : > { %v1513_v16 = vmul.f32 %v9556_v37, %v9412_v56  ;;  %v1902_v56 = vmul.f32 %v9572_v28, %v9454_v46  ;;  %v1512_v21 = vmul.f32 %v9556_v37, %v1254_v9  ;;  %v1516_v18 = vmul.f32 %v9556_v37, %v9423_v23 }
 0x189   : > { %v9543_v26 = vpop.permute.xlu1 %1485  ;;  %v1123_v46 = vmul.f32 %v9541_v34, %v9428_v48  ;;  %v1514_v9 = vmul.f32 %v9556_v37, %v9418_v12 }
 0x18a   : > { %14087 = vst [vmem:[#allocation64_spill] sm:$0xff] %v9543_v26  ;;  %v9561_v26 = vpop.permute.xlu0 %1321  ;;  %v1577_v25 = vadd.f32 %v1513_v16, %v1188_v31 }
 0x18b   : > { %1870 = vperm.xlu1 %8518, %v9205_v38   ;;  %v1117_v38 = vmul.f32 %v9541_v34, %v9407_v50  ;;  %v1193_v35 = vadd.f32 %v9551_v36, %v1123_v46  ;;  %v1127_v46 = vmul.f32 %v9541_v34, %v9441_v62 }
 0x18c   : > { %v1966_v31 = vadd.f32 %v1902_v56, %v1577_v25 }
 0x18d   : > { %v9558_v32 = vpop.permute.xlu1 %1493  ;;  %v1187_v50 = vadd.f32 %v9551_v36, %v1117_v38  ;;  %v1197_v62 = vadd.f32 %v9551_v36, %v1127_v46 }
 0x18e   : > { %14088 = vst [vmem:[#allocation65_spill] sm:$0xff] %v9558_v32  ;;  %v9608_v12 = vmax.f32 %v1966_v31, 0.0 }
 0x18f   : > { %1878 = vperm.xlu1 %8518, %v9210_v39   ;;  %v1119_v39 = vmul.f32 %v9541_v34, %v9225_v42  ;;  %v1576_v16 = vadd.f32 %v1512_v21, %v1187_v50  ;;  %v1520_v42 = vmul.f32 %v9556_v37, %v9431_v47  ;;  %v1518_v47 = vmul.f32 %v9556_v37, %v9426_v58 }
 0x190   : > { %v14090_v50 = vmov 0   ;;  %v1907_v58 = vmul.f32 %v9572_v28, %v9467_v4  ;;  %v1522_v4 = vmul.f32 %v9556_v37, %v9436_v60  ;;  %v1913_v60 = vmul.f32 %v9572_v28, %v9486_v20 }
 0x191   : > { %v9575_v32 = vpop.permute.xlu1 %1501  ;;  %v1189_v48 = vadd.f32 %v9551_v36, %v1119_v39  ;;  %v1584_v56 = vadd.f32 %v1520_v42, %v1195_v2  ;;  %v1582_v31 = vadd.f32 %v1518_v47, %v1193_v35 }
 0x192   : > { %14089 = vst [vmem:[#allocation66_spill] sm:$0xff] %v9575_v32  ;;  %v9589_v32 = vpop.permute.xlu0 %1329  ;;  %v1586_v35 = vadd.f32 %v1522_v4, %v1197_v62 }
 0x193   : > { %1886 = vperm.xlu1 %8518, %v9215_v40   ;;  %v1580_v40 = vadd.f32 %v1516_v18, %v1191_v52  ;;  %v1578_v18 = vadd.f32 %v1514_v9, %v1189_v48  ;;  %v1911_v48 = vmul.f32 %v9572_v28, %v9480_v3 }
 0x195   : > { %v1969_v39 = vadd.f32 %v1905_v29, %v1580_v40  ;;  %v1129_v29 = vmul.f32 %v9541_v34, %v9447_v5 }
 0x196   : > { %v1643_v23 = vpop.permute.xlu1 %1642  ;;  %v9606_v25 = vpop.permute.xlu0 %1337 }
 0x197   : > { %v1901_v38 = vmul.f32 %v9572_v28, %v1643_v23  ;;  %1894 = vperm.xlu1 %8518, %v9220_v41   ;;  %v9624_v9 = vmax.f32 %v1969_v39, 0.0  ;;  %v1973_v23 = vadd.f32 %v1909_v11, %v1584_v56  ;;  %v1199_v42 = vadd.f32 %v9551_v36, %v1129_v29 }
 0x198   : > { %v1524_v11 = vmul.f32 %v9556_v37, %v9439_v1  ;;  %v14091_v39 = vmov 1  }
 0x199   : > { %v1965_v13 = vadd.f32 %v1901_v38, %v1576_v16  ;;  %v1971_v16 = vadd.f32 %v1907_v58, %v1582_v31  ;;  %v9635_v40 = vmax.f32 %v1973_v23, 0.0  ;;  %v1515_v58 = vmul.f32 %v9556_v37, %v9497_v24 }
 0x19a   : > { %v1651_v21 = vpop.permute.xlu1 %1650  ;;  %v1588_v47 = vadd.f32 %v1524_v11, %v1199_v42  ;;  %v1122_v24 = vmul.f32 %v9541_v34, %v9234_v44  ;;  %v1517_v42 = vmul.f32 %v9556_v37, %v9504_v15 }
 0x19b   : > { %v1903_v41 = vmul.f32 %v9572_v28, %v1651_v21  ;;  %8521 = vset.pattern.permute.xlu1 %v14090_v50  ;;  %v9614_v52 = vmax.f32 %v1965_v13, 0.0  ;;  %v9626_v13 = vpop.permute.xlu0 %1345  ;;  %v9644_v5 = vmax.f32 %v1971_v16, 0.0 }
 0x19c   : > { %2102 = vperm.xlu1 %8521, %v9608_v12   ;;  %v1977_v1 = vadd.f32 %v1913_v60, %v1588_v47 }
 0x19d   : > { %v1967_v17 = vadd.f32 %v1903_v41, %v1578_v18  ;;  %2555 = vperm.xlu0 %8520, %v9614_v52   ;;  %v1975_v18 = vadd.f32 %v1911_v48, %v1586_v35  ;;  %v1192_v35 = vadd.f32 %v9551_v36, %v1122_v24 }
 0x19e   : > { %v9663_v41 = vmax.f32 %v1977_v1, 0.0  ;;  %v1655_v46 = vpop.permute.xlu1 %1654  ;;  %v1124_v1 = vmul.f32 %v9541_v34, %v9238_v45 }
 0x19f   : > { %v9622_v2 = vmax.f32 %v1967_v17, 0.0  ;;  %v9640_v38 = vpop.permute.xlu0 %1353  ;;  %v9657_v3 = vmax.f32 %v1975_v18, 0.0  ;;  %v1120_v17 = vmul.f32 %v9541_v34, %v9230_v43  ;;  %v1904_v29 = vmul.f32 %v9572_v28, %v1655_v46 }
 0x1a0   : > { %v1581_v60 = vadd.f32 %v1517_v42, %v1192_v35  ;;  %v1519_v46 = vmul.f32 %v9556_v37, %v9510_v27  ;;  %v1521_v42 = vmul.f32 %v9556_v37, %v9517_v19  ;;  %v14101_v19 = vld [vmem:[#allocation22_spill] sm:$0xff] }
 0x1a1   : > { %2107 = vperm.xlu1 %8521, %v9622_v2   ;;  %2571 = vperm.xlu0 %8520, %v9624_v9   ;;  %v1190_v31 = vadd.f32 %v9551_v36, %v1120_v17 }
 0x1a2   : > { %v1663_v4 = vpop.permute.xlu1 %1662 }
 0x1a3   : > { %v9653_v21 = vpop.permute.xlu0 %1361  ;;  %v1579_v43 = vadd.f32 %v1515_v58, %v1190_v31  ;;  %v1906_v11 = vmul.f32 %v9572_v28, %v1663_v4  ;;  %v1194_v58 = vadd.f32 %v9551_v36, %v1124_v1 }
 0x1a5   : > { %2117 = vperm.xlu1 %8521, %v9624_v9   ;;  %2587 = vperm.xlu0 %8520, %v9635_v40   ;;  %v1968_v62 = vadd.f32 %v1904_v29, %v1579_v43  ;;  %v1970_v18 = vadd.f32 %v1906_v11, %v1581_v60  ;;  %v1583_v45 = vadd.f32 %v1519_v46, %v1194_v58 }
 0x1a6   : > { %v1671_v17 = vpop.permute.xlu1 %1670 }
 0x1a7   : > { %v9660_v56 = vpop.permute.xlu0 %1369  ;;  %v9692_v48 = vmax.f32 %v1968_v62, 0.0  ;;  %v9706_v47 = vmax.f32 %v1970_v18, 0.0  ;;  %v1908_v29 = vmul.f32 %v9572_v28, %v1671_v17  ;;  %v14096_v62 = vld [vmem:[#allocation2_spill] sm:$0xff]  ;;  %v14100_v17 = vld [vmem:[#allocation20_spill] sm:$0xff] }
 0x1a8   : > { %v1126_v27 = vmul.f32 %v9541_v34, %v14096_v62 }
 0x1a9   : > { %2127 = vperm.xlu1 %8521, %v9644_v5   ;;  %8530 = vset.pattern.permute.xlu0 %v14064_v54  ;;  %v1972_v43 = vadd.f32 %v1908_v29, %v1583_v45  ;;  %v14103_v45 = vld [vmem:[#allocation3_spill] sm:$0xff] }
 0x1aa   : > { %1698 = vperm.xlu0 %8530, %v9255_v49   ;;  %v1679_v4 = vpop.permute.xlu1 %1678  ;;  %v1196_v11 = vadd.f32 %v9551_v36, %v1126_v27  ;;  %v14104_v27 = vld [vmem:[#allocation24_spill] sm:$0xff] }
 0x1ab   : > { %v9667_v20 = vpop.permute.xlu0 %1377  ;;  %v9731_v35 = vmax.f32 %v1972_v43, 0.0  ;;  %v1910_v60 = vmul.f32 %v9572_v28, %v1679_v4  ;;  %v1128_v43 = vmul.f32 %v9541_v34, %v14103_v45  ;;  %v1523_v4 = vmul.f32 %v9556_v37, %v9523_v30 }
 0x1ac   : > { %v1585_v18 = vadd.f32 %v1521_v42, %v1196_v11  ;;  %v1525_v30 = vmul.f32 %v9556_v37, %v9530_v22 }
 0x1ad   : > { %2137 = vperm.xlu1 %8521, %v9635_v40   ;;  %v1198_v42 = vadd.f32 %v9551_v36, %v1128_v43  ;;  %v14108_v43 = vld [vmem:[#allocation28_spill] sm:$0xff] }
 0x1ae   : > { %1706 = vperm.xlu0 %8530, %v9262_v51   ;;  %v1974_v46 = vadd.f32 %v1910_v60, %v1585_v18  ;;  %v1687_v62 = vpop.permute.xlu1 %1686  ;;  %v14106_v18 = vld [vmem:[#allocation26_spill] sm:$0xff] }
 0x1af   : > { %v9677_v23 = vpop.permute.xlu0 %1385  ;;  %v1912_v60 = vmul.f32 %v9572_v28, %v1687_v62 }
 0x1b0   : > { %v9745_v29 = vmax.f32 %v1974_v46, 0.0  ;;  %v14107_v46 = vld [vmem:[#allocation4_spill] sm:$0xff] }
 0x1b1   : > { %2147 = vperm.xlu1 %8521, %v9657_v3   ;;  %v1130_v45 = vmul.f32 %v9541_v34, %v14107_v46 }
 0x1b2   : > { %1714 = vperm.xlu0 %8530, %v9269_v53  }
 0x1b3   : > { %v9687_v16 = vpop.permute.xlu0 %1393 }
 0x1b4   : > { %14092 = vst [vmem:[#allocation67_spill] sm:$0xff] %v9687_v16 }
 0x1b5   : > { %2157 = vperm.xlu1 %8521, %v9663_v41  }
 0x1b6   : > { %1722 = vperm.xlu0 %8530, %v9276_v55  }
 0x1b7   : > { %v9698_v44 = vpop.permute.xlu0 %1401 }
 0x1b8   : > { %14093 = vst [vmem:[#allocation68_spill] sm:$0xff] %v9698_v44 }
 0x1b9   : > { %8522 = vset.pattern.permute.xlu1 %v14091_v39 }
 0x1ba   : > { %2559 = vperm.xlu1 %8522, %v9608_v12   ;;  %1730 = vperm.xlu0 %8530, %v9283_v57  }
 0x1bb   : > { %v9704_v15 = vpop.permute.xlu0 %1409 }
 0x1bc   : > { %14094 = vst [vmem:[#allocation69_spill] sm:$0xff] %v9704_v15 }
 0x1be   : > { %8523 = vset.pattern.permute.xlu1 %v14064_v54  ;;  %1738 = vperm.xlu0 %8530, %v9290_v59  }
 0x1bf   : > { %2944 = vperm.xlu1 %8523, %v9614_v52   ;;  %v9716_v31 = vpop.permute.xlu0 %1417 }
 0x1c0   : > { %14095 = vst [vmem:[#allocation70_spill] sm:$0xff] %v9716_v31 }
 0x1c2   : > { %1746 = vperm.xlu0 %8530, %v9297_v61  }
 0x1c3   : > { %8524 = vset.pattern.permute.xlu1 %v14091_v39  ;;  %v9726_v24 = vpop.permute.xlu0 %1425 }
 0x1c4   : > { %2563 = vperm.xlu1 %8524, %v9622_v2   ;;  %14097 = vst [vmem:[#allocation2_spill] sm:$0xff] %v9726_v24 }
 0x1c6   : > { %1754 = vperm.xlu0 %8530, %v9303_v63  }
 0x1c7   : > { %v9737_v1 = vpop.permute.xlu0 %1433 }
 0x1c8   : > { %2567 = vperm.xlu1 %8524, %v9692_v48  }
 0x1ca   : > { %1762 = vperm.xlu0 %8530, %v9309_v6  }
 0x1cb   : > { %v9743_v58 = vpop.permute.xlu0 %1441 }
 0x1cc   : > { %8525 = vset.pattern.permute.xlu1 %v14064_v54  ;;  %14102 = vst [vmem:[#allocation20_spill] sm:$0xff] %v9743_v58  ;;  %v1587_v58 = vadd.f32 %v1523_v4, %v1198_v42  ;;  %v14110_v4 = vld [vmem:[#allocation30_spill] sm:$0xff] }
 0x1cd   : > { %2956 = vperm.xlu1 %8525, %v9692_v48  }
 0x1ce   : > { %1770 = vperm.xlu0 %8530, %v9315_v10   ;;  %v1976_v24 = vadd.f32 %v1912_v60, %v1587_v58  ;;  %v14112_v58 = vld [vmem:[#allocation32_spill] sm:$0xff] }
 0x1cf   : > { %v9755_v11 = vpop.permute.xlu0 %1449 }
 0x1d0   : > { %14105 = vst [vmem:[#allocation22_spill] sm:$0xff] %v9755_v11  ;;  %v1200_v11 = vadd.f32 %v9551_v36, %v1130_v45 }
 0x1d1   : > { %8526 = vset.pattern.permute.xlu1 %v14091_v39 }
 0x1d2   : > { %1778 = vperm.xlu0 %8530, %v9321_v14   ;;  %2575 = vperm.xlu1 %8526, %v9706_v47   ;;  %v1589_v46 = vadd.f32 %v1525_v30, %v1200_v11  ;;  %v14117_v30 = vld [vmem:[#allocation38_spill] sm:$0xff] }
 0x1d3   : > { %v9769_v7 = vpop.permute.xlu0 %1457 }
 0x1d4   : > { %14109 = vst [vmem:[#allocation3_spill] sm:$0xff] %v9769_v7 }
 0x1d6   : > { %1786 = vperm.xlu0 %8530, %v9327_v0   ;;  %8527 = vset.pattern.permute.xlu1 %v14064_v54 }
 0x1d7   : > { %2960 = vperm.xlu1 %8527, %v9624_v9   ;;  %v14098_v9 = vld [vmem:[#allocation18_spill] sm:$0xff]  ;;  %v9776_v22 = vpop.permute.xlu0 %1465 }
 0x1d8   : > { %14099 = vst [vmem:[#allocation18_spill] sm:$0xff] %v9737_v1  ;;  %v1695_v1 = vpop.permute.xlu1 %1694  ;;  %14111 = vst [vmem:[#allocation24_spill] sm:$0xff] %v9776_v22 }
 0x1d9   : > { %v1914_v62 = vmul.f32 %v9572_v28, %v1695_v1  ;;  %v14113_v1 = vld [vmem:[#allocation34_spill] sm:$0xff] }
 0x1da   : > { %1794 = vperm.xlu0 %8530, %v9333_v8  }
 0x1db   : > { %8528 = vset.pattern.permute.xlu1 %v14091_v39  ;;  %v1978_v42 = vadd.f32 %v1914_v62, %v1589_v46  ;;  %v9784_v11 = vpop.permute.xlu0 %1473  ;;  %v14118_v46 = vld [vmem:[#allocation40_spill] sm:$0xff] }
 0x1dc   : > { %2579 = vperm.xlu1 %8528, %v9644_v5   ;;  %14114 = vst [vmem:[#allocation26_spill] sm:$0xff] %v9784_v11  ;;  %v9793_v62 = vpop.permute.xlu1 %1702 }
 0x1dd   : > { %v9779_v60 = vmax.f32 %v1978_v42, 0.0 }
 0x1de   : > { %1802 = vperm.xlu0 %8530, %v14098_v9  }
 0x1df   : > { %v9789_v45 = vpop.permute.xlu0 %1481 }
 0x1e0   : > { %2583 = vperm.xlu1 %8528, %v9731_v35   ;;  %14116 = vst [vmem:[#allocation4_spill] sm:$0xff] %v9789_v45  ;;  %v9798_v22 = vpop.permute.xlu1 %1710 }
 0x1e2   : > { %1810 = vperm.xlu0 %8530, %v14100_v17  }
 0x1e3   : > { %v9796_v42 = vpop.permute.xlu0 %1489 }
 0x1e4   : > { %8529 = vset.pattern.permute.xlu1 %v14064_v54  ;;  %14119 = vst [vmem:[#allocation28_spill] sm:$0xff] %v9796_v42  ;;  %v9804_v7 = vpop.permute.xlu1 %1718 }
 0x1e5   : > { %2972 = vperm.xlu1 %8529, %v9731_v35  }
 0x1e6   : > { %1818 = vperm.xlu0 %8530, %v14101_v19  }
 0x1e7   : > { %v9801_v11 = vpop.permute.xlu0 %1497 }
 0x1e8   : > { %14120 = vst [vmem:[#allocation30_spill] sm:$0xff] %v9801_v11  ;;  %v9809_v31 = vpop.permute.xlu1 %1726 }
 0x1e9   : > { %8531 = vset.pattern.permute.xlu1 %v14091_v39 }
 0x1ea   : > { %1826 = vperm.xlu0 %8530, %v14104_v27   ;;  %2591 = vperm.xlu1 %8531, %v9745_v29  }
 0x1eb   : > { %v9807_v45 = vpop.permute.xlu0 %1505 }
 0x1ec   : > { %14121 = vst [vmem:[#allocation32_spill] sm:$0xff] %v9807_v45  ;;  %v9815_v42 = vpop.permute.xlu1 %1734 }
 0x1ee   : > { %1834 = vperm.xlu0 %8530, %v14106_v18   ;;  %8532 = vset.pattern.permute.xlu1 %v14064_v54 }
 0x1ef   : > { %2976 = vperm.xlu1 %8532, %v9635_v40   ;;  %v9772_v40 = vmax.f32 %v1976_v24, 0.0  ;;  %v14115_v24 = vld [vmem:[#allocation36_spill] sm:$0xff] }
 0x1f0   : > { %v9822_v11 = vpop.permute.xlu1 %1742 }
 0x1f2   : > { %1842 = vperm.xlu0 %8530, %v14108_v43  }
 0x1f3   : > { %8533 = vset.pattern.permute.xlu1 %v14091_v39 }
 0x1f4   : > { %2595 = vperm.xlu1 %8533, %v9657_v3  }
 0x1f6   : > { %1850 = vperm.xlu0 %8530, %v14110_v4  }
 0x1f8   : > { %2599 = vperm.xlu1 %8533, %v9772_v40  }
 0x1fa   : > { %1858 = vperm.xlu0 %8530, %v14112_v58  }
 0x1fc   : > { %8534 = vset.pattern.permute.xlu1 %v14090_v50 }
 0x1fd   : > { %2162 = vperm.xlu1 %8534, %v9779_v60  }
 0x1fe   : > { %1866 = vperm.xlu0 %8530, %v14113_v1  }
 0x201   : > { %8536 = vset.pattern.permute.xlu1 %v14091_v39 }
 0x202   : > { %2603 = vperm.xlu1 %8536, %v9663_v41   ;;  %1874 = vperm.xlu0 %8530, %v14115_v24  }
 0x206   : > { %1882 = vperm.xlu0 %8530, %v14117_v30   ;;  %8537 = vset.pattern.permute.xlu1 %v14090_v50 }
 0x20a   : > { %1890 = vperm.xlu0 %8530, %v14118_v46  }
 0x20e   : > { %2948 = vperm.xlu0 %8530, %v9608_v12  }
 0x212   : > { %2952 = vperm.xlu0 %8530, %v9622_v2  }
 0x216   : > { %2964 = vperm.xlu0 %8530, %v9706_v47  }
 0x21a   : > { %2968 = vperm.xlu0 %8530, %v9644_v5   ;;  %v9829_v5 = vpop.permute.xlu1 %1750 }
 0x21c   : > { %v9812_v15 = vpop.permute.xlu0 %2555 }
 0x21d   : > { %14122 = vst [vmem:[#allocation34_spill] sm:$0xff] %v9812_v15 }
 0x21e   : > { %2980 = vperm.xlu0 %8530, %v9745_v29  }
 0x220   : > { %v9817_v12 = vpop.permute.xlu0 %2571 }
 0x221   : > { %14123 = vst [vmem:[#allocation36_spill] sm:$0xff] %v9817_v12 }
 0x222   : > { %2984 = vperm.xlu0 %8530, %v9657_v3   ;;  %v9836_v3 = vpop.permute.xlu1 %1758 }
 0x224   : > { %v9820_v2 = vpop.permute.xlu0 %2587 }
 0x225   : > { %14124 = vst [vmem:[#allocation38_spill] sm:$0xff] %v9820_v2 }
 0x226   : > { %2988 = vperm.xlu0 %8530, %v9772_v40   ;;  %v9842_v44 = vpop.permute.xlu1 %1766 }
 0x229   : > { %v9825_v45 = vpop.permute.xlu0 %1698 }
 0x22a   : > { %8535 = vset.pattern.permute.xlu0 %v14090_v50  ;;  %v9849_v16 = vpop.permute.xlu1 %1774 }
 0x22b   : > { %865 = vperm.xlu0 %8535, %v9255_v49  }
 0x22d   : > { %v9831_v15 = vpop.permute.xlu0 %1706 }
 0x22f   : > { %875 = vperm.xlu0 %8535, %v9262_v51  }
 0x231   : > { %v9834_v12 = vpop.permute.xlu0 %1714 }
 0x233   : > { %885 = vperm.xlu0 %8535, %v9269_v53   ;;  %v9855_v53 = vpop.permute.xlu1 %1782 }
 0x235   : > { %v9839_v2 = vpop.permute.xlu0 %1722 }
 0x236   : > { %14125 = vst [vmem:[#allocation40_spill] sm:$0xff] %v9839_v2 }
 0x237   : > { %895 = vperm.xlu0 %8535, %v9276_v55  }
 0x239   : > { %v9844_v50 = vpop.permute.xlu0 %1730 }
 0x23a   : > { %14126 = vst [vmem:[#allocation71_spill] sm:$0xff] %v9844_v50  ;;  %v9862_v50 = vpop.permute.xlu1 %1790 }
 0x23b   : > { %905 = vperm.xlu0 %8535, %v9283_v57  }
 0x23d   : > { %v9847_v49 = vpop.permute.xlu0 %1738 }
 0x23f   : > { %915 = vperm.xlu0 %8535, %v9290_v59   ;;  %v9868_v59 = vpop.permute.xlu1 %1798 }
 0x241   : > { %v9852_v51 = vpop.permute.xlu0 %1746 }
 0x242   : > { %14127 = vst [vmem:[#allocation72_spill] sm:$0xff] %v9852_v51 }
 0x243   : > { %925 = vperm.xlu0 %8535, %v9297_v61  }
 0x245   : > { %v9857_v2 = vpop.permute.xlu0 %1754 }
 0x246   : > { %14128 = vst [vmem:[#allocation73_spill] sm:$0xff] %v9857_v2  ;;  %v9875_v2 = vpop.permute.xlu1 %1806 }
 0x247   : > { %935 = vperm.xlu0 %8535, %v9303_v63  }
 0x249   : > { %v9860_v55 = vpop.permute.xlu0 %1762 }
 0x24a   : > { %14129 = vst [vmem:[#allocation74_spill] sm:$0xff] %v9860_v55 }
 0x24b   : > { %945 = vperm.xlu0 %8535, %v9309_v6   ;;  %v9881_v6 = vpop.permute.xlu1 %1814 }
 0x24d   : > { %v9865_v57 = vpop.permute.xlu0 %1770 }
 0x24e   : > { %14130 = vst [vmem:[#allocation75_spill] sm:$0xff] %v9865_v57 }
 0x24f   : > { %955 = vperm.xlu0 %8535, %v9315_v10  }
 0x251   : > { %v9870_v51 = vpop.permute.xlu0 %1778 }
 0x252   : > { %14131 = vst [vmem:[#allocation76_spill] sm:$0xff] %v9870_v51  ;;  %v9888_v51 = vpop.permute.xlu1 %1822 }
 0x253   : > { %965 = vperm.xlu0 %8535, %v9321_v14  }
 0x255   : > { %v9873_v61 = vpop.permute.xlu0 %1786 }
 0x256   : > { %14132 = vst [vmem:[#allocation77_spill] sm:$0xff] %v9873_v61  ;;  %v1916_v61 = vmul.f32 %v9572_v28, %v9793_v62  ;;  %v1918_v62 = vmul.f32 %v9572_v28, %v9798_v22  ;;  %v1920_v22 = vmul.f32 %v9572_v28, %v9804_v7 }
 0x257   : > { %975 = vperm.xlu0 %8535, %v9327_v0   ;;  %v9894_v0 = vpop.permute.xlu1 %1830 }
 0x259   : > { %v9878_v63 = vpop.permute.xlu0 %1794 }
 0x25a   : > { %14133 = vst [vmem:[#allocation78_spill] sm:$0xff] %v9878_v63 }
 0x25b   : > { %985 = vperm.xlu0 %8535, %v9333_v8  }
 0x25d   : > { %v9883_v57 = vpop.permute.xlu0 %1802 }
 0x25e   : > { %14134 = vst [vmem:[#allocation79_spill] sm:$0xff] %v9883_v57  ;;  %v9901_v57 = vpop.permute.xlu1 %1838 }
 0x25f   : > { %995 = vperm.xlu0 %8535, %v14098_v9  }
 0x261   : > { %v9886_v10 = vpop.permute.xlu0 %1810 }
 0x262   : > { %14135 = vst [vmem:[#allocation80_spill] sm:$0xff] %v9886_v10  ;;  %v4392_v10 = vld [vmem:[%s13874_s10 + $0x38] sm:$0xff] }
 0x263   : > { %1005 = vperm.xlu0 %8535, %v14100_v17   ;;  %v9907_v17 = vpop.permute.xlu1 %1846 }
 0x265   : > { %v9891_v14 = vpop.permute.xlu0 %1818 }
 0x266   : > { %14136 = vst [vmem:[#allocation81_spill] sm:$0xff] %v9891_v14 }
 0x267   : > { %1015 = vperm.xlu0 %8535, %v14101_v19  }
 0x269   : > { %v9896_v63 = vpop.permute.xlu0 %1826 }
 0x26a   : > { %14137 = vst [vmem:[#allocation82_spill] sm:$0xff] %v9896_v63  ;;  %v9914_v63 = vpop.permute.xlu1 %1854 }
 0x26b   : > { %1025 = vperm.xlu0 %8535, %v14104_v27  }
 0x26d   : > { %v9899_v8 = vpop.permute.xlu0 %1834 }
 0x26e   : > { %14138 = vst [vmem:[#allocation83_spill] sm:$0xff] %v9899_v8 }
 0x26f   : > { %1035 = vperm.xlu0 %8535, %v14106_v18   ;;  %v9920_v18 = vpop.permute.xlu1 %1862 }
 0x271   : > { %v9904_v9 = vpop.permute.xlu0 %1842 }
 0x272   : > { %14139 = vst [vmem:[#allocation84_spill] sm:$0xff] %v9904_v9 }
 0x273   : > { %1045 = vperm.xlu0 %8535, %v14108_v43  }
 0x275   : > { %v9909_v14 = vpop.permute.xlu0 %1850 }
 0x276   : > { %14140 = vst [vmem:[#allocation85_spill] sm:$0xff] %v9909_v14  ;;  %v9927_v14 = vpop.permute.xlu1 %1870 }
 0x277   : > { %1055 = vperm.xlu0 %8535, %v14110_v4  }
 0x279   : > { %v9912_v19 = vpop.permute.xlu0 %1858 }
 0x27a   : > { %14141 = vst [vmem:[#allocation86_spill] sm:$0xff] %v9912_v19 }
 0x27b   : > { %1065 = vperm.xlu0 %8535, %v14112_v58   ;;  %v9933_v58 = vpop.permute.xlu1 %1878 }
 0x27d   : > { %v9917_v27 = vpop.permute.xlu0 %1866 }
 0x27e   : > { %14142 = vst [vmem:[#allocation87_spill] sm:$0xff] %v9917_v27 }
 0x27f   : > { %1075 = vperm.xlu0 %8535, %v14113_v1   ;;  %v4385_v1 = vld [vmem:[%s13874_s10] sm:$0xff] }
 0x281   : > { %v9922_v9 = vpop.permute.xlu0 %1874 }
 0x282   : > { %14143 = vst [vmem:[#allocation88_spill] sm:$0xff] %v9922_v9  ;;  %v9952_v9 = vpop.permute.xlu1 %1886 }
 0x283   : > { %1085 = vperm.xlu0 %8535, %v14115_v24   ;;  %v4386_v24 = vld [vmem:[%s13874_s10 + $0x8] sm:$0xff] }
 0x285   : > { %v9925_v43 = vpop.permute.xlu0 %1882 }
 0x286   : > { %14144 = vst [vmem:[#allocation89_spill] sm:$0xff] %v9925_v43  ;;  %v8487_v43 = vpack.c.bf16 %v4386_v24, %v4385_v1  ;;  %v9964_v8 = vpop.permute.xlu1 %1894 }
 0x287   : > { %1095 = vperm.xlu0 %8535, %v14117_v30  }
 0x288   : > { %8488 = vmatprep.subr.bf16.mxu0 %v8487_v43 }
 0x289   : > { %v9930_v4 = vpop.permute.xlu0 %1890  ;;  %8490 = vmatpush3.bf16.msra.mxu0 %v8487_v43  ;;  %v4390_v43 = vld [vmem:[%s13874_s10 + $0x28] sm:$0xff] }
 0x28a   : > { %14145 = vst [vmem:[#allocation90_spill] sm:$0xff] %v9930_v4  ;;  %v4388_v4 = vld [vmem:[%s13874_s10 + $0x18] sm:$0xff] }
 0x28b   : > { %1105 = vperm.xlu0 %8535, %v14118_v46   ;;  %v4387_v46 = vld [vmem:[%s13874_s10 + $0x10] sm:$0xff] }
 0x28c   : > { %v8491_v19 = vpack.c.bf16 %v4388_v4, %v4387_v46  ;;  %v14147_v4 = vld [vmem:[#allocation5_spill] sm:$0xff] }
 0x28d   : > { %v9935_v27 = vpop.permute.xlu0 %2948 }
 0x28e   : > { %8492 = vmatprep.subr.bf16.mxu0 %v8491_v19 }
 0x28f   : > { %2097 = vperm.xlu0 %8535, %v9614_v52   ;;  %8494 = vmatpush3.bf16.msra.mxu0 %v8491_v19  ;;  %v4389_v52 = vld [vmem:[%s13874_s10 + $0x20] sm:$0xff]  ;;  %v4391_v19 = vld [vmem:[%s13874_s10 + $0x30] sm:$0xff] }
 0x290   : > { %v8495_v24 = vpack.c.bf16 %v4390_v43, %v4389_v52  ;;  %v8499_v52 = vpack.c.bf16 %v4392_v10, %v4391_v19 }
 0x291   : > { %v9944_v30 = vpop.permute.xlu0 %2952 }
 0x292   : > { %8496 = vmatprep.subr.bf16.mxu0 %v8495_v24 }
 0x293   : > { %2112 = vperm.xlu0 %8535, %v9692_v48   ;;  %v1132_v48 = vmul.f32 %v9541_v34, %v14147_v4  ;;  %8498 = vmatpush3.bf16.msra.mxu0 %v8495_v24  ;;  %v14149_v4 = vld [vmem:[#allocation6_spill] sm:$0xff] }
 0x294   : > { %8500 = vmatprep.subr.bf16.mxu0 %v8499_v52  ;;  %v1134_v24 = vmul.f32 %v9541_v34, %v14149_v4 }
 0x295   : > { %v9955_v1 = vpop.permute.xlu0 %2964  ;;  %v1202_v43 = vadd.f32 %v9551_v36, %v1132_v48 }
 0x296   : > { %14146 = vst [vmem:[#allocation91_spill] sm:$0xff] %v9955_v1  ;;  %v9986_v1 = vpop.permute.xlu1 %2102  ;;  %v1204_v19 = vadd.f32 %v9551_v36, %v1134_v24 }
 0x297   : > { %2122 = vperm.xlu0 %8535, %v9706_v47   ;;  %v1527_v47 = vmul.f32 %v9556_v37, %v9536_v33  ;;  %8502 = vmatpush3.bf16.msra.mxu0 %v8499_v52  ;;  %v1529_v33 = vmul.f32 %v9556_v37, %v9561_v26 }
 0x299   : > { %v9968_v46 = vpop.permute.xlu0 %2968  ;;  %v1591_v10 = vadd.f32 %v1527_v47, %v1202_v43  ;;  %v1593_v52 = vadd.f32 %v1529_v33, %v1204_v19  ;;  %v1531_v47 = vmul.f32 %v9556_v37, %v9589_v32  ;;  %v14153_v43 = vld [vmem:[#allocation8_spill] sm:$0xff]  ;;  %v1533_v32 = vmul.f32 %v9556_v37, %v9606_v25 }
 0x29a   : > { %14148 = vst [vmem:[#allocation5_spill] sm:$0xff] %v9968_v46  ;;  %v1535_v25 = vmul.f32 %v9556_v37, %v9626_v13 }
 0x29b   : > { %2132 = vperm.xlu0 %8535, %v9731_v35   ;;  %v14151_v35 = vld [vmem:[#allocation7_spill] sm:$0xff]  ;;  %v1980_v4 = vadd.f32 %v1916_v61, %v1591_v10  ;;  %v1982_v61 = vadd.f32 %v1918_v62, %v1593_v52  ;;  %v1922_v62 = vmul.f32 %v9572_v28, %v9809_v31 }
 0x29c   : > { %v1136_v48 = vmul.f32 %v9541_v34, %v14151_v35  ;;  %v1138_v35 = vmul.f32 %v9541_v34, %v14153_v43 }
 0x29d   : > { %v9984_v55 = vpop.permute.xlu0 %2980  ;;  %v10006_v24 = vmax.f32 %v1980_v4, 0.0  ;;  %v10018_v43 = vmax.f32 %v1982_v61, 0.0 }
 0x29e   : > { %14150 = vst [vmem:[#allocation6_spill] sm:$0xff] %v9984_v55  ;;  %v1206_v26 = vadd.f32 %v9551_v36, %v1136_v48  ;;  %v1208_v19 = vadd.f32 %v9551_v36, %v1138_v35  ;;  %v14156_v35 = vld [vmem:[#allocation10_spill] sm:$0xff]  ;;  %v1537_v55 = vmul.f32 %v9556_v37, %v9640_v38 }
 0x29f   : > { %2142 = vperm.xlu0 %8535, %v9745_v29   ;;  %v10002_v29 = vpop.permute.xlu1 %2107  ;;  %v1142_v61 = vmul.f32 %v9541_v34, %v14156_v35 }
 0x2a0   : > { %v1595_v33 = vadd.f32 %v1531_v47, %v1206_v26  ;;  %v1597_v47 = vadd.f32 %v1533_v32, %v1208_v19  ;;  %v1924_v32 = vmul.f32 %v9572_v28, %v9815_v42 }
 0x2a1   : > { %v9996_v46 = vpop.permute.xlu0 %2984 }
 0x2a2   : > { %14152 = vst [vmem:[#allocation7_spill] sm:$0xff] %v9996_v46  ;;  %v1984_v4 = vadd.f32 %v1920_v22, %v1595_v33  ;;  %v14157_v22 = vld [vmem:[#allocation42_spill] sm:$0xff]  ;;  %v10537_v46 = vld [vmem:[%s10435_s23 + $0x50] sm:$0xff] }
 0x2a3   : > { %2152 = vperm.xlu0 %8535, %v9772_v40   ;;  %v14155_v40 = vld [vmem:[#allocation9_spill] sm:$0xff]  ;;  %v10022_v7 = vpop.permute.xlu1 %2117  ;;  %v1526_v33 = vmul.f32 %v9556_v37, %v14157_v22  ;;  %v14158_v22 = vld [vmem:[#allocation11_spill] sm:$0xff] }
 0x2a4   : > { %v1140_v48 = vmul.f32 %v9541_v34, %v14155_v40  ;;  %v10033_v31 = vmax.f32 %v1984_v4, 0.0  ;;  %v1212_v4 = vadd.f32 %v9551_v36, %v1142_v61 }
 0x2a5   : > { %v10010_v10 = vpop.permute.xlu0 %2988 }
 0x2a6   : > { %14154 = vst [vmem:[#allocation8_spill] sm:$0xff] %v10010_v10  ;;  %v1210_v40 = vadd.f32 %v9551_v36, %v1140_v48  ;;  %v1986_v10 = vadd.f32 %v1922_v62, %v1597_v47  ;;  %v1915_v48 = vmul.f32 %v9572_v28, %v9825_v45  ;;  %v1144_v62 = vmul.f32 %v9541_v34, %v14158_v22 }
 0x2a7   : > { %2172 = vperm.xlu0 %8535, %v10006_v24   ;;  %v10046_v47 = vpop.permute.xlu1 %2127  ;;  %v1601_v45 = vadd.f32 %v1537_v55, %v1212_v4  ;;  %v1541_v4 = vmul.f32 %v9556_v37, %v9660_v56 }
 0x2a8   : > { %v10048_v42 = vmax.f32 %v1986_v10, 0.0  ;;  %v1214_v10 = vadd.f32 %v9551_v36, %v1144_v62 }
 0x2aa   : > { %v866_v52 = vpop.permute.xlu0 %865 }
 0x2ab   : > { %v1131_v26 = vmul.f32 %v9541_v34, %v866_v52  ;;  %2182 = vperm.xlu0 %8535, %v10018_v43   ;;  %v1599_v52 = vadd.f32 %v1535_v25, %v1210_v40  ;;  %v1926_v25 = vmul.f32 %v9572_v28, %v9822_v11  ;;  %v1928_v11 = vmul.f32 %v9572_v28, %v9829_v5  ;;  %v10067_v55 = vpop.permute.xlu1 %2137 }
 0x2ad   : > { %v1201_v13 = vadd.f32 %v9551_v36, %v1131_v26  ;;  %v1988_v26 = vadd.f32 %v1924_v32, %v1599_v52  ;;  %v1990_v52 = vadd.f32 %v1926_v25, %v1601_v45  ;;  %v1930_v45 = vmul.f32 %v9572_v28, %v9836_v3 }
 0x2ae   : > { %v876_v19 = vpop.permute.xlu0 %875 }
 0x2af   : > { %v1590_v35 = vadd.f32 %v1526_v33, %v1201_v13  ;;  %2192 = vperm.xlu0 %8535, %v10033_v31   ;;  %v1539_v33 = vmul.f32 %v9556_v37, %v9653_v21  ;;  %v14159_v13 = vld [vmem:[#allocation12_spill] sm:$0xff]  ;;  %v10062_v32 = vmax.f32 %v1988_v26, 0.0  ;;  %v1133_v21 = vmul.f32 %v9541_v34, %v876_v19  ;;  %v14161_v26 = vld [vmem:[#allocation13_spill] sm:$0xff] }
 0x2b0   : > { %v1146_v22 = vmul.f32 %v9541_v34, %v14159_v13  ;;  %v1148_v25 = vmul.f32 %v9541_v34, %v14161_v26  ;;  %v10078_v5 = vmax.f32 %v1990_v52, 0.0  ;;  %v1543_v13 = vmul.f32 %v9556_v37, %v9667_v20  ;;  %v14164_v52 = vld [vmem:[#allocation43_spill] sm:$0xff] }
 0x2b1   : > { %v1979_v38 = vadd.f32 %v1915_v48, %v1590_v35  ;;  %14160 = vst [vmem:[#allocation9_spill] sm:$0xff] %v10062_v32  ;;  %v1603_v35 = vadd.f32 %v1539_v33, %v1214_v10  ;;  %v1203_v19 = vadd.f32 %v9551_v36, %v1133_v21  ;;  %v1528_v3 = vmul.f32 %v9556_v37, %v14164_v52 }
 0x2b2   : > { %v10052_v40 = vpop.permute.xlu0 %885  ;;  %v1216_v62 = vadd.f32 %v9551_v36, %v1146_v22  ;;  %14162 = vst [vmem:[#allocation10_spill] sm:$0xff] %v10078_v5  ;;  %v14163_v22 = vld [vmem:[#allocation14_spill] sm:$0xff]  ;;  %v1218_v21 = vadd.f32 %v9551_v36, %v1148_v25  ;;  %v1917_v25 = vmul.f32 %v9572_v28, %v9831_v15 }
 0x2b3   : > { %2202 = vperm.xlu0 %8535, %v10048_v42   ;;  %v10057_v61 = vmax.f32 %v1979_v38, 0.0  ;;  %v1992_v38 = vadd.f32 %v1928_v11, %v1603_v35  ;;  %v1150_v10 = vmul.f32 %v9541_v34, %v14163_v22  ;;  %v10094_v11 = vpop.permute.xlu1 %2147  ;;  %v1545_v22 = vmul.f32 %v9556_v37, %v9677_v23 }
 0x2b4   : > { %v1605_v33 = vadd.f32 %v1541_v4, %v1216_v62  ;;  %v1932_v4 = vmul.f32 %v9572_v28, %v9842_v44  ;;  %v1592_v62 = vadd.f32 %v1528_v3, %v1203_v19  ;;  %v1607_v26 = vadd.f32 %v1543_v13, %v1218_v21  ;;  %v14169_v21 = vld [vmem:[#allocation67_spill] sm:$0xff] }
 0x2b5   : > { %2167 = vperm.xlu1 %8537, %v10057_v61   ;;  %v10097_v35 = vmax.f32 %v1992_v38, 0.0  ;;  %v1220_v52 = vadd.f32 %v9551_v36, %v1150_v10  ;;  %v14166_v38 = vld [vmem:[#allocation15_spill] sm:$0xff]  ;;  %v1547_v15 = vmul.f32 %v9556_v37, %v14169_v21  ;;  %v14173_v21 = vld [vmem:[#allocation68_spill] sm:$0xff] }
 0x2b6   : > { %v10070_v48 = vpop.permute.xlu0 %895  ;;  %v1996_v19 = vadd.f32 %v1932_v4, %v1607_v26  ;;  %v1981_v3 = vadd.f32 %v1917_v25, %v1592_v62  ;;  %v1936_v25 = vmul.f32 %v9572_v28, %v9855_v53 }
 0x2b7   : > { %2212 = vperm.xlu0 %8535, %v10062_v32   ;;  %14165 = vst [vmem:[#allocation42_spill] sm:$0xff] %v10097_v35  ;;  %v10116_v13 = vpop.permute.xlu1 %2157  ;;  %v1609_v10 = vadd.f32 %v1545_v22, %v1220_v52 }
 0x2b8   : > { %14168 = vst [vmem:[#allocation12_spill] sm:$0xff] %v10116_v13  ;;  %v10128_v26 = vmax.f32 %v1996_v19, 0.0  ;;  %v10134_v22 = vmax.f32 %v1981_v3, 0.0  ;;  %v1549_v13 = vmul.f32 %v9556_v37, %v14173_v21  ;;  %v14175_v19 = vld [vmem:[#allocation17_spill] sm:$0xff] }
 0x2b9   : > { %8538 = vset.pattern.permute.xlu1 %v14064_v54 }
 0x2ba   : > { %2992 = vperm.xlu1 %8538, %v9663_v41   ;;  %v10085_v56 = vpop.permute.xlu0 %905  ;;  %v1994_v41 = vadd.f32 %v1930_v45, %v1605_v33  ;;  %v1152_v45 = vmul.f32 %v9541_v34, %v14166_v38  ;;  %v1934_v33 = vmul.f32 %v9572_v28, %v9849_v16  ;;  %14171 = vst [vmem:[#allocation13_spill] sm:$0xff] %v10128_v26 }
 0x2bb   : > { %2222 = vperm.xlu0 %8535, %v10078_v5  }
 0x2bc   : > { %v10112_v44 = vmax.f32 %v1994_v41, 0.0  ;;  %v14170_v41 = vld [vmem:[#allocation16_spill] sm:$0xff]  ;;  %v1222_v16 = vadd.f32 %v9551_v36, %v1152_v45  ;;  %v1998_v62 = vadd.f32 %v1934_v33, %v1609_v10  ;;  %v1156_v33 = vmul.f32 %v9541_v34, %v14175_v19  ;;  %v10143_v10 = vpop.permute.xlu1 %2559 }
 0x2bd   : > { %v1154_v4 = vmul.f32 %v9541_v34, %v14170_v41  ;;  %v1135_v41 = vmul.f32 %v9541_v34, %v10052_v40  ;;  %v1940_v40 = vmul.f32 %v9572_v28, %v9868_v59  ;;  %v14184_v59 = vld [vmem:[#allocation21_spill] sm:$0xff] }
 0x2be   : > { %2996 = vperm.xlu1 %8538, %v9779_v60   ;;  %v10102_v20 = vpop.permute.xlu0 %915  ;;  %14167 = vst [vmem:[#allocation11_spill] sm:$0xff] %v10112_v44  ;;  %v1611_v52 = vadd.f32 %v1547_v15, %v1222_v16  ;;  %v10146_v53 = vmax.f32 %v1998_v62, 0.0  ;;  %v1938_v15 = vmul.f32 %v9572_v28, %v9862_v50  ;;  %v1226_v19 = vadd.f32 %v9551_v36, %v1156_v33 }
 0x2bf   : > { %2232 = vperm.xlu0 %8535, %v10097_v35   ;;  %v1224_v45 = vadd.f32 %v9551_v36, %v1154_v4  ;;  %v14178_v4 = vld [vmem:[#allocation69_spill] sm:$0xff]  ;;  %v14179_v35 = vld [vmem:[#allocation19_spill] sm:$0xff] }
 0x2c0   : > { %14176 = vst [vmem:[#allocation43_spill] sm:$0xff] %v10146_v53  ;;  %v2000_v3 = vadd.f32 %v1936_v25, %v1611_v52  ;;  %v1158_v62 = vmul.f32 %v9541_v34, %v14179_v35  ;;  %v10167_v52 = vpop.permute.xlu1 %2944 }
 0x2c1   : > { %v1613_v21 = vadd.f32 %v1549_v13, %v1224_v45  ;;  %v1205_v13 = vadd.f32 %v9551_v36, %v1135_v41  ;;  %v1160_v41 = vmul.f32 %v9541_v34, %v14184_v59 }
 0x2c2   : > { %8539 = vset.pattern.permute.xlu1 %v14091_v39  ;;  %v10119_v23 = vpop.permute.xlu0 %925  ;;  %v10161_v25 = vmax.f32 %v2000_v3, 0.0 }
 0x2c3   : > { %2242 = vperm.xlu0 %8535, %v10112_v44   ;;  %2611 = vperm.xlu1 %8539, %v10057_v61   ;;  %v14174_v44 = vmov 0   ;;  %v2002_v50 = vadd.f32 %v1938_v15, %v1613_v21  ;;  %v1228_v15 = vadd.f32 %v9551_v36, %v1158_v62  ;;  %v1919_v62 = vmul.f32 %v9572_v28, %v9834_v12 }
 0x2c4   : > { %14180 = vst [vmem:[#allocation67_spill] sm:$0xff] %v10161_v25 }
 0x2c5   : > { %v10179_v21 = vmax.f32 %v2002_v50, 0.0  ;;  %v1230_v50 = vadd.f32 %v9551_v36, %v1160_v41  ;;  %v14191_v41 = vld [vmem:[#allocation18_spill] sm:$0xff] }
 0x2c6   : > { %v10132_v38 = vpop.permute.xlu0 %935 }
 0x2c7   : > { %14172 = vst [vmem:[#allocation14_spill] sm:$0xff] %v10132_v38  ;;  %2252 = vperm.xlu0 %8535, %v10128_v26   ;;  %8540 = vset.pattern.permute.xlu1 %v14174_v44  ;;  %v1551_v26 = vmul.f32 %v9556_v37, %v14178_v4  ;;  %v14182_v4 = vld [vmem:[#allocation70_spill] sm:$0xff]  ;;  %14185 = vst [vmem:[#allocation68_spill] sm:$0xff] %v10179_v21 }
 0x2c8   : > { %2177 = vperm.xlu1 %8540, %v10134_v22   ;;  %v1553_v35 = vmul.f32 %v9556_v37, %v14182_v4 }
 0x2c9   : > { %v1615_v33 = vadd.f32 %v1551_v26, %v1226_v19 }
 0x2ca   : > { %v10152_v16 = vpop.permute.xlu0 %945  ;;  %v1617_v4 = vadd.f32 %v1553_v35, %v1228_v15  ;;  %v1944_v35 = vmul.f32 %v9572_v28, %v9881_v6 }
 0x2cb   : > { %14177 = vst [vmem:[#allocation15_spill] sm:$0xff] %v10152_v16  ;;  %2262 = vperm.xlu0 %8535, %v10146_v53   ;;  %v14183_v16 = vld [vmem:[#allocation44_spill] sm:$0xff] }
 0x2cc   : > { %8541 = vset.pattern.permute.xlu1 %v14064_v54  ;;  %v1530_v3 = vmul.f32 %v9556_v37, %v14183_v16  ;;  %v14187_v16 = vld [vmem:[#allocation2_spill] sm:$0xff] }
 0x2cd   : > { %3000 = vperm.xlu1 %8541, %v10057_v61   ;;  %v2004_v61 = vadd.f32 %v1940_v40, %v1615_v33  ;;  %v14188_v40 = vld [vmem:[#allocation23_spill] sm:$0xff] }
 0x2ce   : > { %v10169_v45 = vpop.permute.xlu0 %955  ;;  %v1594_v26 = vadd.f32 %v1530_v3, %v1205_v13  ;;  %v1162_v33 = vmul.f32 %v9541_v34, %v14188_v40  ;;  %v14192_v40 = vld [vmem:[#allocation25_spill] sm:$0xff] }
 0x2cf   : > { %14181 = vst [vmem:[#allocation16_spill] sm:$0xff] %v10169_v45  ;;  %2272 = vperm.xlu0 %8535, %v10161_v25   ;;  %v1942_v45 = vmul.f32 %v9572_v28, %v9875_v2  ;;  %v1555_v25 = vmul.f32 %v9556_v37, %v14187_v16  ;;  %v10194_v2 = vpop.permute.xlu1 %2563  ;;  %v10196_v13 = vmax.f32 %v2004_v61, 0.0  ;;  %v1557_v16 = vmul.f32 %v9556_v37, %v14191_v41  ;;  %v14195_v41 = vld [vmem:[#allocation20_spill] sm:$0xff] }
 0x2d0   : > { %v1983_v15 = vadd.f32 %v1919_v62, %v1594_v26  ;;  %v1232_v61 = vadd.f32 %v9551_v36, %v1162_v33  ;;  %v1946_v26 = vmul.f32 %v9572_v28, %v9888_v51  ;;  %v1559_v33 = vmul.f32 %v9556_v37, %v14195_v41  ;;  %v14196_v51 = vld [vmem:[#allocation27_spill] sm:$0xff]  ;;  %v10244_v41 = vld [vmem:[%s13868_s4 + $0x1] ss:$0 sm:$0xff] }
 0x2d1   : > { %3004 = vperm.xlu1 %8541, %v10006_v24   ;;  %14189 = vst [vmem:[#allocation69_spill] sm:$0xff] %v10196_v13  ;;  %v2006_v3 = vadd.f32 %v1942_v45, %v1617_v4  ;;  %v1619_v59 = vadd.f32 %v1555_v25, %v1230_v50  ;;  %v1164_v45 = vmul.f32 %v9541_v34, %v14192_v40  ;;  %v10228_v34 = vld [vmem:[%s13868_s4] ss:$0 sm:$0xff]  ;;  %14199 = vst [vmem:[#allocation23_spill] sm:$0xff] %v10244_v41 }
 0x2d2   : > { %v10184_v19 = vpop.permute.xlu0 %965  ;;  %v10214_v62 = vmax.f32 %v1983_v15, 0.0  ;;  %v1621_v50 = vadd.f32 %v1557_v16, %v1232_v61  ;;  %v1948_v16 = vmul.f32 %v9572_v28, %v9894_v0 }
 0x2d3   : > { %14186 = vst [vmem:[#allocation17_spill] sm:$0xff] %v10184_v19  ;;  %2282 = vperm.xlu0 %8535, %v10179_v21   ;;  %v10210_v4 = vmax.f32 %v2006_v3, 0.0  ;;  %v2008_v6 = vadd.f32 %v1944_v35, %v1619_v59  ;;  %v1166_v3 = vmul.f32 %v10228_v34, %v14196_v51  ;;  %v1137_v35 = vmul.f32 %v10228_v34, %v10070_v48  ;;  %v14200_v51 = vld [vmem:[#allocation22_spill] sm:$0xff] }
 0x2d4   : > { %v1234_v15 = vadd.f32 %v9551_v36, %v1164_v45  ;;  %v2010_v37 = vadd.f32 %v1946_v26, %v1621_v50  ;;  %v10253_v36 = vld [vmem:[%s13869_s5] ss:$0 sm:$0xff]  ;;  %v14201_v45 = vld [vmem:[#allocation29_spill] sm:$0xff] }
 0x2d5   : > { %8542 = vset.pattern.permute.xlu1 %v14091_v39  ;;  %14193 = vst [vmem:[#allocation70_spill] sm:$0xff] %v10210_v4  ;;  %v10235_v59 = vmax.f32 %v2008_v6, 0.0  ;;  %v1236_v28 = vadd.f32 %v10253_v36, %v1166_v3  ;;  %v1207_v48 = vadd.f32 %v10253_v36, %v1137_v35  ;;  %v1168_v6 = vmul.f32 %v10228_v34, %v14201_v45 }
 0x2d6   : > { %2619 = vperm.xlu1 %8542, %v10134_v22   ;;  %v10202_v12 = vpop.permute.xlu0 %975  ;;  %v1623_v40 = vadd.f32 %v1559_v33, %v1234_v15  ;;  %v10264_v26 = vmax.f32 %v2010_v37, 0.0  ;;  %v10269_v33 = vld [vmem:[%s13868_s4 + $0x2] ss:$0 sm:$0xff]  ;;  %v14203_v15 = vld [vmem:[#allocation45_spill] sm:$0xff]  ;;  %v14206_v37 = vld [vmem:[#allocation31_spill] sm:$0xff] }
 0x2d7   : > { %14190 = vst [vmem:[#allocation19_spill] sm:$0xff] %v10202_v12  ;;  %2292 = vperm.xlu0 %8535, %v10196_v13   ;;  %v10216_v12 = vpop.permute.xlu1 %2567  ;;  %14197 = vst [vmem:[#allocation21_spill] sm:$0xff] %v10235_v59  ;;  %v1950_v3 = vmul.f32 %v10269_v33, %v9901_v57  ;;  %v1238_v57 = vadd.f32 %v10253_v36, %v1168_v6 }
 0x2d8   : > { %14202 = vst [vmem:[#allocation18_spill] sm:$0xff] %v10264_v26  ;;  %v2012_v50 = vadd.f32 %v1948_v16, %v1623_v40  ;;  %v1170_v16 = vmul.f32 %v10228_v34, %v14206_v37  ;;  %v14210_v37 = vld [vmem:[#allocation24_spill] sm:$0xff] }
 0x2da   : > { %8543 = vset.pattern.permute.xlu1 %v14174_v44  ;;  %v10219_v25 = vpop.permute.xlu0 %985  ;;  %v10284_v19 = vmax.f32 %v2012_v50, 0.0  ;;  %v1240_v6 = vadd.f32 %v10253_v36, %v1170_v16 }
 0x2db   : > { %14194 = vst [vmem:[#allocation44_spill] sm:$0xff] %v10219_v25  ;;  %2302 = vperm.xlu0 %8535, %v10210_v4   ;;  %2187 = vperm.xlu1 %8543, %v10214_v62   ;;  %v1561_v25 = vmul.f32 %v10244_v41, %v14200_v51  ;;  %v10256_v0 = vpop.permute.xlu1 %2956  ;;  %v1532_v51 = vmul.f32 %v10244_v41, %v14203_v15 }
 0x2dc   : > { %14207 = vst [vmem:[#allocation20_spill] sm:$0xff] %v10284_v19 }
 0x2dd   : > { %v1596_v40 = vadd.f32 %v1532_v51, %v1207_v48  ;;  %v1565_v48 = vmul.f32 %v10244_v41, %v14210_v37  ;;  %v14214_v37 = vld [vmem:[#allocation26_spill] sm:$0xff] }
 0x2de   : > { %v10239_v61 = vpop.permute.xlu0 %995  ;;  %v1567_v16 = vmul.f32 %v10244_v41, %v14214_v37 }
 0x2df   : > { %14198 = vst [vmem:[#allocation2_spill] sm:$0xff] %v10239_v61  ;;  %2312 = vperm.xlu0 %8535, %v10235_v59   ;;  %8544 = vset.pattern.permute.xlu1 %v14064_v54  ;;  %v14205_v61 = vld [vmem:[#allocation3_spill] sm:$0xff] }
 0x2e0   : > { %3008 = vperm.xlu1 %8544, %v10134_v22   ;;  %v1625_v22 = vadd.f32 %v1561_v25, %v1236_v28  ;;  %v1563_v45 = vmul.f32 %v10244_v41, %v14205_v61  ;;  %v1952_v25 = vmul.f32 %v10269_v33, %v9907_v17  ;;  %v14208_v28 = vld [vmem:[#allocation40_spill] sm:$0xff]  ;;  %v14211_v17 = vld [vmem:[#allocation33_spill] sm:$0xff] }
 0x2e1   : > { %v1921_v61 = vmul.f32 %v10269_v33, %v14208_v28  ;;  %v1172_v50 = vmul.f32 %v10228_v34, %v14211_v17  ;;  %v1629_v28 = vadd.f32 %v1565_v48, %v1240_v6  ;;  %v14215_v17 = vld [vmem:[#allocation35_spill] sm:$0xff]  ;;  %v1956_v6 = vmul.f32 %v10269_v33, %v9920_v18 }
 0x2e2   : > { %v10275_v35 = vpop.permute.xlu0 %1005  ;;  %v2014_v15 = vadd.f32 %v1950_v3, %v1625_v22  ;;  %v1627_v59 = vadd.f32 %v1563_v45, %v1238_v57  ;;  %v1954_v45 = vmul.f32 %v10269_v33, %v9914_v63  ;;  %v1139_v18 = vmul.f32 %v10228_v34, %v10085_v56 }
 0x2e3   : > { %14204 = vst [vmem:[#allocation25_spill] sm:$0xff] %v10275_v35  ;;  %2322 = vperm.xlu0 %8535, %v10264_v26   ;;  %v10290_v35 = vpop.permute.xlu1 %2575  ;;  %v1985_v3 = vadd.f32 %v1921_v61, %v1596_v40  ;;  %v1242_v40 = vadd.f32 %v10253_v36, %v1172_v50 }
 0x2e4   : > { %3012 = vperm.xlu1 %8544, %v10018_v43   ;;  %v10304_v51 = vmax.f32 %v2014_v15, 0.0  ;;  %v2016_v22 = vadd.f32 %v1952_v25, %v1627_v59  ;;  %v8936_v15 = vmov 1966171168   ;;  %v3343_v59 = vlaneseq }
 0x2e5   : > { %v3341_v61 = vunpack.c.l.s4 %v8936_v15  ;;  %v10318_v63 = vmax.f32 %v1985_v3, 0.0  ;;  %v2018_v48 = vadd.f32 %v1954_v45, %v1629_v28  ;;  %v1631_v3 = vadd.f32 %v1567_v16, %v1242_v40  ;;  %v14220_v28 = vld [vmem:[#allocation37_spill] sm:$0xff]  ;;  %v591_v40 = vld [vmem:[%s10332_s28] sm:$0xff] }
 0x2e6   : > { %v10292_v26 = vpop.permute.xlu0 %1015  ;;  %14212 = vst [vmem:[#allocation22_spill] sm:$0xff] %v10304_v51  ;;  %v1176_v37 = vmul.f32 %v10228_v34, %v14220_v28  ;;  %v1958_v16 = vmul.f32 %v10269_v33, %v9927_v14  ;;  %v14224_v14 = vld [vmem:[#allocation39_spill] sm:$0xff]  ;;  %v14225_v28 = vld [vmem:[#allocation46_spill] sm:$0xff] }
 0x2e7   : > { %14209 = vst [vmem:[#allocation27_spill] sm:$0xff] %v10292_v26  ;;  %2332 = vperm.xlu0 %8535, %v10284_v19   ;;  %v10316_v25 = vpop.permute.xlu1 %2960  ;;  %v10322_v26 = vmax.f32 %v2016_v22, 0.0  ;;  %v14219_v22 = vld [vmem:[#allocation4_spill] sm:$0xff]  ;;  %v3342_v15 = vunpack.c.0.s8 %v3341_v61  ;;  %v10345_v19 = vmax.f32 %v2018_v48, 0.0  ;;  %v2020_v4 = vadd.f32 %v1956_v6, %v1631_v3 }
 0x2e8   : > { %8545 = vset.pattern.permute.xlu1 %v14091_v39  ;;  %v1569_v45 = vmul.f32 %v10244_v41, %v14219_v22  ;;  %v1178_v48 = vmul.f32 %v10228_v34, %v14224_v14  ;;  %v3339_v3 = vcombine.high %v591_v40, %v591_v40 }
 0x2e9   : > { %2627 = vperm.xlu1 %8545, %v10214_v62   ;;  %14216 = vst [vmem:[#allocation45_spill] sm:$0xff] %v10322_v26  ;;  %14221 = vst [vmem:[#allocation31_spill] sm:$0xff] %v10345_v19 }
 0x2ea   : > { %v10309_v57 = vpop.permute.xlu0 %1025 }
 0x2eb   : > { %14213 = vst [vmem:[#allocation29_spill] sm:$0xff] %v10309_v57  ;;  %2342 = vperm.xlu0 %8535, %v10304_v51   ;;  %v1174_v57 = vmul.f32 %v10228_v34, %v14215_v17  ;;  %v3344_v17 = vshrl.u32 %v3343_v59, 7  ;;  %v10350_v22 = vpop.permute.xlu1 %2579  ;;  %v1209_v59 = vadd.f32 %v10253_v36, %v1139_v18  ;;  %v1960_v18 = vmul.f32 %v10269_v33, %v9933_v58 }
 0x2ed   : > { %8546 = vset.pattern.permute.xlu1 %v14174_v44  ;;  %v1244_v51 = vadd.f32 %v10253_v36, %v1174_v57  ;;  %v1246_v57 = vadd.f32 %v10253_v36, %v1176_v37  ;;  %v10363_v6 = vsub.s32 %v3342_v15, %v3344_v17  ;;  %v1248_v15 = vadd.f32 %v10253_v36, %v1178_v48  ;;  %v10396_v48 = vld [vmem:[%s13870_s6] ss:$0 sm:$0xff] }
 0x2ee   : > { %2197 = vperm.xlu1 %8546, %v10318_v63   ;;  %v10335_v50 = vpop.permute.xlu0 %1035 }
 0x2ef   : > { %14218 = vst [vmem:[#allocation3_spill] sm:$0xff] %v10335_v50  ;;  %2352 = vperm.xlu0 %8535, %v10322_v26   ;;  %v1633_v50 = vadd.f32 %v1569_v45, %v1244_v51  ;;  %v14223_v26 = vld [vmem:[#allocation28_spill] sm:$0xff]  ;;  %v1534_v51 = vmul.f32 %v10244_v41, %v14225_v28  ;;  %v10367_v45 = vmax.f32 %v2020_v4, 0.0  ;;  %v14229_v28 = vld [vmem:[#allocation41_spill] sm:$0xff]  ;;  %v10383_v58 = vpop.permute.xlu1 %2583 }
 0x2f0   : > { %v1571_v61 = vmul.f32 %v10244_v41, %v14223_v26  ;;  %v1180_v4 = vmul.f32 %v10228_v34, %v14229_v28 }
 0x2f1   : > { %14226 = vst [vmem:[#allocation24_spill] sm:$0xff] %v10367_v45  ;;  %v2022_v26 = vadd.f32 %v1958_v16, %v1633_v50  ;;  %v1598_v14 = vadd.f32 %v1534_v51, %v1209_v59  ;;  %v10381_v50 = vrot.slane %v3339_v3, %v10363_v6  ;;  %v10386_v16 = vld [vmem:[%s10332_s28 + $0x8] sm:$0xff] }
 0x2f2   : > { %8547 = vset.pattern.permute.xlu1 %v14064_v54  ;;  %v10353_v56 = vpop.permute.xlu0 %1045  ;;  %14230 = vst [vmem:[#allocation26_spill] sm:$0xff] %v10386_v16  ;;  %v14232_v51 = vld [vmem:[#allocation71_spill] sm:$0xff] }
 0x2f3   : > { %14222 = vst [vmem:[#allocation40_spill] sm:$0xff] %v10353_v56  ;;  %2362 = vperm.xlu0 %8535, %v10345_v19   ;;  %3016 = vperm.xlu1 %8547, %v10214_v62   ;;  %v14227_v56 = vld [vmem:[#allocation30_spill] sm:$0xff]  ;;  %v1635_v19 = vadd.f32 %v1571_v61, %v1246_v57  ;;  %v10389_v61 = vmax.f32 %v2022_v26, 0.0  ;;  %v1962_v57 = vmul.f32 %v10269_v33, %v9952_v9 }
 0x2f4   : > { %v1573_v62 = vmul.f32 %v10244_v41, %v14227_v56  ;;  %v3346_v56 = vrot.slane %v591_v40, %v10363_v6  ;;  %v1923_v3 = vmul.f32 %v10269_v33, %v14232_v51  ;;  %v14234_v40 = vld [vmem:[#allocation32_spill] sm:$0xff]  ;;  %v10408_v9 = vrot.slane %v10386_v16, %v10363_v6  ;;  %v603_v16 = vld [vmem:[%s10435_s23 + $0x20] sm:$0xff] }
 0x2f5   : > { %14231 = vst [vmem:[#allocation35_spill] sm:$0xff] %v10389_v61  ;;  %v2024_v59 = vadd.f32 %v1960_v18, %v1635_v19  ;;  %v1575_v19 = vmul.f32 %v10244_v41, %v14234_v40  ;;  %v1250_v18 = vadd.f32 %v10253_v36, %v1180_v4 }
 0x2f6   : > { %v10373_v37 = vpop.permute.xlu0 %1055  ;;  %v1637_v28 = vadd.f32 %v1573_v62, %v1248_v15  ;;  %v1987_v26 = vadd.f32 %v1923_v3, %v1598_v14  ;;  %v10413_v62 = vsub.s32 0, %v3344_v17  ;;  %v3354_v15 = vcombine.high %v3346_v56, %v3346_v56  ;;  %v10425_v3 = vld [vmem:[%s13871_s7] ss:$0 sm:$0xff] }
 0x2f7   : > { %14228 = vst [vmem:[#allocation33_spill] sm:$0xff] %v10373_v37  ;;  %2372 = vperm.xlu0 %8535, %v10367_v45   ;;  %3020 = vperm.xlu1 %8547, %v10033_v31   ;;  %v2423_v37 = vmul.f32 %v10396_v48, %v10022_v7  ;;  %v3369_v7 = vrot.slane %v10381_v50, %v10363_v6  ;;  %v10418_v51 = vmax.f32 %v2024_v59, 0.0  ;;  %v10437_v59 = vpop.permute.xlu1 %2972 }
 0x2f8   : > { %v2026_v40 = vadd.f32 %v1962_v57, %v1637_v28  ;;  %v1964_v14 = vmul.f32 %v10269_v33, %v9964_v8  ;;  %v10428_v17 = vrot.slane %v3346_v56, %v10363_v6  ;;  %v1639_v8 = vadd.f32 %v1575_v19, %v1250_v18  ;;  %v10444_v28 = vld [vmem:[%s13870_s6 + $0x1] ss:$0 sm:$0xff] }
 0x2f9   : > { %14235 = vst [vmem:[#allocation37_spill] sm:$0xff] %v10418_v51  ;;  %v2493_v4 = vadd.f32 %v10425_v3, %v2423_v37  ;;  %v10449_v37 = vld [vmem:[%s13870_s6 + $0x2] ss:$0 sm:$0xff]  ;;  %v3411_v56 = vrot.slane %v10408_v9, %v10363_v6  ;;  %v10462_v13 = vrot.slane %v3354_v15, %v10363_v6  ;;  %v2420_v15 = vmul.f32 %v10396_v48, %v9986_v1 }
 0x2fa   : > { %v10402_v45 = vpop.permute.xlu0 %1065  ;;  %v3207_v18 = vmul.f32 %v10449_v37, %v10316_v25  ;;  %v10465_v21 = vmax.f32 %v2026_v40, 0.0  ;;  %v2028_v53 = vadd.f32 %v1964_v14, %v1639_v8  ;;  %v1141_v40 = vmul.f32 %v10228_v34, %v10102_v20  ;;  %v14241_v8 = vld [vmem:[#allocation48_spill] sm:$0xff] }
 0x2fb   : > { %14233 = vst [vmem:[#allocation4_spill] sm:$0xff] %v10402_v45  ;;  %8548 = vset.pattern.permute.xlu1 %v14091_v39  ;;  %2382 = vperm.xlu0 %8535, %v10389_v61   ;;  %v10454_v45 = vmax.f32 %v1987_v26, 0.0  ;;  %v14237_v61 = vld [vmem:[#allocation36_spill] sm:$0xff]  ;;  %v3384_v26 = vcombine.high %v10428_v17, %v10428_v17  ;;  %v10481_v5 = vmul.f32 %v10244_v41, %v14241_v8  ;;  %v607_v8 = vld [vmem:[%s10435_s23 + $0x40] sm:$0xff] }
 0x2fc   : > { %2635 = vperm.xlu1 %8548, %v10318_v63   ;;  %v2818_v19 = vmul.f32 %v10444_v28, %v14237_v61  ;;  %14238 = vst [vmem:[#allocation39_spill] sm:$0xff] %v10465_v21  ;;  %v14239_v61 = vld [vmem:[#allocation47_spill] sm:$0xff]  ;;  %v3766_v32 = vrot.slane %v3411_v56, %v10413_v62  ;;  %v2815_v1 = vmul.f32 %v10444_v28, %v10143_v10 }
 0x2fd   : > { %v1536_v25 = vmul.f32 %v10244_v41, %v14239_v61  ;;  %14242 = vst [vmem:[#allocation30_spill] sm:$0xff] %v10481_v5  ;;  %v3433_v61 = vcombine.high %v3411_v56, %v3411_v56  ;;  %v2427_v56 = vmul.f32 %v10396_v48, %v10067_v55  ;;  %v10502_v41 = vrot.slane %v3384_v26, %v10413_v62  ;;  %v10517_v55 = vld [vmem:[%s10435_s23 + $0x30] sm:$0xff] }
 0x2fe   : > { %v10439_v57 = vpop.permute.xlu0 %1075  ;;  %v2882_v38 = vadd.f32 %v2818_v19, %v2493_v4  ;;  %v10491_v19 = vpop.permute.xlu1 %2591  ;;  %v2421_v26 = vmul.f32 %v10396_v48, %v10002_v29 }
 0x2ff   : > { %14236 = vst [vmem:[#allocation28_spill] sm:$0xff] %v10439_v57  ;;  %2392 = vperm.xlu0 %8535, %v10418_v51   ;;  %v3750_v57 = vrot.slane %v3369_v7, %v10413_v62  ;;  %v3385_v51 = vcombine.high %v3369_v7, %v3369_v7  ;;  %v10496_v7 = vmax.f32 %v2028_v53, 0.0  ;;  %v3204_v53 = vmul.f32 %v10449_v37, %v9935_v27 }
 0x300   : > { %8549 = vset.pattern.permute.xlu1 %v14174_v44  ;;  %v10489_v20 = vadd.f32 %v3207_v18, %v2882_v38  ;;  %v2490_v38 = vadd.f32 %v10425_v3, %v2420_v15  ;;  %v1211_v18 = vadd.f32 %v10253_v36, %v1141_v40  ;;  %v2425_v15 = vmul.f32 %v10396_v48, %v10046_v47 }
 0x301   : > { %2207 = vperm.xlu1 %8549, %v10454_v45   ;;  %v4055_v4 = vsub.f32 %v603_v16, %v3750_v57  ;;  %14244 = vst [vmem:[#allocation71_spill] sm:$0xff] %v10496_v7  ;;  %v10505_v10 = vrot.slane %v3385_v51, %v10413_v62  ;;  %v10514_v57 = vld [vmem:[%s10435_s23 + $0x10] sm:$0xff]  ;;  %v10527_v16 = vsub.f32 %v607_v8, %v3766_v32  ;;  %v10545_v32 = vld [vmem:[%s13872_s8] ss:$0 sm:$0xff] }
 0x302   : > { %v10477_v14 = vpop.permute.xlu0 %1085  ;;  %14243 = vst [vmem:[#allocation41_spill] sm:$0xff] %v10489_v20  ;;  %v10530_v27 = vrot.slane %v3433_v61, %v10413_v62  ;;  %v2879_v5 = vadd.f32 %v2815_v1, %v2490_v38  ;;  %v2497_v29 = vadd.f32 %v10425_v3, %v2427_v56  ;;  %v2429_v47 = vmul.f32 %v10396_v48, %v10094_v11 }
 0x303   : > { %14240 = vst [vmem:[#allocation46_spill] sm:$0xff] %v10477_v14  ;;  %2402 = vperm.xlu0 %8535, %v10465_v21   ;;  %v3738_v14 = vrot.slane %v10462_v13, %v10413_v62  ;;  %v600_v21 = vld [vmem:[%s10435_s23 + $0x8] sm:$0xff]  ;;  %v4119_v40 = vadd.f32 %v4055_v4, %v10489_v20  ;;  %v4053_v61 = vsub.f32 %v10514_v57, %v10502_v41  ;;  %v2977_v4 = vpop.permute.xlu1 %2976  ;;  %v14249_v41 = vld [vmem:[#allocation38_spill] sm:$0xff] }
 0x304   : > { %v10555_v8 = vadd.f32 %v3204_v53, %v2879_v5  ;;  %v1600_v11 = vadd.f32 %v1536_v25, %v1211_v18  ;;  %v2491_v38 = vadd.f32 %v10425_v3, %v2421_v26  ;;  %v2822_v57 = vmul.f32 %v10444_v28, %v14249_v41 }
 0x305   : > { %8550 = vset.pattern.permute.xlu1 %v14064_v54  ;;  %v2495_v1 = vadd.f32 %v10425_v3, %v2425_v15  ;;  %v1925_v5 = vmul.f32 %v10269_v33, %v9847_v49  ;;  %v2820_v25 = vmul.f32 %v10444_v28, %v10350_v22  ;;  %v3205_v53 = vmul.f32 %v10449_v37, %v9944_v30  ;;  %v10582_v49 = vld [vmem:[%s13873_s9] ss:$0 sm:$0xff] }
 0x306   : > { %3024 = vperm.xlu1 %8550, %v10318_v63   ;;  %v10521_v51 = vpop.permute.xlu0 %1095  ;;  %v3386_v63 = vcombine.high %v10462_v13, %v10462_v13  ;;  %v14246_v13 = vld [vmem:[#allocation34_spill] sm:$0xff]  ;;  %14247 = vst [vmem:[#allocation36_spill] sm:$0xff] %v10555_v8  ;;  %v2499_v18 = vadd.f32 %v10425_v3, %v2429_v47  ;;  %v3203_v26 = vmul.f32 %v10449_v37, %v10167_v52 }
 0x307   : > { %14245 = vst [vmem:[#allocation32_spill] sm:$0xff] %v10521_v51  ;;  %2412 = vperm.xlu0 %8535, %v10496_v7   ;;  %v4052_v51 = vsub.f32 %v600_v21, %v3738_v14  ;;  %v2814_v21 = vmul.f32 %v10444_v28, %v14246_v13  ;;  %v2816_v14 = vmul.f32 %v10444_v28, %v10194_v2  ;;  %v602_v13 = vld [vmem:[%s10435_s23 + $0x18] sm:$0xff] }
 0x308   : > { %v4190_v2 = vmul.f32 %v10545_v32, %v4119_v40  ;;  %v2886_v15 = vadd.f32 %v2822_v57, %v2497_v29  ;;  %v3211_v41 = vmul.f32 %v10449_v37, %v2977_v4  ;;  %v14250_v40 = vld [vmem:[#allocation72_spill] sm:$0xff]  ;;  %v1989_v47 = vadd.f32 %v1925_v5, %v1600_v11 }
 0x309   : > { %v10586_v22 = vmul.f32 %v10269_v33, %v14250_v40  ;;  %v2880_v30 = vadd.f32 %v2816_v14, %v2491_v38  ;;  %v2817_v29 = vmul.f32 %v10444_v28, %v10216_v12  ;;  %v3206_v4 = vmul.f32 %v10449_v37, %v10256_v0  ;;  %v599_v12 = vld [vmem:[%s10435_s23] sm:$0xff] }
 0x30a   : > { %3028 = vperm.xlu1 %8550, %v10048_v42   ;;  %v10558_v56 = vpop.permute.xlu0 %1105  ;;  %v3734_v40 = vrot.slane %v10428_v17, %v10413_v62  ;;  %v2884_v14 = vadd.f32 %v2820_v25, %v2495_v1  ;;  %v10605_v38 = vadd.f32 %v10582_v49, %v4190_v2  ;;  %v10609_v0 = vmul.f32 %v10444_v28, %v10383_v58 }
 0x30b   : > { %14248 = vst [vmem:[#allocation47_spill] sm:$0xff] %v10558_v56  ;;  %8611 = vset.pattern.permute.xlu0 %v14091_v39  ;;  %v10600_v11 = vadd.f32 %v3205_v53, %v2880_v30  ;;  %v10613_v17 = vmul.f32 %v10449_v37, %v10437_v59  ;;  %v10615_v5 = vadd.f32 %v3211_v41, %v2886_v15  ;;  %v14313_v56 = vld [vmem:[#allocation35_spill] sm:$0xff] }
 0x30c   : > { %2607 = vperm.xlu0 %8611, %v9779_v60   ;;  %v4116_v60 = vadd.f32 %v4052_v51, %v10555_v8  ;;  %v2819_v51 = vmul.f32 %v10444_v28, %v10290_v35  ;;  %v2596_v35 = vpop.permute.xlu1 %2595  ;;  %v3746_v30 = vrot.slane %v3386_v63, %v10413_v62  ;;  %v14254_v15 = vcombine.high %v10381_v50, %v10381_v50  ;;  %v14308_v8 = vld [vmem:[#allocation31_spill] sm:$0xff] }
 0x30d   : > { %14251 = vst [vmem:[#allocation48_spill] sm:$0xff] %v10600_v11  ;;  %14252 = vst [vmem:[#allocation34_spill] sm:$0xff] %v10615_v5  ;;  %v1143_v63 = vmul.f32 %v10228_v34, %v10119_v23  ;;  %v10643_v50 = vadd.f32 %v10527_v16, %v10615_v5 }
 0x30e   : > { %8551 = vset.pattern.permute.xlu1 %v14091_v39  ;;  %v2098_v52 = vpop.permute.xlu0 %2097  ;;  %v4187_v25 = vmul.f32 %v10545_v32, %v4116_v60  ;;  %v3383_v41 = vrot.slane %v14254_v15, %v10363_v6  ;;  %v4051_v60 = vsub.f32 %v599_v12, %v3734_v40  ;;  %v4054_v23 = vsub.f32 %v602_v13, %v3746_v30  ;;  %v14257_v13 = vld [vmem:[#allocation91_spill] sm:$0xff] }
 0x30f   : > { %v2419_v57 = vmul.f32 %v10396_v48, %v2098_v52  ;;  %2643 = vperm.xlu1 %8551, %v10454_v45   ;;  %v10622_v52 = vmax.f32 %v1989_v47, 0.0 }
 0x310   : > { %2615 = vperm.xlu0 %8611, %v10006_v24   ;;  %v14253_v24 = vld [vmem:[#allocation5_spill] sm:$0xff] }
 0x311   : > { %v2489_v1 = vadd.f32 %v10425_v3, %v2419_v57  ;;  %v3209_v53 = vmul.f32 %v10449_v37, %v14253_v24  ;;  %v2824_v57 = vmul.f32 %v10444_v28, %v2596_v35  ;;  %v4117_v24 = vadd.f32 %v4053_v61, %v10600_v11  ;;  %v14306_v11 = vld [vmem:[#allocation45_spill] sm:$0xff] }
 0x312   : > { %v2113_v2 = vpop.permute.xlu0 %2112  ;;  %v3387_v35 = vcombine.high %v3383_v41, %v3383_v41 }
 0x313   : > { %v2878_v58 = vadd.f32 %v2814_v21, %v2489_v1  ;;  %v2422_v59 = vmul.f32 %v10396_v48, %v2113_v2  ;;  %8552 = vset.pattern.permute.xlu1 %v14174_v44  ;;  %v10639_v21 = vmul.f32 %v10444_v28, %v10491_v19  ;;  %v10648_v40 = vadd.f32 %v3209_v53, %v2884_v14 }
 0x314   : > { %2217 = vperm.xlu1 %8552, %v10622_v52   ;;  %2623 = vperm.xlu0 %8611, %v10018_v43   ;;  %v4258_v43 = vadd.f32 %v10582_v49, %v4187_v25  ;;  %v3754_v2 = vrot.slane %v3383_v41, %v10413_v62  ;;  %v2888_v16 = vadd.f32 %v2824_v57, %v2499_v18 }
 0x315   : > { %v10645_v47 = vadd.f32 %v3203_v26, %v2878_v58  ;;  %v2492_v61 = vadd.f32 %v10425_v3, %v2422_v59  ;;  %14256 = vst [vmem:[#allocation72_spill] sm:$0xff] %v10648_v40  ;;  %v4188_v26 = vmul.f32 %v10545_v32, %v4117_v24  ;;  %v1213_v58 = vadd.f32 %v10253_v36, %v1143_v63  ;;  %v604_v59 = vld [vmem:[%s10435_s23 + $0x28] sm:$0xff] }
 0x316   : > { %v2123_v12 = vpop.permute.xlu0 %2122  ;;  %v14259_v53 = vsub.f32 %v10517_v55, %v10505_v10  ;;  %v4322_v57 = vmax.f32 %v4258_v43, 0.0  ;;  %v14262_v55 = vld [vmem:[#allocation30_spill] sm:$0xff] }
 0x317   : > { %14255 = vst [vmem:[#allocation38_spill] sm:$0xff] %v10645_v47  ;;  %v2881_v1 = vadd.f32 %v2817_v29, %v2492_v61  ;;  %v2424_v19 = vmul.f32 %v10396_v48, %v2123_v12  ;;  %v4115_v15 = vadd.f32 %v4051_v60, %v10645_v47  ;;  %v3208_v29 = vmul.f32 %v10449_v37, %v14257_v13  ;;  %v606_v61 = vld [vmem:[%s10435_s23 + $0x38] sm:$0xff]  ;;  %v14305_v47 = vld [vmem:[#allocation75_spill] sm:$0xff] }
 0x318   : > { %8553 = vset.pattern.permute.xlu1 %v14064_v54  ;;  %2631 = vperm.xlu0 %8611, %v10033_v31   ;;  %v4121_v30 = vadd.f32 %v14259_v53, %v10648_v40  ;;  %v3762_v60 = vrot.slane %v3387_v35, %v10413_v62  ;;  %v14260_v31 = vcombine.high %v10408_v9, %v10408_v9 }
 0x319   : > { %v10661_v14 = vadd.f32 %v3206_v4, %v2881_v1  ;;  %v2494_v25 = vadd.f32 %v10425_v3, %v2424_v19  ;;  %3032 = vperm.xlu1 %8553, %v10454_v45   ;;  %v4186_v18 = vmul.f32 %v10545_v32, %v4115_v15  ;;  %v4056_v45 = vsub.f32 %v604_v59, %v3754_v2  ;;  %v14261_v1 = vld [vmem:[#allocation7_spill] sm:$0xff] }
 0x31a   : > { %v2133_v41 = vpop.permute.xlu0 %2132  ;;  %v3425_v4 = vrot.slane %v14260_v31, %v10363_v6  ;;  %v3213_v10 = vmul.f32 %v10449_v37, %v14261_v1  ;;  %v1602_v19 = vadd.f32 %v14262_v55, %v1213_v58  ;;  %v4259_v9 = vadd.f32 %v10582_v49, %v4188_v26 }
 0x31b   : > { %14258 = vst [vmem:[#allocation5_spill] sm:$0xff] %v10661_v14  ;;  %v4118_v24 = vadd.f32 %v4054_v23, %v10661_v14  ;;  %v2883_v63 = vadd.f32 %v2819_v51, %v2494_v25  ;;  %v2426_v12 = vmul.f32 %v10396_v48, %v2133_v41  ;;  %v4257_v35 = vadd.f32 %v10582_v49, %v4186_v18  ;;  %v14264_v23 = vld [vmem:[#allocation9_spill] sm:$0xff] }
 0x31c   : > { %2639 = vperm.xlu0 %8611, %v10048_v42   ;;  %v4192_v15 = vmul.f32 %v10545_v32, %v4121_v30  ;;  %v4058_v59 = vsub.f32 %v606_v61, %v3762_v60  ;;  %v3770_v13 = vrot.slane %v3425_v4, %v10413_v62  ;;  %v3435_v53 = vcombine.high %v3425_v4, %v3425_v4 }
 0x31d   : > { %v10684_v43 = vadd.f32 %v3208_v29, %v2883_v63  ;;  %v2496_v51 = vadd.f32 %v10425_v3, %v2426_v12  ;;  %3036 = vperm.xlu1 %8553, %v14264_v23   ;;  %v4189_v2 = vmul.f32 %v10545_v32, %v4118_v24  ;;  %v4321_v42 = vmax.f32 %v4257_v35, 0.0  ;;  %v608_v29 = vld [vmem:[%s10435_s23 + $0x48] sm:$0xff]  ;;  %v2600_v24 = vpop.permute.xlu1 %2599 }
 0x31e   : > { %v2143_v58 = vpop.permute.xlu0 %2142  ;;  %v10695_v41 = vadd.f32 %v3213_v10, %v2888_v16  ;;  %v1991_v31 = vadd.f32 %v10586_v22, %v1602_v19  ;;  %v4323_v30 = vmax.f32 %v4259_v9, 0.0  ;;  %v4325_v22 = vmax.f32 %v10605_v38, 0.0  ;;  %v610_v9 = vld [vmem:[%s10435_s23 + $0x58] sm:$0xff] }
 0x31f   : > { %14263 = vst [vmem:[#allocation91_spill] sm:$0xff] %v10684_v43  ;;  %v4120_v25 = vadd.f32 %v4056_v45, %v10684_v43  ;;  %v2885_v26 = vadd.f32 %v10609_v0, %v2496_v51  ;;  %v2428_v18 = vmul.f32 %v10396_v48, %v2143_v58  ;;  %8293 = vmatprep.mubr.msk.f32.mxu0 %vm4400_vm0, %v4321_v42  ;;  %v14267_v45 = vld [vmem:[#allocation6_spill] sm:$0xff] }
 0x320   : > { %14265 = vst [vmem:[#allocation7_spill] sm:$0xff] %v10695_v41  ;;  %2647 = vperm.xlu0 %8611, %v14264_v23   ;;  %v4260_v60 = vadd.f32 %v10582_v49, %v4189_v2  ;;  %8294 = vmatmul.mubr.msk.f32.vlgmr.msra.gmra.mrb[0].mxu0 %vm4400_vm0, %v4322_v57  ;;  %v4194_v4 = vmul.f32 %v10545_v32, %v10643_v50  ;;  %v14269_v51 = vld [vmem:[#allocation10_spill] sm:$0xff]  ;;  %v10732_v58 = vmax.f32 %v1991_v31, 0.0 }
 0x321   : > { %v10702_v63 = vadd.f32 %v10613_v17, %v2885_v26  ;;  %v2498_v0 = vadd.f32 %v10425_v3, %v2428_v18  ;;  %8554 = vset.pattern.permute.xlu1 %v14091_v39  ;;  %v4191_v16 = vmul.f32 %v10545_v32, %v4120_v25  ;;  %v3212_v61 = vmul.f32 %v10449_v37, %v14267_v45  ;;  %v14272_v31 = vld [vmem:[#allocation14_spill] sm:$0xff] }
 0x322   : > { %v4060_v12 = vsub.f32 %v608_v29, %v3770_v13  ;;  %8296 = vmatprep.mubr.msk.f32.mxu0 %vm4400_vm0, %v4323_v30  ;;  %2651 = vperm.xlu1 %8554, %v10622_v52   ;;  %v2153_v17 = vpop.permute.xlu0 %2152  ;;  %v4324_v57 = vmax.f32 %v4260_v60, 0.0  ;;  %v3778_v55 = vrot.slane %v3435_v53, %v10413_v62  ;;  %v2825_v50 = vmul.f32 %v10444_v28, %v2600_v24  ;;  %v14273_v60 = vld [vmem:[#allocation42_spill] sm:$0xff] }
 0x323   : > { %14266 = vst [vmem:[#allocation30_spill] sm:$0xff] %v10702_v63  ;;  %v4122_v1 = vadd.f32 %v4058_v59, %v10702_v63  ;;  %v2887_v10 = vadd.f32 %v10639_v21, %v2498_v0  ;;  %v2430_v38 = vmul.f32 %v10396_v48, %v2153_v17  ;;  %v14268_v19 = vsub.f32 %v10537_v46, %v10530_v27  ;;  %v14303_v63 = vld [vmem:[#allocation22_spill] sm:$0xff] }
 0x324   : > { %2655 = vperm.xlu0 %8611, %v14269_v51   ;;  %v4262_v23 = vadd.f32 %v10582_v49, %v4191_v16  ;;  %v4263_v2 = vadd.f32 %v10582_v49, %v4192_v15  ;;  %8297 = vmatmul.mubr.msk.f32.gmra.mrb[2].mxu0 %vm4400_vm0, %v4324_v57  ;;  %v4265_v42 = vadd.f32 %v10582_v49, %v4194_v4  ;;  %v14271_v15 = vld [vmem:[#allocation8_spill] sm:$0xff]  ;;  %v10753_v4 = vpop.permute.xlu1 %2162 }
 0x325   : > { %v4125_v35 = vadd.f32 %v14268_v19, %v10695_v41  ;;  %v10728_v59 = vadd.f32 %v3212_v61, %v2887_v10  ;;  %v2500_v21 = vadd.f32 %v10425_v3, %v2430_v38  ;;  %v4193_v13 = vmul.f32 %v10545_v32, %v4122_v1  ;;  %8299 = vmatprep.mubr.msk.f32.mxu0 %vm4400_vm0, %v4325_v22  ;;  %v14276_v38 = vld [vmem:[#allocation11_spill] sm:$0xff] }
 0x326   : > { %8555 = vset.pattern.permute.xlu1 %v14174_v44  ;;  %v10737_v46 = vpop.permute.xlu0 %2172  ;;  %v4326_v27 = vmax.f32 %v4262_v23, 0.0  ;;  %v3214_v25 = vmul.f32 %v10449_v37, %v14271_v15  ;;  %v4062_v18 = vsub.f32 %v610_v9, %v3778_v55  ;;  %v1145_v30 = vmul.f32 %v10228_v34, %v14272_v31  ;;  %v14277_v9 = vld [vmem:[#allocation49_spill] sm:$0xff]  ;;  %v14278_v23 = vld [vmem:[#allocation23_spill] sm:$0xff] }
 0x327   : > { %14270 = vst [vmem:[#allocation9_spill] sm:$0xff] %v10728_v59  ;;  %v4124_v26 = vadd.f32 %v4060_v12, %v10728_v59  ;;  %v2889_v29 = vadd.f32 %v2825_v50, %v2500_v21  ;;  %2227 = vperm.xlu1 %8555, %v10732_v58   ;;  %v4196_v53 = vmul.f32 %v10545_v32, %v4125_v35  ;;  %v4327_v24 = vmax.f32 %v4263_v2, 0.0  ;;  %v14275_v12 = vld [vmem:[#allocation26_spill] sm:$0xff]  ;;  %v14279_v15 = vld [vmem:[#allocation13_spill] sm:$0xff]  ;;  %v14302_v41 = vld [vmem:[#allocation51_spill] sm:$0xff] }
 0x328   : > { %2663 = vperm.xlu0 %8611, %v14273_v60   ;;  %v4264_v0 = vadd.f32 %v10582_v49, %v4193_v13  ;;  %8300 = vmatmul.mubr.msk.f32.gmra.mrb[4].mxu0 %vm4400_vm0, %v4326_v27  ;;  %v3388_v17 = vcombine.high %v14275_v12, %v14275_v12  ;;  %v1215_v10 = vadd.f32 %v10253_v36, %v1145_v30  ;;  %v4329_v55 = vmax.f32 %v4265_v42, 0.0  ;;  %v2604_v27 = vpop.permute.xlu1 %2603  ;;  %v14281_v30 = vld [vmem:[#allocation12_spill] sm:$0xff] }
 0x329   : > { %v10749_v22 = vadd.f32 %v3214_v25, %v2889_v29  ;;  %v4195_v16 = vmul.f32 %v10545_v32, %v4124_v26  ;;  %8302 = vmatprep.mubr.msk.f32.mxu0 %vm4400_vm0, %v4327_v24  ;;  %v4267_v50 = vadd.f32 %v10582_v49, %v4196_v53  ;;  %v1540_v2 = vmul.f32 %v14278_v23, %v14277_v9  ;;  %v14280_v29 = vld [vmem:[#allocation73_spill] sm:$0xff] }
 0x32a   : > { %v10756_v45 = vpop.permute.xlu0 %2182  ;;  %v4328_v61 = vmax.f32 %v4264_v0, 0.0  ;;  %v10775_v13 = vrot.slane %v3388_v17, %v10363_v6  ;;  %v1544_v59 = vmul.f32 %v14278_v23, %v14302_v41  ;;  %v1933_v40 = vmul.f32 %v10269_v33, %v14305_v47  ;;  %v14310_v47 = vld [vmem:[#allocation24_spill] sm:$0xff] }
 0x32b   : > { %14274 = vst [vmem:[#allocation6_spill] sm:$0xff] %v10749_v22  ;;  %v4126_v57 = vadd.f32 %v4062_v18, %v10749_v22  ;;  %8556 = vset.pattern.permute.xlu1 %v14064_v54  ;;  %v4266_v1 = vadd.f32 %v10582_v49, %v4195_v16  ;;  %v1604_v42 = vadd.f32 %v1540_v2, %v1215_v10  ;;  %v4331_v25 = vmax.f32 %v4267_v50, 0.0  ;;  %v14282_v16 = vld [vmem:[#allocation43_spill] sm:$0xff] }
 0x32c   : > { %3040 = vperm.xlu1 %8556, %v10622_v52   ;;  %2671 = vperm.xlu0 %8611, %v14276_v38   ;;  %v1929_v18 = vmul.f32 %v10269_v33, %v14280_v29  ;;  %v10788_v31 = vrot.slane %v10775_v13, %v10363_v6  ;;  %v14283_v10 = vld [vmem:[#allocation67_spill] sm:$0xff] }
 0x32d   : > { %8303 = vmatmul.mubr.msk.f32.gmra.mrb[6].mxu0 %vm4400_vm0, %v4328_v61  ;;  %v4330_v19 = vmax.f32 %v4266_v1, 0.0  ;;  %v4197_v35 = vmul.f32 %v10545_v32, %v4126_v57  ;;  %v2826_v61 = vmul.f32 %v10444_v28, %v2604_v27  ;;  %v611_v57 = vld [vmem:[%s10435_s23 + $0x60] sm:$0xff] }
 0x32e   : > { %8305 = vmatprep.mubr.msk.f32.mxu0 %vm4400_vm0, %v4329_v55  ;;  %v10772_v21 = vpop.permute.xlu0 %2192  ;;  %v1993_v24 = vadd.f32 %v1929_v18, %v1604_v42  ;;  %v3782_v17 = vrot.slane %v10788_v31, %v10413_v62 }
 0x32f   : > { %v4268_v52 = vadd.f32 %v10582_v49, %v4197_v35 }
 0x330   : > { %3044 = vperm.xlu1 %8556, %v14269_v51   ;;  %2679 = vperm.xlu0 %8611, %v14279_v15   ;;  %v2431_v51 = vmul.f32 %v10396_v48, %v14281_v30  ;;  %v2057_v55 = vmax.f32 %v1993_v24, 0.0  ;;  %v4063_v9 = vsub.f32 %v611_v57, %v3782_v17  ;;  %v14289_v24 = vld [vmem:[#allocation69_spill] sm:$0xff] }
 0x331   : > { %8306 = vmatmul.mubr.msk.f32.gmra.mrb[8].mxu0 %vm4400_vm0, %v4330_v19  ;;  %v4332_v26 = vmax.f32 %v4268_v52, 0.0  ;;  %v14285_v52 = vld [vmem:[#allocation15_spill] sm:$0xff] }
 0x332   : > { %8308 = vmatprep.mubr.msk.f32.mxu0 %vm4400_vm0, %v4331_v25  ;;  %v10784_v53 = vpop.permute.xlu0 %2202  ;;  %v2501_v1 = vadd.f32 %v10425_v3, %v2431_v51  ;;  %v1147_v27 = vmul.f32 %v10228_v34, %v14285_v52  ;;  %v14287_v25 = vld [vmem:[#allocation68_spill] sm:$0xff] }
 0x334   : > { %v10792_v0 = vpop.permute.xlu1 %2167  ;;  %8557 = vset.pattern.permute.xlu1 %v14091_v39  ;;  %2687 = vperm.xlu0 %8611, %v14282_v16   ;;  %v2890_v19 = vadd.f32 %v2826_v61, %v2501_v1  ;;  %v1217_v30 = vadd.f32 %v10253_v36, %v1147_v27  ;;  %v14290_v61 = vld [vmem:[#allocation50_spill] sm:$0xff] }
 0x335   : > { %8309 = vmatmul.mubr.msk.f32.gmra.mrb[10].mxu0 %vm4400_vm0, %v4332_v26  ;;  %2659 = vperm.xlu1 %8557, %v10732_v58   ;;  %v1542_v17 = vmul.f32 %v14278_v23, %v14290_v61 }
 0x336   : > { %v10799_v12 = vpop.permute.xlu0 %2212 }
 0x338   : > { %2695 = vperm.xlu0 %8611, %v14283_v10  }
 0x339   : > { %v2993_v50 = vpop.permute.xlu1 %2992  ;;  %8558 = vset.pattern.permute.xlu1 %v14174_v44 }
 0x33a   : > { %v3215_v35 = vmul.f32 %v10449_v37, %v2993_v50  ;;  %2237 = vperm.xlu1 %8558, %v2057_v55   ;;  %v10808_v2 = vpop.permute.xlu0 %2222 }
 0x33b   : > { %14284 = vst [vmem:[#allocation10_spill] sm:$0xff] %v10808_v2 }
 0x33c   : > { %v10812_v42 = vadd.f32 %v3215_v35, %v2890_v19  ;;  %2703 = vperm.xlu0 %8611, %v14287_v25   ;;  %v1606_v19 = vadd.f32 %v1542_v17, %v1217_v30  ;;  %v14292_v35 = vld [vmem:[#allocation70_spill] sm:$0xff] }
 0x33d   : > { %v10815_v26 = vpop.permute.xlu1 %2996 }
 0x33e   : > { %14286 = vst [vmem:[#allocation8_spill] sm:$0xff] %v10812_v42  ;;  %v4127_v29 = vadd.f32 %v4063_v9, %v10812_v42  ;;  %8559 = vset.pattern.permute.xlu1 %v14064_v54  ;;  %v10819_v18 = vpop.permute.xlu0 %2232  ;;  %v14300_v42 = vld [vmem:[#allocation20_spill] sm:$0xff] }
 0x33f   : > { %14288 = vst [vmem:[#allocation14_spill] sm:$0xff] %v10819_v18  ;;  %3048 = vperm.xlu1 %8559, %v10732_v58   ;;  %v14293_v58 = vld [vmem:[#allocation74_spill] sm:$0xff] }
 0x340   : > { %v4198_v51 = vmul.f32 %v10545_v32, %v4127_v29  ;;  %2711 = vperm.xlu0 %8611, %v14289_v24   ;;  %v1931_v52 = vmul.f32 %v10269_v33, %v14293_v58  ;;  %v14298_v58 = vld [vmem:[#allocation16_spill] sm:$0xff] }
 0x342   : > { %v10827_v57 = vpop.permute.xlu1 %2611  ;;  %v10829_v1 = vpop.permute.xlu0 %2242  ;;  %v4269_v50 = vadd.f32 %v10582_v49, %v4198_v51  ;;  %v1995_v29 = vadd.f32 %v1931_v52, %v1606_v19  ;;  %v14295_v51 = vld [vmem:[#allocation21_spill] sm:$0xff]  ;;  %v1149_v19 = vmul.f32 %v10228_v34, %v14298_v58 }
 0x343   : > { %14291 = vst [vmem:[#allocation42_spill] sm:$0xff] %v10829_v1  ;;  %3052 = vperm.xlu1 %8559, %v14273_v60  }
 0x344   : > { %2719 = vperm.xlu0 %8611, %v14292_v35   ;;  %v4333_v9 = vmax.f32 %v4269_v50, 0.0  ;;  %v2059_v60 = vmax.f32 %v1995_v29, 0.0  ;;  %v14297_v50 = vld [vmem:[#allocation18_spill] sm:$0xff]  ;;  %v1219_v29 = vadd.f32 %v10253_v36, %v1149_v19 }
 0x346   : > { %v10836_v27 = vpop.permute.xlu0 %2252  ;;  %8311 = vmatprep.mubr.msk.f32.mxu0 %vm4400_vm0, %v4333_v9  ;;  %v1608_v58 = vadd.f32 %v1544_v59, %v1219_v29 }
 0x347   : > { %14294 = vst [vmem:[#allocation26_spill] sm:$0xff] %v10836_v27  ;;  %v10839_v61 = vpop.permute.xlu1 %2177  ;;  %8560 = vset.pattern.permute.xlu1 %v14091_v39 }
 0x348   : > { %2667 = vperm.xlu1 %8560, %v2057_v55   ;;  %2727 = vperm.xlu0 %8611, %v14295_v51  }
 0x34a   : > { %v10843_v30 = vpop.permute.xlu0 %2262 }
 0x34b   : > { %14296 = vst [vmem:[#allocation11_spill] sm:$0xff] %v10843_v30 }
 0x34c   : > { %v10845_v17 = vpop.permute.xlu1 %3000  ;;  %8561 = vset.pattern.permute.xlu1 %v14174_v44  ;;  %2735 = vperm.xlu0 %8611, %v14297_v50  }
 0x34d   : > { %2247 = vperm.xlu1 %8561, %v2059_v60  }
 0x34e   : > { %v10851_v9 = vpop.permute.xlu0 %2272 }
 0x34f   : > { %14299 = vst [vmem:[#allocation49_spill] sm:$0xff] %v10851_v9 }
 0x350   : > { %v10853_v52 = vpop.permute.xlu1 %3004  ;;  %2743 = vperm.xlu0 %8611, %v14300_v42  }
 0x351   : > { %8562 = vset.pattern.permute.xlu1 %v14064_v54 }
 0x352   : > { %3056 = vperm.xlu1 %8562, %v2057_v55   ;;  %v10858_v22 = vpop.permute.xlu0 %2282  ;;  %v1997_v55 = vadd.f32 %v1933_v40, %v1608_v58  ;;  %v14311_v40 = vld [vmem:[#allocation17_spill] sm:$0xff] }
 0x353   : > { %14301 = vst [vmem:[#allocation23_spill] sm:$0xff] %v10858_v22  ;;  %v1151_v58 = vmul.f32 %v10228_v34, %v14311_v40  ;;  %v14319_v22 = vld [vmem:[#allocation39_spill] sm:$0xff] }
 0x354   : > { %2751 = vperm.xlu0 %8611, %v14303_v63  }
 0x355   : > { %v10863_v43 = vpop.permute.xlu1 %2619 }
 0x356   : > { %3060 = vperm.xlu1 %8562, %v14276_v38   ;;  %v10866_v14 = vpop.permute.xlu0 %2292  ;;  %v2061_v38 = vmax.f32 %v1997_v55, 0.0  ;;  %v1221_v55 = vadd.f32 %v10253_v36, %v1151_v58 }
 0x357   : > { %14304 = vst [vmem:[#allocation13_spill] sm:$0xff] %v10866_v14  ;;  %v14316_v14 = vld [vmem:[#allocation37_spill] sm:$0xff] }
 0x358   : > { %2759 = vperm.xlu0 %8611, %v14306_v11   ;;  %v14318_v11 = vld [vmem:[#allocation76_spill] sm:$0xff] }
 0x35a   : > { %v10871_v19 = vpop.permute.xlu1 %2187  ;;  %8563 = vset.pattern.permute.xlu1 %v14091_v39  ;;  %v10874_v41 = vpop.permute.xlu0 %2302 }
 0x35b   : > { %14307 = vst [vmem:[#allocation73_spill] sm:$0xff] %v10874_v41  ;;  %2675 = vperm.xlu1 %8563, %v2059_v60   ;;  %v14315_v41 = vld [vmem:[#allocation52_spill] sm:$0xff] }
 0x35c   : > { %2767 = vperm.xlu0 %8611, %v14308_v8   ;;  %v1546_v8 = vmul.f32 %v14278_v23, %v14315_v41 }
 0x35e   : > { %v10877_v59 = vpop.permute.xlu0 %2312  ;;  %v1610_v40 = vadd.f32 %v1546_v8, %v1221_v55  ;;  %v14322_v55 = vld [vmem:[#allocation19_spill] sm:$0xff] }
 0x35f   : > { %14309 = vst [vmem:[#allocation12_spill] sm:$0xff] %v10877_v59  ;;  %v10879_v29 = vpop.permute.xlu1 %3008  ;;  %8564 = vset.pattern.permute.xlu1 %v14174_v44 }
 0x360   : > { %2257 = vperm.xlu1 %8564, %v2061_v38   ;;  %2775 = vperm.xlu0 %8611, %v14310_v47  }
 0x362   : > { %v10885_v5 = vpop.permute.xlu0 %2322 }
 0x363   : > { %14312 = vst [vmem:[#allocation43_spill] sm:$0xff] %v10885_v5  ;;  %v10887_v20 = vpop.permute.xlu1 %3012 }
 0x364   : > { %8565 = vset.pattern.permute.xlu1 %v14064_v54  ;;  %2783 = vperm.xlu0 %8611, %v14313_v56   ;;  %v1935_v56 = vmul.f32 %v10269_v33, %v14318_v11 }
 0x365   : > { %3064 = vperm.xlu1 %8565, %v2059_v60  }
 0x366   : > { %v10892_v59 = vpop.permute.xlu0 %2332  ;;  %v1999_v60 = vadd.f32 %v1935_v56, %v1610_v40  ;;  %v1153_v56 = vmul.f32 %v10228_v34, %v14322_v55  ;;  %v5042_v55 = vld [vmem:[%s13876_s12] sm:$0xff] }
 0x367   : > { %14314 = vst [vmem:[#allocation67_spill] sm:$0xff] %v10892_v59  ;;  %v593_v59 = vld [vmem:[%s10332_s28 + $0x10] sm:$0xff]  ;;  %8389 = vmatprep.subr.mxu1 %v5042_v55 }
 0x368   : > { %v10896_v47 = vpop.permute.xlu1 %2627  ;;  %2791 = vperm.xlu0 %8611, %v14316_v14   ;;  %v10911_v8 = vmax.f32 %v1999_v60, 0.0  ;;  %v1223_v60 = vadd.f32 %v10253_v36, %v1153_v56  ;;  %v3437_v56 = vcombine.high %v593_v59, %v593_v59  ;;  %8390 = vmatpush3.msra.mxu1 %v5042_v55 }
 0x369   : > { %3068 = vperm.xlu1 %8565, %v14279_v15  }
 0x36a   : > { %v10900_v5 = vpop.permute.xlu0 %2342 }
 0x36b   : > { %14317 = vst [vmem:[#allocation15_spill] sm:$0xff] %v10900_v5 }
 0x36c   : > { %2799 = vperm.xlu0 %8611, %v14319_v22  }
 0x36d   : > { %v10905_v58 = vpop.permute.xlu1 %2197  ;;  %8566 = vset.pattern.permute.xlu1 %v14091_v39 }
 0x36e   : > { %2683 = vperm.xlu1 %8566, %v2061_v38   ;;  %v10908_v41 = vpop.permute.xlu0 %2352 }
 0x36f   : > { %14320 = vst [vmem:[#allocation68_spill] sm:$0xff] %v10908_v41 }
 0x370   : > { %2807 = vperm.xlu0 %8611, %v10496_v7   ;;  %v14324_v7 = vld [vmem:[#allocation44_spill] sm:$0xff] }
 0x371   : > { %v1155_v5 = vmul.f32 %v10228_v34, %v14324_v7 }
 0x372   : > { %v10913_v15 = vpop.permute.xlu1 %3016  ;;  %8567 = vset.pattern.permute.xlu1 %v14174_v44  ;;  %v10916_v11 = vpop.permute.xlu0 %2362 }
 0x373   : > { %14321 = vst [vmem:[#allocation50_spill] sm:$0xff] %v10916_v11  ;;  %2267 = vperm.xlu1 %8567, %v10911_v8   ;;  %v14325_v11 = vld [vmem:[#allocation53_spill] sm:$0xff]  ;;  %v1225_v7 = vadd.f32 %v10253_v36, %v1155_v5 }
 0x374   : > { %8614 = vset.pattern.permute.xlu0 %v14064_v54  ;;  %v1548_v22 = vmul.f32 %v14278_v23, %v14325_v11  ;;  %v3404_v23 = vcombine.high %v10775_v13, %v10775_v13  ;;  %v14327_v11 = vld [vmem:[#allocation77_spill] sm:$0xff]  ;;  %v3451_v13 = vrot.slane %v3437_v56, %v10363_v6  ;;  %v10977_v56 = vld [vmem:[%s13868_s4 + $0x2] ss:$0 sm:$0xff] }
 0x376   : > { %v10922_v40 = vpop.permute.xlu1 %3020  ;;  %v10924_v41 = vpop.permute.xlu0 %2372  ;;  %v1612_v63 = vadd.f32 %v1548_v22, %v1223_v60  ;;  %v10954_v22 = vld [vmem:[%s13868_s4 + $0x1] ss:$0 sm:$0xff] }
 0x377   : > { %14323 = vst [vmem:[#allocation74_spill] sm:$0xff] %v10924_v41  ;;  %8568 = vset.pattern.permute.xlu1 %v14064_v54  ;;  %v3434_v41 = vcombine.high %v10788_v31, %v10788_v31  ;;  %v1937_v31 = vmul.f32 %v10269_v33, %v14327_v11  ;;  %v14328_v60 = vld [vmem:[#allocation54_spill] sm:$0xff]  ;;  %v2433_v33 = vmul.f32 %v10396_v48, %v10792_v0 }
 0x378   : > { %3072 = vperm.xlu1 %8568, %v2061_v38   ;;  %v3444_v38 = vrot.slane %v593_v59, %v10363_v6  ;;  %v1550_v36 = vmul.f32 %v10954_v22, %v14328_v60 }
 0x379   : > { %v10959_v5 = vrot.slane %v3434_v41, %v10413_v62  ;;  %v2001_v59 = vadd.f32 %v1937_v31, %v1612_v63  ;;  %v3432_v41 = vrot.slane %v3404_v23, %v10363_v6  ;;  %v14330_v63 = vld [vmem:[#allocation78_spill] sm:$0xff]  ;;  %v2503_v30 = vadd.f32 %v10425_v3, %v2433_v33 }
 0x37a   : > { %v10938_v14 = vpop.permute.xlu0 %2382  ;;  %v1614_v55 = vadd.f32 %v1550_v36, %v1225_v7  ;;  %v3460_v11 = vrot.slane %v3444_v38, %v10363_v6  ;;  %v3452_v60 = vcombine.high %v3444_v38, %v3444_v38  ;;  %v1939_v0 = vmul.f32 %v10977_v56, %v14330_v63  ;;  %v14333_v63 = vld [vmem:[#allocation2_spill] sm:$0xff] }
 0x37b   : > { %14326 = vst [vmem:[#allocation16_spill] sm:$0xff] %v10938_v14  ;;  %v10940_v34 = vpop.permute.xlu1 %2635  ;;  %v2432_v14 = vmul.f32 %v10396_v48, %v10753_v4  ;;  %v10967_v4 = vld [vmem:[%s10435_s23 + $0x70] sm:$0xff]  ;;  %v2828_v7 = vmul.f32 %v10444_v28, %v10827_v57  ;;  %v3436_v42 = vcombine.high %v3432_v41, %v3432_v41  ;;  %v11005_v27 = vmax.f32 %v2001_v59, 0.0  ;;  %v615_v33 = vld [vmem:[%s10435_s23 + $0x80] sm:$0xff] }
 0x37c   : > { %3076 = vperm.xlu1 %8568, %v14282_v16   ;;  %v4065_v23 = vsub.f32 %v10967_v4, %v10959_v5  ;;  %v3482_v38 = vcombine.high %v3460_v11, %v3460_v11  ;;  %v2435_v5 = vmul.f32 %v10396_v48, %v10839_v61  ;;  %v3217_v4 = vmul.f32 %v10449_v37, %v10845_v17 }
 0x37d   : > { %v10982_v31 = vadd.f32 %v10425_v3, %v2432_v14  ;;  %v10995_v14 = vld [vmem:[%s13868_s4] ss:$0 sm:$0xff]  ;;  %v3798_v50 = vrot.slane %v3460_v11, %v10413_v62  ;;  %v3474_v51 = vrot.slane %v3452_v60, %v10363_v6  ;;  %v2892_v1 = vadd.f32 %v2828_v7, %v2503_v30  ;;  %v11031_v7 = vld [vmem:[%s10435_s23 + $0x90] sm:$0xff] }
 0x37e   : > { %v10961_v16 = vpop.permute.xlu0 %2392  ;;  %14332 = vst [vmem:[#allocation17_spill] sm:$0xff] %v10995_v14  ;;  %v1157_v57 = vmul.f32 %v10995_v14, %v14333_v63  ;;  %v2830_v63 = vmul.f32 %v10444_v28, %v10863_v43  ;;  %v3453_v17 = vcombine.high %v3451_v13, %v3451_v13  ;;  %v3786_v43 = vrot.slane %v3432_v41, %v10413_v62 }
 0x37f   : > { %14329 = vst [vmem:[#allocation51_spill] sm:$0xff] %v10961_v16  ;;  %v3467_v16 = vrot.slane %v3451_v13, %v10363_v6  ;;  %v11023_v11 = vrot.slane %v3436_v42, %v10413_v62  ;;  %v2505_v60 = vadd.f32 %v10425_v3, %v2435_v5  ;;  %v3219_v13 = vmul.f32 %v10449_v37, %v10879_v29  ;;  %v11046_v29 = vld [vmem:[%s10435_s23 + $0x78] sm:$0xff] }
 0x380   : > { %v10970_v9 = vpop.permute.xlu1 %2207  ;;  %8569 = vset.pattern.permute.xlu1 %v14091_v39  ;;  %v3484_v18 = vcombine.high %v3474_v51, %v3474_v51  ;;  %v4067_v41 = vsub.f32 %v615_v33, %v3798_v50  ;;  %v3802_v14 = vrot.slane %v3474_v51, %v10413_v62  ;;  %v11068_v51 = vld [vmem:[%s10435_s23 + $0xb0] sm:$0xff] }
 0x381   : > { %2691 = vperm.xlu1 %8569, %v10911_v8   ;;  %v3483_v61 = vcombine.high %v3467_v16, %v3467_v16  ;;  %v3814_v59 = vrot.slane %v3467_v16, %v10413_v62  ;;  %v619_v16 = vld [vmem:[%s10435_s23 + $0xa0] sm:$0xff] }
 0x382   : > { %v10989_v36 = vpop.permute.xlu0 %2402 }
 0x383   : > { %14331 = vst [vmem:[#allocation75_spill] sm:$0xff] %v10989_v36  ;;  %v2003_v36 = vadd.f32 %v1939_v0, %v1614_v55  ;;  %v11015_v55 = vrot.slane %v3482_v38, %v10413_v62  ;;  %v11026_v0 = vadd.f32 %v3217_v4, %v2892_v1  ;;  %v612_v38 = vld [vmem:[%s10435_s23 + $0x68] sm:$0xff]  ;;  %v2437_v1 = vmul.f32 %v10396_v48, %v10871_v19 }
 0x384   : > { %v2894_v4 = vadd.f32 %v2830_v63, %v2505_v60  ;;  %v11054_v2 = vrot.slane %v3483_v61, %v10413_v62  ;;  %v11063_v19 = vsub.f32 %v619_v16, %v3814_v59  ;;  %v616_v63 = vld [vmem:[%s10435_s23 + $0x88] sm:$0xff]  ;;  %v2434_v59 = vmul.f32 %v10396_v48, %v10737_v46 }
 0x385   : > { %v11011_v35 = vpop.permute.xlu1 %3024  ;;  %8570 = vset.pattern.permute.xlu1 %v14174_v44  ;;  %14335 = vst [vmem:[#allocation76_spill] sm:$0xff] %v11026_v0  ;;  %v11048_v5 = vmax.f32 %v2003_v36, 0.0  ;;  %v4069_v50 = vsub.f32 %v11031_v7, %v11015_v55  ;;  %v4064_v36 = vsub.f32 %v612_v38, %v3786_v43  ;;  %v4129_v33 = vadd.f32 %v4065_v23, %v11026_v0 }
 0x386   : > { %2277 = vperm.xlu1 %8570, %v11005_v27   ;;  %v11019_v30 = vpop.permute.xlu0 %2412  ;;  %v11071_v61 = vadd.f32 %v3219_v13, %v2894_v4  ;;  %v11077_v55 = vrot.slane %v3484_v18, %v10413_v62  ;;  %v2507_v43 = vadd.f32 %v10425_v3, %v2437_v1  ;;  %v3221_v23 = vmul.f32 %v10449_v37, %v10913_v15  ;;  %v11086_v13 = vld [vmem:[%s10435_s23 + $0x98] sm:$0xff] }
 0x387   : > { %14334 = vst [vmem:[#allocation52_spill] sm:$0xff] %v11019_v30  ;;  %v11038_v30 = vld [vmem:[%s13869_s5] ss:$0 sm:$0xff]  ;;  %v4073_v18 = vsub.f32 %v11068_v51, %v11054_v2  ;;  %v2436_v7 = vmul.f32 %v10396_v48, %v10756_v45  ;;  %v3216_v15 = vmul.f32 %v10449_v37, %v10815_v26  ;;  %v2834_v4 = vmul.f32 %v10444_v28, %v10940_v34 }
 0x388   : > { %14336 = vst [vmem:[#allocation19_spill] sm:$0xff] %v11038_v30  ;;  %v11041_v42 = vadd.f32 %v11038_v30, %v1157_v57  ;;  %v11057_v57 = vrot.slane %v3453_v17, %v10363_v6  ;;  %v2832_v30 = vmul.f32 %v10444_v28, %v10896_v47  ;;  %14337 = vst [vmem:[#allocation44_spill] sm:$0xff] %v11071_v61 }
 0x389   : > { %v11050_v24 = vpop.permute.xlu1 %3028  ;;  %v4066_v47 = vsub.f32 %v11046_v29, %v11023_v11  ;;  %v11090_v11 = vsub.f32 %v616_v63, %v3802_v14  ;;  %v620_v29 = vld [vmem:[%s10435_s23 + $0xa8] sm:$0xff]  ;;  %v4131_v14 = vadd.f32 %v4067_v41, %v11071_v61  ;;  %v2504_v45 = vadd.f32 %v10425_v3, %v2434_v59  ;;  %v11118_v41 = vld [vmem:[%s13870_s6] ss:$0 sm:$0xff] }
 0x38a   : > { %8571 = vset.pattern.permute.xlu1 %v14064_v54  ;;  %v3818_v46 = vrot.slane %v11057_v57, %v10413_v62  ;;  %v2896_v16 = vadd.f32 %v2832_v30, %v2507_v43  ;;  %v2506_v59 = vadd.f32 %v10425_v3, %v2436_v7  ;;  %v3218_v43 = vmul.f32 %v10449_v37, %v10853_v52 }
 0x38b   : > { %3080 = vperm.xlu1 %8571, %v10911_v8   ;;  %v2608_v17 = vpop.permute.xlu0 %2607  ;;  %v2439_v8 = vmul.f32 %v10396_v48, %v10905_v58  ;;  %v4200_v58 = vmul.f32 %v10545_v32, %v4129_v33  ;;  %v4070_v48 = vsub.f32 %v11086_v13, %v11077_v55  ;;  %v3223_v33 = vmul.f32 %v10449_v37, %v11011_v35 }
 0x38c   : > { %v2827_v60 = vmul.f32 %v10444_v28, %v2608_v17  ;;  %v11110_v26 = vadd.f32 %v3221_v23, %v2896_v16  ;;  %v11125_v17 = vsub.f32 %v620_v29, %v3818_v46 }
 0x38d   : > { %v2509_v34 = vadd.f32 %v10425_v3, %v2439_v8  ;;  %v4271_v46 = vadd.f32 %v10582_v49, %v4200_v58  ;;  %v2440_v58 = vmul.f32 %v11118_v41, %v10784_v53 }
 0x38e   : > { %v2891_v38 = vadd.f32 %v2827_v60, %v10982_v31  ;;  %v2644_v1 = vpop.permute.xlu1 %2643  ;;  %14338 = vst [vmem:[#allocation53_spill] sm:$0xff] %v11110_v26  ;;  %v4133_v3 = vadd.f32 %v4069_v50, %v11110_v26  ;;  %v11155_v50 = vld [vmem:[%s13870_s6 + $0x1] ss:$0 sm:$0xff] }
 0x38f   : > { %3084 = vperm.xlu1 %8571, %v14283_v10   ;;  %v2616_v63 = vpop.permute.xlu0 %2615  ;;  %v2438_v10 = vmul.f32 %v11118_v41, %v10772_v21  ;;  %v2898_v16 = vadd.f32 %v2834_v4, %v2509_v34  ;;  %v2441_v21 = vmul.f32 %v11118_v41, %v10970_v9  ;;  %v11147_v9 = vld [vmem:[%s13871_s7] ss:$0 sm:$0xff]  ;;  %v2836_v29 = vmul.f32 %v11155_v50, %v2644_v1 }
 0x390   : > { %v11112_v31 = vadd.f32 %v3216_v15, %v2891_v38  ;;  %v2829_v30 = vmul.f32 %v10444_v28, %v2616_v63  ;;  %v4202_v15 = vmul.f32 %v10545_v32, %v4131_v14  ;;  %v11165_v14 = vld [vmem:[%s13870_s6 + $0x2] ss:$0 sm:$0xff]  ;;  %v4204_v53 = vmul.f32 %v10545_v32, %v4133_v3 }
 0x391   : > { %v2508_v7 = vadd.f32 %v11147_v9, %v2438_v10  ;;  %v11150_v38 = vadd.f32 %v3223_v33, %v2898_v16  ;;  %v3220_v4 = vmul.f32 %v11165_v14, %v10887_v20  ;;  %v3222_v16 = vmul.f32 %v11165_v14, %v10922_v40 }
 0x392   : > { %14339 = vst [vmem:[#allocation77_spill] sm:$0xff] %v11112_v31  ;;  %v4128_v23 = vadd.f32 %v4064_v36, %v11112_v31  ;;  %v2893_v60 = vadd.f32 %v2829_v30, %v2504_v45  ;;  %v2511_v30 = vadd.f32 %v11147_v9, %v2441_v21  ;;  %v4273_v34 = vadd.f32 %v10582_v49, %v4202_v15 }
 0x393   : > { %v11134_v8 = vpop.permute.xlu1 %2217  ;;  %8572 = vset.pattern.permute.xlu1 %v14091_v39  ;;  %v2624_v35 = vpop.permute.xlu0 %2623  ;;  %14341 = vst [vmem:[#allocation78_spill] sm:$0xff] %v11150_v38  ;;  %v2510_v3 = vadd.f32 %v11147_v9, %v2440_v58 }
 0x394   : > { %v4199_v37 = vmul.f32 %v10545_v32, %v4128_v23  ;;  %v11140_v52 = vadd.f32 %v3218_v43, %v2893_v60  ;;  %v2831_v36 = vmul.f32 %v10444_v28, %v2624_v35  ;;  %2699 = vperm.xlu1 %8572, %v11005_v27   ;;  %v3485_v28 = vcombine.high %v11057_v57, %v11057_v57 }
 0x395   : > { %v4335_v57 = vmax.f32 %v4271_v46, 0.0 }
 0x396   : > { %14340 = vst [vmem:[#allocation54_spill] sm:$0xff] %v11140_v52  ;;  %v4130_v63 = vadd.f32 %v4066_v47, %v11140_v52  ;;  %v2895_v45 = vadd.f32 %v2831_v36, %v2506_v59  ;;  %v4270_v10 = vadd.f32 %v10582_v49, %v4199_v37  ;;  %v4135_v47 = vadd.f32 %v11063_v19, %v11150_v38 }
 0x397   : > { %v2632_v1 = vpop.permute.xlu0 %2631  ;;  %v2900_v59 = vadd.f32 %v2836_v29, %v2511_v30  ;;  %v2442_v19 = vmul.f32 %v11118_v41, %v10799_v12  ;;  %v3826_v29 = vrot.slane %v3485_v28, %v10413_v62  ;;  %v4337_v28 = vmax.f32 %v4273_v34, 0.0 }
 0x398   : > { %v4201_v33 = vmul.f32 %v10545_v32, %v4130_v63  ;;  %v11175_v43 = vadd.f32 %v3220_v4, %v2895_v45  ;;  %v2833_v23 = vmul.f32 %v11155_v50, %v2632_v1  ;;  %v3033_v20 = vpop.permute.xlu1 %3032  ;;  %8573 = vset.pattern.permute.xlu1 %v14174_v44  ;;  %v4334_v15 = vmax.f32 %v4270_v10, 0.0  ;;  %v11201_v63 = vld [vmem:[%s10332_s28 + $0x18] sm:$0xff] }
 0x399   : > { %v3225_v60 = vmul.f32 %v11165_v14, %v3033_v20  ;;  %2287 = vperm.xlu1 %8573, %v11048_v5   ;;  %v4206_v12 = vmul.f32 %v10545_v32, %v4135_v47  ;;  %v3224_v45 = vmul.f32 %v11165_v14, %v11050_v24  ;;  %v4275_v30 = vadd.f32 %v10582_v49, %v4204_v53 }
 0x39a   : > { %14342 = vst [vmem:[#allocation2_spill] sm:$0xff] %v11175_v43  ;;  %v4132_v21 = vadd.f32 %v11090_v11, %v11175_v43  ;;  %v2897_v35 = vadd.f32 %v2833_v23, %v2508_v7  ;;  %v4272_v46 = vadd.f32 %v10582_v49, %v4201_v33  ;;  %8312 = vmatmul.mubr.msk.f32.gmra.mrb[12].mxu0 %vm4400_vm0, %v4334_v15  ;;  %v622_v33 = vld [vmem:[%s10435_s23 + $0xb8] sm:$0xff]  ;;  %v14345_v23 = vld [vmem:[#allocation55_spill] sm:$0xff]  ;;  %v11235_v15 = vld [vmem:[%s13872_s8] ss:$0 sm:$0xff] }
 0x39b   : > { %v11191_v37 = vadd.f32 %v3225_v60, %v2900_v59  ;;  %v2640_v36 = vpop.permute.xlu0 %2639  ;;  %8314 = vmatprep.mubr.msk.f32.mxu0 %vm4400_vm0, %v4335_v57  ;;  %v1552_v34 = vmul.f32 %v10954_v22, %v14345_v23  ;;  %v2512_v53 = vadd.f32 %v11147_v9, %v2442_v19  ;;  %v3493_v13 = vrot.slane %v11201_v63, %v10363_v6 }
 0x39c   : > { %v4203_v40 = vmul.f32 %v10545_v32, %v4132_v21  ;;  %v11196_v4 = vadd.f32 %v3222_v16, %v2897_v35  ;;  %v2835_v11 = vmul.f32 %v11155_v50, %v2640_v36  ;;  %v3037_v7 = vpop.permute.xlu1 %3036  ;;  %v4336_v58 = vmax.f32 %v4272_v46, 0.0 }
 0x39d   : > { %14343 = vst [vmem:[#allocation92_spill] sm:$0xff] %v11191_v37  ;;  %8574 = vset.pattern.permute.xlu1 %v14064_v54  ;;  %v4137_v10 = vadd.f32 %v4073_v18, %v11191_v37  ;;  %v4074_v20 = vsub.f32 %v622_v33, %v3826_v29  ;;  %v4339_v59 = vmax.f32 %v4275_v30, 0.0  ;;  %v4277_v60 = vadd.f32 %v10582_v49, %v4206_v12  ;;  %v11260_v12 = vld [vmem:[%s13873_s9] ss:$0 sm:$0xff] }
 0x39e   : > { %14344 = vst [vmem:[#allocation93_spill] sm:$0xff] %v11196_v4  ;;  %v4134_v1 = vadd.f32 %v4070_v48, %v11196_v4  ;;  %v2899_v57 = vadd.f32 %v2835_v11, %v2510_v3  ;;  %3088 = vperm.xlu1 %8574, %v11005_v27   ;;  %v4274_v24 = vadd.f32 %v10582_v49, %v4203_v40  ;;  %v623_v33 = vld [vmem:[%s10435_s23 + $0xc0] sm:$0xff] }
 0x39f   : > { %8315 = vmatmul.mubr.msk.f32.gmra.mrb[14].mxu0 %vm4400_vm0, %v4336_v58  ;;  %v2648_v55 = vpop.permute.xlu0 %2647  ;;  %v1616_v48 = vadd.f32 %v1552_v34, %v11041_v42  ;;  %v3226_v21 = vmul.f32 %v11165_v14, %v3037_v7  ;;  %v14347_v42 = vld [vmem:[#allocation79_spill] sm:$0xff]  ;;  %v11247_v19 = vrot.slane %v3493_v13, %v10363_v6  ;;  %v3501_v36 = vcombine.high %v3493_v13, %v3493_v13  ;;  %v14349_v34 = vld [vmem:[#allocation10_spill] sm:$0xff] }
 0x3a0   : > { %v4205_v2 = vmul.f32 %v10545_v32, %v4134_v1  ;;  %v11226_v51 = vadd.f32 %v3224_v45, %v2899_v57  ;;  %v2837_v27 = vmul.f32 %v11155_v50, %v2648_v55  ;;  %8317 = vmatprep.mubr.msk.f32.mxu0 %vm4400_vm0, %v4337_v28  ;;  %v4338_v18 = vmax.f32 %v4274_v24, 0.0 }
 0x3a1   : > { %v2652_v47 = vpop.permute.xlu1 %2651  ;;  %v4208_v32 = vmul.f32 %v11235_v15, %v4137_v10  ;;  %v1941_v46 = vmul.f32 %v10977_v56, %v14347_v42  ;;  %v2443_v7 = vmul.f32 %v11118_v41, %v11134_v8  ;;  %v3830_v8 = vrot.slane %v11247_v19, %v10413_v62 }
 0x3a2   : > { %14346 = vst [vmem:[#allocation55_spill] sm:$0xff] %v11226_v51  ;;  %v4136_v16 = vadd.f32 %v11125_v17, %v11226_v51  ;;  %v2901_v35 = vadd.f32 %v2837_v27, %v2512_v53  ;;  %3092 = vperm.xlu1 %8574, %v14287_v25   ;;  %v4276_v3 = vadd.f32 %v10582_v49, %v4205_v2  ;;  %v4341_v25 = vmax.f32 %v4277_v60, 0.0 }
 0x3a3   : > { %8318 = vmatmul.mubr.msk.f32.gmra.mrb[16].mxu0 %vm4400_vm0, %v4338_v18  ;;  %v2005_v17 = vadd.f32 %v1941_v46, %v1616_v48  ;;  %v4279_v28 = vadd.f32 %v11260_v12, %v4208_v32  ;;  %v11269_v30 = vrot.slane %v3501_v36, %v10363_v6  ;;  %v2838_v10 = vmul.f32 %v11155_v50, %v2652_v47  ;;  %v2656_v24 = vpop.permute.xlu0 %2655  ;;  %v14350_v32 = vld [vmem:[#allocation25_spill] sm:$0xff] }
 0x3a4   : > { %v4207_v29 = vmul.f32 %v11235_v15, %v4136_v16  ;;  %v11250_v40 = vadd.f32 %v3226_v21, %v2901_v35  ;;  %8320 = vmatprep.mubr.msk.f32.mxu0 %vm4400_vm0, %v4339_v59  ;;  %v4340_v11 = vmax.f32 %v4276_v3, 0.0  ;;  %v2444_v53 = vmul.f32 %v11118_v41, %v14349_v34  ;;  %v14351_v16 = vld [vmem:[#allocation17_spill] sm:$0xff]  ;;  %v624_v35 = vld [vmem:[%s10435_s23 + $0xc8] sm:$0xff] }
 0x3a5   : > { %v11275_v23 = vmax.f32 %v2005_v17, 0.0  ;;  %v2513_v55 = vadd.f32 %v11147_v9, %v2443_v7  ;;  %v4343_v13 = vmax.f32 %v4279_v28, 0.0  ;;  %v4075_v18 = vsub.f32 %v623_v33, %v3830_v8  ;;  %v14355_v28 = vld [vmem:[#allocation56_spill] sm:$0xff] }
 0x3a6   : > { %14348 = vst [vmem:[#allocation79_spill] sm:$0xff] %v11250_v40  ;;  %v4138_v58 = vadd.f32 %v4074_v20, %v11250_v40  ;;  %v2228_v49 = vpop.permute.xlu1 %2227  ;;  %8575 = vset.pattern.permute.xlu1 %v14091_v39  ;;  %v4278_v45 = vadd.f32 %v11260_v12, %v4207_v29  ;;  %v3834_v48 = vrot.slane %v11269_v30, %v10413_v62 }
 0x3a7   : > { %8321 = vmatmul.mubr.msk.f32.gmra.mrb[18].mxu0 %vm4400_vm0, %v4340_v11  ;;  %2707 = vperm.xlu1 %8575, %v11048_v5   ;;  %v2902_v20 = vadd.f32 %v2838_v10, %v2513_v55  ;;  %v2839_v47 = vmul.f32 %v11155_v50, %v2656_v24  ;;  %v1159_v21 = vmul.f32 %v14351_v16, %v14350_v32  ;;  %v14356_v24 = vld [vmem:[#allocation69_spill] sm:$0xff]  ;;  %v14357_v55 = vld [vmem:[#allocation80_spill] sm:$0xff]  ;;  %v2664_v32 = vpop.permute.xlu0 %2663 }
 0x3a8   : > { %v4209_v1 = vmul.f32 %v11235_v15, %v4138_v58  ;;  %8323 = vmatprep.mubr.msk.f32.mxu0 %vm4400_vm0, %v4341_v25  ;;  %v4342_v57 = vmax.f32 %v4278_v45, 0.0  ;;  %v2514_v42 = vadd.f32 %v11147_v9, %v2444_v53  ;;  %v4076_v11 = vsub.f32 %v624_v35, %v3834_v48  ;;  %v14353_v25 = vld [vmem:[#allocation19_spill] sm:$0xff] }
 0x3a9   : > { %v1229_v7 = vadd.f32 %v14353_v25, %v1159_v21  ;;  %v1554_v8 = vmul.f32 %v10954_v22, %v14355_v28  ;;  %v14358_v21 = vld [vmem:[#allocation14_spill] sm:$0xff]  ;;  %v626_v28 = vld [vmem:[%s10435_s23 + $0xd8] sm:$0xff] }
 0x3aa   : > { %v4280_v2 = vadd.f32 %v11260_v12, %v4209_v1  ;;  %v2903_v36 = vadd.f32 %v2839_v47, %v2514_v42 }
 0x3ab   : > { %8324 = vmatmul.mubr.msk.f32.gmra.mrb[20].mxu0 %vm4400_vm0, %v4342_v57  ;;  %v3041_v27 = vpop.permute.xlu1 %3040  ;;  %8576 = vset.pattern.permute.xlu1 %v14174_v44  ;;  %v1618_v33 = vadd.f32 %v1554_v8, %v1229_v7  ;;  %v14359_v7 = vld [vmem:[#allocation27_spill] sm:$0xff] }
 0x3ac   : > { %v3227_v59 = vmul.f32 %v11165_v14, %v3041_v27  ;;  %8326 = vmatprep.mubr.msk.f32.mxu0 %vm4400_vm0, %v4343_v13  ;;  %2297 = vperm.xlu1 %8576, %v11275_v23   ;;  %v4344_v60 = vmax.f32 %v4280_v2, 0.0  ;;  %v1943_v13 = vmul.f32 %v10977_v56, %v14357_v55 }
 0x3ae   : > { %v11293_v46 = vadd.f32 %v3227_v59, %v2902_v20  ;;  %v2007_v27 = vadd.f32 %v1943_v13, %v1618_v33  ;;  %v625_v59 = vld [vmem:[%s10435_s23 + $0xd0] sm:$0xff] }
 0x3af   : > { %8327 = vmatmul.mubr.msk.f32.gmra.mrb[22].mxu0 %vm4400_vm0, %v4344_v60  ;;  %v3045_v3 = vpop.permute.xlu1 %3044  ;;  %v3533_v60 = vcombine.high %v11269_v30, %v11269_v30 }
 0x3b0   : > { %14352 = vst [vmem:[#allocation10_spill] sm:$0xff] %v11293_v46  ;;  %v4139_v29 = vadd.f32 %v4075_v18, %v11293_v46  ;;  %v3228_v17 = vmul.f32 %v11165_v14, %v3045_v3  ;;  %8577 = vset.pattern.permute.xlu1 %v14064_v54  ;;  %v2445_v18 = vmul.f32 %v11118_v41, %v2228_v49  ;;  %v11328_v42 = vmax.f32 %v2007_v27, 0.0 }
 0x3b1   : > { %3096 = vperm.xlu1 %8577, %v11048_v5   ;;  %v3531_v5 = vcombine.high %v11247_v19, %v11247_v19  ;;  %v2446_v49 = vmul.f32 %v11118_v41, %v14358_v21  ;;  %v3842_v30 = vrot.slane %v3533_v60, %v10413_v62  ;;  %v14364_v21 = vld [vmem:[#allocation81_spill] sm:$0xff] }
 0x3b2   : > { %v4210_v58 = vmul.f32 %v11235_v15, %v4139_v29  ;;  %v11302_v45 = vadd.f32 %v3228_v17, %v2903_v36  ;;  %v2515_v35 = vadd.f32 %v11147_v9, %v2445_v18  ;;  %v2841_v29 = vmul.f32 %v11155_v50, %v2664_v32 }
 0x3b3   : > { %v3838_v47 = vrot.slane %v3531_v5, %v10413_v62  ;;  %v2516_v8 = vadd.f32 %v11147_v9, %v2446_v49  ;;  %v1945_v49 = vmul.f32 %v10977_v56, %v14364_v21 }
 0x3b4   : > { %14354 = vst [vmem:[#allocation25_spill] sm:$0xff] %v11302_v45  ;;  %v4140_v1 = vadd.f32 %v4076_v11, %v11302_v45  ;;  %v2660_v10 = vpop.permute.xlu1 %2659  ;;  %v4281_v57 = vadd.f32 %v11260_v12, %v4210_v58  ;;  %v1161_v58 = vmul.f32 %v14351_v16, %v14359_v7 }
 0x3b5   : > { %3100 = vperm.xlu1 %8577, %v14356_v24   ;;  %v2840_v19 = vmul.f32 %v11155_v50, %v2660_v10  ;;  %v4077_v36 = vsub.f32 %v625_v59, %v3838_v47  ;;  %v3486_v10 = vcombine.high %v11201_v63, %v11201_v63  ;;  %v2905_v33 = vadd.f32 %v2841_v29, %v2516_v8  ;;  %v14362_v63 = vld [vmem:[#allocation57_spill] sm:$0xff]  ;;  %v14363_v59 = vld [vmem:[#allocation70_spill] sm:$0xff]  ;;  %v2672_v8 = vpop.permute.xlu0 %2671 }
 0x3b6   : > { %v4211_v34 = vmul.f32 %v11235_v15, %v4140_v1  ;;  %v4345_v53 = vmax.f32 %v4281_v57, 0.0  ;;  %v1231_v5 = vadd.f32 %v14353_v25, %v1161_v58  ;;  %v1556_v27 = vmul.f32 %v10954_v22, %v14362_v63  ;;  %v627_v58 = vld [vmem:[%s10435_s23 + $0xe0] sm:$0xff]  ;;  %v14366_v63 = vld [vmem:[#allocation29_spill] sm:$0xff] }
 0x3b7   : > { %v2904_v17 = vadd.f32 %v2840_v19, %v2515_v35 }
 0x3b8   : > { %8329 = vmatprep.mubr.msk.f32.mxu0 %vm4400_vm0, %v4345_v53  ;;  %v4282_v2 = vadd.f32 %v11260_v12, %v4211_v34  ;;  %v4078_v53 = vsub.f32 %v626_v28, %v3842_v30  ;;  %v1620_v19 = vadd.f32 %v1556_v27, %v1231_v5  ;;  %v1163_v27 = vmul.f32 %v14351_v16, %v14366_v63 }
 0x3b9   : > { %v2238_v48 = vpop.permute.xlu1 %2237  ;;  %8578 = vset.pattern.permute.xlu1 %v14091_v39 }
 0x3ba   : > { %2715 = vperm.xlu1 %8578, %v11275_v23   ;;  %v4346_v20 = vmax.f32 %v4282_v2, 0.0  ;;  %v3500_v2 = vrot.slane %v3486_v10, %v10363_v6  ;;  %v2447_v29 = vmul.f32 %v11118_v41, %v2238_v48  ;;  %v14365_v10 = vld [vmem:[#allocation42_spill] sm:$0xff] }
 0x3bb   : > { %v2448_v48 = vmul.f32 %v11118_v41, %v14365_v10 }
 0x3bc   : > { %8330 = vmatmul.mubr.msk.f32.gmra.mrb[24].mxu0 %vm4400_vm0, %v4346_v20  ;;  %v3516_v32 = vrot.slane %v3500_v2, %v10363_v6  ;;  %v3502_v35 = vcombine.high %v3500_v2, %v3500_v2 }
 0x3be   : > { %v3049_v3 = vpop.permute.xlu1 %3048  ;;  %8579 = vset.pattern.permute.xlu1 %v14174_v44  ;;  %v3846_v30 = vrot.slane %v3516_v32, %v10413_v62  ;;  %v11370_v28 = vrot.slane %v3502_v35, %v10363_v6 }
 0x3bf   : > { %v3229_v11 = vmul.f32 %v11165_v14, %v3049_v3  ;;  %2307 = vperm.xlu1 %8579, %v11328_v42  }
 0x3c0   : > { %v3850_v2 = vrot.slane %v11370_v28, %v10413_v62 }
 0x3c1   : > { %v11339_v1 = vadd.f32 %v3229_v11, %v2904_v17 }
 0x3c2   : > { %v3053_v57 = vpop.permute.xlu1 %3052 }
 0x3c3   : > { %14360 = vst [vmem:[#allocation17_spill] sm:$0xff] %v11339_v1  ;;  %v4141_v24 = vadd.f32 %v4077_v36, %v11339_v1  ;;  %v3230_v34 = vmul.f32 %v11165_v14, %v3053_v57  ;;  %8580 = vset.pattern.permute.xlu1 %v14064_v54  ;;  %v2009_v36 = vadd.f32 %v1945_v49, %v1620_v19 }
 0x3c4   : > { %3104 = vperm.xlu1 %8580, %v11275_v23   ;;  %v2517_v57 = vadd.f32 %v11147_v9, %v2447_v29  ;;  %v1233_v49 = vadd.f32 %v14353_v25, %v1163_v27  ;;  %v629_v27 = vld [vmem:[%s10435_s23 + $0xf0] sm:$0xff] }
 0x3c5   : > { %v4212_v55 = vmul.f32 %v11235_v15, %v4141_v24  ;;  %v11349_v13 = vadd.f32 %v3230_v34, %v2905_v33  ;;  %v11376_v33 = vmax.f32 %v2009_v36, 0.0  ;;  %v4079_v34 = vsub.f32 %v627_v58, %v3846_v30  ;;  %v14369_v36 = vld [vmem:[#allocation58_spill] sm:$0xff] }
 0x3c6   : > { %v1558_v29 = vmul.f32 %v10954_v22, %v14369_v36 }
 0x3c7   : > { %14361 = vst [vmem:[#allocation19_spill] sm:$0xff] %v11349_v13  ;;  %v4142_v18 = vadd.f32 %v4078_v53, %v11349_v13  ;;  %v2668_v20 = vpop.permute.xlu1 %2667  ;;  %v4283_v47 = vadd.f32 %v11260_v12, %v4212_v55  ;;  %v2843_v53 = vmul.f32 %v11155_v50, %v2672_v8  ;;  %v14370_v8 = vld [vmem:[#allocation21_spill] sm:$0xff] }
 0x3c8   : > { %3108 = vperm.xlu1 %8580, %v14363_v59   ;;  %v2842_v7 = vmul.f32 %v11155_v50, %v2668_v20  ;;  %v2518_v20 = vadd.f32 %v11147_v9, %v2448_v48  ;;  %v1622_v58 = vadd.f32 %v1558_v29, %v1233_v49  ;;  %v14373_v29 = vld [vmem:[#allocation3_spill] sm:$0xff] }
 0x3c9   : > { %v4213_v23 = vmul.f32 %v11235_v15, %v4142_v18  ;;  %v4347_v60 = vmax.f32 %v4283_v47, 0.0  ;;  %v628_v18 = vld [vmem:[%s10435_s23 + $0xe8] sm:$0xff] }
 0x3ca   : > { %v2906_v5 = vadd.f32 %v2842_v7, %v2517_v57  ;;  %v2907_v59 = vadd.f32 %v2843_v53, %v2518_v20  ;;  %v4080_v21 = vsub.f32 %v628_v18, %v3850_v2  ;;  %v14371_v57 = vld [vmem:[#allocation82_spill] sm:$0xff]  ;;  %v3534_v18 = vcombine.high %v11370_v28, %v11370_v28  ;;  %v2680_v20 = vpop.permute.xlu0 %2679 }
 0x3cb   : > { %8332 = vmatprep.mubr.msk.f32.mxu0 %vm4400_vm0, %v4347_v60  ;;  %v4284_v3 = vadd.f32 %v11260_v12, %v4213_v23  ;;  %v2845_v49 = vmul.f32 %v11155_v50, %v2680_v20 }
 0x3cc   : > { %v2248_v17 = vpop.permute.xlu1 %2247  ;;  %8581 = vset.pattern.permute.xlu1 %v14091_v39  ;;  %v3858_v36 = vrot.slane %v3534_v18, %v10413_v62 }
 0x3cd   : > { %2723 = vperm.xlu1 %8581, %v11328_v42   ;;  %v4348_v11 = vmax.f32 %v4284_v3, 0.0 }
 0x3cf   : > { %8333 = vmatmul.mubr.msk.f32.gmra.mrb[26].mxu0 %vm4400_vm0, %v4348_v11 }
 0x3d1   : > { %v3057_v24 = vpop.permute.xlu1 %3056  ;;  %8582 = vset.pattern.permute.xlu1 %v14174_v44 }
 0x3d2   : > { %v3231_v55 = vmul.f32 %v11165_v14, %v3057_v24  ;;  %2317 = vperm.xlu1 %8582, %v11376_v33   ;;  %v1947_v24 = vmul.f32 %v10977_v56, %v14371_v57 }
 0x3d4   : > { %v11388_v47 = vadd.f32 %v3231_v55, %v2906_v5  ;;  %v2011_v53 = vadd.f32 %v1947_v24, %v1622_v58  ;;  %v2449_v5 = vmul.f32 %v11118_v41, %v2248_v17 }
 0x3d5   : > { %v3061_v19 = vpop.permute.xlu1 %3060 }
 0x3d6   : > { %14367 = vst [vmem:[#allocation56_spill] sm:$0xff] %v11388_v47  ;;  %v4143_v23 = vadd.f32 %v4079_v34, %v11388_v47  ;;  %v3232_v60 = vmul.f32 %v11165_v14, %v3061_v19  ;;  %8583 = vset.pattern.permute.xlu1 %v14064_v54  ;;  %v14372_v19 = vld [vmem:[#allocation26_spill] sm:$0xff] }
 0x3d7   : > { %3112 = vperm.xlu1 %8583, %v11328_v42   ;;  %v3532_v42 = vcombine.high %v3516_v32, %v3516_v32  ;;  %v2450_v17 = vmul.f32 %v11118_v41, %v14372_v19 }
 0x3d8   : > { %v4214_v35 = vmul.f32 %v11235_v15, %v4143_v23  ;;  %v11396_v3 = vadd.f32 %v3232_v60, %v2907_v59  ;;  %v2519_v59 = vadd.f32 %v11147_v9, %v2449_v5  ;;  %v11420_v23 = vmax.f32 %v2011_v53, 0.0 }
 0x3d9   : > { %v3854_v63 = vrot.slane %v3532_v42, %v10413_v62 }
 0x3da   : > { %14368 = vst [vmem:[#allocation69_spill] sm:$0xff] %v11396_v3  ;;  %v4144_v11 = vadd.f32 %v4080_v21, %v11396_v3  ;;  %v2676_v30 = vpop.permute.xlu1 %2675  ;;  %v4285_v7 = vadd.f32 %v11260_v12, %v4214_v35 }
 0x3db   : > { %3116 = vperm.xlu1 %8583, %v14370_v8   ;;  %v2844_v32 = vmul.f32 %v11155_v50, %v2676_v30  ;;  %v4081_v21 = vsub.f32 %v629_v27, %v3854_v63  ;;  %v630_v30 = vld [vmem:[%s10435_s23 + $0xf8] sm:$0xff]  ;;  %v14376_v63 = vld [vmem:[#allocation59_spill] sm:$0xff] }
 0x3dc   : > { %v4215_v10 = vmul.f32 %v11235_v15, %v4144_v11  ;;  %v4349_v48 = vmax.f32 %v4285_v7, 0.0  ;;  %v1165_v11 = vmul.f32 %v14351_v16, %v14373_v29  ;;  %v2520_v7 = vadd.f32 %v11147_v9, %v2450_v17  ;;  %v14377_v17 = vld [vmem:[#allocation18_spill] sm:$0xff] }
 0x3dd   : > { %v2908_v35 = vadd.f32 %v2844_v32, %v2519_v59  ;;  %v4082_v24 = vsub.f32 %v630_v30, %v3858_v36  ;;  %v1560_v32 = vmul.f32 %v10954_v22, %v14376_v63  ;;  %v11466_v30 = vld [vmem:[%s13875_s11] ss:$0 sm:$0xff] }
 0x3de   : > { %8335 = vmatprep.mubr.msk.f32.mxu0 %vm4400_vm0, %v4349_v48  ;;  %v4286_v34 = vadd.f32 %v11260_v12, %v4215_v10  ;;  %v11434_v10 = vld [vmem:[%s10332_s28 + $0x20] sm:$0xff]  ;;  %v2909_v48 = vadd.f32 %v2845_v49, %v2520_v7  ;;  %v14378_v49 = vld [vmem:[#allocation83_spill] sm:$0xff] }
 0x3df   : > { %v2258_v55 = vpop.permute.xlu1 %2257  ;;  %8584 = vset.pattern.permute.xlu1 %v14091_v39 }
 0x3e0   : > { %2731 = vperm.xlu1 %8584, %v11376_v33   ;;  %v4350_v2 = vmax.f32 %v4286_v34, 0.0  ;;  %v1235_v34 = vadd.f32 %v14353_v25, %v1165_v11  ;;  %v2451_v29 = vmul.f32 %v11118_v41, %v2258_v55 }
 0x3e2   : > { %8336 = vmatmul.mubr.msk.f32.gmra.mrb[28].mxu0 %vm4400_vm0, %v4350_v2  ;;  %v3542_v2 = vrot.slane %v11434_v10, %v10363_v6  ;;  %v1624_v19 = vadd.f32 %v1560_v32, %v1235_v34  ;;  %v2521_v32 = vadd.f32 %v11147_v9, %v2451_v29 }
 0x3e4   : > { %v3065_v60 = vpop.permute.xlu1 %3064  ;;  %8585 = vset.pattern.permute.xlu1 %v14174_v44 }
 0x3e5   : > { %v3233_v28 = vmul.f32 %v11165_v14, %v3065_v60  ;;  %2327 = vperm.xlu1 %8585, %v11420_v23   ;;  %v11453_v60 = vrot.slane %v3542_v2, %v10363_v6 }
 0x3e7   : > { %v11431_v58 = vadd.f32 %v3233_v28, %v2908_v35  ;;  %v1949_v35 = vmul.f32 %v10977_v56, %v14378_v49 }
 0x3e8   : > { %v3069_v8 = vpop.permute.xlu1 %3068 }
 0x3e9   : > { %14374 = vst [vmem:[#allocation80_spill] sm:$0xff] %v11431_v58  ;;  %v4145_v42 = vadd.f32 %v4081_v21, %v11431_v58  ;;  %v3234_v57 = vmul.f32 %v11165_v14, %v3069_v8  ;;  %8586 = vset.pattern.permute.xlu1 %v14064_v54  ;;  %v3550_v21 = vcombine.high %v3542_v2, %v3542_v2  ;;  %v14379_v2 = vld [vmem:[#allocation11_spill] sm:$0xff] }
 0x3ea   : > { %3120 = vperm.xlu1 %8586, %v11376_v33   ;;  %v2013_v36 = vadd.f32 %v1949_v35, %v1624_v19  ;;  %v3862_v8 = vrot.slane %v11453_v60, %v10413_v62  ;;  %v2452_v63 = vmul.f32 %v11118_v41, %v14379_v2  ;;  %v14380_v19 = vld [vmem:[#allocation40_spill] sm:$0xff] }
 0x3eb   : > { %v4216_v53 = vmul.f32 %v11235_v15, %v4145_v42  ;;  %v11442_v5 = vadd.f32 %v3234_v57, %v2909_v48  ;;  %v11472_v48 = vrot.slane %v3550_v21, %v10363_v6  ;;  %v631_v57 = vld [vmem:[%s10435_s23 + $0x100] sm:$0xff] }
 0x3ed   : > { %14375 = vst [vmem:[#allocation14_spill] sm:$0xff] %v11442_v5  ;;  %v4146_v27 = vadd.f32 %v4082_v24, %v11442_v5  ;;  %v2684_v18 = vpop.permute.xlu1 %2683  ;;  %v4287_v20 = vadd.f32 %v11260_v12, %v4216_v53  ;;  %v2688_v24 = vpop.permute.xlu0 %2687  ;;  %v14457_v5 = vld [vmem:[#allocation9_spill] sm:$0xff] }
 0x3ee   : > { %3124 = vperm.xlu1 %8586, %v14377_v17   ;;  %v2846_v55 = vmul.f32 %v11155_v50, %v2684_v18  ;;  %v1167_v18 = vmul.f32 %v14351_v16, %v14380_v19  ;;  %v2847_v21 = vmul.f32 %v11155_v50, %v2688_v24 }
 0x3ef   : > { %v4217_v33 = vmul.f32 %v11235_v15, %v4146_v27  ;;  %v4351_v59 = vmax.f32 %v4287_v20, 0.0  ;;  %v11482_v20 = vmax.f32 %v2013_v36, 0.0  ;;  %v632_v36 = vld [vmem:[%s10435_s23 + $0x108] sm:$0xff] }
 0x3f0   : > { %v2910_v49 = vadd.f32 %v2846_v55, %v2521_v32  ;;  %v1237_v55 = vadd.f32 %v14353_v25, %v1167_v18  ;;  %v14382_v18 = vld [vmem:[#allocation60_spill] sm:$0xff] }
 0x3f1   : > { %8338 = vmatprep.mubr.msk.f32.mxu0 %vm4400_vm0, %v4351_v59  ;;  %v4288_v28 = vadd.f32 %v11260_v12, %v4217_v33  ;;  %v4083_v33 = vsub.f32 %v631_v57, %v3862_v8  ;;  %v3866_v59 = vrot.slane %v11472_v48, %v10413_v62  ;;  %v2522_v57 = vadd.f32 %v11147_v9, %v2452_v63 }
 0x3f2   : > { %v11460_v11 = vpop.permute.xlu1 %2267  ;;  %8587 = vset.pattern.permute.xlu1 %v14091_v39 }
 0x3f3   : > { %2739 = vperm.xlu1 %8587, %v11420_v23   ;;  %v4352_v7 = vmax.f32 %v4288_v28, 0.0  ;;  %v8295_v42 = vpop.f32.mrb[0].mxu0  ;;  %v4084_v32 = vsub.f32 %v632_v36, %v3866_v59 }
 0x3f4   : > { %v4665_v34 = vadd.f32 %v8295_v42, %v11466_v30  ;;  %v4659_v53 = vpop.f32.mrb[1].mxu0 }
 0x3f5   : > { %8339 = vmatmul.mubr.msk.f32.gmra.mrb[30].mxu0 %vm4400_vm0, %v4352_v7  ;;  %v4660_v27 = vadd.f32 %v11466_v30, %v4659_v53 }
 0x3f6   : > { %v4979_v7 = vmax.f32 %v4665_v34, 0.0 }
 0x3f7   : > { %v3073_v17 = vpop.permute.xlu1 %3072  ;;  %8588 = vset.pattern.permute.xlu1 %v14174_v44  ;;  %v4978_v35 = vmax.f32 %v4660_v27, 0.0  ;;  %v8298_v29 = vpop.f32.mrb[2].mxu0  ;;  %v2911_v27 = vadd.f32 %v2847_v21, %v2522_v57 }
 0x3f8   : > { %v3235_v28 = vmul.f32 %v11165_v14, %v3073_v17  ;;  %2337 = vperm.xlu1 %8588, %v11482_v20   ;;  %v4675_v42 = vadd.f32 %v8298_v29, %v11466_v30  ;;  %v4669_v8 = vpop.f32.mrb[3].mxu0 }
 0x3f9   : > { %v4670_v2 = vadd.f32 %v11466_v30, %v4669_v8  ;;  %8391 = vmatprep.mubr.msk.f32.mxu1 %vm5043_vm1, %v4978_v35  ;;  %v1562_v35 = vmul.f32 %v10954_v22, %v14382_v18  ;;  %v2453_v18 = vmul.f32 %v11118_v41, %v11460_v11  ;;  %v3582_v11 = vcombine.high %v11472_v48, %v11472_v48 }
 0x3fa   : > { %v11495_v53 = vadd.f32 %v3235_v28, %v2910_v49  ;;  %8392 = vmatmul.mubr.msk.f32.vlgmr.msra.gmra.mrb[0].mxu1 %vm5043_vm1, %v4979_v7  ;;  %v4981_v63 = vmax.f32 %v4675_v42, 0.0 }
 0x3fb   : > { %v3077_v24 = vpop.permute.xlu1 %3076  ;;  %v4980_v19 = vmax.f32 %v4670_v2, 0.0  ;;  %v8301_v29 = vpop.f32.mrb[4].mxu0  ;;  %v1626_v36 = vadd.f32 %v1562_v35, %v1237_v55  ;;  %v14384_v2 = vld [vmem:[#allocation84_spill] sm:$0xff] }
 0x3fc   : > { %14381 = vst [vmem:[#allocation27_spill] sm:$0xff] %v11495_v53  ;;  %v4147_v34 = vadd.f32 %v4083_v33, %v11495_v53  ;;  %v3236_v17 = vmul.f32 %v11165_v14, %v3077_v24  ;;  %8589 = vset.pattern.permute.xlu1 %v14064_v54  ;;  %v4685_v49 = vadd.f32 %v8301_v29, %v11466_v30  ;;  %v4679_v28 = vpop.f32.mrb[5].mxu0 }
 0x3fd   : > { %3128 = vperm.xlu1 %8589, %v11420_v23   ;;  %v4680_v33 = vadd.f32 %v11466_v30, %v4679_v28  ;;  %8394 = vmatprep.mubr.msk.f32.mxu1 %vm5043_vm1, %v4980_v19  ;;  %v1951_v22 = vmul.f32 %v10977_v56, %v14384_v2  ;;  %v3580_v29 = vcombine.high %v11453_v60, %v11453_v60  ;;  %v2696_v2 = vpop.permute.xlu0 %2695 }
 0x3fe   : > { %v4218_v59 = vmul.f32 %v11235_v15, %v4147_v34  ;;  %v11509_v21 = vadd.f32 %v3236_v17, %v2911_v27  ;;  %8395 = vmatmul.mubr.msk.f32.gmra.mrb[2].mxu1 %vm5043_vm1, %v4981_v63  ;;  %v4983_v24 = vmax.f32 %v4685_v49, 0.0  ;;  %v14385_v17 = vld [vmem:[#allocation20_spill] sm:$0xff] }
 0x3ff   : > { %v4982_v42 = vmax.f32 %v4680_v33, 0.0  ;;  %v2015_v63 = vadd.f32 %v1951_v22, %v1626_v36 }
 0x400   : > { %14383 = vst [vmem:[#allocation57_spill] sm:$0xff] %v11509_v21  ;;  %v4148_v7 = vadd.f32 %v4084_v32, %v11509_v21  ;;  %v8304_v8 = vpop.f32.mrb[6].mxu0  ;;  %v2692_v57 = vpop.permute.xlu1 %2691  ;;  %v4289_v23 = vadd.f32 %v11260_v12, %v4218_v59 }
 0x401   : > { %v4695_v27 = vadd.f32 %v8304_v8, %v11466_v30  ;;  %v4689_v34 = vpop.f32.mrb[7].mxu0  ;;  %3132 = vperm.xlu1 %8589, %v14385_v17   ;;  %8397 = vmatprep.mubr.msk.f32.mxu1 %vm5043_vm1, %v4982_v42  ;;  %v3870_v42 = vrot.slane %v3580_v29, %v10413_v62  ;;  %v2848_v8 = vmul.f32 %v11155_v50, %v2692_v57 }
 0x402   : > { %v4219_v19 = vmul.f32 %v11235_v15, %v4148_v7  ;;  %v4690_v55 = vadd.f32 %v11466_v30, %v4689_v34  ;;  %v4353_v32 = vmax.f32 %v4289_v23, 0.0  ;;  %8398 = vmatmul.mubr.msk.f32.gmra.mrb[4].mxu1 %vm5043_vm1, %v4983_v24  ;;  %v633_v23 = vld [vmem:[%s10435_s23 + $0x110] sm:$0xff]  ;;  %v14386_v34 = vld [vmem:[#allocation49_spill] sm:$0xff] }
 0x403   : > { %v4985_v35 = vmax.f32 %v4695_v27, 0.0  ;;  %v11544_v27 = vmax.f32 %v2015_v63, 0.0  ;;  %v2454_v17 = vmul.f32 %v11118_v41, %v14386_v34  ;;  %v3874_v63 = vrot.slane %v3582_v11, %v10413_v62 }
 0x404   : > { %v4984_v56 = vmax.f32 %v4690_v55, 0.0  ;;  %v8307_v49 = vpop.f32.mrb[8].mxu0  ;;  %8341 = vmatprep.mubr.msk.f32.mxu0 %vm4400_vm0, %v4353_v32  ;;  %v4290_v28 = vadd.f32 %v11260_v12, %v4219_v19  ;;  %v2523_v19 = vadd.f32 %v11147_v9, %v2453_v18  ;;  %v634_v18 = vld [vmem:[%s10435_s23 + $0x118] sm:$0xff]  ;;  %v3535_v11 = vcombine.high %v11434_v10, %v11434_v10 }
 0x405   : > { %v4705_v59 = vadd.f32 %v8307_v49, %v11466_v30  ;;  %v4699_v33 = vpop.f32.mrb[9].mxu0  ;;  %v11531_v7 = vpop.permute.xlu1 %2277  ;;  %8590 = vset.pattern.permute.xlu1 %v14091_v39  ;;  %v2849_v49 = vmul.f32 %v11155_v50, %v2696_v2  ;;  %v4086_v2 = vsub.f32 %v634_v18, %v3874_v63  ;;  %v14392_v18 = vld [vmem:[#allocation85_spill] sm:$0xff] }
 0x406   : > { %v4700_v60 = vadd.f32 %v11466_v30, %v4699_v33  ;;  %8400 = vmatprep.mubr.msk.f32.mxu1 %vm5043_vm1, %v4984_v56  ;;  %2747 = vperm.xlu1 %8590, %v11482_v20   ;;  %v4354_v36 = vmax.f32 %v4290_v28, 0.0  ;;  %v4085_v56 = vsub.f32 %v633_v23, %v3870_v42  ;;  %v2912_v28 = vadd.f32 %v2848_v8, %v2523_v19 }
 0x407   : > { %8401 = vmatmul.mubr.msk.f32.gmra.mrb[6].mxu1 %vm5043_vm1, %v4985_v35  ;;  %v4987_v55 = vmax.f32 %v4705_v59, 0.0  ;;  %v14387_v59 = vld [vmem:[#allocation33_spill] sm:$0xff]  ;;  %v3549_v19 = vrot.slane %v3535_v11, %v10363_v6 }
 0x408   : > { %v4986_v22 = vmax.f32 %v4700_v60, 0.0  ;;  %v8310_v24 = vpop.f32.mrb[10].mxu0  ;;  %8342 = vmatmul.mubr.msk.f32.gmra.mrb[32].mxu0 %vm4400_vm0, %v4354_v36  ;;  %v1169_v33 = vmul.f32 %v14351_v16, %v14387_v59  ;;  %v2524_v36 = vadd.f32 %v11147_v9, %v2454_v17 }
 0x409   : > { %v4715_v48 = vadd.f32 %v8310_v24, %v11466_v30  ;;  %v4709_v57 = vpop.f32.mrb[11].mxu0 }
 0x40a   : > { %v4710_v32 = vadd.f32 %v11466_v30, %v4709_v57  ;;  %8403 = vmatprep.mubr.msk.f32.mxu1 %vm5043_vm1, %v4986_v22  ;;  %v3081_v29 = vpop.permute.xlu1 %3080  ;;  %8591 = vset.pattern.permute.xlu1 %v14174_v44  ;;  %v2913_v22 = vadd.f32 %v2849_v49, %v2524_v36  ;;  %v1239_v16 = vadd.f32 %v14353_v25, %v1169_v33 }
 0x40b   : > { %v3237_v35 = vmul.f32 %v11165_v14, %v3081_v29  ;;  %8404 = vmatmul.mubr.msk.f32.gmra.mrb[8].mxu1 %vm5043_vm1, %v4987_v55  ;;  %2347 = vperm.xlu1 %8591, %v11544_v27   ;;  %v4989_v42 = vmax.f32 %v4715_v48, 0.0  ;;  %v11580_v55 = vld [vmem:[%s13868_s4 + $0x1] ss:$0 sm:$0xff]  ;;  %v14390_v48 = vld [vmem:[#allocation61_spill] sm:$0xff]  ;;  %v3551_v33 = vcombine.high %v3549_v19, %v3549_v19 }
 0x40c   : > { %v4988_v60 = vmax.f32 %v4710_v32, 0.0  ;;  %v1564_v57 = vmul.f32 %v11580_v55, %v14390_v48 }
 0x40d   : > { %v11562_v23 = vadd.f32 %v3237_v35, %v2912_v28  ;;  %v11589_v28 = vrot.slane %v3549_v19, %v10363_v6  ;;  %v11594_v35 = vld [vmem:[%s13868_s4 + $0x2] ss:$0 sm:$0xff] }
 0x40e   : > { %8406 = vmatprep.mubr.msk.f32.mxu1 %vm5043_vm1, %v4988_v60  ;;  %v3085_v8 = vpop.permute.xlu1 %3084  ;;  %v1953_v59 = vmul.f32 %v11594_v35, %v14392_v18  ;;  %v636_v18 = vld [vmem:[%s10435_s23 + $0x128] sm:$0xff] }
 0x40f   : > { %14388 = vst [vmem:[#allocation70_spill] sm:$0xff] %v11562_v23  ;;  %v4149_v24 = vadd.f32 %v4085_v56, %v11562_v23  ;;  %v3238_v34 = vmul.f32 %v11165_v14, %v3085_v8  ;;  %8407 = vmatmul.mubr.msk.f32.gmra.mrb[10].mxu1 %vm5043_vm1, %v4989_v42  ;;  %8592 = vset.pattern.permute.xlu1 %v14064_v54  ;;  %v14391_v56 = vld [vmem:[#allocation22_spill] sm:$0xff] }
 0x410   : > { %3136 = vperm.xlu1 %8592, %v11482_v20   ;;  %v1628_v20 = vadd.f32 %v1564_v57, %v1239_v16  ;;  %v2455_v42 = vmul.f32 %v11118_v41, %v11531_v7  ;;  %v2704_v16 = vpop.permute.xlu0 %2703  ;;  %v14393_v7 = vld [vmem:[#allocation23_spill] sm:$0xff]  ;;  %v14456_v23 = vld [vmem:[#allocation30_spill] sm:$0xff] }
 0x411   : > { %v4220_v17 = vmul.f32 %v11235_v15, %v4149_v24  ;;  %v11574_v10 = vadd.f32 %v3238_v34, %v2913_v22  ;;  %v635_v24 = vld [vmem:[%s10435_s23 + $0x120] sm:$0xff]  ;;  %v11609_v34 = vrot.slane %v3551_v33, %v10363_v6 }
 0x412   : > { %v2017_v36 = vadd.f32 %v1953_v59, %v1628_v20  ;;  %v2525_v19 = vadd.f32 %v11147_v9, %v2455_v42 }
 0x413   : > { %14389 = vst [vmem:[#allocation81_spill] sm:$0xff] %v11574_v10  ;;  %v4150_v32 = vadd.f32 %v4086_v2, %v11574_v10  ;;  %v2700_v29 = vpop.permute.xlu1 %2699  ;;  %v4291_v25 = vadd.f32 %v11260_v12, %v4220_v17  ;;  %v3878_v2 = vrot.slane %v11589_v28, %v10413_v62  ;;  %v2456_v17 = vmul.f32 %v11118_v41, %v14393_v7  ;;  %v11626_v41 = vld [vmem:[%s13868_s4] ss:$0 sm:$0xff] }
 0x414   : > { %3140 = vperm.xlu1 %8592, %v14391_v56   ;;  %v2850_v22 = vmul.f32 %v11155_v50, %v2700_v29  ;;  %v11615_v48 = vmax.f32 %v2017_v36, 0.0  ;;  %v2851_v29 = vmul.f32 %v11155_v50, %v2704_v16  ;;  %v3882_v56 = vrot.slane %v11609_v34, %v10413_v62 }
 0x415   : > { %v4221_v63 = vmul.f32 %v11235_v15, %v4150_v32  ;;  %v4355_v49 = vmax.f32 %v4291_v25, 0.0  ;;  %v4087_v32 = vsub.f32 %v635_v24, %v3878_v2  ;;  %v2526_v59 = vadd.f32 %v11147_v9, %v2456_v17  ;;  %v14397_v17 = vld [vmem:[#allocation62_spill] sm:$0xff] }
 0x416   : > { %v2914_v25 = vadd.f32 %v2850_v22, %v2525_v19  ;;  %v4088_v2 = vsub.f32 %v636_v18, %v3882_v56  ;;  %v11640_v22 = vld [vmem:[%s13869_s5] ss:$0 sm:$0xff]  ;;  %v1566_v19 = vmul.f32 %v11580_v55, %v14397_v17  ;;  %v3583_v17 = vcombine.high %v11609_v34, %v11609_v34 }
 0x417   : > { %8344 = vmatprep.mubr.msk.f32.mxu0 %vm4400_vm0, %v4355_v49  ;;  %v4292_v60 = vadd.f32 %v11260_v12, %v4221_v63  ;;  %v14394_v63 = vld [vmem:[#allocation4_spill] sm:$0xff]  ;;  %v2915_v36 = vadd.f32 %v2851_v29, %v2526_v59 }
 0x418   : > { %v2288_v11 = vpop.permute.xlu1 %2287  ;;  %8593 = vset.pattern.permute.xlu1 %v14091_v39  ;;  %v1171_v49 = vmul.f32 %v11626_v41, %v14394_v63 }
 0x419   : > { %2755 = vperm.xlu1 %8593, %v11544_v27   ;;  %v4356_v8 = vmax.f32 %v4292_v60, 0.0 }
 0x41a   : > { %v1241_v24 = vadd.f32 %v11640_v22, %v1171_v49  ;;  %v14399_v49 = vld [vmem:[#allocation86_spill] sm:$0xff] }
 0x41b   : > { %8345 = vmatmul.mubr.msk.f32.gmra.mrb[34].mxu0 %vm4400_vm0, %v4356_v8  ;;  %v1955_v18 = vmul.f32 %v11594_v35, %v14399_v49  ;;  %v14401_v49 = vld [vmem:[#allocation28_spill] sm:$0xff] }
 0x41d   : > { %v3089_v57 = vpop.permute.xlu1 %3088  ;;  %8594 = vset.pattern.permute.xlu1 %v14174_v44 }
 0x41e   : > { %v3239_v20 = vmul.f32 %v11165_v14, %v3089_v57  ;;  %2357 = vperm.xlu1 %8594, %v11615_v48  }
 0x420   : > { %v11632_v33 = vadd.f32 %v3239_v20, %v2914_v25  ;;  %v1630_v25 = vadd.f32 %v1566_v19, %v1241_v24  ;;  %v14398_v20 = vld [vmem:[#allocation45_spill] sm:$0xff]  ;;  %v2712_v19 = vpop.permute.xlu0 %2711 }
 0x421   : > { %v3093_v60 = vpop.permute.xlu1 %3092 }
 0x422   : > { %14395 = vst [vmem:[#allocation42_spill] sm:$0xff] %v11632_v33  ;;  %v4151_v42 = vadd.f32 %v4087_v32, %v11632_v33  ;;  %v3240_v8 = vmul.f32 %v11165_v14, %v3093_v60  ;;  %8595 = vset.pattern.permute.xlu1 %v14064_v54  ;;  %v2019_v60 = vadd.f32 %v1955_v18, %v1630_v25  ;;  %v14452_v33 = vld [vmem:[#allocation16_spill] sm:$0xff] }
 0x423   : > { %3144 = vperm.xlu1 %8595, %v11544_v27   ;;  %v3581_v27 = vcombine.high %v11589_v28, %v11589_v28  ;;  %v1173_v18 = vmul.f32 %v11626_v41, %v14401_v49  ;;  %v14405_v49 = vld [vmem:[#allocation31_spill] sm:$0xff] }
 0x424   : > { %v4222_v16 = vmul.f32 %v11235_v15, %v4151_v42  ;;  %v11645_v7 = vadd.f32 %v3240_v8, %v2915_v36  ;;  %v11662_v36 = vld [vmem:[%s13870_s6] ss:$0 sm:$0xff]  ;;  %v11676_v25 = vmax.f32 %v2019_v60, 0.0 }
 0x425   : > { %v2457_v42 = vmul.f32 %v11662_v36, %v2288_v11 }
 0x426   : > { %14396 = vst [vmem:[#allocation29_spill] sm:$0xff] %v11645_v7  ;;  %v4152_v57 = vadd.f32 %v4088_v2, %v11645_v7  ;;  %v2708_v32 = vpop.permute.xlu1 %2707  ;;  %v4293_v29 = vadd.f32 %v11260_v12, %v4222_v16  ;;  %v3886_v2 = vrot.slane %v3581_v27, %v10413_v62  ;;  %v637_v16 = vld [vmem:[%s10435_s23 + $0x130] sm:$0xff]  ;;  %v3890_v27 = vrot.slane %v3583_v17, %v10413_v62  ;;  %v11703_v17 = vld [vmem:[%s10332_s28 + $0x28] sm:$0xff] }
 0x427   : > { %3148 = vperm.xlu1 %8595, %v14398_v20   ;;  %v2852_v24 = vmul.f32 %v11155_v50, %v2708_v32  ;;  %v2853_v32 = vmul.f32 %v11155_v50, %v2712_v19  ;;  %v1243_v19 = vadd.f32 %v11640_v22, %v1173_v18 }
 0x428   : > { %v4223_v56 = vmul.f32 %v11235_v15, %v4152_v57  ;;  %v4357_v63 = vmax.f32 %v4293_v29, 0.0  ;;  %v14400_v57 = vld [vmem:[#allocation13_spill] sm:$0xff]  ;;  %v2527_v29 = vadd.f32 %v11147_v9, %v2457_v42 }
 0x429   : > { %v2458_v11 = vmul.f32 %v11662_v36, %v14400_v57  ;;  %v638_v9 = vld [vmem:[%s10435_s23 + $0x138] sm:$0xff] }
 0x42a   : > { %8347 = vmatprep.mubr.msk.f32.mxu0 %vm4400_vm0, %v4357_v63  ;;  %v4294_v59 = vadd.f32 %v11260_v12, %v4223_v56  ;;  %v4089_v56 = vsub.f32 %v637_v16, %v3886_v2  ;;  %v2916_v63 = vadd.f32 %v2852_v24, %v2527_v29  ;;  %v11698_v2 = vld [vmem:[%s13870_s6 + $0x2] ss:$0 sm:$0xff]  ;;  %v4090_v16 = vsub.f32 %v638_v9, %v3890_v27  ;;  %v14404_v29 = vld [vmem:[#allocation63_spill] sm:$0xff] }
 0x42b   : > { %v2298_v8 = vpop.permute.xlu1 %2297  ;;  %8596 = vset.pattern.permute.xlu1 %v14091_v39  ;;  %v14406_v9 = vld [vmem:[#allocation87_spill] sm:$0xff] }
 0x42c   : > { %2763 = vperm.xlu1 %8596, %v11615_v48   ;;  %v4358_v28 = vmax.f32 %v4294_v59, 0.0  ;;  %v11689_v59 = vld [vmem:[%s13871_s7] ss:$0 sm:$0xff] }
 0x42d   : > { %v2528_v60 = vadd.f32 %v11689_v59, %v2458_v11 }
 0x42e   : > { %8348 = vmatmul.mubr.msk.f32.gmra.mrb[36].mxu0 %vm4400_vm0, %v4358_v28 }
 0x42f   : > { %v2917_v28 = vadd.f32 %v2853_v32, %v2528_v60  ;;  %v1957_v60 = vmul.f32 %v11594_v35, %v14406_v9 }
 0x430   : > { %v3097_v20 = vpop.permute.xlu1 %3096  ;;  %8597 = vset.pattern.permute.xlu1 %v14174_v44 }
 0x431   : > { %v3241_v34 = vmul.f32 %v11165_v14, %v3097_v20  ;;  %2367 = vperm.xlu1 %8597, %v11676_v25   ;;  %v1568_v20 = vmul.f32 %v11580_v55, %v14404_v29  ;;  %v11731_v29 = vld [vmem:[%s13870_s6 + $0x1] ss:$0 sm:$0xff] }
 0x433   : > { %v11692_v50 = vadd.f32 %v3241_v34, %v2916_v63  ;;  %v1632_v27 = vadd.f32 %v1568_v20, %v1243_v19 }
 0x434   : > { %v3101_v42 = vpop.permute.xlu1 %3100 }
 0x435   : > { %14402 = vst [vmem:[#allocation58_spill] sm:$0xff] %v11692_v50  ;;  %v4153_v14 = vadd.f32 %v4089_v56, %v11692_v50  ;;  %v3242_v24 = vmul.f32 %v11698_v2, %v3101_v42  ;;  %8598 = vset.pattern.permute.xlu1 %v14064_v54  ;;  %v3591_v56 = vrot.slane %v11703_v17, %v10363_v6 }
 0x436   : > { %3152 = vperm.xlu1 %8598, %v11615_v48  }
 0x437   : > { %v4224_v57 = vmul.f32 %v11235_v15, %v4153_v14  ;;  %v11708_v11 = vadd.f32 %v3242_v24, %v2917_v28  ;;  %v11721_v42 = vrot.slane %v3591_v56, %v10363_v6  ;;  %v3599_v28 = vcombine.high %v3591_v56, %v3591_v56 }
 0x438   : > { %v2021_v24 = vadd.f32 %v1957_v60, %v1632_v27 }
 0x439   : > { %14403 = vst [vmem:[#allocation21_spill] sm:$0xff] %v11708_v11  ;;  %v4154_v32 = vadd.f32 %v4090_v16, %v11708_v11  ;;  %v2716_v63 = vpop.permute.xlu1 %2715  ;;  %v4295_v34 = vadd.f32 %v11260_v12, %v4224_v57  ;;  %v2459_v16 = vmul.f32 %v11662_v36, %v2298_v8  ;;  %v2720_v57 = vpop.permute.xlu0 %2719  ;;  %v3894_v56 = vrot.slane %v11721_v42, %v10413_v62 }
 0x43a   : > { %3156 = vperm.xlu1 %8598, %v14405_v49   ;;  %v2854_v20 = vmul.f32 %v11731_v29, %v2716_v63  ;;  %v11737_v8 = vrot.slane %v3599_v28, %v10363_v6 }
 0x43b   : > { %v4225_v48 = vmul.f32 %v11235_v15, %v4154_v32  ;;  %v4359_v18 = vmax.f32 %v4295_v34, 0.0  ;;  %v639_v32 = vld [vmem:[%s10435_s23 + $0x140] sm:$0xff]  ;;  %v14407_v34 = vld [vmem:[#allocation73_spill] sm:$0xff]  ;;  %v2529_v49 = vadd.f32 %v11689_v59, %v2459_v16  ;;  %v640_v16 = vld [vmem:[%s10435_s23 + $0x148] sm:$0xff] }
 0x43c   : > { %v2460_v27 = vmul.f32 %v11662_v36, %v14407_v34  ;;  %v4091_v28 = vsub.f32 %v639_v32, %v3894_v56 }
 0x43d   : > { %8350 = vmatprep.mubr.msk.f32.mxu0 %vm4400_vm0, %v4359_v18  ;;  %v4296_v14 = vadd.f32 %v11260_v12, %v4225_v48  ;;  %v11744_v48 = vmax.f32 %v2021_v24, 0.0  ;;  %v2855_v18 = vmul.f32 %v11731_v29, %v2720_v57  ;;  %v2918_v9 = vadd.f32 %v2854_v20, %v2529_v49 }
 0x43e   : > { %v2308_v19 = vpop.permute.xlu1 %2307  ;;  %8599 = vset.pattern.permute.xlu1 %v14091_v39  ;;  %v2530_v24 = vadd.f32 %v11689_v59, %v2460_v27 }
 0x43f   : > { %2771 = vperm.xlu1 %8599, %v11676_v25   ;;  %v4360_v15 = vmax.f32 %v4296_v14, 0.0  ;;  %v3898_v14 = vrot.slane %v11737_v8, %v10413_v62 }
 0x440   : > { %v2919_v50 = vadd.f32 %v2855_v18, %v2530_v24  ;;  %v14411_v18 = vld [vmem:[#allocation64_spill] sm:$0xff] }
 0x441   : > { %8351 = vmatmul.mubr.msk.f32.gmra.mrb[38].mxu0 %vm4400_vm0, %v4360_v15  ;;  %v14408_v15 = vld [vmem:[#allocation46_spill] sm:$0xff]  ;;  %v4092_v56 = vsub.f32 %v640_v16, %v3898_v14  ;;  %v14412_v16 = vld [vmem:[#allocation24_spill] sm:$0xff] }
 0x442   : > { %v1175_v34 = vmul.f32 %v11626_v41, %v14408_v15 }
 0x443   : > { %v3105_v63 = vpop.permute.xlu1 %3104  ;;  %8600 = vset.pattern.permute.xlu1 %v14174_v44 }
 0x444   : > { %v3243_v60 = vmul.f32 %v11698_v2, %v3105_v63  ;;  %2377 = vperm.xlu1 %8600, %v11744_v48   ;;  %v1245_v32 = vadd.f32 %v11640_v22, %v1175_v34  ;;  %v11766_v63 = vld [vmem:[%s13872_s8] ss:$0 sm:$0xff] }
 0x446   : > { %v11756_v11 = vadd.f32 %v3243_v60, %v2918_v9  ;;  %v1570_v60 = vmul.f32 %v11580_v55, %v14411_v18 }
 0x447   : > { %v3109_v57 = vpop.permute.xlu1 %3108 }
 0x448   : > { %14409 = vst [vmem:[#allocation82_spill] sm:$0xff] %v11756_v11  ;;  %v4155_v20 = vadd.f32 %v4091_v28, %v11756_v11  ;;  %v3244_v49 = vmul.f32 %v11698_v2, %v3109_v57  ;;  %8601 = vset.pattern.permute.xlu1 %v14064_v54  ;;  %v1634_v34 = vadd.f32 %v1570_v60, %v1245_v32  ;;  %v14413_v57 = vld [vmem:[#allocation88_spill] sm:$0xff]  ;;  %v2728_v60 = vpop.permute.xlu0 %2727 }
 0x449   : > { %3160 = vperm.xlu1 %8601, %v11676_v25  }
 0x44a   : > { %v4226_v27 = vmul.f32 %v11766_v63, %v4155_v20  ;;  %v11769_v9 = vadd.f32 %v3244_v49, %v2919_v50  ;;  %v1959_v20 = vmul.f32 %v11594_v35, %v14413_v57  ;;  %v3629_v50 = vcombine.high %v11721_v42, %v11721_v42 }
 0x44b   : > { %v3631_v42 = vcombine.high %v11737_v8, %v11737_v8 }
 0x44c   : > { %14410 = vst [vmem:[#allocation26_spill] sm:$0xff] %v11769_v9  ;;  %v4156_v28 = vadd.f32 %v4092_v56, %v11769_v9  ;;  %v2724_v14 = vpop.permute.xlu1 %2723  ;;  %v4297_v15 = vadd.f32 %v11260_v12, %v4226_v27  ;;  %v2023_v56 = vadd.f32 %v1959_v20, %v1634_v34  ;;  %v2461_v27 = vmul.f32 %v11662_v36, %v2308_v19  ;;  %v14414_v34 = vld [vmem:[#allocation12_spill] sm:$0xff] }
 0x44d   : > { %3164 = vperm.xlu1 %8601, %v14412_v16   ;;  %v2462_v19 = vmul.f32 %v11662_v36, %v14414_v34  ;;  %v3906_v8 = vrot.slane %v3631_v42, %v10413_v62  ;;  %v642_v34 = vld [vmem:[%s10435_s23 + $0x158] sm:$0xff]  ;;  %v3584_v9 = vcombine.high %v11703_v17, %v11703_v17 }
 0x44e   : > { %v4227_v25 = vmul.f32 %v11766_v63, %v4156_v28  ;;  %v4361_v24 = vmax.f32 %v4297_v15, 0.0  ;;  %v2856_v28 = vmul.f32 %v11731_v29, %v2724_v14  ;;  %v3902_v15 = vrot.slane %v3629_v50, %v10413_v62 }
 0x44f   : > { %v2531_v16 = vadd.f32 %v11689_v59, %v2461_v27  ;;  %v3598_v17 = vrot.slane %v3584_v9, %v10363_v6 }
 0x450   : > { %8353 = vmatprep.mubr.msk.f32.mxu0 %vm4400_vm0, %v4361_v24  ;;  %v4298_v49 = vadd.f32 %v11260_v12, %v4227_v25  ;;  %v641_v12 = vld [vmem:[%s10435_s23 + $0x150] sm:$0xff]  ;;  %v11795_v25 = vmax.f32 %v2023_v56, 0.0  ;;  %v2857_v24 = vmul.f32 %v11731_v29, %v2728_v60  ;;  %v2532_v56 = vadd.f32 %v11689_v59, %v2462_v19 }
 0x451   : > { %v2318_v32 = vpop.permute.xlu1 %2317  ;;  %8602 = vset.pattern.permute.xlu1 %v14091_v39  ;;  %v2920_v14 = vadd.f32 %v2856_v28, %v2531_v16  ;;  %v4093_v50 = vsub.f32 %v641_v12, %v3902_v15  ;;  %v4094_v12 = vsub.f32 %v642_v34, %v3906_v8  ;;  %v11825_v8 = vld [vmem:[%s13873_s9] ss:$0 sm:$0xff]  ;;  %v11833_v9 = vrot.slane %v3598_v17, %v10363_v6 }
 0x452   : > { %2779 = vperm.xlu1 %8602, %v11744_v48   ;;  %v4362_v18 = vmax.f32 %v4298_v49, 0.0  ;;  %v14415_v49 = vld [vmem:[#allocation32_spill] sm:$0xff]  ;;  %v2921_v28 = vadd.f32 %v2857_v24, %v2532_v56 }
 0x454   : > { %8354 = vmatmul.mubr.msk.f32.gmra.mrb[40].mxu0 %vm4400_vm0, %v4362_v18  ;;  %v1177_v18 = vmul.f32 %v11626_v41, %v14415_v49 }
 0x456   : > { %v3113_v57 = vpop.permute.xlu1 %3112  ;;  %8603 = vset.pattern.permute.xlu1 %v14174_v44  ;;  %v1247_v42 = vadd.f32 %v11640_v22, %v1177_v18  ;;  %v14419_v18 = vld [vmem:[#allocation35_spill] sm:$0xff] }
 0x457   : > { %v3245_v20 = vmul.f32 %v11698_v2, %v3113_v57  ;;  %2387 = vperm.xlu1 %8603, %v11795_v25  }
 0x459   : > { %v11806_v27 = vadd.f32 %v3245_v20, %v2920_v14  ;;  %v14418_v14 = vld [vmem:[#allocation65_spill] sm:$0xff] }
 0x45a   : > { %v3117_v60 = vpop.permute.xlu1 %3116  ;;  %v1572_v20 = vmul.f32 %v11580_v55, %v14418_v14 }
 0x45b   : > { %14416 = vst [vmem:[#allocation3_spill] sm:$0xff] %v11806_v27  ;;  %v4157_v16 = vadd.f32 %v4093_v50, %v11806_v27  ;;  %v3246_v15 = vmul.f32 %v11698_v2, %v3117_v60  ;;  %8604 = vset.pattern.permute.xlu1 %v14064_v54  ;;  %v14420_v60 = vld [vmem:[#allocation89_spill] sm:$0xff]  ;;  %v14422_v27 = vld [vmem:[#allocation47_spill] sm:$0xff] }
 0x45c   : > { %3168 = vperm.xlu1 %8604, %v11744_v48   ;;  %v1636_v48 = vadd.f32 %v1572_v20, %v1247_v42  ;;  %v2463_v42 = vmul.f32 %v11662_v36, %v2318_v32  ;;  %v2736_v20 = vpop.permute.xlu0 %2735  ;;  %v14421_v32 = vld [vmem:[#allocation43_spill] sm:$0xff] }
 0x45d   : > { %v4228_v19 = vmul.f32 %v11766_v63, %v4157_v16  ;;  %v11816_v57 = vadd.f32 %v3246_v15, %v2921_v28  ;;  %v1961_v28 = vmul.f32 %v11594_v35, %v14420_v60  ;;  %v3600_v16 = vcombine.high %v3598_v17, %v3598_v17 }
 0x45e   : > { %v2859_v60 = vmul.f32 %v11731_v29, %v2736_v20 }
 0x45f   : > { %14417 = vst [vmem:[#allocation59_spill] sm:$0xff] %v11816_v57  ;;  %v4158_v24 = vadd.f32 %v4094_v12, %v11816_v57  ;;  %v2732_v50 = vpop.permute.xlu1 %2731  ;;  %v4299_v49 = vadd.f32 %v11825_v8, %v4228_v19  ;;  %v2025_v12 = vadd.f32 %v1961_v28, %v1636_v48  ;;  %v11844_v17 = vrot.slane %v3600_v16, %v10363_v6  ;;  %v643_v48 = vld [vmem:[%s10435_s23 + $0x160] sm:$0xff] }
 0x460   : > { %3172 = vperm.xlu1 %8604, %v14419_v18   ;;  %v2464_v18 = vmul.f32 %v11662_v36, %v14421_v32  ;;  %v1179_v32 = vmul.f32 %v11626_v41, %v14422_v27 }
 0x461   : > { %v4229_v34 = vmul.f32 %v11766_v63, %v4158_v24  ;;  %v4363_v56 = vmax.f32 %v4299_v49, 0.0  ;;  %v2858_v24 = vmul.f32 %v11731_v29, %v2732_v50  ;;  %v3910_v49 = vrot.slane %v11833_v9, %v10413_v62 }
 0x463   : > { %8356 = vmatprep.mubr.msk.f32.mxu0 %vm4400_vm0, %v4363_v56  ;;  %v4300_v15 = vadd.f32 %v11825_v8, %v4229_v34  ;;  %v2533_v34 = vadd.f32 %v11689_v59, %v2463_v42  ;;  %v11851_v56 = vmax.f32 %v2025_v12, 0.0  ;;  %v4095_v16 = vsub.f32 %v643_v48, %v3910_v49  ;;  %v644_v42 = vld [vmem:[%s10435_s23 + $0x168] sm:$0xff] }
 0x464   : > { %v2328_v19 = vpop.permute.xlu1 %2327  ;;  %8605 = vset.pattern.permute.xlu1 %v14091_v39  ;;  %v2534_v12 = vadd.f32 %v11689_v59, %v2464_v18 }
 0x465   : > { %2787 = vperm.xlu1 %8605, %v11795_v25   ;;  %v4364_v14 = vmax.f32 %v4300_v15, 0.0  ;;  %v2922_v28 = vadd.f32 %v2858_v24, %v2533_v34 }
 0x466   : > { %v2923_v11 = vadd.f32 %v2859_v60, %v2534_v12 }
 0x467   : > { %8357 = vmatmul.mubr.msk.f32.gmra.mrb[42].mxu0 %vm4400_vm0, %v4364_v14  ;;  %v3914_v14 = vrot.slane %v11844_v17, %v10413_v62 }
 0x469   : > { %v3121_v50 = vpop.permute.xlu1 %3120  ;;  %8606 = vset.pattern.permute.xlu1 %v14174_v44  ;;  %v4096_v49 = vsub.f32 %v644_v42, %v3914_v14 }
 0x46a   : > { %v3247_v15 = vmul.f32 %v11698_v2, %v3121_v50  ;;  %2397 = vperm.xlu1 %8606, %v11851_v56   ;;  %v1249_v50 = vadd.f32 %v11640_v22, %v1179_v32 }
 0x46c   : > { %v11863_v57 = vadd.f32 %v3247_v15, %v2922_v28  ;;  %v14425_v28 = vld [vmem:[#allocation66_spill] sm:$0xff] }
 0x46d   : > { %v3125_v20 = vpop.permute.xlu1 %3124  ;;  %v8313_v48 = vpop.f32.mrb[12].mxu0  ;;  %v1574_v15 = vmul.f32 %v11580_v55, %v14425_v28 }
 0x46e   : > { %14423 = vst [vmem:[#allocation18_spill] sm:$0xff] %v11863_v57  ;;  %v4159_v24 = vadd.f32 %v4095_v16, %v11863_v57  ;;  %v3248_v34 = vmul.f32 %v11698_v2, %v3125_v20  ;;  %8607 = vset.pattern.permute.xlu1 %v14064_v54  ;;  %v4725_v7 = vadd.f32 %v8313_v48, %v11466_v30  ;;  %v4719_v41 = vpop.f32.mrb[13].mxu0 }
 0x46f   : > { %3176 = vperm.xlu1 %8607, %v11795_v25   ;;  %v4720_v60 = vadd.f32 %v11466_v30, %v4719_v41  ;;  %v1638_v32 = vadd.f32 %v1574_v15, %v1249_v50  ;;  %v14427_v41 = vld [vmem:[#allocation90_spill] sm:$0xff]  ;;  %v2465_v15 = vmul.f32 %v11662_v36, %v2328_v19 }
 0x470   : > { %v4230_v27 = vmul.f32 %v11766_v63, %v4159_v24  ;;  %v11872_v18 = vadd.f32 %v3248_v34, %v2923_v11  ;;  %v4991_v20 = vmax.f32 %v4725_v7, 0.0  ;;  %v14426_v24 = vld [vmem:[#allocation37_spill] sm:$0xff] }
 0x471   : > { %v4990_v14 = vmax.f32 %v4720_v60, 0.0 }
 0x472   : > { %14424 = vst [vmem:[#allocation83_spill] sm:$0xff] %v11872_v18  ;;  %v4160_v16 = vadd.f32 %v4096_v49, %v11872_v18  ;;  %v8316_v42 = vpop.f32.mrb[14].mxu0  ;;  %v2740_v12 = vpop.permute.xlu1 %2739  ;;  %v4301_v22 = vadd.f32 %v11825_v8, %v4230_v27  ;;  %v3630_v49 = vcombine.high %v11833_v9, %v11833_v9  ;;  %v1963_v27 = vmul.f32 %v11594_v35, %v14427_v41 }
 0x473   : > { %v4735_v25 = vadd.f32 %v8316_v42, %v11466_v30  ;;  %v4729_v48 = vpop.f32.mrb[15].mxu0  ;;  %3180 = vperm.xlu1 %8607, %v14426_v24   ;;  %8409 = vmatprep.mubr.msk.f32.mxu1 %vm5043_vm1, %v4990_v14  ;;  %v2860_v19 = vmul.f32 %v11731_v29, %v2740_v12  ;;  %v14428_v24 = vld [vmem:[#allocation67_spill] sm:$0xff]  ;;  %v2535_v41 = vadd.f32 %v11689_v59, %v2465_v15 }
 0x474   : > { %v4231_v11 = vmul.f32 %v11766_v63, %v4160_v16  ;;  %v4730_v34 = vadd.f32 %v11466_v30, %v4729_v48  ;;  %v4365_v55 = vmax.f32 %v4301_v22, 0.0  ;;  %8410 = vmatmul.mubr.msk.f32.gmra.mrb[12].mxu1 %vm5043_vm1, %v4991_v20  ;;  %v2027_v28 = vadd.f32 %v1963_v27, %v1638_v32  ;;  %v2744_v32 = vpop.permute.xlu0 %2743 }
 0x475   : > { %v4993_v16 = vmax.f32 %v4735_v25, 0.0  ;;  %v3918_v20 = vrot.slane %v3630_v49, %v10413_v62  ;;  %v645_v25 = vld [vmem:[%s10435_s23 + $0x170] sm:$0xff]  ;;  %v3632_v48 = vcombine.high %v11844_v17, %v11844_v17 }
 0x476   : > { %v4992_v7 = vmax.f32 %v4730_v34, 0.0  ;;  %v8319_v50 = vpop.f32.mrb[16].mxu0  ;;  %8359 = vmatprep.mubr.msk.f32.mxu0 %vm4400_vm0, %v4365_v55  ;;  %v4302_v60 = vadd.f32 %v11825_v8, %v4231_v11  ;;  %v2466_v11 = vmul.f32 %v11662_v36, %v14428_v24  ;;  %v11910_v12 = vmax.f32 %v2027_v28, 0.0 }
 0x477   : > { %v4745_v14 = vadd.f32 %v8319_v50, %v11466_v30  ;;  %v4739_v42 = vpop.f32.mrb[17].mxu0  ;;  %v11893_v9 = vpop.permute.xlu1 %2337  ;;  %8608 = vset.pattern.permute.xlu1 %v14091_v39  ;;  %v2861_v50 = vmul.f32 %v11731_v29, %v2744_v32  ;;  %v3922_v28 = vrot.slane %v3632_v48, %v10413_v62  ;;  %v646_v32 = vld [vmem:[%s10435_s23 + $0x178] sm:$0xff] }
 0x478   : > { %v4740_v35 = vadd.f32 %v11466_v30, %v4739_v42  ;;  %8412 = vmatprep.mubr.msk.f32.mxu1 %vm5043_vm1, %v4992_v7  ;;  %2795 = vperm.xlu1 %8608, %v11851_v56   ;;  %v4366_v22 = vmax.f32 %v4302_v60, 0.0  ;;  %v2924_v42 = vadd.f32 %v2860_v19, %v2535_v41  ;;  %v11926_v19 = vld [vmem:[%s10332_s28 + $0x30] sm:$0xff] }
 0x479   : > { %8413 = vmatmul.mubr.msk.f32.gmra.mrb[14].mxu1 %vm5043_vm1, %v4993_v16  ;;  %v4995_v27 = vmax.f32 %v4745_v14, 0.0  ;;  %v4097_v16 = vsub.f32 %v645_v25, %v3918_v20  ;;  %v2536_v14 = vadd.f32 %v11689_v59, %v2466_v11 }
 0x47a   : > { %v4994_v34 = vmax.f32 %v4740_v35, 0.0  ;;  %v8322_v55 = vpop.f32.mrb[18].mxu0  ;;  %8360 = vmatmul.mubr.msk.f32.gmra.mrb[44].mxu0 %vm4400_vm0, %v4366_v22 }
 0x47b   : > { %v4755_v49 = vadd.f32 %v8322_v55, %v11466_v30  ;;  %v4749_v7 = vpop.f32.mrb[19].mxu0  ;;  %v2925_v25 = vadd.f32 %v2861_v50, %v2536_v14  ;;  %v3640_v50 = vrot.slane %v11926_v19, %v10363_v6 }
 0x47c   : > { %v4750_v17 = vadd.f32 %v11466_v30, %v4749_v7  ;;  %8415 = vmatprep.mubr.msk.f32.mxu1 %vm5043_vm1, %v4994_v34  ;;  %v3129_v60 = vpop.permute.xlu1 %3128  ;;  %8609 = vset.pattern.permute.xlu1 %v14174_v44 }
 0x47d   : > { %v3249_v15 = vmul.f32 %v11698_v2, %v3129_v60  ;;  %8416 = vmatmul.mubr.msk.f32.gmra.mrb[16].mxu1 %vm5043_vm1, %v4995_v27  ;;  %2407 = vperm.xlu1 %8609, %v11910_v12   ;;  %v4997_v24 = vmax.f32 %v4755_v49, 0.0  ;;  %v4098_v27 = vsub.f32 %v646_v32, %v3922_v28  ;;  %v14431_v32 = vld [vmem:[#allocation39_spill] sm:$0xff] }
 0x47e   : > { %v4996_v35 = vmax.f32 %v4750_v17, 0.0  ;;  %v8325_v22 = vpop.f32.mrb[20].mxu0 }
 0x47f   : > { %v11922_v34 = vadd.f32 %v3249_v15, %v2924_v42  ;;  %v4765_v20 = vadd.f32 %v8325_v22, %v11466_v30  ;;  %v4759_v44 = vpop.f32.mrb[21].mxu0 }
 0x480   : > { %v4760_v55 = vadd.f32 %v11466_v30, %v4759_v44  ;;  %8418 = vmatprep.mubr.msk.f32.mxu1 %vm5043_vm1, %v4996_v35  ;;  %v3133_v41 = vpop.permute.xlu1 %3132 }
 0x481   : > { %14429 = vst [vmem:[#allocation11_spill] sm:$0xff] %v11922_v34  ;;  %v4161_v48 = vadd.f32 %v4097_v16, %v11922_v34  ;;  %v3250_v11 = vmul.f32 %v11698_v2, %v3133_v41  ;;  %8419 = vmatmul.mubr.msk.f32.gmra.mrb[18].mxu1 %vm5043_vm1, %v4997_v24  ;;  %8610 = vset.pattern.permute.xlu1 %v14064_v54  ;;  %v4999_v60 = vmax.f32 %v4765_v20, 0.0 }
 0x482   : > { %v4998_v49 = vmax.f32 %v4760_v55, 0.0  ;;  %v8328_v7 = vpop.f32.mrb[22].mxu0  ;;  %3184 = vperm.xlu1 %8610, %v11851_v56   ;;  %v2467_v41 = vmul.f32 %v11662_v36, %v11893_v9 }
 0x483   : > { %v4232_v17 = vmul.f32 %v11766_v63, %v4161_v48  ;;  %v11938_v42 = vadd.f32 %v3250_v11, %v2925_v25  ;;  %v4775_v16 = vadd.f32 %v8328_v7, %v11466_v30  ;;  %v4769_v15 = vpop.f32.mrb[23].mxu0  ;;  %v3656_v25 = vrot.slane %v3640_v50, %v10363_v6 }
 0x484   : > { %v4770_v28 = vadd.f32 %v11466_v30, %v4769_v15  ;;  %8421 = vmatprep.mubr.msk.f32.mxu1 %vm5043_vm1, %v4998_v49  ;;  %v3648_v30 = vcombine.high %v3640_v50, %v3640_v50  ;;  %v2752_v49 = vpop.permute.xlu0 %2751  ;;  %v647_v50 = vld [vmem:[%s10435_s23 + $0x180] sm:$0xff]  ;;  %v2537_v9 = vadd.f32 %v11689_v59, %v2467_v41 }
 0x485   : > { %14430 = vst [vmem:[#allocation40_spill] sm:$0xff] %v11938_v42  ;;  %v4162_v14 = vadd.f32 %v4098_v27, %v11938_v42  ;;  %8422 = vmatmul.mubr.msk.f32.gmra.mrb[20].mxu1 %vm5043_vm1, %v4999_v60  ;;  %v2748_v56 = vpop.permute.xlu1 %2747  ;;  %v4303_v35 = vadd.f32 %v11825_v8, %v4232_v17  ;;  %v5001_v20 = vmax.f32 %v4775_v16, 0.0  ;;  %v3926_v27 = vrot.slane %v3656_v25, %v10413_v62  ;;  %v14432_v60 = vld [vmem:[#allocation15_spill] sm:$0xff] }
 0x486   : > { %v5000_v22 = vmax.f32 %v4770_v28, 0.0  ;;  %3188 = vperm.xlu1 %8610, %v14431_v32   ;;  %v2862_v7 = vmul.f32 %v11731_v29, %v2748_v56  ;;  %v3670_v17 = vrot.slane %v3648_v30, %v10363_v6  ;;  %v2468_v16 = vmul.f32 %v11662_v36, %v14432_v60  ;;  %v648_v30 = vld [vmem:[%s10435_s23 + $0x188] sm:$0xff] }
 0x487   : > { %v4233_v24 = vmul.f32 %v11766_v63, %v4162_v14  ;;  %v4367_v44 = vmax.f32 %v4303_v35, 0.0  ;;  %v4099_v28 = vsub.f32 %v647_v50, %v3926_v27 }
 0x488   : > { %8424 = vmatprep.mubr.msk.f32.mxu1 %vm5043_vm1, %v5000_v22  ;;  %v2926_v35 = vadd.f32 %v2862_v7, %v2537_v9  ;;  %v11971_v22 = vld [vmem:[%s13875_s11] ss:$0 sm:$0xff] }
 0x489   : > { %8425 = vmatmul.mubr.msk.f32.gmra.mrb[22].mxu1 %vm5043_vm1, %v5001_v20  ;;  %8362 = vmatprep.mubr.msk.f32.mxu0 %vm4400_vm0, %v4367_v44  ;;  %v4304_v55 = vadd.f32 %v11825_v8, %v4233_v24  ;;  %v3930_v20 = vrot.slane %v3670_v17, %v10413_v62  ;;  %v2538_v44 = vadd.f32 %v11689_v59, %v2468_v16 }
 0x48a   : > { %v2348_v48 = vpop.permute.xlu1 %2347  ;;  %8612 = vset.pattern.permute.xlu1 %v14091_v39  ;;  %v2863_v39 = vmul.f32 %v11731_v29, %v2752_v49 }
 0x48b   : > { %2803 = vperm.xlu1 %8612, %v11910_v12   ;;  %v4368_v11 = vmax.f32 %v4304_v55, 0.0  ;;  %v4100_v60 = vsub.f32 %v648_v30, %v3930_v20  ;;  %v2760_v30 = vpop.permute.xlu0 %2759 }
 0x48c   : > { %v2927_v41 = vadd.f32 %v2863_v39, %v2538_v44 }
 0x48d   : > { %8363 = vmatmul.mubr.msk.f32.gmra.mrb[46].mxu0 %vm4400_vm0, %v4368_v11 }
 0x48f   : > { %v3137_v15 = vpop.permute.xlu1 %3136  ;;  %8613 = vset.pattern.permute.xlu1 %v14064_v54  ;;  %v8331_v14 = vpop.f32.mrb[24].mxu0 }
 0x490   : > { %v3251_v56 = vmul.f32 %v11698_v2, %v3137_v15  ;;  %v4785_v32 = vadd.f32 %v11971_v22, %v8331_v14  ;;  %3192 = vperm.xlu1 %8613, %v11910_v12   ;;  %v4779_v24 = vpop.f32.mrb[25].mxu0  ;;  %v14434_v12 = vld [vmem:[#allocation71_spill] sm:$0xff] }
 0x491   : > { %v4780_v54 = vadd.f32 %v11971_v22, %v4779_v24  ;;  %v2469_v24 = vmul.f32 %v11662_v36, %v2348_v48 }
 0x492   : > { %v11979_v55 = vadd.f32 %v3251_v56, %v2926_v35  ;;  %v5003_v7 = vmax.f32 %v4785_v32, 0.0  ;;  %v3678_v56 = vcombine.high %v3656_v25, %v3656_v25 }
 0x493   : > { %v5002_v11 = vmax.f32 %v4780_v54, 0.0  ;;  %v3141_v27 = vpop.permute.xlu1 %3140  ;;  %v2539_v25 = vadd.f32 %v11689_v59, %v2469_v24  ;;  %v3633_v24 = vcombine.high %v11926_v19, %v11926_v19 }
 0x494   : > { %14433 = vst [vmem:[#allocation60_spill] sm:$0xff] %v11979_v55  ;;  %v4163_v49 = vadd.f32 %v4099_v28, %v11979_v55  ;;  %v3252_v50 = vmul.f32 %v11698_v2, %v3141_v27  ;;  %3196 = vperm.xlu1 %8613, %v14434_v12   ;;  %v3934_v54 = vrot.slane %v3678_v56, %v10413_v62  ;;  %v650_v56 = vld [vmem:[%s10435_s23 + $0x198] sm:$0xff] }
 0x495   : > { %8427 = vmatprep.mubr.msk.f32.mxu1 %vm5043_vm1, %v5002_v11  ;;  %v649_v11 = vld [vmem:[%s10435_s23 + $0x190] sm:$0xff]  ;;  %v3680_v27 = vcombine.high %v3670_v17, %v3670_v17  ;;  %v3647_v19 = vrot.slane %v3633_v24, %v10363_v6 }
 0x496   : > { %v4234_v16 = vmul.f32 %v11766_v63, %v4163_v49  ;;  %v11986_v9 = vadd.f32 %v3252_v50, %v2927_v41  ;;  %8428 = vmatmul.mubr.msk.f32.gmra.mrb[24].mxu1 %vm5043_vm1, %v5003_v7  ;;  %v14436_v49 = vld [vmem:[#allocation68_spill] sm:$0xff]  ;;  %v2865_v50 = vmul.f32 %v11731_v29, %v2760_v30 }
 0x497   : > { %v2470_v7 = vmul.f32 %v11662_v36, %v14436_v49  ;;  %v3938_v17 = vrot.slane %v3680_v27, %v10413_v62  ;;  %v2768_v27 = vpop.permute.xlu0 %2767 }
 0x498   : > { %14435 = vst [vmem:[#allocation84_spill] sm:$0xff] %v11986_v9  ;;  %v4164_v39 = vadd.f32 %v4100_v60, %v11986_v9  ;;  %v2756_v15 = vpop.permute.xlu1 %2755  ;;  %v4305_v28 = vadd.f32 %v11825_v8, %v4234_v16  ;;  %v4101_v60 = vsub.f32 %v649_v11, %v3934_v54  ;;  %v665_v9 = vld [vmem:[%s12056_s27 + $0x10] sm:$0xff] }
 0x499   : > { %v2864_v41 = vmul.f32 %v11731_v29, %v2756_v15 }
 0x49a   : > { %v4235_v14 = vmul.f32 %v11766_v63, %v4164_v39  ;;  %v4369_v35 = vmax.f32 %v4305_v28, 0.0 }
 0x49b   : > { %v2928_v16 = vadd.f32 %v2864_v41, %v2539_v25  ;;  %v4102_v25 = vsub.f32 %v650_v56, %v3938_v17  ;;  %v3649_v17 = vcombine.high %v3647_v19, %v3647_v19 }
 0x49c   : > { %8365 = vmatprep.mubr.msk.f32.mxu0 %vm4400_vm0, %v4369_v35  ;;  %v4306_v32 = vadd.f32 %v11825_v8, %v4235_v14  ;;  %v2540_v14 = vadd.f32 %v11689_v59, %v2470_v7 }
 0x49d   : > { %v2358_v20 = vpop.permute.xlu1 %2357 }
 0x49e   : > { %v4370_v44 = vmax.f32 %v4306_v32, 0.0 }
 0x4a0   : > { %8366 = vmatmul.mubr.msk.f32.gmra.mrb[48].mxu0 %vm4400_vm0, %v4370_v44  ;;  %v2929_v44 = vadd.f32 %v2865_v50, %v2540_v14 }
 0x4a2   : > { %v3145_v48 = vpop.permute.xlu1 %3144  ;;  %v8334_v12 = vpop.f32.mrb[26].mxu0 }
 0x4a3   : > { %v3253_v39 = vmul.f32 %v11698_v2, %v3145_v48  ;;  %v4795_v15 = vadd.f32 %v11971_v22, %v8334_v12  ;;  %v4789_v28 = vpop.f32.mrb[27].mxu0 }
 0x4a4   : > { %v4790_v35 = vadd.f32 %v11971_v22, %v4789_v28  ;;  %v12027_v28 = vpop.permute.xlu0 %2775 }
 0x4a5   : > { %v12009_v32 = vadd.f32 %v3253_v39, %v2928_v16  ;;  %v5005_v11 = vmax.f32 %v4795_v15, 0.0  ;;  %v12025_v15 = vrot.slane %v3647_v19, %v10363_v6 }
 0x4a6   : > { %v5004_v54 = vmax.f32 %v4790_v35, 0.0  ;;  %v3149_v30 = vpop.permute.xlu1 %3148  ;;  %v2471_v35 = vmul.f32 %v11662_v36, %v2358_v20 }
 0x4a7   : > { %14437 = vst [vmem:[#allocation20_spill] sm:$0xff] %v12009_v32  ;;  %v4165_v41 = vadd.f32 %v4101_v60, %v12009_v32  ;;  %v3254_v49 = vmul.f32 %v11698_v2, %v3149_v30  ;;  %v651_v30 = vld [vmem:[%s10435_s23 + $0x1a0] sm:$0xff] }
 0x4a8   : > { %8430 = vmatprep.mubr.msk.f32.mxu1 %vm5043_vm1, %v5004_v54  ;;  %v12044_v20 = vpop.permute.xlu0 %2783 }
 0x4a9   : > { %v4236_v7 = vmul.f32 %v11766_v63, %v4165_v41  ;;  %v12017_v48 = vadd.f32 %v3254_v49, %v2929_v44  ;;  %8431 = vmatmul.mubr.msk.f32.gmra.mrb[26].mxu1 %vm5043_vm1, %v5005_v11  ;;  %v3942_v44 = vrot.slane %v12025_v15, %v10413_v62  ;;  %v12039_v41 = vrot.slane %v3649_v17, %v10363_v6  ;;  %v14439_v11 = vld [vmem:[#allocation50_spill] sm:$0xff] }
 0x4aa   : > { %v2472_v49 = vmul.f32 %v11662_v36, %v14439_v11 }
 0x4ab   : > { %14438 = vst [vmem:[#allocation49_spill] sm:$0xff] %v12017_v48  ;;  %v4166_v50 = vadd.f32 %v4102_v25, %v12017_v48  ;;  %v2764_v12 = vpop.permute.xlu1 %2763  ;;  %v4307_v60 = vadd.f32 %v11825_v8, %v4236_v7  ;;  %v2541_v25 = vadd.f32 %v11689_v59, %v2471_v35  ;;  %v2867_v7 = vmul.f32 %v11731_v29, %v2768_v27 }
 0x4ac   : > { %v2866_v54 = vmul.f32 %v11731_v29, %v2764_v12  ;;  %v2542_v27 = vadd.f32 %v11689_v59, %v2472_v49  ;;  %v664_v49 = vld [vmem:[%s12056_s27 + $0x8] sm:$0xff]  ;;  %v2792_v34 = vpop.permute.xlu0 %2791 }
 0x4ad   : > { %v4237_v16 = vmul.f32 %v11766_v63, %v4166_v50  ;;  %v4371_v39 = vmax.f32 %v4307_v60, 0.0  ;;  %v4103_v50 = vsub.f32 %v651_v30, %v3942_v44 }
 0x4ae   : > { %v2930_v60 = vadd.f32 %v2866_v54, %v2541_v25  ;;  %v2931_v54 = vadd.f32 %v2867_v7, %v2542_v27  ;;  %v667_v25 = vld [vmem:[%s12056_s27 + $0x20] sm:$0xff]  ;;  %v666_v7 = vld [vmem:[%s12056_s27 + $0x18] sm:$0xff] }
 0x4af   : > { %8368 = vmatprep.mubr.msk.f32.mxu0 %vm4400_vm0, %v4371_v39  ;;  %v4308_v14 = vadd.f32 %v11825_v8, %v4237_v16 }
 0x4b0   : > { %v12032_v56 = vpop.permute.xlu1 %2367 }
 0x4b1   : > { %v4372_v24 = vmax.f32 %v4308_v14, 0.0  ;;  %v3946_v14 = vrot.slane %v12039_v41, %v10413_v62 }
 0x4b3   : > { %8369 = vmatmul.mubr.msk.f32.gmra.mrb[50].mxu0 %vm4400_vm0, %v4372_v24  ;;  %v652_v24 = vld [vmem:[%s10435_s23 + $0x1a8] sm:$0xff] }
 0x4b4   : > { %v4104_v55 = vsub.f32 %v652_v24, %v3946_v14  ;;  %v14443_v14 = vld [vmem:[#allocation34_spill] sm:$0xff] }
 0x4b5   : > { %v3153_v19 = vpop.permute.xlu1 %3152  ;;  %v8337_v12 = vpop.f32.mrb[28].mxu0 }
 0x4b6   : > { %v3255_v16 = vmul.f32 %v11698_v2, %v3153_v19  ;;  %v4805_v39 = vadd.f32 %v11971_v22, %v8337_v12  ;;  %v4799_v17 = vpop.f32.mrb[29].mxu0  ;;  %v671_v19 = vld [vmem:[%s12056_s27 + $0x40] sm:$0xff] }
 0x4b7   : > { %v4800_v35 = vadd.f32 %v11971_v22, %v4799_v17  ;;  %v669_v17 = vld [vmem:[%s12056_s27 + $0x30] sm:$0xff]  ;;  %v12082_v24 = vadd.f32 %v14443_v14, %v671_v19  ;;  %v14449_v19 = vld [vmem:[#allocation5_spill] sm:$0xff] }
 0x4b8   : > { %v12061_v44 = vadd.f32 %v3255_v16, %v2930_v60  ;;  %v5007_v32 = vmax.f32 %v4805_v39, 0.0  ;;  %v663_v60 = vld [vmem:[%s12056_s27] sm:$0xff]  ;;  %v668_v16 = vld [vmem:[%s12056_s27 + $0x28] sm:$0xff]  ;;  %v12100_v14 = vadd.f32 %v14449_v19, %v666_v7 }
 0x4b9   : > { %v5006_v30 = vmax.f32 %v4800_v35, 0.0  ;;  %v3157_v11 = vpop.permute.xlu1 %3156  ;;  %14444 = vst [vmem:[#allocation22_spill] sm:$0xff] %v12082_v24  ;;  %v14454_v19 = vld [vmem:[#allocation75_spill] sm:$0xff] }
 0x4ba   : > { %14440 = vst [vmem:[#allocation33_spill] sm:$0xff] %v12061_v44  ;;  %v4167_v12 = vadd.f32 %v4103_v50, %v12061_v44  ;;  %v3256_v48 = vmul.f32 %v11698_v2, %v3157_v11  ;;  %v14442_v50 = vld [vmem:[#allocation41_spill] sm:$0xff]  ;;  %v14445_v11 = vld [vmem:[#allocation36_spill] sm:$0xff] }
 0x4bb   : > { %8433 = vmatprep.mubr.msk.f32.mxu1 %vm5043_vm1, %v5006_v30  ;;  %v12079_v39 = vadd.f32 %v14442_v50, %v667_v25  ;;  %v12085_v44 = vadd.f32 %v14445_v11, %v664_v49  ;;  %v14446_v30 = vld [vmem:[#allocation48_spill] sm:$0xff]  ;;  %v14448_v25 = vld [vmem:[#allocation38_spill] sm:$0xff]  ;;  %v14450_v49 = vld [vmem:[#allocation91_spill] sm:$0xff] }
 0x4bc   : > { %v4238_v27 = vmul.f32 %v11766_v63, %v4167_v12  ;;  %v12075_v35 = vadd.f32 %v3256_v48, %v2931_v54  ;;  %8434 = vmatmul.mubr.msk.f32.gmra.mrb[28].mxu1 %vm5043_vm1, %v5007_v32  ;;  %v12088_v42 = vadd.f32 %v14446_v30, %v665_v9  ;;  %v598_v54 = vld [vmem:[%s10332_s28 + $0x38] sm:$0xff]  ;;  %v14447_v32 = vld [vmem:[#allocation72_spill] sm:$0xff]  ;;  %v12097_v50 = vadd.f32 %v14448_v25, %v663_v60  ;;  %v14451_v30 = vld [vmem:[#allocation74_spill] sm:$0xff] }
 0x4bd   : > { %v12094_v18 = vadd.f32 %v14447_v32, %v669_v17  ;;  %v12103_v11 = vadd.f32 %v14450_v49, %v668_v16  ;;  %v670_v9 = vld [vmem:[%s12056_s27 + $0x38] sm:$0xff]  ;;  %v3679_v17 = vcombine.high %v12025_v15, %v12025_v15  ;;  %v672_v32 = vld [vmem:[%s12056_s27 + $0x48] sm:$0xff]  ;;  %v2476_v60 = vmul.f32 %v11662_v36, %v14452_v33  ;;  %v2800_v49 = vpop.permute.xlu0 %2799 }
 0x4be   : > { %14441 = vst [vmem:[#allocation61_spill] sm:$0xff] %v12075_v35  ;;  %v4168_v57 = vadd.f32 %v4104_v55, %v12075_v35  ;;  %v2772_v12 = vpop.permute.xlu1 %2771  ;;  %v4309_v48 = vadd.f32 %v11825_v8, %v4238_v27  ;;  %v2474_v55 = vmul.f32 %v11662_v36, %v14451_v30  ;;  %v14453_v25 = vld [vmem:[#allocation51_spill] sm:$0xff]  ;;  %v2480_v16 = vmul.f32 %v11662_v36, %v14454_v19  ;;  %v14455_v30 = vld [vmem:[#allocation52_spill] sm:$0xff] }
 0x4bf   : > { %v2478_v7 = vmul.f32 %v11662_v36, %v14453_v25  ;;  %v3689_v10 = vrot.slane %v598_v54, %v10363_v6  ;;  %v3682_v15 = vcombine.high %v598_v54, %v598_v54  ;;  %v12126_v25 = vadd.f32 %v14456_v23, %v670_v9  ;;  %v653_v9 = vld [vmem:[%s10435_s23 + $0x1b0] sm:$0xff] }
 0x4c0   : > { %v4239_v35 = vmul.f32 %v11766_v63, %v4168_v57  ;;  %v4373_v27 = vmax.f32 %v4309_v48, 0.0  ;;  %v2482_v57 = vmul.f32 %v11662_v36, %v14455_v30  ;;  %v2869_v48 = vmul.f32 %v11731_v29, %v12027_v28 }
 0x4c1   : > { %v2473_v19 = vmul.f32 %v11662_v36, %v12032_v56  ;;  %v3681_v30 = vcombine.high %v12039_v41, %v12039_v41  ;;  %v3697_v53 = vcombine.high %v3689_v10, %v3689_v10  ;;  %v12135_v28 = vadd.f32 %v14457_v5, %v672_v32  ;;  %v2808_v32 = vpop.permute.xlu0 %2807 }
 0x4c2   : > { %8371 = vmatprep.mubr.msk.f32.mxu0 %vm4400_vm0, %v4373_v27  ;;  %v4310_v33 = vadd.f32 %v11825_v8, %v4239_v35  ;;  %v2544_v27 = vadd.f32 %v11689_v59, %v2474_v55  ;;  %v3950_v35 = vrot.slane %v3679_v17, %v10413_v62  ;;  %v2546_v23 = vadd.f32 %v11689_v59, %v2476_v60 }
 0x4c3   : > { %v12130_v21 = vpop.permute.xlu1 %2377  ;;  %14458 = vst [vmem:[#allocation85_spill] sm:$0xff] %v12135_v28  ;;  %v2548_v54 = vadd.f32 %v11689_v59, %v2478_v7  ;;  %v2550_v36 = vadd.f32 %v11689_v59, %v2480_v16  ;;  %v2868_v56 = vmul.f32 %v11731_v29, %v2772_v12  ;;  %v2552_v41 = vadd.f32 %v11689_v59, %v2482_v57 }
 0x4c4   : > { %v4374_v58 = vmax.f32 %v4310_v33, 0.0  ;;  %v2933_v47 = vadd.f32 %v2869_v48, %v2544_v27  ;;  %v3705_v5 = vrot.slane %v3689_v10, %v10363_v6  ;;  %v3696_v55 = vrot.slane %v3682_v15, %v10363_v6 }
 0x4c5   : > { %v2871_v17 = vmul.f32 %v11731_v29, %v12044_v20  ;;  %v2543_v60 = vadd.f32 %v11689_v59, %v2473_v19  ;;  %v3954_v7 = vrot.slane %v3681_v30, %v10413_v62  ;;  %v3719_v12 = vrot.slane %v3697_v53, %v10363_v6 }
 0x4c6   : > { %8372 = vmatmul.mubr.msk.f32.gmra.mrb[52].mxu0 %vm4400_vm0, %v4374_v58  ;;  %v2873_v16 = vmul.f32 %v11731_v29, %v2792_v34  ;;  %v4105_v48 = vsub.f32 %v653_v9, %v3950_v35  ;;  %v654_v58 = vld [vmem:[%s10435_s23 + $0x1b8] sm:$0xff]  ;;  %v3727_v10 = vcombine.high %v3705_v5, %v3705_v5  ;;  %v3698_v27 = vcombine.high %v3696_v55, %v3696_v55 }
 0x4c7   : > { %v2932_v15 = vadd.f32 %v2868_v56, %v2543_v60  ;;  %v3729_v19 = vcombine.high %v3719_v12, %v3719_v12  ;;  %v2875_v30 = vmul.f32 %v11731_v29, %v2800_v49  ;;  %v2877_v53 = vmul.f32 %v11731_v29, %v2808_v32  ;;  %v655_v60 = vld [vmem:[%s10435_s23 + $0x1c0] sm:$0xff]  ;;  %v656_v32 = vld [vmem:[%s10435_s23 + $0x1c8] sm:$0xff] }
 0x4c8   : > { %v3161_v57 = vpop.permute.xlu1 %3160  ;;  %v8340_v33 = vpop.f32.mrb[30].mxu0  ;;  %v3958_v35 = vrot.slane %v3705_v5, %v10413_v62  ;;  %v12161_v9 = vadd.f32 %v2871_v17, %v2546_v23  ;;  %v4106_v56 = vsub.f32 %v654_v58, %v3954_v7  ;;  %v12170_v49 = vld [vmem:[%s13877_s13] ss:$0 sm:$0xff]  ;;  %v12174_v5 = vrot.slane %v3727_v10, %v10413_v62  ;;  %v12183_v58 = vld [vmem:[%s10435_s23 + $0x1d0] sm:$0xff] }
 0x4c9   : > { %v3257_v3 = vmul.f32 %v11698_v2, %v3161_v57  ;;  %v4815_v20 = vadd.f32 %v11971_v22, %v8340_v33  ;;  %v4809_v59 = vpop.f32.mrb[31].mxu0  ;;  %v3962_v57 = vrot.slane %v3719_v12, %v10413_v62  ;;  %v3712_v23 = vrot.slane %v3696_v55, %v10363_v6 }
 0x4ca   : > { %v4810_v34 = vadd.f32 %v11971_v22, %v4809_v59  ;;  %v12188_v59 = vadd.f32 %v2873_v16, %v2548_v54  ;;  %v12192_v10 = vadd.f32 %v2877_v53, %v2552_v41 }
 0x4cb   : > { %v12163_v1 = vadd.f32 %v3257_v3, %v2932_v15  ;;  %v12178_v3 = vrot.slane %v3698_v27, %v10363_v6  ;;  %v5009_v7 = vmax.f32 %v4815_v20, 0.0  ;;  %v12186_v15 = vrot.slane %v3729_v19, %v10413_v62 }
 0x4cc   : > { %v5008_v33 = vmax.f32 %v4810_v34, 0.0  ;;  %v3165_v13 = vpop.permute.xlu1 %3164  ;;  %14461 = vst [vmem:[#allocation62_spill] sm:$0xff] %v12188_v59  ;;  %v12190_v34 = vadd.f32 %v2875_v30, %v2550_v36  ;;  %14463 = vst [vmem:[#allocation86_spill] sm:$0xff] %v12192_v10  ;;  %v12195_v6 = vsub.f32 %v655_v60, %v3958_v35  ;;  %v12207_v41 = vsub.f32 %v656_v32, %v3962_v57  ;;  %v659_v60 = vld [vmem:[%s10435_s23 + $0x1e0] sm:$0xff]  ;;  %v660_v57 = vld [vmem:[%s10435_s23 + $0x1e8] sm:$0xff] }
 0x4cd   : > { %14459 = vst [vmem:[#allocation23_spill] sm:$0xff] %v12163_v1  ;;  %v4169_v17 = vadd.f32 %v4105_v48, %v12163_v1  ;;  %v3258_v12 = vmul.f32 %v11698_v2, %v3165_v13  ;;  %14460 = vst [vmem:[#allocation4_spill] sm:$0xff] %v12186_v15  ;;  %v8393_v55 = vpop.f32.mrb[0].mxu1  ;;  %v12198_v48 = vld [vmem:[%s10435_s23 + $0x1d8] sm:$0xff]  ;;  %v3974_v20 = vrot.slane %v3712_v23, %v10413_v62 }
 0x4ce   : > { %14462 = vst [vmem:[#allocation45_spill] sm:$0xff] %v12190_v34  ;;  %8436 = vmatprep.mubr.msk.f32.mxu1 %vm5043_vm1, %v5008_v33  ;;  %14464 = vst [vmem:[#allocation13_spill] sm:$0xff] %v12198_v48  ;;  %v12204_v54 = vadd.f32 %v8393_v55, %v12170_v49  ;;  %v5302_v36 = vpop.f32.mrb[1].mxu1  ;;  %v12228_v33 = vld [vmem:[%s13870_s6] ss:$0 sm:$0xff]  ;;  %v3728_v55 = vcombine.high %v3712_v23, %v3712_v23 }
 0x4cf   : > { %v4240_v13 = vmul.f32 %v11766_v63, %v4169_v17  ;;  %v12201_v2 = vadd.f32 %v3258_v12, %v2933_v47  ;;  %8437 = vmatmul.mubr.msk.f32.gmra.mrb[30].mxu1 %vm5043_vm1, %v5009_v7  ;;  %v12210_v16 = vadd.f32 %v12170_v49, %v5302_v36  ;;  %v3978_v47 = vrot.slane %v12178_v3, %v10413_v62 }
 0x4d0   : > { %v5699_v30 = vsel %vm4400_vm0, %v12204_v54, -inf  ;;  %v2475_v32 = vmul.f32 %v12228_v33, %v12130_v21  ;;  %v12241_v21 = vsub.f32 %v659_v60, %v3974_v20 }
 0x4d1   : > { %14465 = vst [vmem:[#allocation28_spill] sm:$0xff] %v12201_v2  ;;  %v4170_v19 = vadd.f32 %v4106_v56, %v12201_v2  ;;  %v4311_v53 = vadd.f32 %v11825_v8, %v4240_v13  ;;  %v5700_v17 = vrot.slane %v5699_v30, 4  ;;  %v5692_v56 = vsel %vm4400_vm0, %v12210_v16, -inf  ;;  %v2780_v7 = vpop.permute.xlu1 %2779  ;;  %v8396_v12 = vpop.f32.mrb[2].mxu1 }
 0x4d2   : > { %v5693_v36 = vrot.slane %v5692_v56, 4  ;;  %v12236_v35 = vadd.f32 %v8396_v12, %v12170_v49  ;;  %v5312_v27 = vpop.f32.mrb[3].mxu1  ;;  %14466 = vst [vmem:[#allocation63_spill] sm:$0xff] %v12241_v21  ;;  %v12243_v45 = vsub.f32 %v660_v57, %v3978_v47  ;;  %v2870_v51 = vmul.f32 %v11731_v29, %v2780_v7 }
 0x4d3   : > { %v4241_v13 = vmul.f32 %v11766_v63, %v4170_v19  ;;  %v4375_v1 = vmax.f32 %v4311_v53, 0.0  ;;  %v5701_v2 = vmax.f32 %v5699_v30, %v5700_v17  ;;  %v12239_v46 = vadd.f32 %v12170_v49, %v5312_v27  ;;  %v12253_v19 = vld [vmem:[%s13871_s7] ss:$0 sm:$0xff] }
 0x4d4   : > { %14467 = vst [vmem:[#allocation31_spill] sm:$0xff] %v12243_v45  ;;  %v5694_v40 = vmax.f32 %v5692_v56, %v5693_v36  ;;  %v5713_v63 = vsel %vm4400_vm0, %v12236_v35, -inf  ;;  %v2545_v27 = vadd.f32 %v12253_v19, %v2475_v32 }
 0x4d5   : > { %8374 = vmatprep.mubr.msk.f32.mxu0 %vm4400_vm0, %v4375_v1  ;;  %v4312_v23 = vadd.f32 %v11825_v8, %v4241_v13  ;;  %v5702_v20 = vrot.slane %v5701_v2, 2  ;;  %v5714_v47 = vrot.slane %v5713_v63, 4  ;;  %v5706_v30 = vsel %vm4400_vm0, %v12239_v46, -inf  ;;  %v8399_v29 = vpop.f32.mrb[4].mxu1 }
 0x4d6   : > { %v5695_v53 = vrot.slane %v5694_v40, 2  ;;  %v5707_v60 = vrot.slane %v5706_v30, 4  ;;  %v12259_v57 = vadd.f32 %v8399_v29, %v12170_v49  ;;  %v5322_v1 = vpop.f32.mrb[5].mxu1  ;;  %v12262_v8 = vrot.slane %v3728_v55, %v10413_v62 }
 0x4d7   : > { %v5703_v17 = vmax.f32 %v5701_v2, %v5702_v20  ;;  %v5715_v56 = vmax.f32 %v5713_v63, %v5714_v47  ;;  %v12265_v7 = vadd.f32 %v12170_v49, %v5322_v1  ;;  %v4376_v32 = vmax.f32 %v4312_v23, 0.0  ;;  %v2388_v47 = vpop.permute.xlu1 %2387 }
 0x4d8   : > { %14468 = vst [vmem:[#allocation87_spill] sm:$0xff] %v12262_v8  ;;  %v5696_v12 = vmax.f32 %v5694_v40, %v5695_v53  ;;  %v12267_v13 = vadd.f32 %v2870_v51, %v2545_v27  ;;  %v5708_v36 = vmax.f32 %v5706_v30, %v5707_v60  ;;  %v5727_v4 = vsel %vm4400_vm0, %v12259_v57, -inf }
 0x4d9   : > { %v5704_v37 = vrot.slane %v5703_v17, 1  ;;  %v5716_v29 = vrot.slane %v5715_v56, 2  ;;  %v5728_v43 = vrot.slane %v5727_v4, 4  ;;  %v5720_v55 = vsel %vm4400_vm0, %v12265_v7, -inf  ;;  %8375 = vmatmul.mubr.msk.f32.gmra.mrb[54].mxu0 %vm4400_vm0, %v4376_v32 }
 0x4da   : > { %v8402_v2 = vpop.f32.mrb[6].mxu1  ;;  %v5697_v63 = vrot.slane %v5696_v12, 1  ;;  %v5709_v20 = vrot.slane %v5708_v36, 2  ;;  %v5721_v23 = vrot.slane %v5720_v55, 4 }
 0x4db   : > { %v12275_v51 = vadd.f32 %v8402_v2, %v12170_v49  ;;  %v5332_v40 = vpop.f32.mrb[7].mxu1  ;;  %v5705_v27 = vmax.f32 %v5703_v17, %v5704_v37  ;;  %v5717_v30 = vmax.f32 %v5715_v56, %v5716_v29  ;;  %v5729_v53 = vmax.f32 %v5727_v4, %v5728_v43  ;;  %v8343_v1 = vpop.f32.mrb[32].mxu0 }
 0x4dc   : > { %v12278_v60 = vadd.f32 %v12170_v49, %v5332_v40  ;;  %v5698_v52 = vmax.f32 %v5696_v12, %v5697_v63  ;;  %v5710_v31 = vmax.f32 %v5708_v36, %v5709_v20  ;;  %v5722_v38 = vmax.f32 %v5720_v55, %v5721_v23  ;;  %v4819_v26 = vpop.f32.mrb[33].mxu0  ;;  %v3169_v40 = vpop.permute.xlu1 %3168 }
 0x4dd   : > { %v5741_v32 = vsel %vm4400_vm0, %v12275_v51, -inf  ;;  %v6141_v61 = vsub.f32 %v12204_v54, %v5705_v27  ;;  %v5718_v0 = vrot.slane %v5717_v30, 1  ;;  %v5730_v2 = vrot.slane %v5729_v53, 2 }
 0x4de   : > { %v5742_v24 = vrot.slane %v5741_v32, 4  ;;  %v8405_v10 = vpop.f32.mrb[8].mxu1  ;;  %v6140_v37 = vsub.f32 %v12210_v16, %v5698_v52  ;;  %v5711_v43 = vrot.slane %v5710_v31, 1  ;;  %v5723_v4 = vrot.slane %v5722_v38, 2 }
 0x4df   : > { %v5734_v17 = vsel %vm4400_vm0, %v12278_v60, -inf  ;;  %v5342_v56 = vpop.f32.mrb[9].mxu1  ;;  %v6206_v12 = vmul.f32 1.442695, %v6141_v61  ;;  %v5719_v36 = vmax.f32 %v5717_v30, %v5718_v0  ;;  %v5731_v29 = vmax.f32 %v5729_v53, %v5730_v2 }
 0x4e0   : > { %v5743_v55 = vmax.f32 %v5741_v32, %v5742_v24  ;;  %v6204_v63 = vmul.f32 1.442695, %v6140_v37  ;;  %v5712_v20 = vmax.f32 %v5710_v31, %v5711_v43  ;;  %v5724_v23 = vmax.f32 %v5722_v38, %v5723_v4  ;;  %v12293_v31 = vld [vmem:[%s13870_s6 + $0x2] ss:$0 sm:$0xff] }
 0x4e1   : > { %v5735_v54 = vrot.slane %v5734_v17, 4  ;;  %8623 = vpow2.f32 %v6206_v12  ;;  %v6143_v27 = vsub.f32 %v12236_v35, %v5719_v36  ;;  %v5732_v8 = vrot.slane %v5731_v29, 1 }
 0x4e2   : > { %v5744_v52 = vrot.slane %v5743_v55, 2  ;;  %v8408_v16 = vpop.f32.mrb[10].mxu1  ;;  %8625 = vpow2.f32 %v6204_v63  ;;  %v6142_v45 = vsub.f32 %v12239_v46, %v5712_v20  ;;  %v5725_v34 = vrot.slane %v5724_v23, 1 }
 0x4e3   : > { %v5736_v28 = vmax.f32 %v5734_v17, %v5735_v54  ;;  %v12288_v61 = vpop.f32.mrb[11].mxu1  ;;  %v6210_v0 = vmul.f32 1.442695, %v6143_v27  ;;  %v5733_v24 = vmax.f32 %v5731_v29, %v5732_v8  ;;  %v3259_v38 = vmul.f32 %v12293_v31, %v3169_v40 }
 0x4e4   : > { %v5745_v30 = vmax.f32 %v5743_v55, %v5744_v52  ;;  %v6208_v35 = vmul.f32 1.442695, %v6142_v45  ;;  %v5726_v53 = vmax.f32 %v5724_v23, %v5725_v34  ;;  %v4825_v2 = vadd.f32 %v11971_v22, %v8343_v1 }
 0x4e5   : > { %v5737_v32 = vrot.slane %v5736_v28, 2  ;;  %8627 = vpow2.f32 %v6210_v0  ;;  %v6145_v46 = vsub.f32 %v12259_v57, %v5733_v24  ;;  %v12299_v43 = vadd.f32 %v3259_v38, %v12267_v13  ;;  %v3173_v13 = vpop.permute.xlu1 %3172 }
 0x4e6   : > { %v5746_v37 = vrot.slane %v5745_v30, 1  ;;  %8629 = vpow2.f32 %v6208_v35  ;;  %v6144_v8 = vsub.f32 %v12265_v7, %v5726_v53  ;;  %v2477_v45 = vmul.f32 %v12228_v33, %v2388_v47 }
 0x4e7   : > { %14469 = vst [vmem:[#allocation73_spill] sm:$0xff] %v12299_v43  ;;  %v5738_v4 = vmax.f32 %v5736_v28, %v5737_v32  ;;  %v6214_v12 = vmul.f32 1.442695, %v6145_v46  ;;  %v5011_v36 = vmax.f32 %v4825_v2, 0.0  ;;  %v4820_v57 = vadd.f32 %v11971_v22, %v4819_v26 }
 0x4e8   : > { %v5747_v34 = vmax.f32 %v5745_v30, %v5746_v37  ;;  %v6212_v1 = vmul.f32 1.442695, %v6144_v8  ;;  %v12307_v55 = vadd.f32 %v8405_v10, %v12170_v49  ;;  %v4171_v28 = vadd.f32 %v12195_v6, %v12299_v43  ;;  %v12346_v8 = vld [vmem:[%s13872_s8] ss:$0 sm:$0xff] }
 0x4e9   : > { %v5739_v29 = vrot.slane %v5738_v4, 1  ;;  %8631 = vpow2.f32 %v6214_v12  ;;  %v12313_v63 = vadd.f32 %v12170_v49, %v5342_v56  ;;  %v5010_v20 = vmax.f32 %v4820_v57, 0.0 }
 0x4ea   : > { %v6147_v7 = vsub.f32 %v12275_v51, %v5747_v34  ;;  %8633 = vpow2.f32 %v6212_v1  ;;  %v5755_v23 = vsel %vm4400_vm0, %v12307_v55, -inf  ;;  %v3260_v51 = vmul.f32 %v12293_v31, %v3173_v13 }
 0x4eb   : > { %v5740_v47 = vmax.f32 %v5738_v4, %v5739_v29  ;;  %v12317_v26 = vpop.eup %8623  ;;  %v5756_v10 = vrot.slane %v5755_v23, 4  ;;  %v5748_v54 = vsel %vm4400_vm0, %v12313_v63, -inf  ;;  %v12327_v56 = vadd.f32 %v12253_v19, %v2477_v45  ;;  %8439 = vmatprep.mubr.msk.f32.mxu1 %vm5043_vm1, %v5010_v20 }
 0x4ec   : > { %v6218_v22 = vmul.f32 1.442695, %v6147_v7  ;;  %v12322_v40 = vpop.eup %8625  ;;  %v6339_v6 = vsel %vm4400_vm0, %v12317_v26, 0.0  ;;  %v5749_v52 = vrot.slane %v5748_v54, 4  ;;  %8440 = vmatmul.mubr.msk.f32.gmra.mrb[32].mxu1 %vm5043_vm1, %v5011_v36  ;;  %v12337_v2 = vadd.f32 %v8408_v16, %v12170_v49 }
 0x4ed   : > { %v6146_v27 = vsub.f32 %v12278_v60, %v5740_v47  ;;  %v6340_v0 = vrot.slane %v6339_v6, 4  ;;  %v6332_v24 = vsel %vm4400_vm0, %v12322_v40, 0.0  ;;  %v5757_v30 = vmax.f32 %v5755_v23, %v5756_v10 }
 0x4ee   : > { %8635 = vpow2.f32 %v6218_v22  ;;  %v12334_v38 = vpop.f32.mrb[34].mxu0  ;;  %v6333_v35 = vrot.slane %v6332_v24, 4  ;;  %v5750_v32 = vmax.f32 %v5748_v54, %v5749_v52  ;;  %v12349_v4 = vmul.f32 %v12346_v8, %v4171_v28 }
 0x4ef   : > { %v6216_v53 = vmul.f32 1.442695, %v6146_v27  ;;  %v12339_v60 = vpop.f32.mrb[35].mxu0  ;;  %v12341_v46 = vpop.eup %8627  ;;  %v6341_v37 = vadd.f32 %v6340_v0, %v6339_v6  ;;  %v5758_v12 = vrot.slane %v5757_v30, 2  ;;  %v12352_v45 = vadd.f32 %v3260_v51, %v12161_v9 }
 0x4f0   : > { %14470 = vst [vmem:[#allocation46_spill] sm:$0xff] %v12339_v60  ;;  %v12354_v34 = vpop.eup %8629  ;;  %v6334_v16 = vadd.f32 %v6333_v35, %v6332_v24  ;;  %v6353_v36 = vsel %vm4400_vm0, %v12341_v46, 0.0  ;;  %v5751_v1 = vrot.slane %v5750_v32, 2  ;;  %v12362_v9 = vsel %vm4400_vm0, %v12337_v2, -inf  ;;  %v12370_v6 = vpop.permute.xlu1 %2787 }
 0x4f1   : > { %8637 = vpow2.f32 %v6216_v53  ;;  %v6342_v29 = vrot.slane %v6341_v37, 2  ;;  %v6354_v57 = vrot.slane %v6353_v36, 4  ;;  %v6346_v13 = vsel %vm4400_vm0, %v12354_v34, 0.0 }
 0x4f2   : > { %v5759_v7 = vmax.f32 %v5757_v30, %v5758_v12  ;;  %v6335_v28 = vrot.slane %v6334_v16, 2  ;;  %v6347_v47 = vrot.slane %v6346_v13, 4  ;;  %v5752_v20 = vmax.f32 %v5750_v32, %v5751_v1 }
 0x4f3   : > { %v12364_v23 = vpop.eup %8631  ;;  %v6343_v22 = vadd.f32 %v6342_v29, %v6341_v37  ;;  %v6355_v10 = vadd.f32 %v6354_v57, %v6353_v36  ;;  %v12368_v51 = vadd.f32 %v12170_v49, %v12288_v61 }
 0x4f4   : > { %v5760_v54 = vrot.slane %v5759_v7, 1  ;;  %v12372_v27 = vpop.eup %8633  ;;  %v6336_v52 = vadd.f32 %v6335_v28, %v6334_v16  ;;  %v6348_v0 = vadd.f32 %v6347_v47, %v6346_v13  ;;  %v6367_v24 = vsel %vm4400_vm0, %v12364_v23, 0.0  ;;  %v12382_v59 = vpop.permute.xlu1 %2397 }
 0x4f5   : > { %v5753_v30 = vrot.slane %v5752_v20, 1  ;;  %v6344_v35 = vrot.slane %v6343_v22, 1  ;;  %v6356_v53 = vrot.slane %v6355_v10, 2  ;;  %v6368_v32 = vrot.slane %v6367_v24, 4 }
 0x4f6   : > { %v6360_v37 = vsel %vm4400_vm0, %v12372_v27, 0.0  ;;  %v6337_v12 = vrot.slane %v6336_v52, 1  ;;  %v6349_v36 = vrot.slane %v6348_v0, 2  ;;  %v5761_v61 = vmax.f32 %v5759_v7, %v5760_v54 }
 0x4f7   : > { %v6361_v49 = vrot.slane %v6360_v37, 4  ;;  %v6345_v29 = vadd.f32 %v6344_v35, %v6343_v22  ;;  %v6357_v57 = vadd.f32 %v6356_v53, %v6355_v10  ;;  %v6369_v16 = vadd.f32 %v6368_v32, %v6367_v24 }
 0x4f8   : > { %v12378_v1 = vpop.eup %8635  ;;  %v5754_v13 = vmax.f32 %v5752_v20, %v5753_v30  ;;  %v6338_v28 = vadd.f32 %v6337_v12, %v6336_v52  ;;  %v6350_v47 = vadd.f32 %v6349_v36, %v6348_v0  ;;  %v6149_v10 = vsub.f32 %v12307_v55, %v5761_v61  ;;  %v3177_v55 = vpop.permute.xlu1 %3176 }
 0x4f9   : > { %v6362_v17 = vadd.f32 %v6361_v49, %v6360_v37  ;;  %v6381_v43 = vsel %vm4400_vm0, %v12378_v1, 0.0  ;;  %8639 = vrcp.f32 %v6345_v29  ;;  %v6358_v21 = vrot.slane %v6357_v57, 1 }
 0x4fa   : > { %v6370_v15 = vrot.slane %v6369_v16, 2  ;;  %v6382_v48 = vrot.slane %v6381_v43, 4  ;;  %8641 = vrcp.f32 %v6338_v28  ;;  %v6351_v7 = vrot.slane %v6350_v47, 1 }
 0x4fb   : > { %v12384_v60 = vpop.eup %8637  ;;  %v6363_v22 = vrot.slane %v6362_v17, 2  ;;  %v6359_v20 = vadd.f32 %v6358_v21, %v6357_v57  ;;  %v6222_v53 = vmul.f32 1.442695, %v6149_v10  ;;  %v6148_v12 = vsub.f32 %v12313_v63, %v5754_v13  ;;  %v12410_v10 = vld [vmem:[%s13873_s9] ss:$0 sm:$0xff] }
 0x4fc   : > { %v6371_v54 = vadd.f32 %v6370_v15, %v6369_v16  ;;  %v6383_v52 = vadd.f32 %v6382_v48, %v6381_v43  ;;  %v6374_v0 = vsel %vm4400_vm0, %v12384_v60, 0.0  ;;  %v6352_v24 = vadd.f32 %v6351_v7, %v6350_v47 }
 0x4fd   : > { %v6364_v30 = vadd.f32 %v6363_v22, %v6362_v17  ;;  %v6375_v35 = vrot.slane %v6374_v0, 4  ;;  %8643 = vrcp.f32 %v6359_v20  ;;  %v4172_v21 = vadd.f32 %v12207_v41, %v12352_v45  ;;  %v12400_v41 = vld [vmem:[%s13870_s6 + $0x1] ss:$0 sm:$0xff] }
 0x4fe   : > { %v6372_v32 = vrot.slane %v6371_v54, 1  ;;  %v6384_v37 = vrot.slane %v6383_v52, 2  ;;  %8645 = vrcp.f32 %v6352_v24  ;;  %v6220_v43 = vmul.f32 1.442695, %v6148_v12  ;;  %v12417_v12 = vpop.permute.xlu1 %3180 }
 0x4ff   : > { %v6365_v36 = vrot.slane %v6364_v30, 1  ;;  %v6376_v49 = vadd.f32 %v6375_v35, %v6374_v0  ;;  %8647 = vpow2.f32 %v6222_v53  ;;  %v5770_v29 = vrot.slane %v12362_v9, 4 }
 0x500   : > { %v6373_v15 = vadd.f32 %v6372_v32, %v6371_v54  ;;  %v6385_v48 = vadd.f32 %v6384_v37, %v6383_v52  ;;  %v5762_v57 = vsel %vm4400_vm0, %v12368_v51, -inf  ;;  %v2872_v28 = vmul.f32 %v12400_v41, %v12370_v6 }
 0x501   : > { %v6366_v61 = vadd.f32 %v6365_v36, %v6364_v30  ;;  %v6377_v17 = vrot.slane %v6376_v49, 2  ;;  %v12395_v16 = vpop.f32.mrb[36].mxu0  ;;  %v5763_v13 = vrot.slane %v5762_v57, 4  ;;  %v5771_v22 = vmax.f32 %v12362_v9, %v5770_v29 }
 0x502   : > { %8649 = vrcp.f32 %v6373_v15  ;;  %v6386_v63 = vrot.slane %v6385_v48, 1  ;;  %v12404_v47 = vpop.f32.mrb[37].mxu0  ;;  %v4313_v20 = vadd.f32 %v12410_v10, %v12349_v4  ;;  %v4243_v0 = vmul.f32 %v12346_v8, %v4172_v21 }
 0x503   : > { %8651 = vrcp.f32 %v6366_v61  ;;  %v6378_v7 = vadd.f32 %v6377_v17, %v6376_v49  ;;  %v8640_v54 = vpop.eup %8639  ;;  %v5764_v6 = vmax.f32 %v5762_v57, %v5763_v13  ;;  %v5772_v53 = vrot.slane %v5771_v22, 2 }
 0x504   : > { %v6387_v52 = vadd.f32 %v6386_v63, %v6385_v48  ;;  %8653 = vpow2.f32 %v6220_v43  ;;  %v8642_v24 = vpop.eup %8641  ;;  %v6783_v30 = vmul.f32 %v8640_v54, %v12317_v26  ;;  %v4377_v9 = vmax.f32 %v4313_v20, 0.0 }
 0x505   : > { %v6379_v35 = vrot.slane %v6378_v7, 1  ;;  %v6781_v32 = vmul.f32 %v8642_v24, %v12322_v40  ;;  %v5765_v37 = vrot.slane %v5764_v6, 2  ;;  %v14471_v4 = vcombine.high %v12178_v3, %v12178_v3 }
 0x506   : > { %8655 = vrcp.f32 %v6387_v52  ;;  %v6973_v49 = vmul.f32 %v12085_v44, %v6783_v30  ;;  %v5773_v15 = vmax.f32 %v5771_v22, %v5772_v53  ;;  %v12427_v26 = vadd.f32 %v2872_v28, %v12327_v56  ;;  %8377 = vmatprep.mubr.msk.f32.mxu0 %vm4400_vm0, %v4377_v9 }
 0x507   : > { %v12423_v36 = vrot.slane %v14471_v4, %v10413_v62  ;;  %v6380_v21 = vadd.f32 %v6379_v35, %v6378_v7  ;;  %v8644_v40 = vpop.eup %8643  ;;  %v6972_v48 = vmul.f32 %v12097_v50, %v6781_v32  ;;  %v5766_v43 = vmax.f32 %v5764_v6, %v5765_v37  ;;  %v12451_v6 = vpop.permute.xlu1 %2795 }
 0x508   : > { %v12432_v61 = vadd.f32 %v12410_v10, %v4243_v0  ;;  %v12435_v3 = vmul.f32 %v12293_v31, %v3177_v55  ;;  %v8646_v62 = vpop.eup %8645  ;;  %v7043_v44 = vsel %vm4400_vm0, %v6973_v49, 0.0  ;;  %v6787_v17 = vmul.f32 %v8644_v40, %v12341_v46 }
 0x509   : > { %8657 = vrcp.f32 %v6380_v21  ;;  %v5774_v56 = vrot.slane %v5773_v15, 1  ;;  %v12439_v29 = vpop.eup %8647  ;;  %v7044_v57 = vrot.slane %v7043_v44, 4  ;;  %v7036_v63 = vsel %vm4400_vm0, %v6972_v48, 0.0 }
 0x50a   : > { %v6785_v50 = vmul.f32 %v8646_v62, %v12354_v34  ;;  %v5767_v13 = vrot.slane %v5766_v43, 1  ;;  %v7037_v28 = vrot.slane %v7036_v63, 4  ;;  %v6975_v7 = vmul.f32 %v12100_v14, %v6787_v17 }
 0x50b   : > { %v6395_v55 = vsel %vm4400_vm0, %v12439_v29, 0.0  ;;  %v12446_v22 = vmax.f32 %v5773_v15, %v5774_v56  ;;  %v7045_v46 = vadd.f32 %v7044_v57, %v7043_v44 }
 0x50c   : > { %v8650_v20 = vpop.eup %8649  ;;  %v6974_v54 = vmul.f32 %v12088_v42, %v6785_v50  ;;  %v6396_v52 = vrot.slane %v6395_v55, 4  ;;  %v12449_v0 = vmax.f32 %v5766_v43, %v5767_v13  ;;  %v7038_v34 = vadd.f32 %v7037_v28, %v7036_v63  ;;  %v12472_v13 = vpop.permute.xlu1 %2407 }
 0x50d   : > { %v8652_v24 = vpop.eup %8651  ;;  %v7057_v30 = vsel %vm4400_vm0, %v6975_v7, 0.0  ;;  %v6791_v14 = vmul.f32 %v8650_v20, %v12364_v23  ;;  %v6151_v35 = vsub.f32 %v12337_v2, %v12446_v22  ;;  %v7046_v9 = vrot.slane %v7045_v46, 2  ;;  %v12527_v22 = vld [vmem:[%s10435_s23 + $0x1f8] sm:$0xff] }
 0x50e   : > { %v12457_v53 = vpop.eup %8653  ;;  %v7058_v32 = vrot.slane %v7057_v30, 4  ;;  %v7050_v42 = vsel %vm4400_vm0, %v6974_v54, 0.0  ;;  %v6789_v37 = vmul.f32 %v8652_v24, %v12372_v27  ;;  %v7039_v4 = vrot.slane %v7038_v34, 2 }
 0x50f   : > { %v7051_v49 = vrot.slane %v7050_v42, 4  ;;  %v6977_v21 = vmul.f32 %v12103_v11, %v6791_v14  ;;  %v12462_v15 = vadd.f32 %v6396_v52, %v6395_v55  ;;  %v7047_v48 = vadd.f32 %v7046_v9, %v7045_v46 }
 0x510   : > { %v8656_v40 = vpop.eup %8655  ;;  %v7059_v23 = vadd.f32 %v7058_v32, %v7057_v30  ;;  %v6976_v43 = vmul.f32 %v12079_v39, %v6789_v37  ;;  %v12467_v62 = vsel %vm4400_vm0, %v12457_v53, 0.0  ;;  %v7040_v44 = vadd.f32 %v7039_v4, %v7038_v34  ;;  %v12477_v39 = vld [vmem:[%s13878_s14] ss:$0 sm:$0xff] }
 0x511   : > { %v7052_v17 = vadd.f32 %v7051_v49, %v7050_v42  ;;  %v7071_v56 = vsel %vm4400_vm0, %v6977_v21, 0.0  ;;  %v6795_v27 = vmul.f32 %v8656_v40, %v12378_v1  ;;  %v7048_v57 = vrot.slane %v7047_v48, 1  ;;  %v12486_v30 = vld [vmem:[%s13879_s15] ss:$0 sm:$0xff] }
 0x512   : > { %v7060_v63 = vrot.slane %v7059_v23, 2  ;;  %v7072_v11 = vrot.slane %v7071_v56, 4  ;;  %v7064_v50 = vsel %vm4400_vm0, %v6976_v43, 0.0  ;;  %v7041_v7 = vrot.slane %v7040_v44, 1 }
 0x513   : > { %v8658_v28 = vpop.eup %8657  ;;  %v7053_v55 = vrot.slane %v7052_v17, 2  ;;  %v7065_v20 = vrot.slane %v7064_v50, 4  ;;  %v6979_v46 = vmul.f32 %v12126_v25, %v6795_v27  ;;  %v7049_v1 = vadd.f32 %v7048_v57, %v7047_v48  ;;  %v12495_v27 = vpop.permute.xlu1 %3184 }
 0x514   : > { %v7061_v54 = vadd.f32 %v7060_v63, %v7059_v23  ;;  %v7073_v52 = vadd.f32 %v7072_v11, %v7071_v56  ;;  %v6793_v24 = vmul.f32 %v8658_v28, %v12384_v60  ;;  %v12481_v34 = vpop.f32.mrb[38].mxu0  ;;  %v7042_v14 = vadd.f32 %v7041_v7, %v7040_v44 }
 0x515   : > { %v7054_v9 = vadd.f32 %v7053_v55, %v7052_v17  ;;  %v7066_v32 = vadd.f32 %v7065_v20, %v7064_v50  ;;  %v7085_v42 = vsel %vm4400_vm0, %v6979_v46, 0.0  ;;  %v12489_v37 = vpop.f32.mrb[39].mxu0  ;;  %v7492_v25 = vmul.f32 %v12477_v39, %v7049_v1 }
 0x516   : > { %v7062_v4 = vrot.slane %v7061_v54, 1  ;;  %v7074_v49 = vrot.slane %v7073_v52, 2  ;;  %v7086_v21 = vrot.slane %v7085_v42, 4  ;;  %v7491_v60 = vmul.f32 %v12477_v39, %v7042_v14 }
 0x517   : > { %v7055_v40 = vrot.slane %v7054_v9, 1  ;;  %v7067_v48 = vrot.slane %v7066_v32, 2  ;;  %v6978_v23 = vmul.f32 %v12094_v18, %v6793_v24  ;;  %v7563_v43 = vadd.f32 %v12486_v30, %v7492_v25 }
 0x518   : > { %v7063_v44 = vadd.f32 %v7062_v4, %v7061_v54  ;;  %v7075_v17 = vadd.f32 %v7074_v49, %v7073_v52  ;;  %v7087_v56 = vadd.f32 %v7086_v21, %v7085_v42  ;;  %v7562_v57 = vadd.f32 %v12486_v30, %v7491_v60 }
 0x519   : > { %v7056_v63 = vadd.f32 %v7055_v40, %v7054_v9  ;;  %v7068_v11 = vadd.f32 %v7067_v48, %v7066_v32  ;;  %v7078_v50 = vsel %vm4400_vm0, %v6978_v23, 0.0  ;;  %v7627_v28 = vmax.f32 %v7563_v43, 0.0  ;;  %v12506_v48 = vpop.permute.xlu1 %3188 }
 0x51a   : > { %v7494_v7 = vmul.f32 %v12477_v39, %v7063_v44  ;;  %v7076_v55 = vrot.slane %v7075_v17, 1  ;;  %v7088_v18 = vrot.slane %v7087_v56, 2  ;;  %v7626_v20 = vmax.f32 %v7562_v57, 0.0 }
 0x51b   : > { %v7493_v46 = vmul.f32 %v12477_v39, %v7056_v63  ;;  %v7069_v1 = vrot.slane %v7068_v11, 1  ;;  %v7079_v54 = vrot.slane %v7078_v50, 4  ;;  %v7754_v52 = vrot.slane %v7627_v28, 7 }
 0x51c   : > { %v7565_v24 = vadd.f32 %v12486_v30, %v7494_v7  ;;  %v7077_v14 = vadd.f32 %v7076_v55, %v7075_v17  ;;  %v7089_v9 = vadd.f32 %v7088_v18, %v7087_v56  ;;  %v6398_v4 = vrot.slane %v12462_v15, 2 }
 0x51d   : > { %v7564_v32 = vadd.f32 %v12486_v30, %v7493_v46  ;;  %v7070_v42 = vadd.f32 %v7069_v1, %v7068_v11  ;;  %v7080_v25 = vadd.f32 %v7079_v54, %v7078_v50  ;;  %v7756_v49 = vsel %vm7755_vm2, %v7754_v52, %v7626_v20 }
 0x51e   : > { %v7629_v21 = vmax.f32 %v7565_v24, 0.0  ;;  %v7496_v60 = vmul.f32 %v12477_v39, %v7077_v14  ;;  %v7090_v40 = vrot.slane %v7089_v9, 1  ;;  %v6399_v17 = vadd.f32 %v6398_v4, %v12462_v15 }
 0x51f   : > { %v7628_v23 = vmax.f32 %v7564_v32, 0.0  ;;  %v7495_v43 = vmul.f32 %v12477_v39, %v7070_v42  ;;  %v7081_v44 = vrot.slane %v7080_v25, 2  ;;  %v6389_v11 = vrot.slane %v12467_v62, 4 }
 0x520   : > { %v7760_v56 = vrot.slane %v7629_v21, 5  ;;  %v7567_v57 = vadd.f32 %v12486_v30, %v7496_v60  ;;  %v7091_v63 = vadd.f32 %v7090_v40, %v7089_v9  ;;  %v6400_v55 = vrot.slane %v6399_v17, 1 }
 0x521   : > { %v7757_v50 = vrot.slane %v7628_v23, 6  ;;  %v7566_v28 = vadd.f32 %v12486_v30, %v7495_v43  ;;  %v7082_v7 = vadd.f32 %v7081_v44, %v7080_v25  ;;  %v6390_v46 = vadd.f32 %v6389_v11, %v12467_v62  ;;  %v12522_v25 = vpop.permute.xlu1 %2803 }
 0x522   : > { %v7631_v18 = vmax.f32 %v7567_v57, 0.0  ;;  %v7498_v20 = vmul.f32 %v12477_v39, %v7091_v63  ;;  %v6226_v15 = vmul.f32 1.442695, %v6151_v35  ;;  %v6401_v24 = vadd.f32 %v6400_v55, %v6399_v17  ;;  %v12554_v57 = vld [vmem:[%s13875_s11] ss:$0 sm:$0xff] }
 0x523   : > { %v7759_v1 = vsel %vm7758_vm3, %v7757_v50, %v7756_v49  ;;  %v7630_v54 = vmax.f32 %v7566_v28, 0.0  ;;  %v7083_v52 = vrot.slane %v7082_v7, 1  ;;  %v6391_v32 = vrot.slane %v6390_v46, 2  ;;  %v14473_v28 = vld [vmem:[#allocation46_spill] sm:$0xff] }
 0x524   : > { %v7766_v14 = vrot.slane %v7631_v18, 3  ;;  %v7762_v9 = vsel %vm7761_vm4, %v7760_v56, %v7759_v1  ;;  %v2479_v42 = vmul.f32 %v12228_v33, %v12382_v59  ;;  %8659 = vrcp.f32 %v6401_v24 }
 0x525   : > { %v7763_v62 = vrot.slane %v7630_v54, 4  ;;  %v7084_v4 = vadd.f32 %v7083_v52, %v7082_v7  ;;  %v6150_v2 = vsub.f32 %v12368_v51, %v12449_v0  ;;  %v7569_v35 = vadd.f32 %v12486_v30, %v7498_v20  ;;  %v3193_v18 = vpop.permute.xlu1 %3192 }
 0x526   : > { %v6392_v49 = vadd.f32 %v6391_v32, %v6390_v46  ;;  %8661 = vpow2.f32 %v6226_v15  ;;  %v4378_v21 = vmax.f32 %v12432_v61, 0.0  ;;  %v12535_v23 = vadd.f32 %v12435_v3, %v12427_v26  ;;  %v14474_v15 = vld [vmem:[#allocation62_spill] sm:$0xff] }
 0x527   : > { %v7765_v60 = vsel %vm7764_vm5, %v7763_v62, %v7762_v9  ;;  %v7497_v59 = vmul.f32 %v12477_v39, %v7084_v4  ;;  %v6224_v40 = vmul.f32 1.442695, %v6150_v2  ;;  %v12537_v43 = vpop.f32.mrb[40].mxu0  ;;  %v2549_v44 = vadd.f32 %v12253_v19, %v2479_v42 }
 0x528   : > { %v7768_v51 = vsel %vm7767_vm6, %v7766_v14, %v7765_v60  ;;  %v6393_v0 = vrot.slane %v6392_v49, 1  ;;  %8378 = vmatmul.mubr.msk.f32.gmra.mrb[56].mxu0 %vm4400_vm0, %v4378_v21  ;;  %v4114_v61 = vsub.f32 %v12527_v22, %v12423_v36  ;;  %v12544_v17 = vpop.f32.mrb[41].mxu0  ;;  %v14472_v26 = vsub.f32 %v12183_v58, %v12174_v5 }
 0x529   : > { %v7568_v56 = vadd.f32 %v12486_v30, %v7497_v59  ;;  %8663 = vpow2.f32 %v6224_v40  ;;  %v4835_v63 = vadd.f32 %v12554_v57, %v12334_v38  ;;  %v7633_v11 = vmax.f32 %v7569_v35, 0.0  ;;  %v3197_v40 = vpop.permute.xlu1 %3196 }
 0x52a   : > { %v4173_v3 = vadd.f32 %v14472_v26, %v12535_v23  ;;  %v6394_v50 = vadd.f32 %v6393_v0, %v6392_v49  ;;  %v4830_v7 = vadd.f32 %v12554_v57, %v14473_v28  ;;  %v3262_v55 = vmul.f32 %v12293_v31, %v12417_v12  ;;  %v14480_v26 = vld [vmem:[#allocation85_spill] sm:$0xff] }
 0x52b   : > { %v7632_v5 = vmax.f32 %v7568_v56, 0.0  ;;  %v2874_v20 = vmul.f32 %v12400_v41, %v12451_v6  ;;  %v2481_v46 = vmul.f32 %v12228_v33, %v12472_v13  ;;  %v3263_v54 = vmul.f32 %v12293_v31, %v12495_v27  ;;  %v14475_v6 = vld [vmem:[#allocation13_spill] sm:$0xff]  ;;  %v14476_v13 = vld [vmem:[#allocation4_spill] sm:$0xff] }
 0x52c   : > { %v4244_v58 = vmul.f32 %v12346_v8, %v4173_v3  ;;  %8665 = vrcp.f32 %v6394_v50  ;;  %v5012_v38 = vmax.f32 %v4830_v7, 0.0  ;;  %v12568_v1 = vadd.f32 %v3262_v55, %v14474_v15  ;;  %v661_v50 = vld [vmem:[%s10435_s23 + $0x1f0] sm:$0xff] }
 0x52d   : > { %v7769_v52 = vrot.slane %v7632_v5, 2  ;;  %v5013_v12 = vmax.f32 %v4835_v63, 0.0  ;;  %v2938_v24 = vadd.f32 %v2874_v20, %v2549_v44  ;;  %v7772_v33 = vrot.slane %v7633_v11, 1  ;;  %v14481_v11 = vld [vmem:[#allocation45_spill] sm:$0xff] }
 0x52e   : > { %v4315_v14 = vadd.f32 %v12410_v10, %v4244_v58  ;;  %v14477_v9 = vsub.f32 %v14475_v6, %v14476_v13  ;;  %8442 = vmatprep.mubr.msk.f32.mxu1 %vm5043_vm1, %v5012_v38  ;;  %v4845_v27 = vadd.f32 %v12554_v57, %v12395_v16  ;;  %v4840_v42 = vadd.f32 %v12554_v57, %v12404_v47  ;;  %v8660_v62 = vpop.eup %8659  ;;  %v14485_v6 = vld [vmem:[#allocation86_spill] sm:$0xff] }
 0x52f   : > { %v7771_v4 = vsel %vm7770_vm7, %v7769_v52, %v7768_v51  ;;  %8443 = vmatmul.mubr.msk.f32.gmra.mrb[34].mxu1 %vm5043_vm1, %v5013_v12  ;;  %v12591_v35 = vadd.f32 %v3263_v54, %v2938_v24  ;;  %v3264_v49 = vmul.f32 %v12293_v31, %v12506_v48  ;;  %v6799_v16 = vmul.f32 %v8660_v62, %v12439_v29  ;;  %v14479_v48 = vld [vmem:[#allocation63_spill] sm:$0xff] }
 0x530   : > { %v4174_v32 = vadd.f32 %v14477_v9, %v12568_v1  ;;  %v4379_v2 = vmax.f32 %v4315_v14, 0.0  ;;  %v12595_v21 = vpop.eup %8661  ;;  %v7774_v60 = vsel %vm7773_vm8, %v7772_v33, %v7771_v4  ;;  %v2551_v59 = vadd.f32 %v12253_v19, %v2481_v46  ;;  %v14483_v12 = vld [vmem:[#allocation31_spill] sm:$0xff] }
 0x531   : > { %14478 = vst [vmem:[#allocation64_spill] sm:$0xff] %v12591_v35  ;;  %7881 = vst.msk [vmem:[%s12578_s29] sm:$0xff] %vm4400_vm0, %v7774_v60  ;;  %v6409_v51 = vsel %vm4400_vm0, %v12595_v21, 0.0  ;;  %v4175_v0 = vadd.f32 %v14479_v48, %v12591_v35  ;;  %v5015_v44 = vmax.f32 %v4845_v27, 0.0  ;;  %v5014_v56 = vmax.f32 %v4840_v42, 0.0  ;;  %v14484_v14 = vld [vmem:[#allocation87_spill] sm:$0xff] }
 0x532   : > { %v4245_v47 = vmul.f32 %v12346_v8, %v4174_v32  ;;  %8380 = vmatprep.mubr.msk.f32.mxu0 %vm4400_vm0, %v4379_v2  ;;  %v6981_v3 = vmul.f32 %v14480_v26, %v6799_v16  ;;  %v6410_v29 = vrot.slane %v6409_v51, 4  ;;  %v12611_v19 = vadd.f32 %v3264_v49, %v14481_v11  ;;  %v14488_v16 = vld [vmem:[#allocation22_spill] sm:$0xff] }
 0x533   : > { %v12614_v28 = vpop.eup %8663  ;;  %v4246_v7 = vmul.f32 %v12346_v8, %v4175_v0  ;;  %8445 = vmatprep.mubr.msk.f32.mxu1 %vm5043_vm1, %v5014_v56  ;;  %v2876_v55 = vmul.f32 %v12400_v41, %v12522_v25  ;;  %v3265_v5 = vmul.f32 %v12293_v31, %v3193_v18  ;;  %v3266_v58 = vmul.f32 %v12293_v31, %v3197_v40 }
 0x534   : > { %v4316_v63 = vadd.f32 %v12410_v10, %v4245_v47  ;;  %14482 = vst [vmem:[#allocation24_spill] sm:$0xff] %v12611_v19  ;;  %v7099_v20 = vsel %vm4400_vm0, %v6981_v3, 0.0  ;;  %v6411_v46 = vadd.f32 %v6410_v29, %v6409_v51  ;;  %v6402_v38 = vsel %vm4400_vm0, %v12614_v28, 0.0  ;;  %8446 = vmatmul.mubr.msk.f32.gmra.mrb[36].mxu1 %vm5043_vm1, %v5015_v44 }
 0x535   : > { %v7100_v54 = vrot.slane %v7099_v20, 4  ;;  %v6403_v52 = vrot.slane %v6402_v38, 4  ;;  %v4176_v24 = vadd.f32 %v14483_v12, %v12611_v19  ;;  %v4113_v41 = vsub.f32 %v661_v50, %v14484_v14  ;;  %v673_v12 = vld [vmem:[%s12056_s27 + $0x50] sm:$0xff]  ;;  %v674_v14 = vld [vmem:[%s12056_s27 + $0x58] sm:$0xff] }
 0x536   : > { %v4380_v15 = vmax.f32 %v4316_v63, 0.0  ;;  %v8666_v25 = vpop.eup %8665  ;;  %v6412_v18 = vrot.slane %v6411_v46, 2  ;;  %v2940_v31 = vadd.f32 %v2876_v55, %v2551_v59  ;;  %v4317_v33 = vadd.f32 %v12410_v10, %v4246_v7 }
 0x537   : > { %v12632_v13 = vadd.f32 %v3266_v58, %v14485_v6  ;;  %v7101_v9 = vadd.f32 %v7100_v54, %v7099_v20  ;;  %v6797_v32 = vmul.f32 %v8666_v25, %v12457_v53  ;;  %v6404_v27 = vadd.f32 %v6403_v52, %v6402_v38  ;;  %v677_v25 = vld [vmem:[%s12056_s27 + $0x70] sm:$0xff]  ;;  %v683_v6 = vld [vmem:[%s12056_s27 + $0xa0] sm:$0xff] }
 0x538   : > { %8381 = vmatmul.mubr.msk.f32.gmra.mrb[58].mxu0 %vm4400_vm0, %v4380_v15  ;;  %v4247_v42 = vmul.f32 %v12346_v8, %v4176_v24  ;;  %v6413_v62 = vadd.f32 %v6412_v18, %v6411_v46  ;;  %v4381_v4 = vmax.f32 %v4317_v33, 0.0  ;;  %v12636_v2 = vadd.f32 %v3265_v5, %v2940_v31  ;;  %v679_v31 = vld [vmem:[%s12056_s27 + $0x80] sm:$0xff]  ;;  %v681_v33 = vld [vmem:[%s12056_s27 + $0x90] sm:$0xff] }
 0x539   : > { %14486 = vst [vmem:[#allocation88_spill] sm:$0xff] %v12632_v13  ;;  %v4178_v49 = vadd.f32 %v4114_v61, %v12632_v13  ;;  %v7102_v60 = vrot.slane %v7101_v9, 2  ;;  %v6980_v47 = vmul.f32 %v14488_v16, %v6797_v32  ;;  %v6405_v59 = vrot.slane %v6404_v27, 2  ;;  %v14490_v16 = vld [vmem:[#allocation6_spill] sm:$0xff] }
 0x53a   : > { %14487 = vst [vmem:[#allocation12_spill] sm:$0xff] %v12636_v2  ;;  %v4318_v40 = vadd.f32 %v12410_v10, %v4247_v42  ;;  %v6414_v51 = vrot.slane %v6413_v62, 1  ;;  %8383 = vmatprep.mubr.msk.f32.mxu0 %vm4400_vm0, %v4381_v4  ;;  %v4177_v53 = vadd.f32 %v4113_v41, %v12636_v2  ;;  %v8358_v0 = vpop.f32.mrb[42].mxu0  ;;  %v4855_v50 = vadd.f32 %v12554_v57, %v12481_v34  ;;  %v675_v41 = vld [vmem:[%s12056_s27 + $0x60] sm:$0xff] }
 0x53b   : > { %v4249_v48 = vmul.f32 %v12346_v8, %v4178_v49  ;;  %v7103_v44 = vadd.f32 %v7102_v60, %v7101_v9  ;;  %v7092_v56 = vsel %vm4400_vm0, %v6980_v47, 0.0  ;;  %v6406_v26 = vadd.f32 %v6405_v59, %v6404_v27  ;;  %v4869_v22 = vpop.f32.mrb[43].mxu0  ;;  %v676_v49 = vld [vmem:[%s12056_s27 + $0x68] sm:$0xff]  ;;  %v678_v60 = vld [vmem:[%s12056_s27 + $0x78] sm:$0xff]  ;;  %v14491_v59 = vld [vmem:[#allocation8_spill] sm:$0xff] }
 0x53c   : > { %v4382_v36 = vmax.f32 %v4318_v40, 0.0  ;;  %v7093_v61 = vrot.slane %v7092_v56, 4  ;;  %v6415_v3 = vadd.f32 %v6414_v51, %v6413_v62  ;;  %v4248_v29 = vmul.f32 %v12346_v8, %v4177_v53  ;;  %v14489_v62 = vld [vmem:[#allocation7_spill] sm:$0xff]  ;;  %v685_v53 = vld [vmem:[%s12056_s27 + $0xb0] sm:$0xff] }
 0x53d   : > { %v7104_v63 = vrot.slane %v7103_v44, 1  ;;  %v6407_v11 = vrot.slane %v6406_v26, 1  ;;  %v4850_v7 = vadd.f32 %v12554_v57, %v12489_v37  ;;  %v4320_v58 = vadd.f32 %v12410_v10, %v4249_v48  ;;  %v680_v51 = vld [vmem:[%s12056_s27 + $0x88] sm:$0xff] }
 0x53e   : > { %8384 = vmatmul.mubr.msk.f32.gmra.mrb[60].mxu0 %vm4400_vm0, %v4382_v36  ;;  %v7094_v55 = vadd.f32 %v7093_v61, %v7092_v56  ;;  %8667 = vrcp.f32 %v6415_v3  ;;  %v4319_v5 = vadd.f32 %v12410_v10, %v4248_v29  ;;  %v5017_v8 = vmax.f32 %v4855_v50, 0.0  ;;  %v14495_v3 = vld [vmem:[#allocation78_spill] sm:$0xff]  ;;  %v14496_v50 = vld [vmem:[#allocation77_spill] sm:$0xff] }
 0x53f   : > { %v7105_v20 = vadd.f32 %v7104_v63, %v7103_v44  ;;  %v6408_v46 = vadd.f32 %v6407_v11, %v6406_v26  ;;  %v5016_v38 = vmax.f32 %v4850_v7, 0.0  ;;  %v4384_v34 = vmax.f32 %v4320_v58, 0.0  ;;  %v14493_v26 = vld [vmem:[#allocation44_spill] sm:$0xff]  ;;  %v682_v63 = vld [vmem:[%s12056_s27 + $0x98] sm:$0xff]  ;;  %v684_v58 = vld [vmem:[%s12056_s27 + $0xa8] sm:$0xff] }
 0x540   : > { %v7095_v15 = vrot.slane %v7094_v55, 2  ;;  %v4383_v54 = vmax.f32 %v4319_v5, 0.0  ;;  %v4865_v37 = vadd.f32 %v12554_v57, %v12537_v43  ;;  %v4860_v10 = vadd.f32 %v12554_v57, %v12544_v17 }
 0x541   : > { %v7500_v52 = vmul.f32 %v12477_v39, %v7105_v20  ;;  %8669 = vrcp.f32 %v6408_v46  ;;  %8448 = vmatprep.mubr.msk.f32.mxu1 %vm5043_vm1, %v5016_v38  ;;  %v4870_v43 = vadd.f32 %v12554_v57, %v4869_v22  ;;  %v4875_v27 = vadd.f32 %v12554_v57, %v8358_v0  ;;  %v14492_v0 = vld [vmem:[#allocation76_spill] sm:$0xff]  ;;  %v14494_v22 = vld [vmem:[#allocation53_spill] sm:$0xff] }
 0x542   : > { %v7096_v24 = vadd.f32 %v7095_v15, %v7094_v55  ;;  %8449 = vmatmul.mubr.msk.f32.gmra.mrb[38].mxu1 %vm5043_vm1, %v5017_v8  ;;  %8386 = vmatprep.mubr.msk.f32.mxu0 %vm4400_vm0, %v4383_v54  ;;  %v5018_v17 = vmax.f32 %v4860_v10, 0.0  ;;  %v5019_v32 = vmax.f32 %v4865_v37, 0.0  ;;  %v6918_v4 = vadd.f32 %v14489_v62, %v673_v12  ;;  %v14497_v55 = vld [vmem:[#allocation54_spill] sm:$0xff]  ;;  %v686_v20 = vld [vmem:[%s12056_s27 + $0xb8] sm:$0xff] }
 0x543   : > { %v7571_v18 = vadd.f32 %v12486_v30, %v7500_v52  ;;  %8387 = vmatmul.mubr.msk.f32.gmra.mrb[62].mxu0 %vm4400_vm0, %v4384_v34  ;;  %v5020_v42 = vmax.f32 %v4870_v43, 0.0  ;;  %v6919_v47 = vadd.f32 %v14490_v16, %v674_v14  ;;  %v12681_v40 = vadd.f32 %v14491_v59, %v675_v41  ;;  %v14498_v15 = vld [vmem:[#allocation2_spill] sm:$0xff]  ;;  %v14499_v34 = vld [vmem:[#allocation92_spill] sm:$0xff]  ;;  %v14500_v43 = vld [vmem:[#allocation93_spill] sm:$0xff] }
 0x544   : > { %v7097_v9 = vrot.slane %v7096_v24, 1  ;;  %8451 = vmatprep.mubr.msk.f32.mxu1 %vm5043_vm1, %v5018_v17  ;;  %v12687_v56 = vadd.f32 %v14492_v0, %v677_v25  ;;  %v12690_v36 = vadd.f32 %v14493_v26, %v679_v31  ;;  %v12693_v61 = vadd.f32 %v14494_v22, %v681_v33  ;;  %v12719_v10 = vld [vmem:[%s13877_s13] ss:$0 sm:$0xff]  ;;  %v688_v41 = vld [vmem:[%s12056_s27 + $0xc8] sm:$0xff]  ;;  %v14503_v59 = vld [vmem:[#allocation25_spill] sm:$0xff] }
 0x545   : > { %v7635_v48 = vmax.f32 %v7571_v18, 0.0  ;;  %v12696_v29 = vadd.f32 %v14495_v3, %v683_v6  ;;  %v12701_v7 = vadd.f32 %v14496_v50, %v676_v49  ;;  %v12704_v5 = vadd.f32 %v14497_v55, %v678_v60  ;;  %v14501_v31 = vld [vmem:[#allocation55_spill] sm:$0xff] }
 0x546   : > { %v7098_v44 = vadd.f32 %v7097_v9, %v7096_v24  ;;  %8452 = vmatmul.mubr.msk.f32.gmra.mrb[40].mxu1 %vm5043_vm1, %v5019_v32  ;;  %v5021_v8 = vmax.f32 %v4875_v27, 0.0  ;;  %v12710_v54 = vadd.f32 %v14498_v15, %v680_v51  ;;  %v12713_v37 = vadd.f32 %v14499_v34, %v685_v53  ;;  %v14502_v6 = vld [vmem:[#allocation79_spill] sm:$0xff] }
 0x547   : > { %8454 = vmatprep.mubr.msk.f32.mxu1 %vm5043_vm1, %v5020_v42  ;;  %v8411_v38 = vpop.f32.mrb[12].mxu1  ;;  %v12725_v14 = vadd.f32 %v14500_v43, %v682_v63  ;;  %v7775_v25 = vrot.slane %v7635_v48, 7  ;;  %v12734_v33 = vadd.f32 %v14501_v31, %v684_v58  ;;  %v12737_v9 = vadd.f32 %v14502_v6, %v686_v20 }
 0x548   : > { %v8668_v11 = vpop.eup %8667  ;;  %v7499_v46 = vmul.f32 %v12477_v39, %v7098_v44  ;;  %v12722_v12 = vadd.f32 %v12719_v10, %v8411_v38  ;;  %v5362_v24 = vpop.f32.mrb[13].mxu1  ;;  %v12745_v51 = vadd.f32 %v14503_v59, %v688_v41 }
 0x549   : > { %v6803_v52 = vmul.f32 %v8668_v11, %v12595_v21  ;;  %v12731_v21 = vadd.f32 %v12719_v10, %v5362_v24 }
 0x54a   : > { %v7570_v18 = vadd.f32 %v12486_v30, %v7499_v46  ;;  %8455 = vmatmul.mubr.msk.f32.gmra.mrb[42].mxu1 %vm5043_vm1, %v5021_v8  ;;  %v5783_v27 = vsel %vm4400_vm0, %v12722_v12, -inf }
 0x54b   : > { %v8670_v17 = vpop.eup %8669  ;;  %v6983_v32 = vmul.f32 %v6919_v47, %v6803_v52  ;;  %v5784_v49 = vrot.slane %v5783_v27, 4  ;;  %v5776_v60 = vsel %vm4400_vm0, %v12731_v21, -inf }
 0x54c   : > { %v7634_v42 = vmax.f32 %v7570_v18, 0.0  ;;  %v6801_v62 = vmul.f32 %v8670_v17, %v12614_v28  ;;  %v8414_v16 = vpop.f32.mrb[14].mxu1  ;;  %v5777_v48 = vrot.slane %v5776_v60, 4 }
 0x54d   : > { %v7113_v53 = vsel %vm4400_vm0, %v6983_v32, 0.0  ;;  %v12749_v44 = vadd.f32 %v12719_v10, %v8414_v16  ;;  %v5372_v47 = vpop.f32.mrb[15].mxu1  ;;  %v8361_v0 = vpop.f32.mrb[44].mxu0  ;;  %v5785_v3 = vmax.f32 %v5783_v27, %v5784_v49 }
 0x54e   : > { %v12752_v26 = vsel %vm7755_vm2, %v7775_v25, %v7634_v42  ;;  %v7114_v28 = vrot.slane %v7113_v53, 4  ;;  %v6982_v22 = vmul.f32 %v6918_v4, %v6801_v62  ;;  %v4879_v63 = vpop.f32.mrb[45].mxu0  ;;  %v5778_v11 = vmax.f32 %v5776_v60, %v5777_v48 }
 0x54f   : > { %v5797_v50 = vsel %vm4400_vm0, %v12749_v44, -inf  ;;  %v12757_v55 = vadd.f32 %v12719_v10, %v5372_v47  ;;  %v4885_v58 = vadd.f32 %v12554_v57, %v8361_v0  ;;  %v5786_v8 = vrot.slane %v5785_v3, 2 }
 0x550   : > { %v7115_v20 = vadd.f32 %v7114_v28, %v7113_v53  ;;  %v7106_v46 = vsel %vm4400_vm0, %v6982_v22, 0.0  ;;  %v5798_v38 = vrot.slane %v5797_v50, 4  ;;  %v8417_v15 = vpop.f32.mrb[16].mxu1  ;;  %v5779_v52 = vrot.slane %v5778_v11, 2 }
 0x551   : > { %v7107_v34 = vrot.slane %v7106_v46, 4  ;;  %v5790_v4 = vsel %vm4400_vm0, %v12757_v55, -inf  ;;  %v5023_v24 = vmax.f32 %v4885_v58, 0.0  ;;  %v5382_v43 = vpop.f32.mrb[17].mxu1  ;;  %v5787_v25 = vmax.f32 %v5785_v3, %v5786_v8 }
 0x552   : > { %v7116_v41 = vrot.slane %v7115_v20, 2  ;;  %v5799_v18 = vmax.f32 %v5797_v50, %v5798_v38  ;;  %v5791_v17 = vrot.slane %v5790_v4, 4  ;;  %v5780_v6 = vmax.f32 %v5778_v11, %v5779_v52 }
 0x553   : > { %v7108_v31 = vadd.f32 %v7107_v34, %v7106_v46  ;;  %v4880_v32 = vadd.f32 %v12554_v57, %v4879_v63  ;;  %v12765_v27 = vadd.f32 %v12719_v10, %v8417_v15  ;;  %v5788_v62 = vrot.slane %v5787_v25, 1 }
 0x554   : > { %v7117_v42 = vadd.f32 %v7116_v41, %v7115_v20  ;;  %v5800_v49 = vrot.slane %v5799_v18, 2  ;;  %v5792_v60 = vmax.f32 %v5790_v4, %v5791_v17  ;;  %v8420_v16 = vpop.f32.mrb[18].mxu1  ;;  %v5781_v53 = vrot.slane %v5780_v6, 1 }
 0x555   : > { %v7109_v59 = vrot.slane %v7108_v31, 2  ;;  %v5022_v48 = vmax.f32 %v4880_v32, 0.0  ;;  %v5811_v47 = vsel %vm4400_vm0, %v12765_v27, -inf  ;;  %v5392_v0 = vpop.f32.mrb[19].mxu1  ;;  %v5789_v22 = vmax.f32 %v5787_v25, %v5788_v62 }
 0x556   : > { %v7118_v28 = vrot.slane %v7117_v42, 1  ;;  %v5801_v3 = vmax.f32 %v5799_v18, %v5800_v49  ;;  %v5793_v11 = vrot.slane %v5792_v60, 2  ;;  %v5782_v50 = vmax.f32 %v5780_v6, %v5781_v53 }
 0x557   : > { %v7110_v63 = vadd.f32 %v7109_v59, %v7108_v31  ;;  %v5812_v58 = vrot.slane %v5811_v47, 4  ;;  %v12770_v20 = vadd.f32 %v12719_v10, %v5382_v43  ;;  %8457 = vmatprep.mubr.msk.f32.mxu1 %vm5043_vm1, %v5022_v48  ;;  %v6153_v8 = vsub.f32 %v12722_v12, %v5789_v22 }
 0x558   : > { %v7119_v46 = vadd.f32 %v7118_v28, %v7117_v42  ;;  %v5802_v38 = vrot.slane %v5801_v3, 1  ;;  %v5794_v15 = vmax.f32 %v5792_v60, %v5793_v11  ;;  %8458 = vmatmul.mubr.msk.f32.gmra.mrb[44].mxu1 %vm5043_vm1, %v5023_v24  ;;  %v8423_v34 = vpop.f32.mrb[20].mxu1  ;;  %v6152_v4 = vsub.f32 %v12731_v21, %v5782_v50 }
 0x559   : > { %v7111_v52 = vrot.slane %v7110_v63, 1  ;;  %v5813_v41 = vmax.f32 %v5811_v47, %v5812_v58  ;;  %v5804_v25 = vsel %vm4400_vm0, %v12770_v20, -inf  ;;  %v5402_v18 = vpop.f32.mrb[21].mxu1  ;;  %v6230_v17 = vmul.f32 1.442695, %v6153_v8 }
 0x55a   : > { %v7502_v43 = vmul.f32 %v12477_v39, %v7119_v46  ;;  %v5803_v31 = vmax.f32 %v5801_v3, %v5802_v38  ;;  %v5795_v6 = vrot.slane %v5794_v15, 1  ;;  %v6228_v12 = vmul.f32 1.442695, %v6152_v4 }
 0x55b   : > { %v7112_v32 = vadd.f32 %v7111_v52, %v7110_v63  ;;  %v5814_v42 = vrot.slane %v5813_v41, 2  ;;  %v5805_v62 = vrot.slane %v5804_v25, 4  ;;  %8671 = vpow2.f32 %v6230_v17 }
 0x55c   : > { %v7573_v24 = vadd.f32 %v12486_v30, %v7502_v43  ;;  %v6155_v49 = vsub.f32 %v12749_v44, %v5803_v31  ;;  %v5796_v21 = vmax.f32 %v5794_v15, %v5795_v6  ;;  %v8426_v60 = vpop.f32.mrb[22].mxu1  ;;  %8673 = vpow2.f32 %v6228_v12 }
 0x55d   : > { %v7501_v59 = vmul.f32 %v12477_v39, %v7112_v32  ;;  %v5815_v53 = vmax.f32 %v5813_v41, %v5814_v42  ;;  %v5806_v48 = vmax.f32 %v5804_v25, %v5805_v62  ;;  %v12782_v47 = vpop.f32.mrb[23].mxu1  ;;  %v12786_v11 = vadd.f32 %v12719_v10, %v8420_v16 }
 0x55e   : > { %v7637_v28 = vmax.f32 %v7573_v24, 0.0  ;;  %v6234_v22 = vmul.f32 1.442695, %v6155_v49  ;;  %v6154_v3 = vsub.f32 %v12757_v55, %v5796_v21  ;;  %v12790_v58 = vadd.f32 %v12719_v10, %v5392_v0 }
 0x55f   : > { %v7572_v63 = vadd.f32 %v12486_v30, %v7501_v59  ;;  %v5816_v50 = vrot.slane %v5815_v53, 1  ;;  %v5807_v44 = vrot.slane %v5806_v48, 2  ;;  %v5825_v8 = vsel %vm4400_vm0, %v12786_v11, -inf }
 0x560   : > { %v7779_v39 = vrot.slane %v7637_v28, 5  ;;  %8675 = vpow2.f32 %v6234_v22  ;;  %v6232_v46 = vmul.f32 1.442695, %v6154_v3  ;;  %v12794_v38 = vpop.f32.mrb[46].mxu0  ;;  %v5826_v16 = vrot.slane %v5825_v8, 4 }
 0x561   : > { %v7636_v15 = vmax.f32 %v7572_v63, 0.0  ;;  %v5817_v55 = vmax.f32 %v5815_v53, %v5816_v50  ;;  %v5808_v52 = vmax.f32 %v5806_v48, %v5807_v44  ;;  %v12796_v4 = vpop.f32.mrb[47].mxu0  ;;  %v5818_v30 = vsel %vm4400_vm0, %v12790_v58, -inf }
 0x562   : > { %8677 = vpow2.f32 %v6232_v46  ;;  %v12801_v0 = vadd.f32 %v12719_v10, %v8423_v34  ;;  %v12804_v41 = vadd.f32 %v12719_v10, %v5402_v18  ;;  %v5827_v31 = vmax.f32 %v5825_v8, %v5826_v16 }
 0x563   : > { %v7777_v25 = vrot.slane %v7636_v15, 6  ;;  %v6157_v43 = vsub.f32 %v12765_v27, %v5817_v55  ;;  %v5809_v17 = vrot.slane %v5808_v52, 1  ;;  %v5819_v6 = vrot.slane %v5818_v30, 4 }
 0x564   : > { %v5839_v32 = vsel %vm4400_vm0, %v12801_v0, -inf  ;;  %v5832_v12 = vsel %vm4400_vm0, %v12804_v41, -inf  ;;  %v12812_v42 = vadd.f32 %v12719_v10, %v8426_v60  ;;  %v5828_v24 = vrot.slane %v5827_v31, 2 }
 0x565   : > { %v7778_v34 = vsel %vm7758_vm3, %v7777_v25, %v12752_v26  ;;  %v6238_v18 = vmul.f32 1.442695, %v6157_v43  ;;  %v5810_v62 = vmax.f32 %v5808_v52, %v5809_v17  ;;  %v12816_v49 = vpop.eup %8671  ;;  %v5820_v21 = vmax.f32 %v5818_v30, %v5819_v6 }
 0x566   : > { %v12819_v27 = vsel %vm7761_vm4, %v7779_v39, %v7778_v34  ;;  %v5840_v59 = vrot.slane %v5839_v32, 4  ;;  %v5833_v53 = vrot.slane %v5832_v12, 4  ;;  %v12821_v48 = vpop.eup %8673  ;;  %v6423_v60 = vsel %vm4400_vm0, %v12816_v49, 0.0 }
 0x567   : > { %8679 = vpow2.f32 %v6238_v18  ;;  %v6156_v28 = vsub.f32 %v12770_v20, %v5810_v62  ;;  %v5829_v26 = vmax.f32 %v5827_v31, %v5828_v24  ;;  %v6424_v22 = vrot.slane %v6423_v60, 4 }
 0x568   : > { %v6416_v3 = vsel %vm4400_vm0, %v12821_v48, 0.0  ;;  %v5821_v63 = vrot.slane %v5820_v21, 2  ;;  %v5841_v50 = vmax.f32 %v5839_v32, %v5840_v59  ;;  %v5834_v8 = vmax.f32 %v5832_v12, %v5833_v53 }
 0x569   : > { %v6417_v44 = vrot.slane %v6416_v3, 4  ;;  %v6236_v39 = vmul.f32 1.442695, %v6156_v28  ;;  %v5830_v46 = vrot.slane %v5829_v26, 1  ;;  %v12828_v15 = vpop.f32.mrb[24].mxu1  ;;  %v6425_v52 = vadd.f32 %v6424_v22, %v6423_v60 }
 0x56a   : > { %v12830_v55 = vpop.eup %8675  ;;  %v5822_v16 = vmax.f32 %v5820_v21, %v5821_v63  ;;  %v5842_v30 = vrot.slane %v5841_v50, 2  ;;  %v5853_v20 = vsel %vm4400_vm0, %v12812_v42, -inf  ;;  %v12834_v25 = vpop.f32.mrb[25].mxu1  ;;  %v5835_v59 = vrot.slane %v5834_v8, 2 }
 0x56b   : > { %v6418_v43 = vadd.f32 %v6417_v44, %v6416_v3  ;;  %v6437_v17 = vsel %vm4400_vm0, %v12830_v55, 0.0  ;;  %8681 = vpow2.f32 %v6236_v39  ;;  %v5831_v31 = vmax.f32 %v5829_v26, %v5830_v46 }
 0x56c   : > { %v12838_v6 = vpop.eup %8677  ;;  %v6426_v32 = vrot.slane %v6425_v52, 2  ;;  %v6438_v12 = vrot.slane %v6437_v17, 4  ;;  %v5823_v34 = vrot.slane %v5822_v16, 1  ;;  %v5843_v18 = vmax.f32 %v5841_v50, %v5842_v30 }
 0x56d   : > { %v6419_v62 = vrot.slane %v6418_v43, 2  ;;  %v6430_v24 = vsel %vm4400_vm0, %v12838_v6, 0.0  ;;  %v6159_v21 = vsub.f32 %v12786_v11, %v5831_v31  ;;  %v5836_v44 = vmax.f32 %v5834_v8, %v5835_v59 }
 0x56e   : > { %v6427_v53 = vadd.f32 %v6426_v32, %v6425_v52  ;;  %v6439_v60 = vadd.f32 %v6438_v12, %v6437_v17  ;;  %v6431_v28 = vrot.slane %v6430_v24, 4  ;;  %v5824_v22 = vmax.f32 %v5822_v16, %v5823_v34 }
 0x56f   : > { %v6420_v3 = vadd.f32 %v6419_v62, %v6418_v43  ;;  %v6242_v63 = vmul.f32 1.442695, %v6159_v21  ;;  %v5844_v26 = vrot.slane %v5843_v18, 1  ;;  %v5837_v11 = vrot.slane %v5836_v44, 1 }
 0x570   : > { %v6428_v39 = vrot.slane %v6427_v53, 1  ;;  %v6440_v46 = vrot.slane %v6439_v60, 2  ;;  %v6432_v2 = vadd.f32 %v6431_v28, %v6430_v24  ;;  %v6158_v50 = vsub.f32 %v12790_v58, %v5824_v22 }
 0x571   : > { %v12844_v30 = vpop.eup %8679  ;;  %v6421_v13 = vrot.slane %v6420_v3, 1  ;;  %8683 = vpow2.f32 %v6242_v63  ;;  %v5845_v35 = vmax.f32 %v5843_v18, %v5844_v26  ;;  %v5838_v24 = vmax.f32 %v5836_v44, %v5837_v11 }
 0x572   : > { %v6429_v31 = vadd.f32 %v6428_v39, %v6427_v53  ;;  %v6441_v52 = vadd.f32 %v6440_v46, %v6439_v60  ;;  %v6433_v17 = vrot.slane %v6432_v2, 2  ;;  %v6451_v16 = vsel %vm4400_vm0, %v12844_v30, 0.0 }
 0x573   : > { %v6422_v43 = vadd.f32 %v6421_v13, %v6420_v3  ;;  %v6452_v32 = vrot.slane %v6451_v16, 4  ;;  %v6240_v8 = vmul.f32 1.442695, %v6158_v50  ;;  %v6161_v12 = vsub.f32 %v12801_v0, %v5845_v35  ;;  %v8367_v34 = vpop.f32.mrb[48].mxu0 }
 0x574   : > { %8685 = vrcp.f32 %v6429_v31  ;;  %v6442_v58 = vrot.slane %v6441_v52, 1  ;;  %v6434_v62 = vadd.f32 %v6433_v17, %v6432_v2  ;;  %v12849_v21 = vpop.f32.mrb[49].mxu0  ;;  %v5854_v60 = vrot.slane %v5853_v20, 4 }
 0x575   : > { %v12851_v18 = vpop.eup %8681  ;;  %8687 = vrcp.f32 %v6422_v43  ;;  %v6453_v59 = vadd.f32 %v6452_v32, %v6451_v16  ;;  %v6246_v53 = vmul.f32 1.442695, %v6161_v12  ;;  %v6160_v2 = vsub.f32 %v12804_v41, %v5838_v24 }
 0x576   : > { %v6443_v28 = vadd.f32 %v6442_v58, %v6441_v52  ;;  %v6435_v22 = vrot.slane %v6434_v62, 1  ;;  %v6444_v13 = vsel %vm4400_vm0, %v12851_v18, 0.0  ;;  %8689 = vpow2.f32 %v6240_v8 }
 0x577   : > { %v6454_v35 = vrot.slane %v6453_v59, 2  ;;  %v6445_v0 = vrot.slane %v6444_v13, 4  ;;  %8691 = vpow2.f32 %v6246_v53  ;;  %v5855_v63 = vmax.f32 %v5853_v20, %v5854_v60 }
 0x578   : > { %8693 = vrcp.f32 %v6443_v28  ;;  %v6436_v3 = vadd.f32 %v6435_v22, %v6434_v62  ;;  %v12858_v26 = vadd.f32 %v12719_v10, %v12782_v47  ;;  %v6244_v46 = vmul.f32 1.442695, %v6160_v2 }
 0x579   : > { %v6455_v44 = vadd.f32 %v6454_v35, %v6453_v59  ;;  %v6446_v39 = vadd.f32 %v6445_v0, %v6444_v13  ;;  %v4895_v50 = vadd.f32 %v12554_v57, %v12794_v38  ;;  %v5856_v11 = vrot.slane %v5855_v63, 2 }
 0x57a   : > { %8695 = vrcp.f32 %v6436_v3  ;;  %v5846_v31 = vsel %vm4400_vm0, %v12858_v26, -inf  ;;  %v4890_v41 = vadd.f32 %v12554_v57, %v12796_v4  ;;  %v12879_v60 = vadd.f32 %v12719_v10, %v12828_v15 }
 0x57b   : > { %v12866_v52 = vpop.eup %8683  ;;  %v6456_v20 = vrot.slane %v6455_v44, 1  ;;  %v6447_v17 = vrot.slane %v6446_v39, 2  ;;  %8697 = vpow2.f32 %v6244_v46  ;;  %v5847_v47 = vrot.slane %v5846_v31, 4 }
 0x57c   : > { %v6465_v16 = vsel %vm4400_vm0, %v12866_v52, 0.0  ;;  %v5857_v43 = vmax.f32 %v5855_v63, %v5856_v11  ;;  %v5025_v32 = vmax.f32 %v4895_v50, 0.0  ;;  %v5024_v38 = vmax.f32 %v4890_v41, 0.0  ;;  %v12870_v8 = vpop.f32.mrb[26].mxu1 }
 0x57d   : > { %v6457_v12 = vadd.f32 %v6456_v20, %v6455_v44  ;;  %v6448_v58 = vadd.f32 %v6447_v17, %v6446_v39  ;;  %v6466_v62 = vrot.slane %v6465_v16, 4  ;;  %v12872_v24 = vmax.f32 %v5846_v31, %v5847_v47  ;;  %v12874_v4 = vpop.f32.mrb[27].mxu1 }
 0x57e   : > { %v8686_v59 = vpop.eup %8685  ;;  %v5858_v53 = vrot.slane %v5857_v43, 1  ;;  %8460 = vmatprep.mubr.msk.f32.mxu1 %vm5043_vm1, %v5024_v38  ;;  %v12883_v28 = vadd.f32 %v12719_v10, %v12834_v25  ;;  %v12886_v22 = vadd.f32 %v12554_v57, %v8367_v34  ;;  %v12898_v57 = vsel %vm4400_vm0, %v12879_v60, -inf }
 0x57f   : > { %v8688_v13 = vpop.eup %8687  ;;  %v6807_v35 = vmul.f32 %v8686_v59, %v12816_v49  ;;  %8699 = vrcp.f32 %v6457_v12  ;;  %v6449_v0 = vrot.slane %v6448_v58, 1  ;;  %v6467_v2 = vadd.f32 %v6466_v62, %v6465_v16  ;;  %8461 = vmatmul.mubr.msk.f32.gmra.mrb[46].mxu1 %vm5043_vm1, %v5025_v32 }
 0x580   : > { %v12890_v3 = vpop.eup %8689  ;;  %v6805_v15 = vmul.f32 %v8688_v13, %v12821_v48  ;;  %v12893_v63 = vmax.f32 %v5857_v43, %v5858_v53 }
 0x581   : > { %v12900_v34 = vpop.eup %8691  ;;  %v6985_v49 = vmul.f32 %v12701_v7, %v6807_v35  ;;  %v6450_v44 = vadd.f32 %v6449_v0, %v6448_v58  ;;  %v6468_v39 = vrot.slane %v6467_v2, 2  ;;  %v6458_v46 = vsel %vm4400_vm0, %v12890_v3, 0.0 }
 0x582   : > { %v8694_v50 = vpop.eup %8693  ;;  %v6984_v48 = vmul.f32 %v12681_v40, %v6805_v15  ;;  %v6459_v11 = vrot.slane %v6458_v46, 4  ;;  %v6479_v31 = vsel %vm4400_vm0, %v12900_v34, 0.0 }
 0x583   : > { %v7127_v20 = vsel %vm4400_vm0, %v6985_v49, 0.0  ;;  %v6811_v17 = vmul.f32 %v8694_v50, %v12830_v55  ;;  %8701 = vrcp.f32 %v6450_v44  ;;  %v6469_v7 = vadd.f32 %v6468_v39, %v6467_v2 }
 0x584   : > { %v8696_v47 = vpop.eup %8695  ;;  %v7128_v16 = vrot.slane %v7127_v20, 4  ;;  %v7120_v43 = vsel %vm4400_vm0, %v6984_v48, 0.0  ;;  %v6460_v32 = vadd.f32 %v6459_v11, %v6458_v46  ;;  %v6480_v38 = vrot.slane %v6479_v31, 4 }
 0x585   : > { %v12913_v40 = vpop.eup %8697  ;;  %v7121_v12 = vrot.slane %v7120_v43, 4  ;;  %v6987_v58 = vmul.f32 %v12704_v5, %v6811_v17  ;;  %v6809_v62 = vmul.f32 %v8696_v47, %v12838_v6  ;;  %v6470_v59 = vrot.slane %v6469_v7, 1 }
 0x586   : > { %v7129_v53 = vadd.f32 %v7128_v16, %v7127_v20  ;;  %v6461_v13 = vrot.slane %v6460_v32, 2  ;;  %v6481_v35 = vadd.f32 %v6480_v38, %v6479_v31  ;;  %v6472_v55 = vsel %vm4400_vm0, %v12913_v40, 0.0  ;;  %v12919_v0 = vpop.f32.mrb[50].mxu0 }
 0x587   : > { %v7122_v2 = vadd.f32 %v7121_v12, %v7120_v43  ;;  %v7141_v15 = vsel %vm4400_vm0, %v6987_v58, 0.0  ;;  %v6986_v49 = vmul.f32 %v12687_v56, %v6809_v62  ;;  %v6471_v44 = vadd.f32 %v6470_v59, %v6469_v7  ;;  %v12923_v39 = vpop.f32.mrb[51].mxu0 }
 0x588   : > { %v7130_v5 = vrot.slane %v7129_v53, 2  ;;  %v7142_v46 = vrot.slane %v7141_v15, 4  ;;  %v6462_v6 = vadd.f32 %v6461_v13, %v6460_v32  ;;  %v6482_v50 = vrot.slane %v6481_v35, 2 }
 0x589   : > { %v8700_v48 = vpop.eup %8699  ;;  %v7123_v11 = vrot.slane %v7122_v2, 2  ;;  %v7134_v31 = vsel %vm4400_vm0, %v6986_v49, 0.0  ;;  %8703 = vrcp.f32 %v6471_v44  ;;  %v6473_v20 = vrot.slane %v6472_v55, 4 }
 0x58a   : > { %v7131_v17 = vadd.f32 %v7130_v5, %v7129_v53  ;;  %v7143_v47 = vadd.f32 %v7142_v46, %v7141_v15  ;;  %v7135_v16 = vrot.slane %v7134_v31, 4  ;;  %v6815_v43 = vmul.f32 %v8700_v48, %v12844_v30 }
 0x58b   : > { %v7124_v38 = vadd.f32 %v7123_v11, %v7122_v2  ;;  %v6463_v56 = vrot.slane %v6462_v6, 1  ;;  %v6483_v7 = vadd.f32 %v6482_v50, %v6481_v35  ;;  %v6474_v12 = vadd.f32 %v6473_v20, %v6472_v55  ;;  %v12945_v20 = vld [vmem:[%s13879_s15] ss:$0 sm:$0xff] }
 0x58c   : > { %v7132_v58 = vrot.slane %v7131_v17, 1  ;;  %v7144_v62 = vrot.slane %v7143_v47, 2  ;;  %v7136_v59 = vadd.f32 %v7135_v16, %v7134_v31  ;;  %v6989_v32 = vmul.f32 %v12710_v54, %v6815_v43  ;;  %v12935_v54 = vld [vmem:[%s13878_s14] ss:$0 sm:$0xff] }
 0x58d   : > { %v8702_v13 = vpop.eup %8701  ;;  %v7125_v25 = vrot.slane %v7124_v38, 1  ;;  %v6464_v41 = vadd.f32 %v6463_v56, %v6462_v6  ;;  %v6484_v49 = vrot.slane %v6483_v7, 1  ;;  %v6475_v44 = vrot.slane %v6474_v12, 2 }
 0x58e   : > { %v7133_v19 = vadd.f32 %v7132_v58, %v7131_v17  ;;  %v7145_v53 = vadd.f32 %v7144_v62, %v7143_v47  ;;  %v7137_v15 = vrot.slane %v7136_v59, 2  ;;  %v7155_v5 = vsel %vm4400_vm0, %v6989_v32, 0.0 }
 0x58f   : > { %v7126_v30 = vadd.f32 %v7125_v25, %v7124_v38  ;;  %v7156_v2 = vrot.slane %v7155_v5, 4  ;;  %v6813_v35 = vmul.f32 %v8702_v13, %v12851_v18  ;;  %8705 = vrcp.f32 %v6464_v41  ;;  %v12930_v55 = vpop.f32.mrb[28].mxu1 }
 0x590   : > { %v7504_v46 = vmul.f32 %v12935_v54, %v7133_v19  ;;  %v7146_v6 = vrot.slane %v7145_v53, 1  ;;  %v7138_v50 = vadd.f32 %v7137_v15, %v7136_v59  ;;  %v6485_v48 = vadd.f32 %v6484_v49, %v6483_v7  ;;  %v12938_v11 = vpop.f32.mrb[29].mxu1 }
 0x591   : > { %v7503_v25 = vmul.f32 %v12935_v54, %v7126_v30  ;;  %v7157_v31 = vadd.f32 %v7156_v2, %v7155_v5  ;;  %v6988_v18 = vmul.f32 %v12690_v36, %v6813_v35  ;;  %v6476_v41 = vadd.f32 %v6475_v44, %v6474_v12 }
 0x592   : > { %v7575_v17 = vadd.f32 %v12945_v20, %v7504_v46  ;;  %v7147_v47 = vadd.f32 %v7146_v6, %v7145_v53  ;;  %v7139_v19 = vrot.slane %v7138_v50, 1  ;;  %8707 = vrcp.f32 %v6485_v48 }
 0x593   : > { %v8704_v16 = vpop.eup %8703  ;;  %v7574_v43 = vadd.f32 %v12945_v20, %v7503_v25  ;;  %v7158_v38 = vrot.slane %v7157_v31, 2  ;;  %v7148_v56 = vsel %vm4400_vm0, %v6988_v18, 0.0  ;;  %v6477_v7 = vrot.slane %v6476_v41, 1 }
 0x594   : > { %v7639_v58 = vmax.f32 %v7575_v17, 0.0  ;;  %v7506_v36 = vmul.f32 %v12935_v54, %v7147_v47  ;;  %v7140_v12 = vadd.f32 %v7139_v19, %v7138_v50  ;;  %v7149_v62 = vrot.slane %v7148_v56, 4 }
 0x595   : > { %v7638_v59 = vmax.f32 %v7574_v43, 0.0  ;;  %v7159_v32 = vadd.f32 %v7158_v38, %v7157_v31  ;;  %v6819_v13 = vmul.f32 %v8704_v16, %v12866_v52  ;;  %v6478_v49 = vadd.f32 %v6477_v7, %v6476_v41 }
 0x596   : > { %v7783_v44 = vrot.slane %v7639_v58, 3  ;;  %v7577_v53 = vadd.f32 %v12945_v20, %v7506_v36  ;;  %v7505_v15 = vmul.f32 %v12935_v54, %v7140_v12  ;;  %v7150_v5 = vadd.f32 %v7149_v62, %v7148_v56 }
 0x597   : > { %v7781_v30 = vrot.slane %v7638_v59, 4  ;;  %v7160_v2 = vrot.slane %v7159_v32, 1  ;;  %v6991_v35 = vmul.f32 %v12725_v14, %v6819_v13  ;;  %8709 = vrcp.f32 %v6478_v49 }
 0x598   : > { %v7641_v46 = vmax.f32 %v7577_v53, 0.0  ;;  %v7576_v6 = vadd.f32 %v12945_v20, %v7505_v15  ;;  %v7151_v50 = vrot.slane %v7150_v5, 2  ;;  %v14504_v48 = vsub.f32 %v12812_v42, %v12893_v63 }
 0x599   : > { %v8706_v25 = vpop.eup %8705  ;;  %v7782_v31 = vsel %vm7764_vm5, %v7781_v30, %v12819_v27  ;;  %v7161_v18 = vadd.f32 %v7160_v2, %v7159_v32  ;;  %v7169_v41 = vsel %vm4400_vm0, %v6991_v35, 0.0  ;;  %v14505_v17 = vrot.slane %v12872_v24, 2  ;;  %v12965_v47 = vpop.f32.mrb[52].mxu0 }
 0x59a   : > { %v6250_v52 = vmul.f32 1.442695, %v14504_v48  ;;  %v7787_v19 = vrot.slane %v7641_v46, 1  ;;  %v7640_v16 = vmax.f32 %v7576_v6, 0.0  ;;  %v7784_v43 = vsel %vm7767_vm6, %v7783_v44, %v7782_v31  ;;  %v12968_v42 = vpop.f32.mrb[53].mxu0 }
 0x59b   : > { %v5850_v14 = vmax.f32 %v12872_v24, %v14505_v17  ;;  %v7152_v38 = vadd.f32 %v7151_v50, %v7150_v5  ;;  %v7508_v63 = vmul.f32 %v12935_v54, %v7161_v18  ;;  %v7170_v56 = vrot.slane %v7169_v41, 4 }
 0x59c   : > { %v6817_v27 = vmul.f32 %v8706_v25, %v12890_v3  ;;  %8711 = vpow2.f32 %v6250_v52  ;;  %v8708_v7 = vpop.eup %8707  ;;  %v7785_v58 = vrot.slane %v7640_v16, 2  ;;  %v5868_v12 = vrot.slane %v12898_v57, 4 }
 0x59d   : > { %v7153_v36 = vrot.slane %v7152_v38, 1  ;;  %v5851_v24 = vrot.slane %v5850_v14, 1  ;;  %v7579_v62 = vadd.f32 %v12945_v20, %v7508_v63  ;;  %v7171_v59 = vadd.f32 %v7170_v56, %v7169_v41 }
 0x59e   : > { %v6990_v32 = vmul.f32 %v12693_v61, %v6817_v27  ;;  %v6823_v13 = vmul.f32 %v8708_v7, %v12900_v34  ;;  %v7786_v49 = vsel %vm7770_vm7, %v7785_v58, %v7784_v43  ;;  %v5869_v3 = vmax.f32 %v12898_v57, %v5868_v12 }
 0x59f   : > { %v7154_v44 = vadd.f32 %v7153_v36, %v7152_v38  ;;  %v5852_v53 = vmax.f32 %v5850_v14, %v5851_v24  ;;  %v7788_v15 = vsel %vm7773_vm8, %v7787_v19, %v7786_v49  ;;  %v7643_v5 = vmax.f32 %v7579_v62, 0.0 }
 0x5a0   : > { %v7172_v30 = vrot.slane %v7171_v59, 2  ;;  %v7162_v2 = vsel %vm4400_vm0, %v6990_v32, 0.0  ;;  %7882 = vst.msk [vmem:[%s12578_s29 + $0x8] sm:$0xff] %vm4400_vm0, %v7788_v15  ;;  %v6993_v61 = vmul.f32 %v12734_v33, %v6823_v13  ;;  %v5870_v52 = vrot.slane %v5869_v3, 2 }
 0x5a1   : > { %v7507_v35 = vmul.f32 %v12935_v54, %v7154_v44  ;;  %v7163_v46 = vrot.slane %v7162_v2, 4  ;;  %v6162_v34 = vsub.f32 %v12858_v26, %v5852_v53  ;;  %v8710_v6 = vpop.eup %8709  ;;  %v7789_v50 = vrot.slane %v7643_v5, 7 }
 0x5a2   : > { %v7173_v48 = vadd.f32 %v7172_v30, %v7171_v59  ;;  %v5860_v57 = vsel %vm4400_vm0, %v12883_v28, -inf  ;;  %v7183_v18 = vsel %vm4400_vm0, %v6993_v61, 0.0  ;;  %v6821_v41 = vmul.f32 %v8710_v6, %v12913_v40  ;;  %v12990_v17 = vpop.f32.mrb[30].mxu1 }
 0x5a3   : > { %v7578_v25 = vadd.f32 %v12945_v20, %v7507_v35  ;;  %v7164_v31 = vadd.f32 %v7163_v46, %v7162_v2  ;;  %v7184_v33 = vrot.slane %v7183_v18, 4  ;;  %v6248_v19 = vmul.f32 1.442695, %v6162_v34  ;;  %v12992_v16 = vpop.f32.mrb[31].mxu1  ;;  %v13010_v34 = vld [vmem:[%s13875_s11] ss:$0 sm:$0xff] }
 0x5a4   : > { %v7174_v14 = vrot.slane %v7173_v48, 1  ;;  %v5871_v26 = vmax.f32 %v5869_v3, %v5870_v52  ;;  %v6992_v63 = vmul.f32 %v12696_v29, %v6821_v41  ;;  %v5861_v56 = vrot.slane %v5860_v57, 4 }
 0x5a5   : > { %v7642_v43 = vmax.f32 %v7578_v25, 0.0  ;;  %v7165_v38 = vrot.slane %v7164_v31, 2  ;;  %v7185_v58 = vadd.f32 %v7184_v33, %v7183_v18  ;;  %8713 = vpow2.f32 %v6248_v19 }
 0x5a6   : > { %v12995_v27 = vpop.eup %8711  ;;  %v7175_v7 = vadd.f32 %v7174_v14, %v7173_v48  ;;  %v5872_v36 = vrot.slane %v5871_v26, 1  ;;  %v7176_v12 = vsel %vm4400_vm0, %v6992_v63, 0.0  ;;  %v5862_v53 = vmax.f32 %v5860_v57, %v5861_v56 }
 0x5a7   : > { %v12998_v40 = vsel %vm7755_vm2, %v7789_v50, %v7642_v43  ;;  %v7166_v24 = vadd.f32 %v7165_v38, %v7164_v31  ;;  %v6493_v62 = vsel %vm4400_vm0, %v12995_v27, 0.0  ;;  %v7186_v32 = vrot.slane %v7185_v58, 2 }
 0x5a8   : > { %v7510_v59 = vmul.f32 %v12935_v54, %v7175_v7  ;;  %v7177_v29 = vrot.slane %v7176_v12, 4  ;;  %v6494_v13 = vrot.slane %v6493_v62, 4  ;;  %v5873_v44 = vmax.f32 %v5871_v26, %v5872_v36 }
 0x5a9   : > { %v7167_v49 = vrot.slane %v7166_v24, 1  ;;  %v5027_v3 = vmax.f32 %v12886_v22, 0.0  ;;  %v7187_v5 = vadd.f32 %v7186_v32, %v7185_v58  ;;  %v5863_v61 = vrot.slane %v5862_v53, 2 }
 0x5aa   : > { %v7581_v15 = vadd.f32 %v12945_v20, %v7510_v59  ;;  %v7178_v30 = vadd.f32 %v7177_v29, %v7176_v12  ;;  %v6495_v2 = vadd.f32 %v6494_v13, %v6493_v62  ;;  %v6165_v46 = vsub.f32 %v12879_v60, %v5873_v44 }
 0x5ab   : > { %v7168_v35 = vadd.f32 %v7167_v49, %v7166_v24  ;;  %v4900_v6 = vadd.f32 %v13010_v34, %v12849_v21  ;;  %v7188_v48 = vrot.slane %v7187_v5, 1  ;;  %v5864_v31 = vmax.f32 %v5862_v53, %v5863_v61 }
 0x5ac   : > { %v7645_v50 = vmax.f32 %v7581_v15, 0.0  ;;  %v7179_v22 = vrot.slane %v7178_v30, 2  ;;  %v6496_v52 = vrot.slane %v6495_v2, 2  ;;  %v6254_v25 = vmul.f32 1.442695, %v6165_v46  ;;  %v13015_v19 = vpop.f32.mrb[54].mxu0 }
 0x5ad   : > { %v7509_v57 = vmul.f32 %v12935_v54, %v7168_v35  ;;  %v5026_v18 = vmax.f32 %v4900_v6, 0.0  ;;  %v7189_v60 = vadd.f32 %v7188_v48, %v7187_v5  ;;  %v5865_v43 = vrot.slane %v5864_v31, 1  ;;  %v13023_v38 = vpop.f32.mrb[55].mxu0 }
 0x5ae   : > { %v7793_v41 = vrot.slane %v7645_v50, 5  ;;  %v7180_v14 = vadd.f32 %v7179_v22, %v7178_v30  ;;  %v6497_v33 = vadd.f32 %v6496_v52, %v6495_v2  ;;  %8715 = vpow2.f32 %v6254_v25 }
 0x5af   : > { %v7580_v26 = vadd.f32 %v12945_v20, %v7509_v57  ;;  %8463 = vmatprep.mubr.msk.f32.mxu1 %vm5043_vm1, %v5026_v18  ;;  %v13021_v21 = vadd.f32 %v12719_v10, %v12870_v8  ;;  %v13025_v63 = vpop.eup %8713  ;;  %v7512_v56 = vmul.f32 %v12935_v54, %v7189_v60  ;;  %v13031_v36 = vadd.f32 %v12719_v10, %v12874_v4 }
 0x5b0   : > { %v7181_v7 = vrot.slane %v7180_v14, 1  ;;  %v6498_v58 = vrot.slane %v6497_v33, 1  ;;  %8464 = vmatmul.mubr.msk.f32.gmra.mrb[48].mxu1 %vm5043_vm1, %v5027_v3  ;;  %v6486_v12 = vsel %vm4400_vm0, %v13025_v63, 0.0  ;;  %v5866_v8 = vmax.f32 %v5864_v31, %v5865_v43 }
 0x5b1   : > { %v7644_v24 = vmax.f32 %v7580_v26, 0.0  ;;  %v5881_v62 = vsel %vm4400_vm0, %v13021_v21, -inf  ;;  %v7583_v59 = vadd.f32 %v12945_v20, %v7512_v56  ;;  %v6487_v13 = vrot.slane %v6486_v12, 4 }
 0x5b2   : > { %v7182_v32 = vadd.f32 %v7181_v7, %v7180_v14  ;;  %v6499_v29 = vadd.f32 %v6498_v58, %v6497_v33  ;;  %v6164_v44 = vsub.f32 %v12883_v28, %v5866_v8  ;;  %v5882_v53 = vrot.slane %v5881_v62, 4 }
 0x5b3   : > { %v7791_v49 = vrot.slane %v7644_v24, 6  ;;  %v5874_v4 = vsel %vm4400_vm0, %v13031_v36, -inf  ;;  %v7647_v3 = vmax.f32 %v7583_v59, 0.0  ;;  %v6488_v5 = vadd.f32 %v6487_v13, %v6486_v12 }
 0x5b4   : > { %v7511_v15 = vmul.f32 %v12935_v54, %v7182_v32  ;;  %8717 = vrcp.f32 %v6499_v29  ;;  %v6252_v2 = vmul.f32 1.442695, %v6164_v44  ;;  %v5883_v35 = vmax.f32 %v5881_v62, %v5882_v53 }
 0x5b5   : > { %v7792_v30 = vsel %vm7758_vm3, %v7791_v49, %v12998_v40  ;;  %v5875_v46 = vrot.slane %v5874_v4, 4  ;;  %v7797_v61 = vrot.slane %v7647_v3, 3  ;;  %v6489_v50 = vrot.slane %v6488_v5, 2 }
 0x5b6   : > { %v7582_v6 = vadd.f32 %v12945_v20, %v7511_v15  ;;  %v7794_v28 = vsel %vm7761_vm4, %v7793_v41, %v7792_v30  ;;  %8719 = vpow2.f32 %v6252_v2  ;;  %v5884_v48 = vrot.slane %v5883_v35, 2 }
 0x5b7   : > { %v5876_v22 = vmax.f32 %v5874_v4, %v5875_v46  ;;  %v4915_v52 = vadd.f32 %v13010_v34, %v12919_v0  ;;  %v6490_v25 = vadd.f32 %v6489_v50, %v6488_v5  ;;  %v4910_v40 = vadd.f32 %v13010_v34, %v12923_v39 }
 0x5b8   : > { %v7646_v57 = vmax.f32 %v7582_v6, 0.0  ;;  %v13052_v31 = vadd.f32 %v12719_v10, %v12930_v55  ;;  %v13054_v18 = vpop.eup %8715  ;;  %v5885_v60 = vmax.f32 %v5883_v35, %v5884_v48  ;;  %v13058_v33 = vadd.f32 %v12719_v10, %v12938_v11 }
 0x5b9   : > { %v5877_v41 = vrot.slane %v5876_v22, 2  ;;  %v5029_v14 = vmax.f32 %v4915_v52, 0.0  ;;  %v6491_v0 = vrot.slane %v6490_v25, 1  ;;  %v6507_v43 = vsel %vm4400_vm0, %v13054_v18, 0.0 }
 0x5ba   : > { %v7795_v26 = vrot.slane %v7646_v57, 4  ;;  %v5028_v56 = vmax.f32 %v4910_v40, 0.0  ;;  %v6508_v39 = vrot.slane %v6507_v43, 4  ;;  %v5886_v7 = vrot.slane %v5885_v60, 1 }
 0x5bb   : > { %v5878_v58 = vmax.f32 %v5876_v22, %v5877_v41  ;;  %v5895_v55 = vsel %vm4400_vm0, %v13052_v31, -inf  ;;  %v6492_v12 = vadd.f32 %v6491_v0, %v6490_v25  ;;  %v5888_v10 = vsel %vm4400_vm0, %v13058_v33, -inf }
 0x5bc   : > { %v7796_v24 = vsel %vm7764_vm5, %v7795_v26, %v7794_v28  ;;  %8466 = vmatprep.mubr.msk.f32.mxu1 %vm5043_vm1, %v5028_v56  ;;  %v5896_v8 = vrot.slane %v5895_v55, 4  ;;  %v6509_v62 = vadd.f32 %v6508_v39, %v6507_v43  ;;  %v5887_v59 = vmax.f32 %v5885_v60, %v5886_v7  ;;  %v13094_v26 = vld [vmem:[%s13877_s13] ss:$0 sm:$0xff] }
 0x5bd   : > { %v13069_v11 = vsel %vm7767_vm6, %v7797_v61, %v7796_v24  ;;  %v5879_v32 = vrot.slane %v5878_v58, 1  ;;  %8467 = vmatmul.mubr.msk.f32.gmra.mrb[50].mxu1 %vm5043_vm1, %v5029_v14  ;;  %8721 = vrcp.f32 %v6492_v12  ;;  %v5889_v49 = vrot.slane %v5888_v10, 4 }
 0x5be   : > { %v8718_v29 = vpop.eup %8717  ;;  %v5897_v13 = vmax.f32 %v5895_v55, %v5896_v8  ;;  %v4925_v44 = vadd.f32 %v13010_v34, %v12965_v47  ;;  %v6510_v4 = vrot.slane %v6509_v62, 2  ;;  %v6167_v3 = vsub.f32 %v13021_v21, %v5887_v59 }
 0x5bf   : > { %v6827_v53 = vmul.f32 %v8718_v29, %v12995_v27  ;;  %v5880_v15 = vmax.f32 %v5878_v58, %v5879_v32  ;;  %v5890_v30 = vmax.f32 %v5888_v10, %v5889_v49  ;;  %v4920_v35 = vadd.f32 %v13010_v34, %v12968_v42  ;;  %v13084_v22 = vpop.f32.mrb[32].mxu1 }
 0x5c0   : > { %v5898_v5 = vrot.slane %v5897_v13, 2  ;;  %v5031_v2 = vmax.f32 %v4925_v44, 0.0  ;;  %v13078_v46 = vpop.eup %8719  ;;  %v6511_v6 = vadd.f32 %v6510_v4, %v6509_v62  ;;  %v6258_v28 = vmul.f32 1.442695, %v6167_v3  ;;  %v13087_v25 = vpop.f32.mrb[33].mxu1 }
 0x5c1   : > { %v6995_v61 = vmul.f32 %v12737_v9, %v6827_v53  ;;  %v6166_v47 = vsub.f32 %v13031_v36, %v5880_v15  ;;  %v6500_v27 = vsel %vm4400_vm0, %v13078_v46, 0.0  ;;  %v5891_v21 = vrot.slane %v5890_v30, 2 }
 0x5c2   : > { %v5899_v50 = vmax.f32 %v5897_v13, %v5898_v5  ;;  %v5030_v48 = vmax.f32 %v4920_v35, 0.0  ;;  %v6512_v57 = vrot.slane %v6511_v6, 1  ;;  %v6501_v42 = vrot.slane %v6500_v27, 4 }
 0x5c3   : > { %v7197_v52 = vsel %vm4400_vm0, %v6995_v61, 0.0  ;;  %8723 = vpow2.f32 %v6258_v28  ;;  %v6256_v40 = vmul.f32 1.442695, %v6166_v47  ;;  %v5892_v41 = vmax.f32 %v5890_v30, %v5891_v21 }
 0x5c4   : > { %v7198_v9 = vrot.slane %v7197_v52, 4  ;;  %v5900_v60 = vrot.slane %v5899_v50, 1  ;;  %8469 = vmatprep.mubr.msk.f32.mxu1 %vm5043_vm1, %v5030_v48  ;;  %v6513_v36 = vadd.f32 %v6512_v57, %v6511_v6  ;;  %v6502_v14 = vadd.f32 %v6501_v42, %v6500_v27 }
 0x5c5   : > { %8470 = vmatmul.mubr.msk.f32.gmra.mrb[52].mxu1 %vm5043_vm1, %v5031_v2  ;;  %v13098_v0 = vadd.f32 %v13094_v26, %v12990_v17  ;;  %v13102_v43 = vadd.f32 %v13094_v26, %v12992_v16  ;;  %8725 = vpow2.f32 %v6256_v40  ;;  %v5893_v7 = vrot.slane %v5892_v41, 1 }
 0x5c6   : > { %v7199_v56 = vadd.f32 %v7198_v9, %v7197_v52  ;;  %v5901_v39 = vmax.f32 %v5899_v50, %v5900_v60  ;;  %8727 = vrcp.f32 %v6513_v36  ;;  %v6503_v58 = vrot.slane %v6502_v14, 2  ;;  %v687_v9 = vld [vmem:[%s12056_s27 + $0xc0] sm:$0xff] }
 0x5c7   : > { %v5909_v55 = vsel %vm4400_vm0, %v13098_v0, -inf  ;;  %v5902_v24 = vsel %vm4400_vm0, %v13102_v43, -inf  ;;  %v8722_v12 = vpop.eup %8721  ;;  %v5894_v10 = vmax.f32 %v5892_v41, %v5893_v7  ;;  %v4935_v29 = vadd.f32 %v13010_v34, %v13015_v19 }
 0x5c8   : > { %v7200_v8 = vrot.slane %v7199_v56, 2  ;;  %v6169_v17 = vsub.f32 %v13052_v31, %v5901_v39  ;;  %v5910_v62 = vrot.slane %v5909_v55, 4  ;;  %v6825_v16 = vmul.f32 %v8722_v12, %v13025_v63  ;;  %v14506_v12 = vld [vmem:[#allocation10_spill] sm:$0xff] }
 0x5c9   : > { %v6504_v59 = vadd.f32 %v6503_v58, %v6502_v14  ;;  %v5903_v32 = vrot.slane %v5902_v24, 4  ;;  %v6168_v44 = vsub.f32 %v13058_v33, %v5894_v10  ;;  %v5033_v5 = vmax.f32 %v4935_v29, 0.0 }
 0x5ca   : > { %v7201_v13 = vadd.f32 %v7200_v8, %v7199_v56  ;;  %v6262_v49 = vmul.f32 1.442695, %v6169_v17  ;;  %v5911_v53 = vmax.f32 %v5909_v55, %v5910_v62  ;;  %v6994_v4 = vmul.f32 %v12713_v37, %v6825_v16 }
 0x5cb   : > { %v6505_v3 = vrot.slane %v6504_v59, 1  ;;  %v5904_v15 = vmax.f32 %v5902_v24, %v5903_v32  ;;  %v6260_v30 = vmul.f32 1.442695, %v6168_v44  ;;  %v4930_v33 = vadd.f32 %v13010_v34, %v13023_v38 }
 0x5cc   : > { %v7202_v31 = vrot.slane %v7201_v13, 1  ;;  %8729 = vpow2.f32 %v6262_v49  ;;  %v5912_v2 = vrot.slane %v5911_v53, 2  ;;  %v7190_v35 = vsel %vm4400_vm0, %v6994_v4, 0.0 }
 0x5cd   : > { %v13114_v63 = vpop.eup %8723  ;;  %v6506_v61 = vadd.f32 %v6505_v3, %v6504_v59  ;;  %v5905_v19 = vrot.slane %v5904_v15, 2  ;;  %v7191_v28 = vrot.slane %v7190_v35, 4  ;;  %8731 = vpow2.f32 %v6260_v30 }
 0x5ce   : > { %v7203_v6 = vadd.f32 %v7202_v31, %v7201_v13  ;;  %v6521_v37 = vsel %vm4400_vm0, %v13114_v63, 0.0  ;;  %v5913_v27 = vmax.f32 %v5911_v53, %v5912_v2  ;;  %v5032_v57 = vmax.f32 %v4930_v33, 0.0 }
 0x5cf   : > { %8733 = vrcp.f32 %v6506_v61  ;;  %v6522_v47 = vrot.slane %v6521_v37, 4  ;;  %v5906_v50 = vmax.f32 %v5904_v15, %v5905_v19  ;;  %v13121_v21 = vpop.eup %8725  ;;  %v7192_v52 = vadd.f32 %v7191_v28, %v7190_v35 }
 0x5d0   : > { %v7514_v48 = vmul.f32 %v12935_v54, %v7203_v6  ;;  %v13126_v42 = vadd.f32 %v13094_v26, %v13084_v22  ;;  %v8728_v38 = vpop.eup %8727  ;;  %v6514_v60 = vsel %vm4400_vm0, %v13121_v21, 0.0  ;;  %v5914_v41 = vrot.slane %v5913_v27, 1  ;;  %8472 = vmatprep.mubr.msk.f32.mxu1 %vm5043_vm1, %v5032_v57 }
 0x5d1   : > { %v6523_v40 = vadd.f32 %v6522_v47, %v6521_v37  ;;  %v5907_v36 = vrot.slane %v5906_v50, 1  ;;  %v7193_v56 = vrot.slane %v7192_v52, 2  ;;  %v6831_v39 = vmul.f32 %v8728_v38, %v13054_v18  ;;  %8473 = vmatmul.mubr.msk.f32.gmra.mrb[54].mxu1 %vm5043_vm1, %v5033_v5 }
 0x5d2   : > { %v7585_v14 = vadd.f32 %v12945_v20, %v7514_v48  ;;  %v6515_v7 = vrot.slane %v6514_v60, 4  ;;  %v5915_v55 = vmax.f32 %v5913_v27, %v5914_v41  ;;  %v5923_v24 = vsel %vm4400_vm0, %v13126_v42, -inf }
 0x5d3   : > { %v6524_v58 = vrot.slane %v6523_v40, 2  ;;  %v5908_v22 = vmax.f32 %v5906_v50, %v5907_v36  ;;  %v6932_v8 = vadd.f32 %v14506_v12, %v687_v9  ;;  %v7194_v17 = vadd.f32 %v7193_v56, %v7192_v52 }
 0x5d4   : > { %v6997_v10 = vmul.f32 %v12745_v51, %v6831_v39  ;;  %v6516_v62 = vadd.f32 %v6515_v7, %v6514_v60  ;;  %v7649_v16 = vmax.f32 %v7585_v14, 0.0  ;;  %v6171_v18 = vsub.f32 %v13098_v0, %v5915_v55 }
 0x5d5   : > { %v6525_v59 = vadd.f32 %v6524_v58, %v6523_v40  ;;  %v6170_v32 = vsub.f32 %v13102_v43, %v5908_v22  ;;  %v7195_v13 = vrot.slane %v7194_v17, 1  ;;  %v5924_v53 = vrot.slane %v5923_v24, 4 }
 0x5d6   : > { %v13141_v29 = vpop.eup %8729  ;;  %v7211_v49 = vsel %vm4400_vm0, %v6997_v10, 0.0  ;;  %v6517_v44 = vrot.slane %v6516_v62, 2  ;;  %v6266_v51 = vmul.f32 1.442695, %v6171_v18  ;;  %v7801_v58 = vrot.slane %v7649_v16, 1  ;;  %v690_v16 = vld [vmem:[%s12056_s27 + $0xd8] sm:$0xff] }
 0x5d7   : > { %v7212_v4 = vrot.slane %v7211_v49, 4  ;;  %v6526_v3 = vrot.slane %v6525_v59, 1  ;;  %v6535_v15 = vsel %vm4400_vm0, %v13141_v29, 0.0  ;;  %v13146_v5 = vpop.eup %8731  ;;  %v7196_v31 = vadd.f32 %v7195_v13, %v7194_v17 }
 0x5d8   : > { %v6518_v30 = vadd.f32 %v6517_v44, %v6516_v62  ;;  %v6536_v0 = vrot.slane %v6535_v15, 4  ;;  %v6264_v2 = vmul.f32 1.442695, %v6170_v32  ;;  %v6528_v19 = vsel %vm4400_vm0, %v13146_v5, 0.0 }
 0x5d9   : > { %v8734_v43 = vpop.eup %8733  ;;  %v7213_v35 = vadd.f32 %v7212_v4, %v7211_v49  ;;  %v6527_v61 = vadd.f32 %v6526_v3, %v6525_v59  ;;  %8735 = vpow2.f32 %v6266_v51  ;;  %v7513_v33 = vmul.f32 %v12935_v54, %v7196_v31 }
 0x5da   : > { %v6829_v6 = vmul.f32 %v8734_v43, %v13078_v46  ;;  %v6519_v28 = vrot.slane %v6518_v30, 1  ;;  %v6537_v37 = vadd.f32 %v6536_v0, %v6535_v15  ;;  %v6529_v27 = vrot.slane %v6528_v19, 4  ;;  %v689_v0 = vld [vmem:[%s12056_s27 + $0xd0] sm:$0xff] }
 0x5db   : > { %v7214_v47 = vrot.slane %v7213_v35, 2  ;;  %8737 = vrcp.f32 %v6527_v61  ;;  %v5925_v50 = vmax.f32 %v5923_v24, %v5924_v53  ;;  %v7584_v48 = vadd.f32 %v12945_v20, %v7513_v33 }
 0x5dc   : > { %v6996_v52 = vmul.f32 %v6932_v8, %v6829_v6  ;;  %v6520_v57 = vadd.f32 %v6519_v28, %v6518_v30  ;;  %v6538_v38 = vrot.slane %v6537_v37, 2  ;;  %v6530_v40 = vadd.f32 %v6529_v27, %v6528_v19 }
 0x5dd   : > { %v7215_v9 = vadd.f32 %v7214_v47, %v7213_v35  ;;  %8739 = vpow2.f32 %v6264_v2  ;;  %v5926_v60 = vrot.slane %v5925_v50, 2  ;;  %v7648_v41 = vmax.f32 %v7584_v48, 0.0  ;;  %v14507_v2 = vld [vmem:[#allocation19_spill] sm:$0xff] }
 0x5de   : > { %v7204_v36 = vsel %vm4400_vm0, %v6996_v52, 0.0  ;;  %8741 = vrcp.f32 %v6520_v57  ;;  %v6539_v46 = vadd.f32 %v6538_v38, %v6537_v37  ;;  %v6531_v39 = vrot.slane %v6530_v40, 2  ;;  %v14508_v57 = vld [vmem:[#allocation17_spill] sm:$0xff] }
 0x5df   : > { %v7216_v14 = vrot.slane %v7215_v9, 1  ;;  %v7205_v56 = vrot.slane %v7204_v36, 4  ;;  %v5927_v7 = vmax.f32 %v5925_v50, %v5926_v60  ;;  %v7799_v55 = vrot.slane %v7648_v41, 2 }
 0x5e0   : > { %v6540_v22 = vrot.slane %v6539_v46, 1  ;;  %v13156_v24 = vadd.f32 %v13094_v26, %v13087_v25  ;;  %v6532_v17 = vadd.f32 %v6531_v39, %v6530_v40  ;;  %v6935_v43 = vadd.f32 %v14507_v2, %v690_v16 }
 0x5e1   : > { %v7217_v12 = vadd.f32 %v7216_v14, %v7215_v9  ;;  %v7206_v8 = vadd.f32 %v7205_v56, %v7204_v36  ;;  %v5928_v10 = vrot.slane %v5927_v7, 1  ;;  %v7800_v62 = vsel %vm7770_vm7, %v7799_v55, %v13069_v11  ;;  %v692_v36 = vld [vmem:[%s12056_s27 + $0xe8] sm:$0xff] }
 0x5e2   : > { %v6541_v59 = vadd.f32 %v6540_v22, %v6539_v46  ;;  %v5916_v18 = vsel %vm4400_vm0, %v13156_v24, -inf  ;;  %v7802_v13 = vsel %vm7773_vm8, %v7801_v58, %v7800_v62  ;;  %v6533_v44 = vrot.slane %v6532_v17, 1  ;;  %v691_v22 = vld [vmem:[%s12056_s27 + $0xe0] sm:$0xff]  ;;  %v14509_v62 = vld [vmem:[#allocation69_spill] sm:$0xff] }
 0x5e3   : > { %v13162_v32 = vpop.eup %8735  ;;  %v7516_v25 = vmul.f32 %v12935_v54, %v7217_v12  ;;  %v7207_v49 = vrot.slane %v7206_v8, 2  ;;  %7883 = vst.msk [vmem:[%s12578_s29 + $0x10] sm:$0xff] %vm4400_vm0, %v7802_v13  ;;  %v5929_v53 = vmax.f32 %v5927_v7, %v5928_v10  ;;  %v5917_v4 = vrot.slane %v5916_v18, 4 }
 0x5e4   : > { %8743 = vrcp.f32 %v6541_v59  ;;  %v6549_v11 = vsel %vm4400_vm0, %v13162_v32, 0.0  ;;  %v6534_v31 = vadd.f32 %v6533_v44, %v6532_v17  ;;  %v6934_v38 = vadd.f32 %v14508_v57, %v689_v0 }
 0x5e5   : > { %v8738_v3 = vpop.eup %8737  ;;  %v7587_v15 = vadd.f32 %v12945_v20, %v7516_v25  ;;  %v7208_v51 = vadd.f32 %v7207_v49, %v7206_v8  ;;  %v6550_v30 = vrot.slane %v6549_v11, 4  ;;  %v6173_v61 = vsub.f32 %v13126_v42, %v5929_v53  ;;  %v14510_v53 = vld [vmem:[#allocation56_spill] sm:$0xff] }
 0x5e6   : > { %v6835_v35 = vmul.f32 %v8738_v3, %v13114_v63  ;;  %v5918_v19 = vmax.f32 %v5916_v18, %v5917_v4  ;;  %8745 = vrcp.f32 %v6534_v31  ;;  %v6937_v59 = vadd.f32 %v14509_v62, %v692_v36  ;;  %v693_v3 = vld [vmem:[%s12056_s27 + $0xf0] sm:$0xff] }
 0x5e7   : > { %v13176_v33 = vpop.eup %8739  ;;  %v7651_v6 = vmax.f32 %v7587_v15, 0.0  ;;  %v7209_v28 = vrot.slane %v7208_v51, 1  ;;  %v6551_v37 = vadd.f32 %v6550_v30, %v6549_v11  ;;  %v6270_v48 = vmul.f32 1.442695, %v6173_v61  ;;  %v701_v62 = vld [vmem:[%s12056_s27 + $0x130] sm:$0xff] }
 0x5e8   : > { %v8742_v47 = vpop.eup %8741  ;;  %v6999_v27 = vmul.f32 %v6935_v43, %v6835_v35  ;;  %v6542_v50 = vsel %vm4400_vm0, %v13176_v33, 0.0  ;;  %v5919_v52 = vrot.slane %v5918_v19, 2  ;;  %v6936_v4 = vadd.f32 %v14510_v53, %v691_v22  ;;  %v694_v35 = vld [vmem:[%s12056_s27 + $0xf8] sm:$0xff]  ;;  %v14517_v53 = vld [vmem:[#allocation42_spill] sm:$0xff] }
 0x5e9   : > { %v7210_v63 = vadd.f32 %v7209_v28, %v7208_v51  ;;  %v6833_v42 = vmul.f32 %v8742_v47, %v13121_v21  ;;  %v6552_v9 = vrot.slane %v6551_v37, 2  ;;  %v6543_v60 = vrot.slane %v6542_v50, 4  ;;  %v14511_v28 = vld [vmem:[#allocation80_spill] sm:$0xff] }
 0x5ea   : > { %v7225_v40 = vsel %vm4400_vm0, %v6999_v27, 0.0  ;;  %8747 = vpow2.f32 %v6270_v48  ;;  %v5920_v41 = vmax.f32 %v5918_v19, %v5919_v52  ;;  %v7803_v7 = vrot.slane %v7651_v6, 7 }
 0x5eb   : > { %v7515_v46 = vmul.f32 %v12935_v54, %v7210_v63  ;;  %v7226_v14 = vrot.slane %v7225_v40, 4  ;;  %v6998_v56 = vmul.f32 %v6934_v38, %v6833_v42  ;;  %v6553_v39 = vadd.f32 %v6552_v9, %v6551_v37  ;;  %v14512_v63 = vld [vmem:[#allocation14_spill] sm:$0xff]  ;;  %v696_v42 = vld [vmem:[%s12056_s27 + $0x108] sm:$0xff]  ;;  %v697_v9 = vld [vmem:[%s12056_s27 + $0x110] sm:$0xff] }
 0x5ec   : > { %v6544_v58 = vadd.f32 %v6543_v60, %v6542_v50  ;;  %v5921_v55 = vrot.slane %v5920_v41, 1  ;;  %v13199_v37 = vadd.f32 %v14511_v28, %v693_v3  ;;  %v695_v50 = vld [vmem:[%s12056_s27 + $0x100] sm:$0xff]  ;;  %v14518_v3 = vld [vmem:[#allocation29_spill] sm:$0xff] }
 0x5ed   : > { %v7586_v12 = vadd.f32 %v12945_v20, %v7515_v46  ;;  %v7227_v21 = vadd.f32 %v7226_v14, %v7225_v40  ;;  %v7218_v8 = vsel %vm4400_vm0, %v6998_v56, 0.0  ;;  %v6554_v17 = vrot.slane %v6553_v39, 1  ;;  %v14513_v56 = vld [vmem:[#allocation27_spill] sm:$0xff] }
 0x5ee   : > { %v8744_v10 = vpop.eup %8743  ;;  %v7219_v18 = vrot.slane %v7218_v8, 4  ;;  %v6545_v16 = vrot.slane %v6544_v58, 2  ;;  %v5922_v13 = vmax.f32 %v5920_v41, %v5921_v55  ;;  %v698_v41 = vld [vmem:[%s12056_s27 + $0x118] sm:$0xff] }
 0x5ef   : > { %v7650_v25 = vmax.f32 %v7586_v12, 0.0  ;;  %v7228_v49 = vrot.slane %v7227_v21, 2  ;;  %v6839_v44 = vmul.f32 %v8744_v10, %v13141_v29  ;;  %v6555_v11 = vadd.f32 %v6554_v17, %v6553_v39  ;;  %v14515_v17 = vld [vmem:[#allocation70_spill] sm:$0xff] }
 0x5f0   : > { %v7220_v15 = vadd.f32 %v7219_v18, %v7218_v8  ;;  %v6546_v51 = vadd.f32 %v6545_v16, %v6544_v58  ;;  %v6172_v31 = vsub.f32 %v13156_v24, %v5922_v13  ;;  %v8746_v30 = vpop.eup %8745  ;;  %v13213_v39 = vadd.f32 %v14513_v56, %v695_v50  ;;  %v700_v58 = vld [vmem:[%s12056_s27 + $0x128] sm:$0xff]  ;;  %v14516_v16 = vld [vmem:[#allocation81_spill] sm:$0xff] }
 0x5f1   : > { %v13194_v0 = vsel %vm7755_vm2, %v7803_v7, %v7650_v25  ;;  %v7229_v2 = vadd.f32 %v7228_v49, %v7227_v21  ;;  %v7001_v43 = vmul.f32 %v6937_v59, %v6839_v44  ;;  %8749 = vrcp.f32 %v6555_v11  ;;  %v699_v7 = vld [vmem:[%s12056_s27 + $0x120] sm:$0xff]  ;;  %v14514_v21 = vld [vmem:[#allocation57_spill] sm:$0xff] }
 0x5f2   : > { %v7221_v29 = vrot.slane %v7220_v15, 2  ;;  %v6837_v61 = vmul.f32 %v8746_v30, %v13146_v5  ;;  %v6547_v19 = vrot.slane %v6546_v51, 1  ;;  %v6268_v6 = vmul.f32 1.442695, %v6172_v31  ;;  %v702_v25 = vld [vmem:[%s12056_s27 + $0x138] sm:$0xff] }
 0x5f3   : > { %v7230_v24 = vrot.slane %v7229_v2, 1  ;;  %v7239_v47 = vsel %vm4400_vm0, %v7001_v43, 0.0  ;;  %v6939_v5 = vadd.f32 %v14512_v63, %v694_v35  ;;  %v13219_v8 = vadd.f32 %v14514_v21, %v696_v42  ;;  %v14519_v43 = vld [vmem:[#allocation58_spill] sm:$0xff] }
 0x5f4   : > { %v13202_v27 = vpop.eup %8747  ;;  %v7222_v48 = vadd.f32 %v7221_v29, %v7220_v15  ;;  %v7240_v52 = vrot.slane %v7239_v47, 4  ;;  %v7000_v57 = vmul.f32 %v6936_v4, %v6837_v61  ;;  %v6548_v38 = vadd.f32 %v6547_v19, %v6546_v51  ;;  %v703_v51 = vld [vmem:[%s12056_s27 + $0x140] sm:$0xff] }
 0x5f5   : > { %v7231_v40 = vadd.f32 %v7230_v24, %v7229_v2  ;;  %v6563_v60 = vsel %vm4400_vm0, %v13202_v27, 0.0  ;;  %8751 = vpow2.f32 %v6268_v6  ;;  %v13222_v10 = vadd.f32 %v14515_v17, %v697_v9  ;;  %v14520_v6 = vld [vmem:[#allocation21_spill] sm:$0xff] }
 0x5f6   : > { %v7223_v36 = vrot.slane %v7222_v48, 1  ;;  %v7241_v46 = vadd.f32 %v7240_v52, %v7239_v47  ;;  %v7232_v14 = vsel %vm4400_vm0, %v7000_v57, 0.0  ;;  %8753 = vrcp.f32 %v6548_v38  ;;  %v14521_v52 = vld [vmem:[#allocation82_spill] sm:$0xff] }
 0x5f7   : > { %v7518_v55 = vmul.f32 %v12935_v54, %v7231_v40  ;;  %v7233_v22 = vrot.slane %v7232_v14, 4  ;;  %v6564_v12 = vrot.slane %v6563_v60, 4  ;;  %v13226_v13 = vadd.f32 %v14516_v16, %v698_v41 }
 0x5f8   : > { %v7224_v59 = vadd.f32 %v7223_v36, %v7222_v48  ;;  %v7242_v18 = vrot.slane %v7241_v46, 2  ;;  %v13231_v4 = vadd.f32 %v14517_v53, %v699_v7  ;;  %v13234_v15 = vadd.f32 %v14518_v3, %v700_v58 }
 0x5f9   : > { %v7589_v49 = vadd.f32 %v12945_v20, %v7518_v55  ;;  %v7234_v44 = vadd.f32 %v7233_v22, %v7232_v14  ;;  %v6565_v11 = vadd.f32 %v6564_v12, %v6563_v60  ;;  %v13239_v35 = vadd.f32 %v14519_v43, %v701_v62 }
 0x5fa   : > { %v7517_v31 = vmul.f32 %v12935_v54, %v7224_v59  ;;  %v7243_v30 = vadd.f32 %v7242_v18, %v7241_v46  ;;  %v13242_v28 = vadd.f32 %v14520_v6, %v702_v25  ;;  %v13247_v57 = vadd.f32 %v14521_v52, %v703_v51 }
 0x5fb   : > { %v8750_v2 = vpop.eup %8749  ;;  %v7653_v29 = vmax.f32 %v7589_v49, 0.0  ;;  %v7235_v61 = vrot.slane %v7234_v44, 2  ;;  %v6566_v19 = vrot.slane %v6565_v11, 2  ;;  %v8379_v48 = vpop.f32.mrb[56].mxu0 }
 0x5fc   : > { %v7588_v24 = vadd.f32 %v12945_v20, %v7517_v31  ;;  %v7244_v47 = vrot.slane %v7243_v30, 1  ;;  %v6843_v50 = vmul.f32 %v8750_v2, %v13162_v32  ;;  %v4945_v42 = vadd.f32 %v13010_v34, %v8379_v48  ;;  %v4939_v9 = vpop.f32.mrb[57].mxu0  ;;  %v13277_v2 = vld [vmem:[%s13879_s15] ss:$0 sm:$0xff] }
 0x5fd   : > { %v7236_v38 = vadd.f32 %v7235_v61, %v7234_v44  ;;  %v6567_v63 = vadd.f32 %v6566_v19, %v6565_v11  ;;  %v4940_v36 = vadd.f32 %v13010_v34, %v4939_v9  ;;  %v7807_v14 = vrot.slane %v7653_v29, 5  ;;  %v704_v44 = vld [vmem:[%s12056_s27 + $0x148] sm:$0xff]  ;;  %v14522_v19 = vld [vmem:[#allocation26_spill] sm:$0xff] }
 0x5fe   : > { %v7652_v40 = vmax.f32 %v7588_v24, 0.0  ;;  %v7245_v60 = vadd.f32 %v7244_v47, %v7243_v30  ;;  %v7003_v41 = vmul.f32 %v6939_v5, %v6843_v50  ;;  %v5035_v7 = vmax.f32 %v4945_v42, 0.0 }
 0x5ff   : > { %v13251_v46 = vpop.eup %8751  ;;  %v7237_v56 = vrot.slane %v7236_v38, 1  ;;  %v6568_v32 = vrot.slane %v6567_v63, 1  ;;  %v5034_v49 = vmax.f32 %v4940_v36, 0.0  ;;  %v13286_v6 = vadd.f32 %v14522_v19, %v704_v44 }
 0x600   : > { %v8754_v58 = vpop.eup %8753  ;;  %v7805_v55 = vrot.slane %v7652_v40, 6  ;;  %v7520_v22 = vmul.f32 %v12935_v54, %v7245_v60  ;;  %v7253_v12 = vsel %vm4400_vm0, %v7003_v41, 0.0  ;;  %v6556_v21 = vsel %vm4400_vm0, %v13251_v46, 0.0  ;;  %v13265_v54 = vld [vmem:[%s13878_s14] ss:$0 sm:$0xff] }
 0x601   : > { %v7238_v17 = vadd.f32 %v7237_v56, %v7236_v38  ;;  %v7254_v5 = vrot.slane %v7253_v12, 4  ;;  %v6841_v62 = vmul.f32 %v8754_v58, %v13176_v33  ;;  %v6569_v59 = vadd.f32 %v6568_v32, %v6567_v63  ;;  %8475 = vmatprep.mubr.msk.f32.mxu1 %vm5043_vm1, %v5034_v49 }
 0x602   : > { %v7806_v18 = vsel %vm7758_vm3, %v7805_v55, %v13194_v0  ;;  %v7591_v16 = vadd.f32 %v12945_v20, %v7520_v22  ;;  %v6557_v25 = vrot.slane %v6556_v21, 4  ;;  %v8444_v51 = vpop.f32.mrb[34].mxu1  ;;  %8476 = vmatmul.mubr.msk.f32.gmra.mrb[56].mxu1 %vm5043_vm1, %v5035_v7 }
 0x603   : > { %v7519_v11 = vmul.f32 %v13265_v54, %v7238_v17  ;;  %v7808_v53 = vsel %vm7761_vm4, %v7807_v14, %v7806_v18  ;;  %v7255_v3 = vadd.f32 %v7254_v5, %v7253_v12  ;;  %v7002_v33 = vmul.f32 %v13199_v37, %v6841_v62  ;;  %v5472_v30 = vpop.f32.mrb[35].mxu1 }
 0x604   : > { %v7655_v31 = vmax.f32 %v7591_v16, 0.0  ;;  %8755 = vrcp.f32 %v6569_v59  ;;  %v6558_v0 = vadd.f32 %v6557_v25, %v6556_v21  ;;  %v13272_v20 = vadd.f32 %v13094_v26, %v8444_v51 }
 0x605   : > { %v7590_v43 = vadd.f32 %v13277_v2, %v7519_v11  ;;  %v7256_v29 = vrot.slane %v7255_v3, 2  ;;  %v7246_v37 = vsel %vm4400_vm0, %v7002_v33, 0.0  ;;  %v13283_v61 = vadd.f32 %v13094_v26, %v5472_v30 }
 0x606   : > { %v7247_v24 = vrot.slane %v7246_v37, 4  ;;  %v6559_v47 = vrot.slane %v6558_v0, 2  ;;  %v5937_v50 = vsel %vm4400_vm0, %v13272_v20, -inf  ;;  %v7811_v42 = vrot.slane %v7655_v31, 3 }
 0x607   : > { %v7654_v48 = vmax.f32 %v7590_v43, 0.0  ;;  %v7257_v52 = vadd.f32 %v7256_v29, %v7255_v3  ;;  %v5938_v38 = vrot.slane %v5937_v50, 4  ;;  %v5930_v63 = vsel %vm4400_vm0, %v13283_v61, -inf  ;;  %v8447_v41 = vpop.f32.mrb[36].mxu1 }
 0x608   : > { %v7248_v9 = vadd.f32 %v7247_v24, %v7246_v37  ;;  %v6560_v40 = vadd.f32 %v6559_v47, %v6558_v0  ;;  %v5931_v60 = vrot.slane %v5930_v63, 4  ;;  %v13293_v32 = vadd.f32 %v13094_v26, %v8447_v41  ;;  %v5482_v7 = vpop.f32.mrb[37].mxu1 }
 0x609   : > { %v7809_v36 = vrot.slane %v7654_v48, 4  ;;  %v7258_v14 = vrot.slane %v7257_v52, 1  ;;  %v5939_v56 = vmax.f32 %v5937_v50, %v5938_v38  ;;  %v13296_v21 = vadd.f32 %v13094_v26, %v5482_v7 }
 0x60a   : > { %v7249_v58 = vrot.slane %v7248_v9, 2  ;;  %v6561_v55 = vrot.slane %v6560_v40, 1  ;;  %v5932_v22 = vmax.f32 %v5930_v63, %v5931_v60  ;;  %v5951_v30 = vsel %vm4400_vm0, %v13293_v32, -inf }
 0x60b   : > { %v8382_v12 = vpop.f32.mrb[58].mxu0  ;;  %v7810_v17 = vsel %vm7764_vm5, %v7809_v36, %v7808_v53  ;;  %v7259_v5 = vadd.f32 %v7258_v14, %v7257_v52  ;;  %v5940_v62 = vrot.slane %v5939_v56, 2  ;;  %v5952_v50 = vrot.slane %v5951_v30, 4 }
 0x60c   : > { %v4955_v59 = vadd.f32 %v13010_v34, %v8382_v12  ;;  %v4949_v18 = vpop.f32.mrb[59].mxu0  ;;  %v7250_v16 = vadd.f32 %v7249_v58, %v7248_v9  ;;  %v13301_v25 = vsel %vm7767_vm6, %v7811_v42, %v7810_v17  ;;  %v6562_v49 = vadd.f32 %v6561_v55, %v6560_v40 }
 0x60d   : > { %v5933_v44 = vrot.slane %v5932_v22, 2  ;;  %v7522_v11 = vmul.f32 %v13265_v54, %v7259_v5  ;;  %v5941_v3 = vmax.f32 %v5939_v56, %v5940_v62  ;;  %v4950_v51 = vadd.f32 %v13010_v34, %v4949_v18 }
 0x60e   : > { %v5037_v33 = vmax.f32 %v4955_v59, 0.0  ;;  %v8756_v31 = vpop.eup %8755  ;;  %v7251_v0 = vrot.slane %v7250_v16, 1  ;;  %8757 = vrcp.f32 %v6562_v49  ;;  %v5944_v48 = vsel %vm4400_vm0, %v13296_v21, -inf }
 0x60f   : > { %v5934_v53 = vmax.f32 %v5932_v22, %v5933_v44  ;;  %v7593_v43 = vadd.f32 %v13277_v2, %v7522_v11  ;;  %v6847_v29 = vmul.f32 %v8756_v31, %v13202_v27  ;;  %v5942_v37 = vrot.slane %v5941_v3, 1 }
 0x610   : > { %v5036_v19 = vmax.f32 %v4950_v51, 0.0  ;;  %v7252_v24 = vadd.f32 %v7251_v0, %v7250_v16  ;;  %v5945_v42 = vrot.slane %v5944_v48, 4  ;;  %v5953_v27 = vmax.f32 %v5951_v30, %v5952_v50 }
 0x611   : > { %v5935_v47 = vrot.slane %v5934_v53, 1  ;;  %v7657_v52 = vmax.f32 %v7593_v43, 0.0  ;;  %v7005_v38 = vmul.f32 %v13219_v8, %v6847_v29  ;;  %v5943_v63 = vmax.f32 %v5941_v3, %v5942_v37  ;;  %v8385_v9 = vpop.f32.mrb[60].mxu0 }
 0x612   : > { %8478 = vmatprep.mubr.msk.f32.mxu1 %vm5043_vm1, %v5036_v19  ;;  %v7521_v40 = vmul.f32 %v13265_v54, %v7252_v24  ;;  %v4965_v41 = vadd.f32 %v13010_v34, %v8385_v9  ;;  %v4959_v36 = vpop.f32.mrb[61].mxu0  ;;  %v5946_v8 = vmax.f32 %v5944_v48, %v5945_v42  ;;  %v5954_v12 = vrot.slane %v5953_v27, 2 }
 0x613   : > { %v5936_v60 = vmax.f32 %v5934_v53, %v5935_v47  ;;  %8479 = vmatmul.mubr.msk.f32.gmra.mrb[58].mxu1 %vm5043_vm1, %v5037_v33  ;;  %v7815_v14 = vrot.slane %v7657_v52, 1  ;;  %v7267_v56 = vsel %vm4400_vm0, %v7005_v38, 0.0  ;;  %v6175_v7 = vsub.f32 %v13272_v20, %v5943_v63 }
 0x614   : > { %v7592_v58 = vadd.f32 %v13277_v2, %v7521_v40  ;;  %v7268_v55 = vrot.slane %v7267_v56, 4  ;;  %v5947_v5 = vrot.slane %v5946_v8, 2  ;;  %v5039_v62 = vmax.f32 %v4965_v41, 0.0 }
 0x615   : > { %v6174_v22 = vsub.f32 %v13283_v61, %v5936_v60  ;;  %v6274_v17 = vmul.f32 1.442695, %v6175_v7  ;;  %v4960_v59 = vadd.f32 %v13010_v34, %v4959_v36  ;;  %v5955_v44 = vmax.f32 %v5953_v27, %v5954_v12  ;;  %v8450_v11 = vpop.f32.mrb[38].mxu1 }
 0x616   : > { %v7656_v18 = vmax.f32 %v7592_v58, 0.0  ;;  %v7269_v16 = vadd.f32 %v7268_v55, %v7267_v56  ;;  %v5948_v3 = vmax.f32 %v5946_v8, %v5947_v5  ;;  %v13322_v33 = vadd.f32 %v13094_v26, %v8450_v11  ;;  %v5492_v51 = vpop.f32.mrb[39].mxu1  ;;  %v8388_v31 = vpop.f32.mrb[62].mxu0 }
 0x617   : > { %v6272_v49 = vmul.f32 1.442695, %v6174_v22  ;;  %8759 = vpow2.f32 %v6274_v17  ;;  %v5038_v20 = vmax.f32 %v4960_v59, 0.0  ;;  %v5956_v30 = vrot.slane %v5955_v44, 1  ;;  %v4969_v43 = vpop.f32.mrb[63].mxu0 }
 0x618   : > { %v8758_v61 = vpop.eup %8757  ;;  %v7813_v0 = vrot.slane %v7656_v18, 2  ;;  %v7270_v53 = vrot.slane %v7269_v16, 2  ;;  %v5949_v29 = vrot.slane %v5948_v3, 1  ;;  %v5965_v37 = vsel %vm4400_vm0, %v13322_v33, -inf }
 0x619   : > { %8761 = vpow2.f32 %v6272_v49  ;;  %v6845_v34 = vmul.f32 %v8758_v61, %v13251_v46  ;;  %8481 = vmatprep.mubr.msk.f32.mxu1 %vm5043_vm1, %v5038_v20  ;;  %v13329_v19 = vadd.f32 %v13094_v26, %v5492_v51  ;;  %v5957_v50 = vmax.f32 %v5955_v44, %v5956_v30  ;;  %v8453_v52 = vpop.f32.mrb[40].mxu1 }
 0x61a   : > { %v7814_v24 = vsel %vm7770_vm7, %v7813_v0, %v13301_v25  ;;  %v7271_v47 = vadd.f32 %v7270_v53, %v7269_v16  ;;  %8482 = vmatmul.mubr.msk.f32.gmra.mrb[60].mxu1 %vm5043_vm1, %v5039_v62  ;;  %v5966_v48 = vrot.slane %v5965_v37, 4  ;;  %v5950_v63 = vmax.f32 %v5948_v3, %v5949_v29  ;;  %v5502_v9 = vpop.f32.mrb[41].mxu1 }
 0x61b   : > { %v7816_v46 = vsel %vm7773_vm8, %v7815_v14, %v7814_v24  ;;  %v7004_v38 = vmul.f32 %v13213_v39, %v6845_v34  ;;  %v5958_v42 = vsel %vm4400_vm0, %v13329_v19, -inf  ;;  %v6177_v25 = vsub.f32 %v13293_v32, %v5957_v50  ;;  %v8918_v39 = vld [vmem:[%s13875_s11] ss:$0 sm:$0xff] }
 0x61c   : > { %7884 = vst.msk [vmem:[%s12578_s29 + $0x18] sm:$0xff] %vm4400_vm0, %v7816_v46  ;;  %v7272_v40 = vrot.slane %v7271_v47, 1  ;;  %v5967_v60 = vmax.f32 %v5965_v37, %v5966_v48  ;;  %v5959_v27 = vrot.slane %v5958_v42, 4  ;;  %v6176_v36 = vsub.f32 %v13296_v21, %v5950_v63 }
 0x61d   : > { %v7260_v41 = vsel %vm4400_vm0, %v7004_v38, 0.0  ;;  %v4975_v14 = vadd.f32 %v8918_v39, %v8388_v31  ;;  %v4970_v56 = vadd.f32 %v8918_v39, %v4969_v43  ;;  %v6278_v58 = vmul.f32 1.442695, %v6177_v25  ;;  %v8456_v22 = vpop.f32.mrb[42].mxu1 }
 0x61e   : > { %v7273_v7 = vadd.f32 %v7272_v40, %v7271_v47  ;;  %v7261_v8 = vrot.slane %v7260_v41, 4  ;;  %v5968_v55 = vrot.slane %v5967_v60, 2  ;;  %v6276_v12 = vmul.f32 1.442695, %v6176_v36  ;;  %v13346_v62 = vpop.f32.mrb[43].mxu1 }
 0x61f   : > { %v5960_v17 = vmax.f32 %v5958_v42, %v5959_v27  ;;  %v5041_v32 = vmax.f32 %v4975_v14, 0.0  ;;  %v5040_v5 = vmax.f32 %v4970_v56, 0.0  ;;  %8763 = vpow2.f32 %v6278_v58 }
 0x620   : > { %v7524_v59 = vmul.f32 %v13265_v54, %v7273_v7  ;;  %v7262_v21 = vadd.f32 %v7261_v8, %v7260_v41  ;;  %v5969_v18 = vmax.f32 %v5967_v60, %v5968_v55  ;;  %8765 = vpow2.f32 %v6276_v12 }
 0x621   : > { %v13349_v16 = vpop.eup %8759  ;;  %v5961_v49 = vrot.slane %v5960_v17, 2  ;;  %8484 = vmatprep.mubr.msk.f32.mxu1 %vm5043_vm1, %v5040_v5  ;;  %v13353_v44 = vadd.f32 %v13094_v26, %v8453_v52  ;;  %v13356_v11 = vadd.f32 %v13094_v26, %v5502_v9  ;;  %v13372_v39 = vadd.f32 %v13094_v26, %v8456_v22 }
 0x622   : > { %v7595_v20 = vadd.f32 %v13277_v2, %v7524_v59  ;;  %v7263_v51 = vrot.slane %v7262_v21, 2  ;;  %v6577_v31 = vsel %vm4400_vm0, %v13349_v16, 0.0  ;;  %v5970_v61 = vrot.slane %v5969_v18, 1  ;;  %8485 = vmatmul.mubr.msk.f32.gmra.mrb[62].mxu1 %vm5043_vm1, %v5041_v32 }
 0x623   : > { %v13358_v3 = vpop.eup %8761  ;;  %v6578_v0 = vrot.slane %v6577_v31, 4  ;;  %v5962_v30 = vmax.f32 %v5960_v17, %v5961_v49  ;;  %v5979_v43 = vsel %vm4400_vm0, %v13353_v44, -inf  ;;  %v5972_v52 = vsel %vm4400_vm0, %v13356_v11, -inf }
 0x624   : > { %v6570_v53 = vsel %vm4400_vm0, %v13358_v3, 0.0  ;;  %v7659_v34 = vmax.f32 %v7595_v20, 0.0  ;;  %v7264_v29 = vadd.f32 %v7263_v51, %v7262_v21  ;;  %v5971_v24 = vmax.f32 %v5969_v18, %v5970_v61 }
 0x625   : > { %v6571_v37 = vrot.slane %v6570_v53, 4  ;;  %v6579_v47 = vadd.f32 %v6578_v0, %v6577_v31  ;;  %v5963_v50 = vrot.slane %v5962_v30, 1  ;;  %v5980_v48 = vrot.slane %v5979_v43, 4 }
 0x626   : > { %v7817_v46 = vrot.slane %v7659_v34, 7  ;;  %v7265_v38 = vrot.slane %v7264_v29, 1  ;;  %v6179_v42 = vsub.f32 %v13322_v33, %v5971_v24  ;;  %v5973_v60 = vrot.slane %v5972_v52, 4 }
 0x627   : > { %v6572_v63 = vadd.f32 %v6571_v37, %v6570_v53  ;;  %v6580_v9 = vrot.slane %v6579_v47, 2  ;;  %v5964_v40 = vmax.f32 %v5962_v30, %v5963_v50  ;;  %v5981_v25 = vmax.f32 %v5979_v43, %v5980_v48 }
 0x628   : > { %v7266_v27 = vadd.f32 %v7265_v38, %v7264_v29  ;;  %v6282_v36 = vmul.f32 1.442695, %v6179_v42  ;;  %v5974_v8 = vmax.f32 %v5972_v52, %v5973_v60  ;;  %v5993_v12 = vsel %vm4400_vm0, %v13372_v39, -inf }
 0x629   : > { %v6573_v41 = vrot.slane %v6572_v63, 2  ;;  %v6581_v14 = vadd.f32 %v6580_v9, %v6579_v47  ;;  %v6178_v56 = vsub.f32 %v13329_v19, %v5964_v40  ;;  %v5982_v7 = vrot.slane %v5981_v25, 2  ;;  %v13375_v58 = vpop.eup %8763 }
 0x62a   : > { %v7523_v55 = vmul.f32 %v13265_v54, %v7266_v27  ;;  %8767 = vpow2.f32 %v6282_v36  ;;  %v13380_v17 = vpop.eup %8765  ;;  %v6591_v22 = vsel %vm4400_vm0, %v13375_v58, 0.0  ;;  %v5975_v34 = vrot.slane %v5974_v8, 2 }
 0x62b   : > { %v6574_v33 = vadd.f32 %v6573_v41, %v6572_v63  ;;  %v6582_v32 = vrot.slane %v6581_v14, 1  ;;  %v6280_v5 = vmul.f32 1.442695, %v6178_v56  ;;  %v5983_v59 = vmax.f32 %v5981_v25, %v5982_v7  ;;  %v8459_v20 = vpop.f32.mrb[44].mxu1 }
 0x62c   : > { %v7594_v19 = vadd.f32 %v13277_v2, %v7523_v55  ;;  %v6592_v18 = vrot.slane %v6591_v22, 4  ;;  %v6584_v49 = vsel %vm4400_vm0, %v13380_v17, 0.0  ;;  %v5522_v0 = vpop.f32.mrb[45].mxu1  ;;  %v5994_v24 = vrot.slane %v5993_v12, 4 }
 0x62d   : > { %v6575_v21 = vrot.slane %v6574_v33, 1  ;;  %v6583_v51 = vadd.f32 %v6582_v32, %v6581_v14  ;;  %v6585_v31 = vrot.slane %v6584_v49, 4  ;;  %8769 = vpow2.f32 %v6280_v5 }
 0x62e   : > { %v5984_v61 = vrot.slane %v5983_v59, 1  ;;  %v7658_v53 = vmax.f32 %v7594_v19, 0.0  ;;  %v6593_v43 = vadd.f32 %v6592_v18, %v6591_v22  ;;  %v5976_v48 = vmax.f32 %v5974_v8, %v5975_v34 }
 0x62f   : > { %v6576_v30 = vadd.f32 %v6575_v21, %v6574_v33  ;;  %8771 = vrcp.f32 %v6583_v51  ;;  %v6586_v29 = vadd.f32 %v6585_v31, %v6584_v49  ;;  %v5995_v63 = vmax.f32 %v5993_v12, %v5994_v24 }
 0x630   : > { %v5985_v37 = vmax.f32 %v5983_v59, %v5984_v61  ;;  %v13388_v47 = vsel %vm7755_vm2, %v7817_v46, %v7658_v53  ;;  %v6594_v50 = vrot.slane %v6593_v43, 2  ;;  %v13393_v42 = vadd.f32 %v13094_v26, %v13346_v62 }
 0x631   : > { %8773 = vrcp.f32 %v6576_v30  ;;  %v6587_v52 = vrot.slane %v6586_v29, 2  ;;  %v5977_v40 = vrot.slane %v5976_v48, 1  ;;  %v13396_v25 = vadd.f32 %v13094_v26, %v8459_v20 }
 0x632   : > { %v6181_v38 = vsub.f32 %v13353_v44, %v5985_v37  ;;  %v6595_v9 = vadd.f32 %v6594_v50, %v6593_v43  ;;  %v13399_v60 = vadd.f32 %v13094_v26, %v5522_v0  ;;  %v5996_v41 = vrot.slane %v5995_v63, 2 }
 0x633   : > { %v6588_v46 = vadd.f32 %v6587_v52, %v6586_v29  ;;  %v5986_v36 = vsel %vm4400_vm0, %v13393_v42, -inf  ;;  %v5978_v56 = vmax.f32 %v5976_v48, %v5977_v40  ;;  %v6007_v7 = vsel %vm4400_vm0, %v13396_v25, -inf }
 0x634   : > { %v6286_v27 = vmul.f32 1.442695, %v6181_v38  ;;  %v13403_v44 = vpop.eup %8767  ;;  %v6596_v14 = vrot.slane %v6595_v9, 1  ;;  %v5987_v62 = vrot.slane %v5986_v36, 4  ;;  %v5997_v26 = vmax.f32 %v5995_v63, %v5996_v41 }
 0x635   : > { %v6589_v8 = vrot.slane %v6588_v46, 1  ;;  %v6605_v55 = vsel %vm4400_vm0, %v13403_v44, 0.0  ;;  %v6180_v32 = vsub.f32 %v13356_v11, %v5978_v56  ;;  %v6008_v21 = vrot.slane %v6007_v7, 4 }
 0x636   : > { %8775 = vpow2.f32 %v6286_v27  ;;  %v6597_v33 = vadd.f32 %v6596_v14, %v6595_v9  ;;  %v6606_v12 = vrot.slane %v6605_v55, 4  ;;  %v5988_v22 = vmax.f32 %v5986_v36, %v5987_v62 }
 0x637   : > { %v13410_v5 = vpop.eup %8769  ;;  %v6590_v59 = vadd.f32 %v6589_v8, %v6588_v46  ;;  %v5998_v19 = vrot.slane %v5997_v26, 1  ;;  %v6000_v18 = vsel %vm4400_vm0, %v13399_v60, -inf  ;;  %v6284_v51 = vmul.f32 1.442695, %v6180_v32 }
 0x638   : > { %8777 = vrcp.f32 %v6597_v33  ;;  %v6607_v49 = vadd.f32 %v6606_v12, %v6605_v55  ;;  %v6598_v20 = vsel %vm4400_vm0, %v13410_v5, 0.0  ;;  %v5989_v11 = vrot.slane %v5988_v22, 2 }
 0x639   : > { %v8772_v31 = vpop.eup %8771  ;;  %8779 = vrcp.f32 %v6590_v59  ;;  %v6599_v61 = vrot.slane %v6598_v20, 4  ;;  %v5999_v0 = vmax.f32 %v5997_v26, %v5998_v19  ;;  %v6009_v34 = vmax.f32 %v6007_v7, %v6008_v21 }
 0x63a   : > { %v6851_v30 = vmul.f32 %v8772_v31, %v13349_v16  ;;  %v6608_v43 = vrot.slane %v6607_v49, 2  ;;  %8781 = vpow2.f32 %v6284_v51  ;;  %v5990_v50 = vmax.f32 %v5988_v22, %v5989_v11 }
 0x63b   : > { %v8774_v53 = vpop.eup %8773  ;;  %v6600_v37 = vadd.f32 %v6599_v61, %v6598_v20  ;;  %v6183_v24 = vsub.f32 %v13372_v39, %v5999_v0  ;;  %v6010_v38 = vrot.slane %v6009_v34, 2  ;;  %v6001_v63 = vrot.slane %v6000_v18, 4 }
 0x63c   : > { %v6849_v29 = vmul.f32 %v8774_v53, %v13358_v3  ;;  %v7007_v48 = vmul.f32 %v13226_v13, %v6851_v30  ;;  %v6609_v52 = vadd.f32 %v6608_v43, %v6607_v49  ;;  %v5991_v27 = vrot.slane %v5990_v50, 1 }
 0x63d   : > { %v6601_v40 = vrot.slane %v6600_v37, 2  ;;  %v6290_v46 = vmul.f32 1.442695, %v6183_v24  ;;  %v6011_v36 = vmax.f32 %v6009_v34, %v6010_v38  ;;  %v13422_v14 = vmax.f32 %v6000_v18, %v6001_v63 }
 0x63e   : > { %v7006_v9 = vmul.f32 %v13222_v10, %v6849_v29  ;;  %v7281_v16 = vsel %vm4400_vm0, %v7007_v48, 0.0  ;;  %v6610_v41 = vrot.slane %v6609_v52, 1  ;;  %v5992_v8 = vmax.f32 %v5990_v50, %v5991_v27 }
 0x63f   : > { %v7282_v39 = vrot.slane %v7281_v16, 4  ;;  %v6602_v13 = vadd.f32 %v6601_v40, %v6600_v37  ;;  %8783 = vpow2.f32 %v6290_v46  ;;  %v6012_v12 = vrot.slane %v6011_v36, 1 }
 0x640   : > { %v13424_v3 = vpop.eup %8775  ;;  %v7274_v56 = vsel %vm4400_vm0, %v7006_v9, 0.0  ;;  %v6611_v7 = vadd.f32 %v6610_v41, %v6609_v52  ;;  %v6182_v59 = vsub.f32 %v13393_v42, %v5992_v8  ;;  %v6003_v19 = vrot.slane %v13422_v14, 2 }
 0x641   : > { %v7275_v62 = vrot.slane %v7274_v56, 4  ;;  %v6619_v10 = vsel %vm4400_vm0, %v13424_v3, 0.0  ;;  %v7283_v55 = vadd.f32 %v7282_v39, %v7281_v16  ;;  %v6603_v26 = vrot.slane %v6602_v13, 1 }
 0x642   : > { %v6620_v33 = vrot.slane %v6619_v10, 4  ;;  %v8778_v32 = vpop.eup %8777  ;;  %8785 = vrcp.f32 %v6611_v7  ;;  %v6288_v11 = vmul.f32 1.442695, %v6182_v59  ;;  %v6013_v53 = vmax.f32 %v6011_v36, %v6012_v12 }
 0x643   : > { %v7276_v22 = vadd.f32 %v7275_v62, %v7274_v56  ;;  %v8780_v21 = vpop.eup %8779  ;;  %v7284_v18 = vrot.slane %v7283_v55, 2  ;;  %v6855_v49 = vmul.f32 %v8778_v32, %v13375_v58  ;;  %v6604_v20 = vadd.f32 %v6603_v26, %v6602_v13 }
 0x644   : > { %v6621_v51 = vadd.f32 %v6620_v33, %v6619_v10  ;;  %v13432_v31 = vpop.eup %8781  ;;  %v6853_v0 = vmul.f32 %v8780_v21, %v13380_v17 }
 0x645   : > { %v7277_v61 = vrot.slane %v7276_v22, 2  ;;  %v7285_v30 = vadd.f32 %v7284_v18, %v7283_v55  ;;  %v7009_v43 = vmul.f32 %v13234_v15, %v6855_v49  ;;  %8787 = vrcp.f32 %v6604_v20 }
 0x646   : > { %v6622_v42 = vrot.slane %v6621_v51, 2  ;;  %v7008_v29 = vmul.f32 %v13231_v4, %v6853_v0  ;;  %v6612_v58 = vsel %vm4400_vm0, %v13432_v31, 0.0  ;;  %8789 = vpow2.f32 %v6288_v11 }
 0x647   : > { %v7278_v34 = vadd.f32 %v7277_v61, %v7276_v22  ;;  %v7286_v37 = vrot.slane %v7285_v30, 1  ;;  %v7295_v24 = vsel %vm4400_vm0, %v7009_v43, 0.0  ;;  %v6613_v48 = vrot.slane %v6612_v58, 4 }
 0x648   : > { %v6623_v50 = vadd.f32 %v6622_v42, %v6621_v51  ;;  %v7296_v52 = vrot.slane %v7295_v24, 4  ;;  %v7288_v38 = vsel %vm4400_vm0, %v7008_v29, 0.0  ;;  %v6185_v15 = vsub.f32 %v13396_v25, %v6013_v53 }
 0x649   : > { %v7279_v17 = vrot.slane %v7278_v34, 1  ;;  %v13442_v63 = vpop.eup %8783  ;;  %v7287_v9 = vadd.f32 %v7286_v37, %v7285_v30  ;;  %v7289_v40 = vrot.slane %v7288_v38, 4  ;;  %v6614_v46 = vadd.f32 %v6613_v48, %v6612_v58 }
 0x64a   : > { %v6624_v4 = vrot.slane %v6623_v50, 1  ;;  %v7297_v16 = vadd.f32 %v7296_v52, %v7295_v24  ;;  %v6633_v41 = vsel %vm4400_vm0, %v13442_v63, 0.0  ;;  %v6294_v36 = vmul.f32 1.442695, %v6185_v15 }
 0x64b   : > { %v7280_v27 = vadd.f32 %v7279_v17, %v7278_v34  ;;  %v7526_v39 = vmul.f32 %v13265_v54, %v7287_v9  ;;  %v7290_v56 = vadd.f32 %v7289_v40, %v7288_v38  ;;  %v6615_v62 = vrot.slane %v6614_v46, 2 }
 0x64c   : > { %v6625_v13 = vadd.f32 %v6624_v4, %v6623_v50  ;;  %v8786_v7 = vpop.eup %8785  ;;  %v7298_v10 = vrot.slane %v7297_v16, 2  ;;  %v6634_v8 = vrot.slane %v6633_v41, 4  ;;  %8791 = vpow2.f32 %v6294_v36 }
 0x64d   : > { %v7525_v25 = vmul.f32 %v13265_v54, %v7280_v27  ;;  %v7597_v55 = vadd.f32 %v13277_v2, %v7526_v39  ;;  %v7291_v26 = vrot.slane %v7290_v56, 2  ;;  %v6859_v33 = vmul.f32 %v8786_v7, %v13403_v44 }
 0x64e   : > { %8793 = vrcp.f32 %v6625_v13  ;;  %v7299_v32 = vadd.f32 %v7298_v10, %v7297_v16  ;;  %v6616_v22 = vadd.f32 %v6615_v62, %v6614_v46  ;;  %v6635_v59 = vadd.f32 %v6634_v8, %v6633_v41 }
 0x64f   : > { %v7596_v12 = vadd.f32 %v13277_v2, %v7525_v25  ;;  %v8788_v21 = vpop.eup %8787  ;;  %v7661_v18 = vmax.f32 %v7597_v55, 0.0  ;;  %v7292_v49 = vadd.f32 %v7291_v26, %v7290_v56  ;;  %v7011_v20 = vmul.f32 %v13242_v28, %v6859_v33 }
 0x650   : > { %v6004_v51 = vmax.f32 %v13422_v14, %v6003_v19  ;;  %v13453_v61 = vpop.eup %8789  ;;  %v7300_v11 = vrot.slane %v7299_v32, 1  ;;  %v6857_v53 = vmul.f32 %v8788_v21, %v13410_v5  ;;  %v6617_v44 = vrot.slane %v6616_v22, 1 }
 0x651   : > { %v7660_v0 = vmax.f32 %v7596_v12, 0.0  ;;  %v7821_v30 = vrot.slane %v7661_v18, 5  ;;  %v7293_v43 = vrot.slane %v7292_v49, 1  ;;  %v7309_v42 = vsel %vm4400_vm0, %v7011_v20, 0.0 }
 0x652   : > { %v6636_v34 = vrot.slane %v6635_v59, 2  ;;  %v7301_v58 = vadd.f32 %v7300_v11, %v7299_v32  ;;  %v7310_v37 = vrot.slane %v7309_v42, 4  ;;  %v7010_v24 = vmul.f32 %v13239_v35, %v6857_v53  ;;  %v8462_v48 = vpop.f32.mrb[46].mxu1 }
 0x653   : > { %v7819_v29 = vrot.slane %v7660_v0, 6  ;;  %v7294_v28 = vadd.f32 %v7293_v43, %v7292_v49  ;;  %v6618_v50 = vadd.f32 %v6617_v44, %v6616_v22  ;;  %v6626_v19 = vsel %vm4400_vm0, %v13453_v61, 0.0  ;;  %v13464_v15 = vpop.f32.mrb[47].mxu1 }
 0x654   : > { %v6637_v14 = vadd.f32 %v6636_v34, %v6635_v59  ;;  %v7528_v17 = vmul.f32 %v13265_v54, %v7301_v58  ;;  %v7311_v52 = vadd.f32 %v7310_v37, %v7309_v42  ;;  %v7302_v38 = vsel %vm4400_vm0, %v7010_v24, 0.0  ;;  %v706_v37 = vld [vmem:[%s12056_s27 + $0x158] sm:$0xff] }
 0x655   : > { %v7820_v5 = vsel %vm7758_vm3, %v7819_v29, %v13388_v47  ;;  %v7527_v9 = vmul.f32 %v13265_v54, %v7294_v28  ;;  %v7303_v40 = vrot.slane %v7302_v38, 4  ;;  %8795 = vrcp.f32 %v6618_v50 }
 0x656   : > { %v7822_v35 = vsel %vm7761_vm4, %v7821_v30, %v7820_v5  ;;  %v13468_v4 = vpop.eup %8791  ;;  %v7599_v46 = vadd.f32 %v13277_v2, %v7528_v17  ;;  %v7312_v27 = vrot.slane %v7311_v52, 2  ;;  %v6638_v16 = vrot.slane %v6637_v14, 1 }
 0x657   : > { %v6627_v47 = vrot.slane %v6626_v19, 4  ;;  %v7598_v36 = vadd.f32 %v13277_v2, %v7527_v9  ;;  %v7304_v39 = vadd.f32 %v7303_v40, %v7302_v38  ;;  %v6647_v56 = vsel %vm4400_vm0, %v13468_v4, 0.0 }
 0x658   : > { %v8794_v41 = vpop.eup %8793  ;;  %v6005_v13 = vrot.slane %v6004_v51, 1  ;;  %v7663_v62 = vmax.f32 %v7599_v46, 0.0  ;;  %v7313_v7 = vadd.f32 %v7312_v27, %v7311_v52  ;;  %v6639_v10 = vadd.f32 %v6638_v16, %v6637_v14 }
 0x659   : > { %v6863_v25 = vmul.f32 %v8794_v41, %v13424_v3  ;;  %v7662_v8 = vmax.f32 %v7598_v36, 0.0  ;;  %v7305_v55 = vrot.slane %v7304_v39, 2  ;;  %v6628_v26 = vadd.f32 %v6627_v47, %v6626_v19  ;;  %v13480_v3 = vld [vmem:[%s13877_s13] ss:$0 sm:$0xff] }
 0x65a   : > { %v6648_v33 = vrot.slane %v6647_v56, 4  ;;  %v7825_v12 = vrot.slane %v7663_v62, 3  ;;  %v7314_v32 = vrot.slane %v7313_v7, 1  ;;  %8797 = vrcp.f32 %v6639_v10 }
 0x65b   : > { %v7013_v22 = vmul.f32 %v13286_v6, %v6863_v25  ;;  %v7823_v59 = vrot.slane %v7662_v8, 4  ;;  %v7306_v21 = vadd.f32 %v7305_v55, %v7304_v39  ;;  %v6629_v18 = vrot.slane %v6628_v26, 2 }
 0x65c   : > { %v6649_v49 = vadd.f32 %v6648_v33, %v6647_v56  ;;  %v7315_v20 = vadd.f32 %v7314_v32, %v7313_v7  ;;  %v6006_v11 = vmax.f32 %v6004_v51, %v6005_v13  ;;  %v13483_v53 = vadd.f32 %v13480_v3, %v8462_v48 }
 0x65d   : > { %v7323_v0 = vsel %vm4400_vm0, %v7013_v22, 0.0  ;;  %v7824_v6 = vsel %vm7764_vm5, %v7823_v59, %v7822_v35  ;;  %v7307_v44 = vrot.slane %v7306_v21, 1  ;;  %v6630_v43 = vadd.f32 %v6629_v18, %v6628_v26 }
 0x65e   : > { %v7324_v30 = vrot.slane %v7323_v0, 4  ;;  %v7530_v42 = vmul.f32 %v13265_v54, %v7315_v20  ;;  %v7826_v34 = vsel %vm7767_vm6, %v7825_v12, %v7824_v6  ;;  %v6650_v29 = vrot.slane %v6649_v49, 2 }
 0x65f   : > { %v6184_v51 = vsub.f32 %v13399_v60, %v6006_v11  ;;  %v8796_v58 = vpop.eup %8795  ;;  %v7308_v24 = vadd.f32 %v7307_v44, %v7306_v21  ;;  %v6631_v50 = vrot.slane %v6630_v43, 1  ;;  %v6021_v14 = vsel %vm4400_vm0, %v13483_v53, -inf  ;;  %v14523_v60 = vld [vmem:[#allocation59_spill] sm:$0xff] }
 0x660   : > { %v7325_v28 = vadd.f32 %v7324_v30, %v7323_v0  ;;  %v7601_v19 = vadd.f32 %v13277_v2, %v7530_v42  ;;  %v6861_v48 = vmul.f32 %v8796_v58, %v13432_v31  ;;  %v6651_v5 = vadd.f32 %v6650_v29, %v6649_v49  ;;  %v705_v49 = vld [vmem:[%s12056_s27 + $0x150] sm:$0xff]  ;;  %v708_v42 = vld [vmem:[%s12056_s27 + $0x168] sm:$0xff] }
 0x661   : > { %v6292_v17 = vmul.f32 1.442695, %v6184_v51  ;;  %v7529_v52 = vmul.f32 %v13265_v54, %v7308_v24  ;;  %v6632_v9 = vadd.f32 %v6631_v50, %v6630_v43  ;;  %v6022_v35 = vrot.slane %v6021_v14, 4 }
 0x662   : > { %v7326_v38 = vrot.slane %v7325_v28, 2  ;;  %v6951_v40 = vadd.f32 %v14523_v60, %v706_v37  ;;  %v7012_v46 = vmul.f32 %v13247_v57, %v6861_v48  ;;  %v6652_v27 = vrot.slane %v6651_v5, 1  ;;  %v14524_v37 = vld [vmem:[#allocation3_spill] sm:$0xff] }
 0x663   : > { %8799 = vpow2.f32 %v6292_v17  ;;  %v7600_v16 = vadd.f32 %v13277_v2, %v7529_v52  ;;  %v6023_v41 = vmax.f32 %v6021_v14, %v6022_v35  ;;  %v7665_v31 = vmax.f32 %v7601_v19, 0.0  ;;  %v14525_v52 = vld [vmem:[#allocation83_spill] sm:$0xff] }
 0x664   : > { %v7327_v47 = vadd.f32 %v7326_v38, %v7325_v28  ;;  %8801 = vrcp.f32 %v6632_v9  ;;  %v8798_v36 = vpop.eup %8797  ;;  %v7316_v39 = vsel %vm4400_vm0, %v7012_v46, 0.0  ;;  %v6653_v56 = vadd.f32 %v6652_v27, %v6651_v5 }
 0x665   : > { %v13501_v13 = vadd.f32 %v13480_v3, %v13464_v15  ;;  %v7664_v62 = vmax.f32 %v7600_v16, 0.0  ;;  %v7317_v25 = vrot.slane %v7316_v39, 4  ;;  %v6867_v57 = vmul.f32 %v8798_v36, %v13442_v63 }
 0x666   : > { %v7328_v7 = vrot.slane %v7327_v47, 1  ;;  %8803 = vrcp.f32 %v6653_v56  ;;  %v6024_v10 = vrot.slane %v6023_v41, 2  ;;  %v7829_v32 = vrot.slane %v7665_v31, 1 }
 0x667   : > { %v6014_v8 = vsel %vm4400_vm0, %v13501_v13, -inf  ;;  %v7827_v55 = vrot.slane %v7664_v62, 2  ;;  %v7318_v33 = vadd.f32 %v7317_v25, %v7316_v39  ;;  %v7015_v12 = vmul.f32 %v6951_v40, %v6867_v57 }
 0x668   : > { %v7329_v26 = vadd.f32 %v7328_v7, %v7327_v47  ;;  %v6025_v15 = vmax.f32 %v6023_v41, %v6024_v10  ;;  %v6015_v22 = vrot.slane %v6014_v8, 4  ;;  %v6950_v24 = vadd.f32 %v14524_v37, %v705_v49 }
 0x669   : > { %v7828_v59 = vsel %vm7770_vm7, %v7827_v55, %v7826_v34  ;;  %v7319_v18 = vrot.slane %v7318_v33, 2  ;;  %v7337_v63 = vsel %vm4400_vm0, %v7015_v12, 0.0  ;;  %v6953_v38 = vadd.f32 %v14525_v52, %v708_v42 }
 0x66a   : > { %v7532_v21 = vmul.f32 %v13265_v54, %v7329_v26  ;;  %v7830_v20 = vsel %vm7773_vm8, %v7829_v32, %v7828_v59  ;;  %v7338_v0 = vrot.slane %v7337_v63, 4  ;;  %v6026_v11 = vrot.slane %v6025_v15, 1  ;;  %v13533_v59 = vld [vmem:[%s13878_s14] ss:$0 sm:$0xff] }
 0x66b   : > { %v6016_v6 = vmax.f32 %v6014_v8, %v6015_v22  ;;  %7885 = vst.msk [vmem:[%s12578_s29 + $0x20] sm:$0xff] %vm4400_vm0, %v7830_v20  ;;  %v7320_v30 = vadd.f32 %v7319_v18, %v7318_v33 }
 0x66c   : > { %v7603_v44 = vadd.f32 %v13277_v2, %v7532_v21  ;;  %v7339_v34 = vadd.f32 %v7338_v0, %v7337_v63  ;;  %v6027_v29 = vmax.f32 %v6025_v15, %v6026_v11  ;;  %v13543_v0 = vld [vmem:[%s13879_s15] ss:$0 sm:$0xff] }
 0x66d   : > { %v13514_v43 = vpop.eup %8799  ;;  %v6017_v51 = vrot.slane %v6016_v6, 2  ;;  %v7321_v50 = vrot.slane %v7320_v30, 1 }
 0x66e   : > { %v8802_v58 = vpop.eup %8801  ;;  %v7667_v28 = vmax.f32 %v7603_v44, 0.0  ;;  %v6640_v14 = vsel %vm4400_vm0, %v13514_v43, 0.0  ;;  %v7340_v19 = vrot.slane %v7339_v34, 2  ;;  %v6187_v17 = vsub.f32 %v13483_v53, %v6027_v29 }
 0x66f   : > { %v6865_v48 = vmul.f32 %v8802_v58, %v13453_v61  ;;  %v6641_v5 = vrot.slane %v6640_v14, 4  ;;  %v7322_v9 = vadd.f32 %v7321_v50, %v7320_v30  ;;  %v6018_v35 = vmax.f32 %v6016_v6, %v6017_v51  ;;  %v707_v30 = vld [vmem:[%s12056_s27 + $0x160] sm:$0xff] }
 0x670   : > { %v8804_v60 = vpop.eup %8803  ;;  %v7341_v40 = vadd.f32 %v7340_v19, %v7339_v34  ;;  %v6298_v16 = vmul.f32 1.442695, %v6187_v17  ;;  %v7831_v47 = vrot.slane %v7667_v28, 7 }
 0x671   : > { %v7014_v46 = vmul.f32 %v6950_v24, %v6865_v48  ;;  %v6642_v27 = vadd.f32 %v6641_v5, %v6640_v14  ;;  %v7531_v41 = vmul.f32 %v13265_v54, %v7322_v9  ;;  %v6871_v36 = vmul.f32 %v8804_v60, %v13468_v4  ;;  %v14526_v24 = vld [vmem:[#allocation18_spill] sm:$0xff] }
 0x672   : > { %v6019_v31 = vrot.slane %v6018_v35, 1  ;;  %v7342_v39 = vrot.slane %v7341_v40, 1  ;;  %8805 = vpow2.f32 %v6298_v16  ;;  %v6952_v28 = vadd.f32 %v14526_v24, %v707_v30 }
 0x673   : > { %v7330_v61 = vsel %vm4400_vm0, %v7014_v46, 0.0  ;;  %v6643_v56 = vrot.slane %v6642_v27, 2  ;;  %v7602_v53 = vadd.f32 %v13277_v2, %v7531_v41  ;;  %v7017_v7 = vmul.f32 %v6953_v38, %v6871_v36 }
 0x674   : > { %v7331_v62 = vrot.slane %v7330_v61, 4  ;;  %v6020_v25 = vmax.f32 %v6018_v35, %v6019_v31  ;;  %v7343_v26 = vadd.f32 %v7342_v39, %v7341_v40 }
 0x675   : > { %v6644_v57 = vadd.f32 %v6643_v56, %v6642_v27  ;;  %v7666_v10 = vmax.f32 %v7602_v53, 0.0  ;;  %v7351_v55 = vsel %vm4400_vm0, %v7017_v7, 0.0 }
 0x676   : > { %v7332_v8 = vadd.f32 %v7331_v62, %v7330_v61  ;;  %v6186_v54 = vsub.f32 %v13501_v13, %v6020_v25  ;;  %v7352_v15 = vrot.slane %v7351_v55, 4  ;;  %v7534_v21 = vmul.f32 %v13533_v59, %v7343_v26 }
 0x677   : > { %v6645_v4 = vrot.slane %v6644_v57, 1  ;;  %v7832_v33 = vsel %vm7755_vm2, %v7831_v47, %v7666_v10 }
 0x678   : > { %v7333_v12 = vrot.slane %v7332_v8, 2  ;;  %v6296_v32 = vmul.f32 1.442695, %v6186_v54  ;;  %v7353_v63 = vadd.f32 %v7352_v15, %v7351_v55  ;;  %v7605_v11 = vadd.f32 %v13543_v0, %v7534_v21  ;;  %v710_v21 = vld [vmem:[%s12056_s27 + $0x178] sm:$0xff] }
 0x679   : > { %v6646_v22 = vadd.f32 %v6645_v4, %v6644_v57 }
 0x67a   : > { %v7334_v2 = vadd.f32 %v7333_v12, %v7332_v8  ;;  %8807 = vpow2.f32 %v6296_v32  ;;  %v7354_v42 = vrot.slane %v7353_v63, 2  ;;  %v7669_v51 = vmax.f32 %v7605_v11, 0.0 }
 0x67b   : > { %8809 = vrcp.f32 %v6646_v22 }
 0x67c   : > { %v7335_v13 = vrot.slane %v7334_v2, 1  ;;  %v13536_v18 = vpop.eup %8805  ;;  %v7355_v48 = vadd.f32 %v7354_v42, %v7353_v63  ;;  %v7835_v46 = vrot.slane %v7669_v51, 5 }
 0x67d   : > { %v6661_v20 = vsel %vm4400_vm0, %v13536_v18, 0.0 }
 0x67e   : > { %v7336_v49 = vadd.f32 %v7335_v13, %v7334_v2  ;;  %v6662_v6 = vrot.slane %v6661_v20, 4  ;;  %v7356_v39 = vrot.slane %v7355_v48, 1 }
 0x680   : > { %v7533_v44 = vmul.f32 %v13533_v59, %v7336_v49  ;;  %v6663_v34 = vadd.f32 %v6662_v6, %v6661_v20  ;;  %v7357_v54 = vadd.f32 %v7356_v39, %v7355_v48 }
 0x682   : > { %v7604_v29 = vadd.f32 %v13543_v0, %v7533_v44  ;;  %v6664_v58 = vrot.slane %v6663_v34, 2  ;;  %v7536_v13 = vmul.f32 %v13533_v59, %v7357_v54 }
 0x683   : > { %v8465_v14 = vpop.f32.mrb[48].mxu1 }
 0x684   : > { %v13549_v37 = vpop.eup %8807  ;;  %v7668_v50 = vmax.f32 %v7604_v29, 0.0  ;;  %v6665_v5 = vadd.f32 %v6664_v58, %v6663_v34  ;;  %v5677_v52 = vadd.f32 %v13480_v3, %v8465_v14  ;;  %v5542_v38 = vpop.f32.mrb[49].mxu1  ;;  %v14527_v34 = vld [vmem:[#allocation40_spill] sm:$0xff] }
 0x685   : > { %v8810_v19 = vpop.eup %8809  ;;  %v6654_v17 = vsel %vm4400_vm0, %v13549_v37, 0.0  ;;  %v5676_v40 = vadd.f32 %v13480_v3, %v5542_v38  ;;  %v6955_v29 = vadd.f32 %v14527_v34, %v710_v21 }
 0x686   : > { %v7833_v9 = vrot.slane %v7668_v50, 6  ;;  %v6869_v35 = vmul.f32 %v8810_v19, %v13514_v43  ;;  %v6655_v60 = vrot.slane %v6654_v17, 4  ;;  %v6666_v27 = vrot.slane %v6665_v5, 1 }
 0x687   : > { %v6035_v16 = vsel %vm4400_vm0, %v5677_v52, -inf  ;;  %v6028_v53 = vsel %vm4400_vm0, %v5676_v40, -inf  ;;  %v7607_v50 = vadd.f32 %v13543_v0, %v7536_v13 }
 0x688   : > { %v7834_v47 = vsel %vm7758_vm3, %v7833_v9, %v7832_v33  ;;  %v7016_v41 = vmul.f32 %v6952_v28, %v6869_v35  ;;  %v6656_v36 = vadd.f32 %v6655_v60, %v6654_v17  ;;  %v6036_v31 = vrot.slane %v6035_v16, 4 }
 0x689   : > { %v13560_v61 = vsel %vm7761_vm4, %v7835_v46, %v7834_v47  ;;  %v6667_v56 = vadd.f32 %v6666_v27, %v6665_v5  ;;  %v6029_v25 = vrot.slane %v6028_v53, 4  ;;  %v7671_v47 = vmax.f32 %v7607_v50, 0.0 }
 0x68a   : > { %v7344_v43 = vsel %vm4400_vm0, %v7016_v41, 0.0  ;;  %v6657_v62 = vrot.slane %v6656_v36, 2  ;;  %v6037_v7 = vmax.f32 %v6035_v16, %v6036_v31  ;;  %v709_v16 = vld [vmem:[%s12056_s27 + $0x170] sm:$0xff] }
 0x68b   : > { %v7345_v57 = vrot.slane %v7344_v43, 4  ;;  %8811 = vrcp.f32 %v6667_v56  ;;  %v6030_v55 = vmax.f32 %v6028_v53, %v6029_v25 }
 0x68c   : > { %v6658_v10 = vadd.f32 %v6657_v62, %v6656_v36  ;;  %v6038_v8 = vrot.slane %v6037_v7, 2 }
 0x68d   : > { %v7346_v26 = vadd.f32 %v7345_v57, %v7344_v43  ;;  %v6031_v12 = vrot.slane %v6030_v55, 2  ;;  %v14528_v57 = vld [vmem:[#allocation11_spill] sm:$0xff] }
 0x68e   : > { %v6659_v4 = vrot.slane %v6658_v10, 1  ;;  %v6039_v33 = vmax.f32 %v6037_v7, %v6038_v8 }
 0x68f   : > { %v7347_v32 = vrot.slane %v7346_v26, 2  ;;  %v6032_v2 = vmax.f32 %v6030_v55, %v6031_v12  ;;  %v7839_v12 = vrot.slane %v7671_v47, 3 }
 0x690   : > { %v6660_v15 = vadd.f32 %v6659_v4, %v6658_v10  ;;  %v6040_v22 = vrot.slane %v6039_v33, 1  ;;  %v8468_v49 = vpop.f32.mrb[50].mxu1  ;;  %v6954_v10 = vadd.f32 %v14528_v57, %v709_v16 }
 0x691   : > { %v7348_v63 = vadd.f32 %v7347_v32, %v7346_v26  ;;  %v6033_v11 = vrot.slane %v6032_v2, 1  ;;  %v13567_v6 = vadd.f32 %v13480_v3, %v8468_v49  ;;  %v5552_v44 = vpop.f32.mrb[51].mxu1 }
 0x692   : > { %8813 = vrcp.f32 %v6660_v15  ;;  %v6041_v20 = vmax.f32 %v6039_v33, %v6040_v22  ;;  %v13570_v42 = vadd.f32 %v13480_v3, %v5552_v44 }
 0x693   : > { %v7349_v30 = vrot.slane %v7348_v63, 1  ;;  %v6034_v58 = vmax.f32 %v6032_v2, %v6033_v11  ;;  %v6049_v24 = vsel %vm4400_vm0, %v13567_v6, -inf }
 0x694   : > { %v6189_v51 = vsub.f32 %v5677_v52, %v6041_v20  ;;  %v6050_v19 = vrot.slane %v6049_v24, 4  ;;  %v6042_v48 = vsel %vm4400_vm0, %v13570_v42, -inf }
 0x695   : > { %v8812_v28 = vpop.eup %8811  ;;  %v7350_v14 = vadd.f32 %v7349_v30, %v7348_v63  ;;  %v6188_v38 = vsub.f32 %v5676_v40, %v6034_v58  ;;  %v6043_v9 = vrot.slane %v6042_v48, 4 }
 0x696   : > { %v6875_v5 = vmul.f32 %v8812_v28, %v13536_v18  ;;  %v6302_v17 = vmul.f32 1.442695, %v6189_v51  ;;  %v6051_v35 = vmax.f32 %v6049_v24, %v6050_v19 }
 0x697   : > { %v7535_v52 = vmul.f32 %v13533_v59, %v7350_v14  ;;  %v6300_v46 = vmul.f32 1.442695, %v6188_v38  ;;  %v6044_v27 = vmax.f32 %v6042_v48, %v6043_v9 }
 0x698   : > { %v7019_v60 = vmul.f32 %v6955_v29, %v6875_v5  ;;  %8815 = vpow2.f32 %v6302_v17  ;;  %v6052_v36 = vrot.slane %v6051_v35, 2  ;;  %v8471_v31 = vpop.f32.mrb[52].mxu1 }
 0x699   : > { %v7606_v41 = vadd.f32 %v13543_v0, %v7535_v52  ;;  %8817 = vpow2.f32 %v6300_v46  ;;  %v6045_v18 = vrot.slane %v6044_v27, 2  ;;  %v13584_v40 = vadd.f32 %v13480_v3, %v8471_v31  ;;  %v5562_v56 = vpop.f32.mrb[53].mxu1 }
 0x69a   : > { %v7365_v39 = vsel %vm4400_vm0, %v7019_v60, 0.0  ;;  %v6053_v62 = vmax.f32 %v6051_v35, %v6052_v36  ;;  %v13587_v7 = vadd.f32 %v13480_v3, %v5562_v56 }
 0x69b   : > { %v7670_v53 = vmax.f32 %v7606_v41, 0.0  ;;  %v7366_v43 = vrot.slane %v7365_v39, 4  ;;  %v6046_v8 = vmax.f32 %v6044_v27, %v6045_v18  ;;  %v6063_v55 = vsel %vm4400_vm0, %v13584_v40, -inf }
 0x69c   : > { %v8814_v25 = vpop.eup %8813  ;;  %v6054_v33 = vrot.slane %v6053_v62, 1  ;;  %v6064_v15 = vrot.slane %v6063_v55, 4  ;;  %v6056_v22 = vsel %vm4400_vm0, %v13587_v7, -inf }
 0x69d   : > { %v7837_v54 = vrot.slane %v7670_v53, 4  ;;  %v7367_v26 = vadd.f32 %v7366_v43, %v7365_v39  ;;  %v6873_v4 = vmul.f32 %v8814_v25, %v13549_v37  ;;  %v6047_v32 = vrot.slane %v6046_v8, 1 }
 0x69e   : > { %v6055_v63 = vmax.f32 %v6053_v62, %v6054_v33  ;;  %v6065_v11 = vmax.f32 %v6063_v55, %v6064_v15  ;;  %v6057_v44 = vrot.slane %v6056_v22, 4 }
 0x69f   : > { %v7838_v2 = vsel %vm7764_vm5, %v7837_v54, %v13560_v61  ;;  %v7368_v21 = vrot.slane %v7367_v26, 2  ;;  %v7018_v13 = vmul.f32 %v6954_v10, %v6873_v4  ;;  %v6048_v20 = vmax.f32 %v6046_v8, %v6047_v32 }
 0x6a0   : > { %v13598_v49 = vsel %vm7767_vm6, %v7839_v12, %v7838_v2  ;;  %v6191_v34 = vsub.f32 %v13567_v6, %v6055_v63  ;;  %v6066_v61 = vrot.slane %v6065_v11, 2  ;;  %v6058_v24 = vmax.f32 %v6056_v22, %v6057_v44 }
 0x6a1   : > { %v7369_v37 = vadd.f32 %v7368_v21, %v7367_v26  ;;  %v7358_v30 = vsel %vm4400_vm0, %v7018_v13, 0.0  ;;  %v6190_v58 = vsub.f32 %v13570_v42, %v6048_v20 }
 0x6a2   : > { %v13602_v29 = vpop.eup %8815  ;;  %v7359_v51 = vrot.slane %v7358_v30, 4  ;;  %v6306_v14 = vmul.f32 1.442695, %v6191_v34  ;;  %v6067_v38 = vmax.f32 %v6065_v11, %v6066_v61  ;;  %v6059_v52 = vrot.slane %v6058_v24, 2 }
 0x6a3   : > { %v7370_v28 = vrot.slane %v7369_v37, 1  ;;  %v6675_v50 = vsel %vm4400_vm0, %v13602_v29, 0.0  ;;  %v13607_v19 = vpop.eup %8817  ;;  %v6304_v17 = vmul.f32 1.442695, %v6190_v58 }
 0x6a4   : > { %v7360_v48 = vadd.f32 %v7359_v51, %v7358_v30  ;;  %v6676_v5 = vrot.slane %v6675_v50, 4  ;;  %v6668_v6 = vsel %vm4400_vm0, %v13607_v19, 0.0  ;;  %8819 = vpow2.f32 %v6306_v14  ;;  %v8474_v47 = vpop.f32.mrb[54].mxu1 }
 0x6a5   : > { %v7371_v9 = vadd.f32 %v7370_v28, %v7369_v37  ;;  %v6669_v60 = vrot.slane %v6668_v6, 4  ;;  %8821 = vpow2.f32 %v6304_v17  ;;  %v6068_v27 = vrot.slane %v6067_v38, 1  ;;  %v5572_v18 = vpop.f32.mrb[55].mxu1 }
 0x6a6   : > { %v7361_v42 = vrot.slane %v7360_v48, 2  ;;  %v6677_v35 = vadd.f32 %v6676_v5, %v6675_v50  ;;  %v6060_v16 = vmax.f32 %v6058_v24, %v6059_v52  ;;  %v13613_v39 = vadd.f32 %v13480_v3, %v8474_v47 }
 0x6a7   : > { %v7538_v46 = vmul.f32 %v13533_v59, %v7371_v9  ;;  %v6670_v31 = vadd.f32 %v6669_v60, %v6668_v6  ;;  %v6069_v56 = vmax.f32 %v6067_v38, %v6068_v27  ;;  %v13616_v43 = vadd.f32 %v13480_v3, %v5572_v18  ;;  %v712_v27 = vld [vmem:[%s12056_s27 + $0x188] sm:$0xff] }
 0x6a8   : > { %v7362_v41 = vadd.f32 %v7361_v42, %v7360_v48  ;;  %v6678_v36 = vrot.slane %v6677_v35, 2  ;;  %v6061_v53 = vrot.slane %v6060_v16, 1  ;;  %v6077_v10 = vsel %vm4400_vm0, %v13613_v39, -inf }
 0x6a9   : > { %v6671_v57 = vrot.slane %v6670_v31, 2  ;;  %v7609_v8 = vadd.f32 %v13543_v0, %v7538_v46  ;;  %v6193_v55 = vsub.f32 %v13584_v40, %v6069_v56  ;;  %v6078_v26 = vrot.slane %v6077_v10, 4  ;;  %v711_v56 = vld [vmem:[%s12056_s27 + $0x180] sm:$0xff] }
 0x6aa   : > { %v7363_v62 = vrot.slane %v7362_v41, 1  ;;  %v6679_v25 = vadd.f32 %v6678_v36, %v6677_v35  ;;  %v6062_v54 = vmax.f32 %v6060_v16, %v6061_v53  ;;  %v6070_v32 = vsel %vm4400_vm0, %v13616_v43, -inf }
 0x6ab   : > { %v6672_v12 = vadd.f32 %v6671_v57, %v6670_v31  ;;  %v6310_v15 = vmul.f32 1.442695, %v6193_v55  ;;  %v6079_v2 = vmax.f32 %v6077_v10, %v6078_v26  ;;  %v6071_v20 = vrot.slane %v6070_v32, 4  ;;  %v14529_v57 = vld [vmem:[#allocation84_spill] sm:$0xff] }
 0x6ac   : > { %v7364_v4 = vadd.f32 %v7363_v62, %v7362_v41  ;;  %v6680_v33 = vrot.slane %v6679_v25, 1  ;;  %v6192_v22 = vsub.f32 %v13587_v7, %v6062_v54  ;;  %v7673_v40 = vmax.f32 %v7609_v8, 0.0 }
 0x6ad   : > { %v6673_v63 = vrot.slane %v6672_v12, 1  ;;  %8823 = vpow2.f32 %v6310_v15  ;;  %v6080_v37 = vrot.slane %v6079_v2, 2  ;;  %v6072_v14 = vmax.f32 %v6070_v32, %v6071_v20 }
 0x6ae   : > { %v7537_v21 = vmul.f32 %v13533_v59, %v7364_v4  ;;  %v6681_v13 = vadd.f32 %v6680_v33, %v6679_v25  ;;  %v13626_v11 = vpop.eup %8819  ;;  %v6308_v44 = vmul.f32 1.442695, %v6192_v22  ;;  %v7843_v6 = vrot.slane %v7673_v40, 1 }
 0x6af   : > { %v13628_v30 = vpop.eup %8821  ;;  %v6674_v51 = vadd.f32 %v6673_v63, %v6672_v12  ;;  %v6689_v7 = vsel %vm4400_vm0, %v13626_v11, 0.0  ;;  %v6081_v24 = vmax.f32 %v6079_v2, %v6080_v37  ;;  %v6073_v9 = vrot.slane %v6072_v14, 2  ;;  %v14530_v12 = vld [vmem:[#allocation60_spill] sm:$0xff] }
 0x6b0   : > { %v7608_v34 = vadd.f32 %v13543_v0, %v7537_v21  ;;  %8825 = vrcp.f32 %v6681_v13  ;;  %v6690_v58 = vrot.slane %v6689_v7, 4  ;;  %v6682_v61 = vsel %vm4400_vm0, %v13628_v30, 0.0 }
 0x6b1   : > { %8827 = vpow2.f32 %v6308_v44  ;;  %v6683_v50 = vrot.slane %v6682_v61, 4  ;;  %v6082_v5 = vrot.slane %v6081_v24, 1  ;;  %v6074_v46 = vmax.f32 %v6072_v14, %v6073_v9 }
 0x6b2   : > { %v7672_v28 = vmax.f32 %v7608_v34, 0.0  ;;  %8829 = vrcp.f32 %v6674_v51  ;;  %v6691_v48 = vadd.f32 %v6690_v58, %v6689_v7  ;;  %v6956_v32 = vadd.f32 %v14530_v12, %v711_v56  ;;  %v14532_v56 = vld [vmem:[#allocation20_spill] sm:$0xff] }
 0x6b3   : > { %v6684_v38 = vadd.f32 %v6683_v50, %v6682_v61  ;;  %v6083_v42 = vmax.f32 %v6081_v24, %v6082_v5  ;;  %v6075_v31 = vrot.slane %v6074_v46, 1 }
 0x6b4   : > { %v7841_v17 = vrot.slane %v7672_v28, 2  ;;  %v6692_v52 = vrot.slane %v6691_v48, 2  ;;  %v714_v28 = vld [vmem:[%s12056_s27 + $0x198] sm:$0xff] }
 0x6b5   : > { %v6685_v60 = vrot.slane %v6684_v38, 2  ;;  %v6195_v41 = vsub.f32 %v13613_v39, %v6083_v42  ;;  %v6076_v55 = vmax.f32 %v6074_v46, %v6075_v31 }
 0x6b6   : > { %v7842_v35 = vsel %vm7770_vm7, %v7841_v17, %v13598_v49  ;;  %v6693_v47 = vadd.f32 %v6692_v52, %v6691_v48  ;;  %v6957_v49 = vadd.f32 %v14529_v57, %v712_v27 }
 0x6b7   : > { %v7844_v16 = vsel %vm7773_vm8, %v7843_v6, %v7842_v35  ;;  %v6686_v36 = vadd.f32 %v6685_v60, %v6684_v38  ;;  %v13642_v18 = vpop.eup %8823  ;;  %v6314_v62 = vmul.f32 1.442695, %v6195_v41  ;;  %v6194_v2 = vsub.f32 %v13616_v43, %v6076_v55  ;;  %v713_v38 = vld [vmem:[%s12056_s27 + $0x190] sm:$0xff]  ;;  %v14531_v60 = vld [vmem:[#allocation49_spill] sm:$0xff] }
 0x6b8   : > { %7886 = vst.msk [vmem:[%s12578_s29 + $0x28] sm:$0xff] %vm4400_vm0, %v7844_v16  ;;  %v6694_v53 = vrot.slane %v6693_v47, 1  ;;  %v6703_v8 = vsel %vm4400_vm0, %v13642_v18, 0.0  ;;  %v6959_v46 = vadd.f32 %v14531_v60, %v714_v28 }
 0x6b9   : > { %v6687_v10 = vrot.slane %v6686_v36, 1  ;;  %v6704_v4 = vrot.slane %v6703_v8, 4  ;;  %8831 = vpow2.f32 %v6314_v62  ;;  %v6312_v20 = vmul.f32 1.442695, %v6194_v2 }
 0x6ba   : > { %v8826_v25 = vpop.eup %8825  ;;  %v6695_v26 = vadd.f32 %v6694_v53, %v6693_v47  ;;  %v6958_v53 = vadd.f32 %v14532_v56, %v713_v38 }
 0x6bb   : > { %v13648_v54 = vpop.eup %8827  ;;  %v6879_v39 = vmul.f32 %v8826_v25, %v13602_v29  ;;  %v6688_v15 = vadd.f32 %v6687_v10, %v6686_v36  ;;  %v6705_v63 = vadd.f32 %v6704_v4, %v6703_v8 }
 0x6bc   : > { %v8830_v33 = vpop.eup %8829  ;;  %v6696_v22 = vsel %vm4400_vm0, %v13648_v54, 0.0  ;;  %8833 = vrcp.f32 %v6695_v26 }
 0x6bd   : > { %v7021_v21 = vmul.f32 %v6957_v49, %v6879_v39  ;;  %v6877_v13 = vmul.f32 %v8830_v33, %v13607_v19  ;;  %8835 = vrcp.f32 %v6688_v15  ;;  %v6697_v29 = vrot.slane %v6696_v22, 4 }
 0x6be   : > { %v6706_v37 = vrot.slane %v6705_v63, 2  ;;  %8837 = vpow2.f32 %v6312_v20 }
 0x6bf   : > { %v7379_v40 = vsel %vm4400_vm0, %v7021_v21, 0.0  ;;  %v7020_v44 = vmul.f32 %v6956_v32, %v6877_v13  ;;  %v6698_v51 = vadd.f32 %v6697_v29, %v6696_v22  ;;  %v716_v22 = vld [vmem:[%s12056_s27 + $0x1a8] sm:$0xff] }
 0x6c0   : > { %v7380_v34 = vrot.slane %v7379_v40, 4  ;;  %v6707_v43 = vadd.f32 %v6706_v37, %v6705_v63 }
 0x6c1   : > { %v7372_v7 = vsel %vm4400_vm0, %v7020_v44, 0.0  ;;  %v6699_v19 = vrot.slane %v6698_v51, 2 }
 0x6c2   : > { %v7381_v58 = vadd.f32 %v7380_v34, %v7379_v40  ;;  %v7373_v61 = vrot.slane %v7372_v7, 4  ;;  %v6708_v24 = vrot.slane %v6707_v43, 1 }
 0x6c3   : > { %v6700_v48 = vadd.f32 %v6699_v19, %v6698_v51  ;;  %v13659_v5 = vpop.eup %8831  ;;  %v715_v19 = vld [vmem:[%s12056_s27 + $0x1a0] sm:$0xff] }
 0x6c4   : > { %v7382_v50 = vrot.slane %v7381_v58, 2  ;;  %v7374_v14 = vadd.f32 %v7373_v61, %v7372_v7  ;;  %v6709_v17 = vadd.f32 %v6708_v24, %v6707_v43  ;;  %v6717_v42 = vsel %vm4400_vm0, %v13659_v5, 0.0  ;;  %v14533_v7 = vld [vmem:[#allocation61_spill] sm:$0xff] }
 0x6c5   : > { %v6701_v52 = vrot.slane %v6700_v48, 1  ;;  %v6718_v27 = vrot.slane %v6717_v42, 4  ;;  %v6961_v43 = vadd.f32 %v14533_v7, %v716_v22 }
 0x6c6   : > { %v7383_v9 = vadd.f32 %v7382_v50, %v7381_v58  ;;  %v7375_v6 = vrot.slane %v7374_v14, 2  ;;  %v8834_v35 = vpop.eup %8833  ;;  %8839 = vrcp.f32 %v6709_v17 }
 0x6c7   : > { %v8836_v16 = vpop.eup %8835  ;;  %v6883_v36 = vmul.f32 %v8834_v35, %v13626_v11  ;;  %v6702_v31 = vadd.f32 %v6701_v52, %v6700_v48  ;;  %v6719_v25 = vadd.f32 %v6718_v27, %v6717_v42  ;;  %v14534_v42 = vld [vmem:[#allocation33_spill] sm:$0xff] }
 0x6c8   : > { %v7384_v47 = vrot.slane %v7383_v9, 1  ;;  %v7376_v41 = vadd.f32 %v7375_v6, %v7374_v14  ;;  %v6881_v62 = vmul.f32 %v8836_v16, %v13628_v30  ;;  %v13668_v57 = vpop.eup %8837  ;;  %v6960_v35 = vadd.f32 %v14534_v42, %v715_v19 }
 0x6c9   : > { %v7023_v8 = vmul.f32 %v6959_v46, %v6883_v36  ;;  %8841 = vrcp.f32 %v6702_v31  ;;  %v6720_v39 = vrot.slane %v6719_v25, 2  ;;  %v6710_v26 = vsel %vm4400_vm0, %v13668_v57, 0.0 }
 0x6ca   : > { %v7385_v49 = vadd.f32 %v7384_v47, %v7383_v9  ;;  %v7377_v10 = vrot.slane %v7376_v41, 1  ;;  %v7022_v55 = vmul.f32 %v6958_v53, %v6881_v62  ;;  %v6711_v12 = vrot.slane %v6710_v26, 4  ;;  %v718_v53 = vld [vmem:[%s12056_s27 + $0x1b8] sm:$0xff] }
 0x6cb   : > { %v7393_v33 = vsel %vm4400_vm0, %v7023_v8, 0.0  ;;  %v6721_v15 = vadd.f32 %v6720_v39, %v6719_v25 }
 0x6cc   : > { %v7540_v11 = vmul.f32 %v13533_v59, %v7385_v49  ;;  %v7378_v4 = vadd.f32 %v7377_v10, %v7376_v41  ;;  %v7394_v30 = vrot.slane %v7393_v33, 4  ;;  %v7386_v32 = vsel %vm4400_vm0, %v7022_v55, 0.0 }
 0x6cd   : > { %v7387_v13 = vrot.slane %v7386_v32, 4  ;;  %v6712_v63 = vadd.f32 %v6711_v12, %v6710_v26  ;;  %v6722_v20 = vrot.slane %v6721_v15, 1 }
 0x6ce   : > { %v7611_v2 = vadd.f32 %v13543_v0, %v7540_v11  ;;  %v7539_v21 = vmul.f32 %v13533_v59, %v7378_v4  ;;  %v7395_v29 = vadd.f32 %v7394_v30, %v7393_v33  ;;  %v14535_v33 = vld [vmem:[#allocation28_spill] sm:$0xff] }
 0x6cf   : > { %v7388_v37 = vadd.f32 %v7387_v13, %v7386_v32  ;;  %v6713_v34 = vrot.slane %v6712_v63, 2  ;;  %v6723_v61 = vadd.f32 %v6722_v20, %v6721_v15  ;;  %v6963_v12 = vadd.f32 %v14535_v33, %v718_v53 }
 0x6d0   : > { %v7675_v40 = vmax.f32 %v7611_v2, 0.0  ;;  %v7610_v44 = vadd.f32 %v13543_v0, %v7539_v21  ;;  %v8840_v51 = vpop.eup %8839  ;;  %v7396_v58 = vrot.slane %v7395_v29, 2 }
 0x6d1   : > { %v7389_v50 = vrot.slane %v7388_v37, 2  ;;  %v6887_v14 = vmul.f32 %v8840_v51, %v13642_v18  ;;  %8843 = vrcp.f32 %v6723_v61  ;;  %v6714_v17 = vadd.f32 %v6713_v34, %v6712_v63  ;;  %v717_v61 = vld [vmem:[%s12056_s27 + $0x1b0] sm:$0xff] }
 0x6d2   : > { %v7845_v24 = vrot.slane %v7675_v40, 7  ;;  %v7674_v28 = vmax.f32 %v7610_v44, 0.0  ;;  %v7397_v48 = vadd.f32 %v7396_v58, %v7395_v29 }
 0x6d3   : > { %v8842_v38 = vpop.eup %8841  ;;  %v7390_v6 = vadd.f32 %v7389_v50, %v7388_v37  ;;  %v7025_v52 = vmul.f32 %v6961_v43, %v6887_v14  ;;  %v6715_v27 = vrot.slane %v6714_v17, 1 }
 0x6d4   : > { %v7846_v9 = vsel %vm7755_vm2, %v7845_v24, %v7674_v28  ;;  %v7398_v60 = vrot.slane %v7397_v48, 1  ;;  %v6885_v46 = vmul.f32 %v8842_v38, %v13648_v54 }
 0x6d5   : > { %v7391_v16 = vrot.slane %v7390_v6, 1  ;;  %v7407_v47 = vsel %vm4400_vm0, %v7025_v52, 0.0  ;;  %v6716_v31 = vadd.f32 %v6715_v27, %v6714_v17  ;;  %v8477_v10 = vpop.f32.mrb[56].mxu1 }
 0x6d6   : > { %v7399_v41 = vadd.f32 %v7398_v60, %v7397_v48  ;;  %v7408_v18 = vrot.slane %v7407_v47, 4  ;;  %v7024_v36 = vmul.f32 %v6960_v35, %v6885_v46  ;;  %v13691_v55 = vadd.f32 %v13480_v3, %v8477_v10  ;;  %v5582_v39 = vpop.f32.mrb[57].mxu1  ;;  %v14536_v35 = vld [vmem:[#allocation23_spill] sm:$0xff] }
 0x6d7   : > { %v7392_v56 = vadd.f32 %v7391_v16, %v7390_v6  ;;  %8845 = vrcp.f32 %v6716_v31  ;;  %v13695_v4 = vadd.f32 %v13480_v3, %v5582_v39  ;;  %v6962_v60 = vadd.f32 %v14536_v35, %v717_v61 }
 0x6d8   : > { %v7542_v62 = vmul.f32 %v13533_v59, %v7399_v41  ;;  %v7409_v25 = vadd.f32 %v7408_v18, %v7407_v47  ;;  %v7400_v49 = vsel %vm4400_vm0, %v7024_v36, 0.0  ;;  %v6091_v15 = vsel %vm4400_vm0, %v13691_v55, -inf }
 0x6d9   : > { %v7541_v8 = vmul.f32 %v13533_v59, %v7392_v56  ;;  %v7401_v54 = vrot.slane %v7400_v49, 4  ;;  %v6092_v13 = vrot.slane %v6091_v15, 4  ;;  %v6084_v63 = vsel %vm4400_vm0, %v13695_v4, -inf }
 0x6da   : > { %v7613_v26 = vadd.f32 %v13543_v0, %v7542_v62  ;;  %v7410_v11 = vrot.slane %v7409_v25, 2  ;;  %v6085_v44 = vrot.slane %v6084_v63, 4 }
 0x6db   : > { %v7612_v30 = vadd.f32 %v13543_v0, %v7541_v8  ;;  %v7402_v32 = vadd.f32 %v7401_v54, %v7400_v49  ;;  %v8844_v22 = vpop.eup %8843  ;;  %v6093_v34 = vmax.f32 %v6091_v15, %v6092_v13 }
 0x6dc   : > { %v7677_v2 = vmax.f32 %v7613_v26, 0.0  ;;  %v7411_v21 = vadd.f32 %v7410_v11, %v7409_v25  ;;  %v6891_v40 = vmul.f32 %v8844_v22, %v13659_v5  ;;  %v6086_v58 = vmax.f32 %v6084_v63, %v6085_v44 }
 0x6dd   : > { %v7676_v29 = vmax.f32 %v7612_v30, 0.0  ;;  %v7403_v20 = vrot.slane %v7402_v32, 2  ;;  %v6094_v28 = vrot.slane %v6093_v34, 2 }
 0x6de   : > { %v7412_v37 = vrot.slane %v7411_v21, 1  ;;  %v7027_v43 = vmul.f32 %v6963_v12, %v6891_v40  ;;  %v7849_v19 = vrot.slane %v7677_v2, 5  ;;  %v6087_v17 = vrot.slane %v6086_v58, 2 }
 0x6df   : > { %v7847_v51 = vrot.slane %v7676_v29, 6  ;;  %v7404_v7 = vadd.f32 %v7403_v20, %v7402_v32  ;;  %v6095_v42 = vmax.f32 %v6093_v34, %v6094_v28 }
 0x6e0   : > { %v7413_v24 = vadd.f32 %v7412_v37, %v7411_v21  ;;  %v7421_v48 = vsel %vm4400_vm0, %v7027_v43, 0.0  ;;  %v6088_v16 = vmax.f32 %v6086_v58, %v6087_v17 }
 0x6e1   : > { %v7848_v50 = vsel %vm7758_vm3, %v7847_v51, %v7846_v9  ;;  %v7405_v14 = vrot.slane %v7404_v7, 1  ;;  %v8846_v38 = vpop.eup %8845  ;;  %v7422_v52 = vrot.slane %v7421_v48, 4  ;;  %v6096_v41 = vrot.slane %v6095_v42, 1 }
 0x6e2   : > { %v7544_v5 = vmul.f32 %v13533_v59, %v7413_v24  ;;  %v7850_v6 = vsel %vm7761_vm4, %v7849_v19, %v7848_v50  ;;  %v6889_v27 = vmul.f32 %v8846_v38, %v13668_v57  ;;  %v6089_v31 = vrot.slane %v6088_v16, 1  ;;  %v8922_v24 = vld [vmem:[%s13877_s13] ss:$0 sm:$0xff] }
 0x6e3   : > { %v7406_v46 = vadd.f32 %v7405_v14, %v7404_v7  ;;  %v7423_v9 = vadd.f32 %v7422_v52, %v7421_v48  ;;  %v6097_v25 = vmax.f32 %v6095_v42, %v6096_v41 }
 0x6e4   : > { %v7615_v47 = vadd.f32 %v13543_v0, %v7544_v5  ;;  %v7026_v36 = vmul.f32 %v6962_v60, %v6889_v27  ;;  %v6090_v54 = vmax.f32 %v6088_v16, %v6089_v31 }
 0x6e5   : > { %v7543_v18 = vmul.f32 %v13533_v59, %v7406_v46  ;;  %v7424_v62 = vrot.slane %v7423_v9, 2  ;;  %v6197_v33 = vsub.f32 %v13691_v55, %v6097_v25 }
 0x6e6   : > { %v8480_v56 = vpop.f32.mrb[58].mxu1  ;;  %v7679_v53 = vmax.f32 %v7615_v47, 0.0  ;;  %v7414_v57 = vsel %vm4400_vm0, %v7026_v36, 0.0  ;;  %v6196_v30 = vsub.f32 %v13695_v4, %v6090_v54 }
 0x6e7   : > { %v13714_v49 = vadd.f32 %v13480_v3, %v8480_v56  ;;  %v5592_v10 = vpop.f32.mrb[59].mxu1  ;;  %v7614_v8 = vadd.f32 %v13543_v0, %v7543_v18  ;;  %v7425_v26 = vadd.f32 %v7424_v62, %v7423_v9  ;;  %v7415_v11 = vrot.slane %v7414_v57, 4 }
 0x6e8   : > { %v13719_v39 = vadd.f32 %v13480_v3, %v5592_v10  ;;  %v6318_v21 = vmul.f32 1.442695, %v6197_v33  ;;  %v7853_v63 = vrot.slane %v7679_v53, 3  ;;  %v6316_v29 = vmul.f32 1.442695, %v6196_v30 }
 0x6e9   : > { %v7678_v12 = vmax.f32 %v7614_v8, 0.0  ;;  %v6105_v32 = vsel %vm4400_vm0, %v13714_v49, -inf  ;;  %v7426_v22 = vrot.slane %v7425_v26, 1  ;;  %v7416_v2 = vadd.f32 %v7415_v11, %v7414_v57 }
 0x6ea   : > { %v6098_v15 = vsel %vm4400_vm0, %v13719_v39, -inf  ;;  %v6106_v13 = vrot.slane %v6105_v32, 4  ;;  %8847 = vpow2.f32 %v6318_v21 }
 0x6eb   : > { %v7851_v3 = vrot.slane %v7678_v12, 4  ;;  %v6099_v20 = vrot.slane %v6098_v15, 4  ;;  %v7427_v40 = vadd.f32 %v7426_v22, %v7425_v26  ;;  %v7417_v44 = vrot.slane %v7416_v2, 2 }
 0x6ec   : > { %v6107_v55 = vmax.f32 %v6105_v32, %v6106_v13  ;;  %8849 = vpow2.f32 %v6316_v29 }
 0x6ed   : > { %v7852_v4 = vsel %vm7764_vm5, %v7851_v3, %v7850_v6  ;;  %v6100_v37 = vmax.f32 %v6098_v15, %v6099_v20  ;;  %v8483_v34 = vpop.f32.mrb[60].mxu1  ;;  %v7546_v51 = vmul.f32 %v13533_v59, %v7427_v40  ;;  %v7418_v7 = vadd.f32 %v7417_v44, %v7416_v2 }
 0x6ee   : > { %v7854_v43 = vsel %vm7767_vm6, %v7853_v63, %v7852_v4  ;;  %v6108_v58 = vrot.slane %v6107_v55, 2  ;;  %v5602_v61 = vpop.f32.mrb[61].mxu1  ;;  %v13733_v28 = vadd.f32 %v8922_v24, %v8483_v34 }
 0x6ef   : > { %v6101_v19 = vrot.slane %v6100_v37, 2  ;;  %v13735_v50 = vadd.f32 %v8922_v24, %v5602_v61  ;;  %v7617_v14 = vadd.f32 %v13543_v0, %v7546_v51  ;;  %v7419_v48 = vrot.slane %v7418_v7, 1 }
 0x6f0   : > { %v6109_v17 = vmax.f32 %v6107_v55, %v6108_v58  ;;  %v6119_v5 = vsel %vm4400_vm0, %v13733_v28, -inf }
 0x6f1   : > { %v6102_v38 = vmax.f32 %v6100_v37, %v6101_v19  ;;  %v6112_v6 = vsel %vm4400_vm0, %v13735_v50, -inf  ;;  %v7681_v52 = vmax.f32 %v7617_v14, 0.0  ;;  %v7420_v42 = vadd.f32 %v7419_v48, %v7418_v7 }
 0x6f2   : > { %v6110_v35 = vrot.slane %v6109_v17, 1  ;;  %v6120_v60 = vrot.slane %v6119_v5, 4  ;;  %v6113_v27 = vrot.slane %v6112_v6, 4 }
 0x6f3   : > { %v6103_v46 = vrot.slane %v6102_v38, 1  ;;  %v7545_v16 = vmul.f32 %v13533_v59, %v7420_v42  ;;  %v7857_v41 = vrot.slane %v7681_v52, 1 }
 0x6f4   : > { %v6111_v47 = vmax.f32 %v6109_v17, %v6110_v35  ;;  %v6121_v9 = vmax.f32 %v6119_v5, %v6120_v60  ;;  %v6114_v36 = vmax.f32 %v6112_v6, %v6113_v27  ;;  %v13743_v56 = vpop.eup %8847 }
 0x6f5   : > { %v6104_v18 = vmax.f32 %v6102_v38, %v6103_v46  ;;  %v8486_v31 = vpop.f32.mrb[62].mxu1  ;;  %v7616_v53 = vadd.f32 %v13543_v0, %v7545_v16  ;;  %v6731_v59 = vsel %vm4400_vm0, %v13743_v56, 0.0 }
 0x6f6   : > { %v6199_v62 = vsub.f32 %v13714_v49, %v6111_v47  ;;  %v6122_v25 = vrot.slane %v6121_v9, 2  ;;  %v13747_v10 = vadd.f32 %v8922_v24, %v8486_v31  ;;  %v5612_v8 = vpop.f32.mrb[63].mxu1  ;;  %v13749_v57 = vpop.eup %8849  ;;  %v6115_v26 = vrot.slane %v6114_v36, 2 }
 0x6f7   : > { %v6198_v54 = vsub.f32 %v13719_v39, %v6104_v18  ;;  %v13754_v11 = vadd.f32 %v8922_v24, %v5612_v8  ;;  %v7680_v33 = vmax.f32 %v7616_v53, 0.0  ;;  %v6732_v12 = vrot.slane %v6731_v59, 4 }
 0x6f8   : > { %v6724_v0 = vsel %vm4400_vm0, %v13749_v57, 0.0  ;;  %v6322_v49 = vmul.f32 1.442695, %v6199_v62  ;;  %v6123_v15 = vmax.f32 %v6121_v9, %v6122_v25  ;;  %v6116_v22 = vmax.f32 %v6114_v36, %v6115_v26 }
 0x6f9   : > { %v6725_v30 = vrot.slane %v6724_v0, 4  ;;  %v6320_v32 = vmul.f32 1.442695, %v6198_v54  ;;  %v7855_v2 = vrot.slane %v7680_v33, 2  ;;  %v6733_v21 = vadd.f32 %v6732_v12, %v6731_v59  ;;  %v720_v59 = vld [vmem:[%s12056_s27 + $0x1c8] sm:$0xff] }
 0x6fa   : > { %8851 = vpow2.f32 %v6322_v49  ;;  %v6133_v39 = vsel %vm4400_vm0, %v13747_v10, -inf  ;;  %v6124_v63 = vrot.slane %v6123_v15, 1  ;;  %v6117_v3 = vrot.slane %v6116_v22, 1 }
 0x6fb   : > { %v6726_v13 = vadd.f32 %v6725_v30, %v6724_v0  ;;  %8853 = vpow2.f32 %v6320_v32  ;;  %v7856_v29 = vsel %vm7770_vm7, %v7855_v2, %v7854_v43  ;;  %v6734_v20 = vrot.slane %v6733_v21, 2  ;;  %v719_v0 = vld [vmem:[%s12056_s27 + $0x1c0] sm:$0xff] }
 0x6fc   : > { %v6134_v40 = vrot.slane %v6133_v39, 4  ;;  %v6126_v44 = vsel %vm4400_vm0, %v13754_v11, -inf  ;;  %v7858_v55 = vsel %vm7773_vm8, %v7857_v41, %v7856_v29  ;;  %v6125_v37 = vmax.f32 %v6123_v15, %v6124_v63  ;;  %v14537_v63 = vld [vmem:[#allocation73_spill] sm:$0xff] }
 0x6fd   : > { %v6727_v4 = vrot.slane %v6726_v13, 2  ;;  %v6118_v34 = vmax.f32 %v6116_v22, %v6117_v3  ;;  %7887 = vst.msk [vmem:[%s12578_s29 + $0x30] sm:$0xff] %vm4400_vm0, %v7858_v55  ;;  %v6735_v51 = vadd.f32 %v6734_v20, %v6733_v21  ;;  %v6127_v58 = vrot.slane %v6126_v44, 4 }
 0x6fe   : > { %v6135_v7 = vmax.f32 %v6133_v39, %v6134_v40  ;;  %v6201_v19 = vsub.f32 %v13733_v28, %v6125_v37  ;;  %v6965_v15 = vadd.f32 %v12352_v45, %v720_v59  ;;  %v6964_v3 = vadd.f32 %v14537_v63, %v719_v0 }
 0x6ff   : > { %v6728_v61 = vadd.f32 %v6727_v4, %v6726_v13  ;;  %v6200_v43 = vsub.f32 %v13735_v50, %v6118_v34  ;;  %v6736_v24 = vrot.slane %v6735_v51, 1  ;;  %v6128_v48 = vmax.f32 %v6126_v44, %v6127_v58 }
 0x700   : > { %v6136_v14 = vrot.slane %v6135_v7, 2  ;;  %v6326_v38 = vmul.f32 1.442695, %v6201_v19 }
 0x701   : > { %v6729_v17 = vrot.slane %v6728_v61, 1  ;;  %v6737_v5 = vadd.f32 %v6736_v24, %v6735_v51  ;;  %v6324_v6 = vmul.f32 1.442695, %v6200_v43  ;;  %v6129_v42 = vrot.slane %v6128_v48, 2 }
 0x702   : > { %v6137_v52 = vmax.f32 %v6135_v7, %v6136_v14  ;;  %8855 = vpow2.f32 %v6326_v38 }
 0x703   : > { %v6730_v35 = vadd.f32 %v6729_v17, %v6728_v61  ;;  %8857 = vrcp.f32 %v6737_v5  ;;  %v6130_v27 = vmax.f32 %v6128_v48, %v6129_v42  ;;  %v721_v42 = vld [vmem:[%s12056_s27 + $0x1d0] sm:$0xff] }
 0x704   : > { %v13768_v60 = vpop.eup %8851  ;;  %v6138_v46 = vrot.slane %v6137_v52, 1 }
 0x705   : > { %v13770_v28 = vpop.eup %8853  ;;  %8859 = vrcp.f32 %v6730_v35  ;;  %v6745_v50 = vsel %vm4400_vm0, %v13768_v60, 0.0  ;;  %v6131_v18 = vrot.slane %v6130_v27, 1 }
 0x706   : > { %v6746_v16 = vrot.slane %v6745_v50, 4  ;;  %v6738_v47 = vsel %vm4400_vm0, %v13770_v28, 0.0  ;;  %8861 = vpow2.f32 %v6324_v6  ;;  %v6139_v9 = vmax.f32 %v6137_v52, %v6138_v46 }
 0x707   : > { %v6739_v41 = vrot.slane %v6738_v47, 4  ;;  %v6132_v62 = vmax.f32 %v6130_v27, %v6131_v18  ;;  %v722_v27 = vld [vmem:[%s12056_s27 + $0x1d8] sm:$0xff] }
 0x708   : > { %v6747_v36 = vadd.f32 %v6746_v16, %v6745_v50  ;;  %v6203_v31 = vsub.f32 %v13747_v10, %v6139_v9  ;;  %v6967_v59 = vadd.f32 %v12568_v1, %v722_v27 }
 0x709   : > { %v6740_v53 = vadd.f32 %v6739_v41, %v6738_v47  ;;  %v6202_v26 = vsub.f32 %v13754_v11, %v6132_v62 }
 0x70a   : > { %v6748_v25 = vrot.slane %v6747_v36, 2  ;;  %v6330_v8 = vmul.f32 1.442695, %v6203_v31  ;;  %v6966_v31 = vadd.f32 %v12535_v23, %v721_v42  ;;  %v13811_v23 = vld [vmem:[%s13878_s14] ss:$0 sm:$0xff] }
 0x70b   : > { %v6741_v54 = vrot.slane %v6740_v53, 2  ;;  %v6328_v30 = vmul.f32 1.442695, %v6202_v26 }
 0x70c   : > { %v6749_v33 = vadd.f32 %v6748_v25, %v6747_v36  ;;  %8863 = vpow2.f32 %v6330_v8  ;;  %v13779_v12 = vpop.eup %8855 }
 0x70d   : > { %v6742_v49 = vadd.f32 %v6741_v54, %v6740_v53  ;;  %v8858_v32 = vpop.eup %8857  ;;  %v6759_v10 = vsel %vm4400_vm0, %v13779_v12, 0.0  ;;  %8865 = vpow2.f32 %v6328_v30 }
 0x70e   : > { %v6750_v22 = vrot.slane %v6749_v33, 1  ;;  %v6895_v21 = vmul.f32 %v8858_v32, %v13743_v56  ;;  %v6760_v13 = vrot.slane %v6759_v10, 4 }
 0x70f   : > { %v8860_v2 = vpop.eup %8859  ;;  %v6743_v39 = vrot.slane %v6742_v49, 1 }
 0x710   : > { %v13786_v11 = vpop.eup %8861  ;;  %v6893_v29 = vmul.f32 %v8860_v2, %v13749_v57  ;;  %v6751_v20 = vadd.f32 %v6750_v22, %v6749_v33  ;;  %v7029_v40 = vmul.f32 %v6965_v15, %v6895_v21  ;;  %v6761_v45 = vadd.f32 %v6760_v13, %v6759_v10 }
 0x711   : > { %v6744_v44 = vadd.f32 %v6743_v39, %v6742_v49  ;;  %v6752_v55 = vsel %vm4400_vm0, %v13786_v11, 0.0  ;;  %v13819_v39 = vld [vmem:[%s13879_s15] ss:$0 sm:$0xff] }
 0x712   : > { %v7028_v4 = vmul.f32 %v6964_v3, %v6893_v29  ;;  %8867 = vrcp.f32 %v6751_v20  ;;  %v6753_v37 = vrot.slane %v6752_v55, 4  ;;  %v7435_v56 = vsel %vm4400_vm0, %v7029_v40, 0.0  ;;  %v724_v20 = vld [vmem:[%s12056_s27 + $0x1e8] sm:$0xff] }
 0x713   : > { %8869 = vrcp.f32 %v6744_v44  ;;  %v6762_v34 = vrot.slane %v6761_v45, 2  ;;  %v7436_v51 = vrot.slane %v7435_v56, 4 }
 0x714   : > { %v7428_v7 = vsel %vm4400_vm0, %v7028_v4, 0.0  ;;  %v6754_v58 = vadd.f32 %v6753_v37, %v6752_v55 }
 0x715   : > { %v7429_v57 = vrot.slane %v7428_v7, 4  ;;  %v6763_v61 = vadd.f32 %v6762_v34, %v6761_v45  ;;  %v7437_v43 = vadd.f32 %v7436_v51, %v7435_v56 }
 0x716   : > { %v13794_v19 = vpop.eup %8863  ;;  %v6755_v24 = vrot.slane %v6754_v58, 2 }
 0x717   : > { %v7430_v14 = vadd.f32 %v7429_v57, %v7428_v7  ;;  %v6764_v48 = vrot.slane %v6763_v61, 1  ;;  %v6773_v17 = vsel %vm4400_vm0, %v13794_v19, 0.0  ;;  %v7438_v38 = vrot.slane %v7437_v43, 2  ;;  %v13798_v52 = vpop.eup %8865  ;;  %v723_v7 = vld [vmem:[%s12056_s27 + $0x1e0] sm:$0xff] }
 0x718   : > { %v6756_v5 = vadd.f32 %v6755_v24, %v6754_v58  ;;  %v6774_v6 = vrot.slane %v6773_v17, 4  ;;  %v6766_v9 = vsel %vm4400_vm0, %v13798_v52, 0.0  ;;  %v14538_v58 = vld [vmem:[#allocation24_spill] sm:$0xff] }
 0x719   : > { %v7431_v35 = vrot.slane %v7430_v14, 2  ;;  %v6765_v46 = vadd.f32 %v6764_v48, %v6763_v61  ;;  %v7439_v50 = vadd.f32 %v7438_v38, %v7437_v43  ;;  %v6767_v18 = vrot.slane %v6766_v9, 4 }
 0x71a   : > { %v6757_v16 = vrot.slane %v6756_v5, 1  ;;  %v6775_v47 = vadd.f32 %v6774_v6, %v6773_v17  ;;  %v6969_v57 = vadd.f32 %v14538_v58, %v724_v20  ;;  %v14539_v6 = vld [vmem:[#allocation64_spill] sm:$0xff] }
 0x71b   : > { %v7432_v41 = vadd.f32 %v7431_v35, %v7430_v14  ;;  %8871 = vrcp.f32 %v6765_v46  ;;  %v7440_v53 = vrot.slane %v7439_v50, 1  ;;  %v6768_v33 = vadd.f32 %v6767_v18, %v6766_v9 }
 0x71c   : > { %v8868_v36 = vpop.eup %8867  ;;  %v6758_v62 = vadd.f32 %v6757_v16, %v6756_v5  ;;  %v6776_v25 = vrot.slane %v6775_v47, 2  ;;  %v6968_v42 = vadd.f32 %v14539_v6, %v723_v7 }
 0x71d   : > { %v8870_v8 = vpop.eup %8869  ;;  %v7433_v54 = vrot.slane %v7432_v41, 1  ;;  %v6899_v26 = vmul.f32 %v8868_v36, %v13768_v60  ;;  %v7441_v0 = vadd.f32 %v7440_v53, %v7439_v50  ;;  %v6769_v22 = vrot.slane %v6768_v33, 2 }
 0x71e   : > { %v6897_v49 = vmul.f32 %v8870_v8, %v13770_v28  ;;  %8873 = vrcp.f32 %v6758_v62  ;;  %v6777_v30 = vadd.f32 %v6776_v25, %v6775_v47  ;;  %v725_v8 = vld [vmem:[%s12056_s27 + $0x1f0] sm:$0xff] }
 0x71f   : > { %v7434_v32 = vadd.f32 %v7433_v54, %v7432_v41  ;;  %v7031_v15 = vmul.f32 %v6967_v59, %v6899_v26  ;;  %v7548_v1 = vmul.f32 %v13811_v23, %v7441_v0  ;;  %v6770_v28 = vadd.f32 %v6769_v22, %v6768_v33  ;;  %v14540_v59 = vld [vmem:[#allocation88_spill] sm:$0xff] }
 0x720   : > { %v7030_v10 = vmul.f32 %v6966_v31, %v6897_v49  ;;  %v6778_v2 = vrot.slane %v6777_v30, 1 }
 0x721   : > { %v7547_v60 = vmul.f32 %v13811_v23, %v7434_v32  ;;  %v7449_v21 = vsel %vm4400_vm0, %v7031_v15, 0.0  ;;  %v7619_v13 = vadd.f32 %v13819_v39, %v7548_v1  ;;  %v6771_v45 = vrot.slane %v6770_v28, 1  ;;  %v14541_v1 = vld [vmem:[#allocation12_spill] sm:$0xff] }
 0x722   : > { %v7450_v63 = vrot.slane %v7449_v21, 4  ;;  %v7442_v3 = vsel %vm4400_vm0, %v7030_v10, 0.0  ;;  %v6779_v29 = vadd.f32 %v6778_v2, %v6777_v30  ;;  %v6970_v10 = vadd.f32 %v14541_v1, %v725_v8 }
 0x723   : > { %v7618_v40 = vadd.f32 %v13819_v39, %v7547_v60  ;;  %v7443_v44 = vrot.slane %v7442_v3, 4  ;;  %v7683_v55 = vmax.f32 %v7619_v13, 0.0  ;;  %v6772_v51 = vadd.f32 %v6771_v45, %v6770_v28 }
 0x724   : > { %v7451_v4 = vadd.f32 %v7450_v63, %v7449_v21  ;;  %8875 = vrcp.f32 %v6779_v29 }
 0x725   : > { %v8872_v37 = vpop.eup %8871  ;;  %v7682_v56 = vmax.f32 %v7618_v40, 0.0  ;;  %v7444_v34 = vadd.f32 %v7443_v44, %v7442_v3  ;;  %v7859_v61 = vrot.slane %v7683_v55, 7  ;;  %8877 = vrcp.f32 %v6772_v51 }
 0x726   : > { %v7452_v43 = vrot.slane %v7451_v4, 2  ;;  %v6903_v24 = vmul.f32 %v8872_v37, %v13779_v12  ;;  %v726_v12 = vld [vmem:[%s12056_s27 + $0x1f8] sm:$0xff] }
 0x727   : > { %v7445_v14 = vrot.slane %v7444_v34, 2  ;;  %v7860_v17 = vsel %vm7755_vm2, %v7859_v61, %v7682_v56  ;;  %v6971_v54 = vadd.f32 %v14540_v59, %v726_v12 }
 0x728   : > { %v8874_v48 = vpop.eup %8873  ;;  %v7453_v38 = vadd.f32 %v7452_v43, %v7451_v4  ;;  %v7033_v5 = vmul.f32 %v6969_v57, %v6903_v24 }
 0x729   : > { %v7446_v35 = vadd.f32 %v7445_v14, %v7444_v34  ;;  %v6901_v46 = vmul.f32 %v8874_v48, %v13786_v11 }
 0x72a   : > { %v7454_v27 = vrot.slane %v7453_v38, 1  ;;  %v7463_v50 = vsel %vm4400_vm0, %v7033_v5, 0.0 }
 0x72b   : > { %v7447_v16 = vrot.slane %v7446_v35, 1  ;;  %v7464_v47 = vrot.slane %v7463_v50, 4  ;;  %v7032_v9 = vmul.f32 %v6968_v42, %v6901_v46 }
 0x72c   : > { %v7455_v41 = vadd.f32 %v7454_v27, %v7453_v38 }
 0x72d   : > { %v7448_v18 = vadd.f32 %v7447_v16, %v7446_v35  ;;  %v7465_v36 = vadd.f32 %v7464_v47, %v7463_v50  ;;  %v7456_v31 = vsel %vm4400_vm0, %v7032_v9, 0.0 }
 0x72e   : > { %v8876_v53 = vpop.eup %8875  ;;  %v7550_v62 = vmul.f32 %v13811_v23, %v7455_v41  ;;  %v7457_v25 = vrot.slane %v7456_v31, 4 }
 0x72f   : > { %v7549_v11 = vmul.f32 %v13811_v23, %v7448_v18  ;;  %v7466_v26 = vrot.slane %v7465_v36, 2  ;;  %v6907_v33 = vmul.f32 %v8876_v53, %v13794_v19  ;;  %v8878_v30 = vpop.eup %8877 }
 0x730   : > { %v7621_v0 = vadd.f32 %v13819_v39, %v7550_v62  ;;  %v7458_v49 = vadd.f32 %v7457_v25, %v7456_v31  ;;  %v6905_v21 = vmul.f32 %v8878_v30, %v13798_v52 }
 0x731   : > { %v7620_v32 = vadd.f32 %v13819_v39, %v7549_v11  ;;  %v7467_v15 = vadd.f32 %v7466_v26, %v7465_v36  ;;  %v7035_v22 = vmul.f32 %v6971_v54, %v6907_v33 }
 0x732   : > { %v7685_v2 = vmax.f32 %v7621_v0, 0.0  ;;  %v7459_v60 = vrot.slane %v7458_v49, 2  ;;  %v7034_v29 = vmul.f32 %v6970_v10, %v6905_v21 }
 0x733   : > { %v7684_v28 = vmax.f32 %v7620_v32, 0.0  ;;  %v7468_v13 = vrot.slane %v7467_v15, 1  ;;  %v7477_v63 = vsel %vm4400_vm0, %v7035_v22, 0.0 }
 0x734   : > { %v7460_v3 = vadd.f32 %v7459_v60, %v7458_v49  ;;  %v7478_v19 = vrot.slane %v7477_v63, 4  ;;  %v7863_v44 = vrot.slane %v7685_v2, 5  ;;  %v7470_v4 = vsel %vm4400_vm0, %v7034_v29, 0.0 }
 0x735   : > { %v7861_v20 = vrot.slane %v7684_v28, 6  ;;  %v7469_v40 = vadd.f32 %v7468_v13, %v7467_v15  ;;  %v7471_v34 = vrot.slane %v7470_v4, 4 }
 0x736   : > { %v7461_v45 = vrot.slane %v7460_v3, 1  ;;  %v7479_v55 = vadd.f32 %v7478_v19, %v7477_v63 }
 0x737   : > { %v7862_v37 = vsel %vm7758_vm3, %v7861_v20, %v7860_v17  ;;  %v7552_v56 = vmul.f32 %v13811_v23, %v7469_v40  ;;  %v7472_v57 = vadd.f32 %v7471_v34, %v7470_v4 }
 0x738   : > { %v7462_v52 = vadd.f32 %v7461_v45, %v7460_v3  ;;  %v7864_v51 = vsel %vm7761_vm4, %v7863_v44, %v7862_v37  ;;  %v7480_v7 = vrot.slane %v7479_v55, 2 }
 0x739   : > { %v7623_v58 = vadd.f32 %v13819_v39, %v7552_v56  ;;  %v7473_v24 = vrot.slane %v7472_v57, 2 }
 0x73a   : > { %v7551_v61 = vmul.f32 %v13811_v23, %v7462_v52  ;;  %v7481_v43 = vadd.f32 %v7480_v7, %v7479_v55 }
 0x73b   : > { %v7687_v38 = vmax.f32 %v7623_v58, 0.0  ;;  %v7474_v5 = vadd.f32 %v7473_v24, %v7472_v57 }
 0x73c   : > { %v7622_v14 = vadd.f32 %v13819_v39, %v7551_v61  ;;  %v7482_v48 = vrot.slane %v7481_v43, 1 }
 0x73d   : > { %v7475_v42 = vrot.slane %v7474_v5, 1  ;;  %v7867_v27 = vrot.slane %v7687_v38, 3 }
 0x73e   : > { %v7686_v17 = vmax.f32 %v7622_v14, 0.0  ;;  %v7483_v6 = vadd.f32 %v7482_v48, %v7481_v43 }
 0x73f   : > { %v7476_v50 = vadd.f32 %v7475_v42, %v7474_v5 }
 0x740   : > { %v7865_v35 = vrot.slane %v7686_v17, 4  ;;  %v7554_v46 = vmul.f32 %v13811_v23, %v7483_v6 }
 0x741   : > { %v7553_v9 = vmul.f32 %v13811_v23, %v7476_v50 }
 0x742   : > { %v7866_v16 = vsel %vm7764_vm5, %v7865_v35, %v7864_v51  ;;  %v7625_v47 = vadd.f32 %v13819_v39, %v7554_v46 }
 0x743   : > { %v7868_v12 = vsel %vm7767_vm6, %v7867_v27, %v7866_v16  ;;  %v7624_v41 = vadd.f32 %v13819_v39, %v7553_v9 }
 0x744   : > { %v7689_v18 = vmax.f32 %v7625_v47, 0.0 }
 0x745   : > { %v7688_v36 = vmax.f32 %v7624_v41, 0.0 }
 0x746   : > { %v7871_v53 = vrot.slane %v7689_v18, 1 }
 0x747   : > { %v7869_v31 = vrot.slane %v7688_v36, 2 }
 0x749   : > { %v7870_v62 = vsel %vm7770_vm7, %v7869_v31, %v7868_v12 }
 0x74a   : > { %v7872_v25 = vsel %vm7773_vm8, %v7871_v53, %v7870_v62 }
 0x74b   : > { %7888 = vst.msk [vmem:[%s12578_s29 + $0x38] sm:$0xff] %vm4400_vm0, %v7872_v25 }
 0x74c PF: > { %s26_s21 = sadd.s32 1, %s8931_s21  }
 0x74d   : > { %p23_p5 = scmp.ge.s32.totalorder %s26_s21, 4  }
 0x74f   :  { %25 = sbr.rel (!%p23_p5) target bundleno = 2 (0x2), region = 123 }

</bundles_post_ra>
